<compile_context>
chip_gen: v6e
topology: v6e:2x2x1
jax: 0.10.0
libtpu: 0.0.40
codegen_flags: <defaults>
</compile_context>

<pallas_src>
import numpy as np
import jax
import jax.numpy as jnp
from jax.experimental import pallas as pl
from jax.experimental.pallas import tpu as pltpu

LATENT = 16
IMG = 28
EPS = 1e-5

# Lane-dense (multiple-of-128) feature widths.
F_IN = 896            # 784 = 1*28*28 input pixels, zero-padded
LAT_P = 128           # 16 latent dims, padded
H1 = 128              # Linear(latent, 128)
H2 = 384              # 288 = 32*3*3, padded

# Row-grouped activation layouts for the conv-transpose stack: each group is one
# 128-lane chunk holding (C, W) = 112 real values + 16 zero lanes.
G1, F1 = 7, 7 * 128       # after ConvT1+BN1: (16, 7, 7)  -> 7 groups   = 896 lanes
G2, F2 = 14, 14 * 128     # after ConvT2+BN2: (8, 14, 14) -> 14 groups  = 1792 lanes
G3, F_OUT = 7, 7 * 128    # output (1, 28, 28): 7 groups of 4 image rows = 896 lanes

# Static band structure (stride-2, k=3 deconv => each output row reads <=2 input rows):
#   ConvT2 output bundle t = output rows {2t, 2t+1}   reads input groups [B2_KSTART[t]/128, +2)
#   ConvT3 output bundle t = output rows {4t..4t+3}   reads input groups [B3_KSTART[t]/128, +3)
B2_KSTART = tuple(min(t, G1 - 2) * 128 for t in range(7))
B3_KSTART = tuple(min(2 * t, G2 - 3) * 128 for t in range(7))


# ----------------------------------------------------------------------------
# Parameter setup (plain numpy / JAX glue, runs once)
# ----------------------------------------------------------------------------
def convtranspose2d_as_matrix(W, b, h_in, w_in, stride, padding, output_padding):
    """W: (C_in, C_out, K, K) PyTorch ConvTranspose2d weight. Returns a dense
    matrix M (C_in*h_in*w_in, C_out*h_out*w_out) s.t. y_flat = x_flat @ M + bias."""
    c_in, c_out, k, _ = W.shape
    h_out = (h_in - 1) * stride - 2 * padding + k + output_padding
    w_out = (w_in - 1) * stride - 2 * padding + k + output_padding
    M = np.zeros((c_in, h_in * w_in, c_out, h_out * w_out), dtype=np.float32)
    for ih in range(h_in):
        for iw in range(w_in):
            for kh in range(k):
                for kw in range(k):
                    oh = ih * stride - padding + kh
                    ow = iw * stride - padding + kw
                    if 0 <= oh < h_out and 0 <= ow < w_out:
                        M[:, ih * w_in + iw, :, oh * w_out + ow] += W[:, :, kh, kw]
    M = M.reshape(c_in * h_in * w_in, c_out * h_out * w_out)
    bias_vec = np.repeat(b.astype(np.float32), h_out * w_out)
    return M, bias_vec, h_out, w_out


def bn_eval_vectors(num_ch, hw):
    """Fresh BatchNorm2d in eval mode: gamma=1, beta=0, mean=0, var=1."""
    gamma = np.ones((num_ch,), np.float32)
    beta = np.zeros((num_ch,), np.float32)
    mean = np.zeros((num_ch,), np.float32)
    var = np.ones((num_ch,), np.float32)
    scale = gamma / np.sqrt(var + EPS)
    shift = beta - mean * scale
    return np.repeat(scale, hw), np.repeat(shift, hw)


def pad2d(M, rows, cols):
    return np.pad(M, ((0, rows - M.shape[0]), (0, cols - M.shape[1])))


def regroup_cols(M, c, h, w, pad_to=128):
    """Columns of M are in (c, h, w) row-major order. Re-lay them out so each of
    the h spatial rows is one contiguous `pad_to`-wide lane group holding (c, w)
    followed by zero padding."""
    assert c * w <= pad_to and M.shape[1] == c * h * w
    R = M.shape[0]
    Mr = M.reshape(R, c, h, w)
    out = np.zeros((R, h * pad_to), dtype=M.dtype)
    for g in range(h):
        out[:, g * pad_to:g * pad_to + c * w] = Mr[:, :, g, :].reshape(R, c * w)
    return out


def regroup_rows(M, c, h, w, pad_to=128):
    return regroup_cols(M.T, c, h, w, pad_to).T


def extract_bands(M, row_starts, rlen, col_starts, clen):
    """Stack the static band blocks of M and verify nothing lives outside them."""
    bands = np.stack([M[r:r + rlen, c:c + clen] for r, c in zip(row_starts, col_starts)])
    leftover = M.copy()
    for r, c in zip(row_starts, col_starts):
        leftover[r:r + rlen, c:c + clen] = 0.0
    assert not np.any(leftover), "band decomposition misses nonzero scatter entries"
    return bands


def make_params(key):
    ks = jax.random.split(key, 6)

    def rnd(k, shape, scale=0.05):
        return np.asarray(scale * jax.random.normal(k, shape, jnp.float32))

    # encoder: Flatten -> Linear(784, LATENT) -> ReLU
    enc_W = rnd(ks[0], (IMG * IMG, LATENT))
    enc_b = np.zeros((LATENT,), np.float32)

    # decoder linear stack
    W1 = rnd(ks[1], (LATENT, 128))
    b1 = np.zeros((128,), np.float32)
    W2 = rnd(ks[2], (128, 32 * 3 * 3))
    b2 = np.zeros((32 * 3 * 3,), np.float32)

    # ConvTranspose2d(32,16,k=3,s=2): (32,3,3) -> (16,7,7), then BN(16) folded in
    Wt1 = rnd(ks[3], (32, 16, 3, 3))
    bt1 = np.zeros((16,), np.float32)
    M1, c1, h1, w1 = convtranspose2d_as_matrix(Wt1, bt1, 3, 3, 2, 0, 0)
    s1, t1 = bn_eval_vectors(16, h1 * w1)
    M1 = M1 * s1[None, :]
    c1 = c1 * s1 + t1

    # ConvTranspose2d(16,8,k=3,s=2,p=1,op=1): (16,7,7) -> (8,14,14), BN(8) folded in
    Wt2 = rnd(ks[4], (16, 8, 3, 3))
    bt2 = np.zeros((8,), np.float32)
    M2, c2, h2, w2 = convtranspose2d_as_matrix(Wt2, bt2, h1, w1, 2, 1, 1)
    s2, t2 = bn_eval_vectors(8, h2 * w2)
    M2 = M2 * s2[None, :]
    c2 = c2 * s2 + t2

    # ConvTranspose2d(8,1,k=3,s=2,p=1,op=1): (8,14,14) -> (1,28,28)
    Wt3 = rnd(ks[5], (8, 1, 3, 3))
    bt3 = np.zeros((1,), np.float32)
    M3, c3, h3, w3 = convtranspose2d_as_matrix(Wt3, bt3, h2, w2, 2, 1, 1)
    assert (h3, w3) == (IMG, IMG)

    # ---- re-layout the deconv stack to row-grouped, lane-dense form ----------
    M1g = regroup_cols(M1, 16, 7, 7)                               # (288, 896)
    c1g = regroup_cols(c1[None, :], 16, 7, 7)[0]                   # (896,)
    M2g = regroup_rows(regroup_cols(M2, 8, 14, 14), 16, 7, 7)      # (896, 1792)
    c2g = regroup_cols(c2[None, :], 8, 14, 14)[0]                  # (1792,)
    M3g = regroup_cols(regroup_rows(M3, 8, 14, 14), 1, G3, 4 * IMG)  # (1792, 896)
    c3g = regroup_cols(c3[None, :], 1, G3, 4 * IMG)[0]             # (896,)
    M1g = np.pad(M1g, ((0, H2 - M1g.shape[0]), (0, 0)))            # rows 288 -> 384

    # ---- extract the static bands (asserts the rest of the matrix is zero) ---
    B2 = extract_bands(M2g, B2_KSTART, 256, [t * 256 for t in range(7)], 256)  # (7,256,256)
    B3 = extract_bands(M3g, B3_KSTART, 384, [t * 128 for t in range(7)], 128)  # (7,384,128)

    def bf16(a):
        return jnp.asarray(a, jnp.bfloat16)

    def row(v, n):
        return jnp.asarray(np.pad(v, (0, n - v.shape[0])), jnp.float32)[None, :]

    kernel_params = (
        bf16(pad2d(enc_W, F_IN, LAT_P)), row(enc_b, LAT_P),
        bf16(pad2d(W1, LAT_P, H1)),      row(b1, H1),
        bf16(pad2d(W2, H1, H2)),         row(b2, H2),
        bf16(M1g),                       row(c1g, F1),
        bf16(B2),                        row(c2g, F2),
        bf16(B3),                        row(c3g, F_OUT),
    )
    # Reference uses the same bf16-rounded weights but the full (un-banded) matrices.
    ref_params = kernel_params[:8] + (bf16(M2g), kernel_params[9],
                                      bf16(M3g), kernel_params[11])
    return kernel_params, ref_params


# ----------------------------------------------------------------------------
# Pallas kernel: whole forward pass for one batch tile
# ----------------------------------------------------------------------------
def autoencoder_kernel(x_ref,
                       encW_ref, encb_ref,
                       W1_ref, b1_ref, W2_ref, b2_ref,
                       M1_ref, c1_ref, B2_ref, c2_ref, B3_ref, c3_ref,
                       out_ref, a2_ref):
    def mm(a, w, b):  # bf16 x bf16 MXU matmul, f32 accumulation
        return jnp.dot(a, w, preferred_element_type=jnp.float32) + b

    def relu_bf16(a):
        return jnp.maximum(a, 0.0).astype(jnp.bfloat16)

    x = x_ref[...]                                          # (TB, 896) bf16
    z = relu_bf16(mm(x, encW_ref[...], encb_ref[...]))      # encoder Linear + ReLU
    h = relu_bf16(mm(z, W1_ref[...], b1_ref[...]))          # Linear(latent,128) + ReLU
    h = relu_bf16(mm(h, W2_ref[...], b2_ref[...]))          # Linear(128,288) + ReLU (=Unflatten)
    a1 = relu_bf16(mm(h, M1_ref[...], c1_ref[...]))         # ConvT1 + BN1 + ReLU, 7x128 groups

    # ConvT2 + BN2 + ReLU, banded: 7 bundles of 2 output rows; each reads only
    # the two contributing input-row groups -> (TB,256) x (256,256) on the MXU.
    for t in range(7):
        k0 = B2_KSTART[t]
        y = jnp.dot(a1[:, k0:k0 + 256], B2_ref[t],
                    preferred_element_type=jnp.float32)
        y = y + c2_ref[:, t * 256:(t + 1) * 256]
        a2_ref[:, t * 256:(t + 1) * 256] = relu_bf16(y)      # 14x128 groups total

    # ConvT3 + sigmoid, banded: 7 bundles of 4 output image rows; each reads only
    # the three contributing input-row groups -> (TB,384) x (384,128) on the MXU.
    for t in range(7):
        k0 = B3_KSTART[t]
        y = jnp.dot(a2_ref[:, k0:k0 + 384], B3_ref[t],
                    preferred_element_type=jnp.float32)
        y = y + c3_ref[:, t * 128:(t + 1) * 128]
        # sigmoid via EUP exp + approximate EUP reciprocal (keeps VPU slots free)
        out_ref[:, t * 128:(t + 1) * 128] = pl.reciprocal(1.0 + jnp.exp(-y), approx=True)


# ----------------------------------------------------------------------------
# Wrapper
# ----------------------------------------------------------------------------
def _device_defaults():
    """(batch tile, vmem_limit_bytes) per TPU generation."""
    try:
        kind = jax.devices()[0].device_kind.lower()
    except Exception:
        kind = ""
    if "v5" in kind:                       # v5e/v5p: 128-wide MXU, 128 MiB VMEM
        return 128, 96 * 1024 * 1024
    if "v7" in kind or "7x" in kind:       # v7x: 256-wide MXU, 64 MiB physical VMEM
        return 256, 48 * 1024 * 1024
    return 256, 96 * 1024 * 1024           # v6e (and default): 256-wide MXU, 128 MiB VMEM


def _degroup_output(y_grouped, B):
    """(Bp, 896) = 7 groups of [4 image rows * 28 cols + 16 pad] -> (B,1,28,28)."""
    y = y_grouped[:B].reshape(B, G3, 128)[:, :, :4 * IMG].reshape(B, IMG * IMG)
    return y.reshape(B, 1, IMG, IMG)


def autoencoder_forward(x, params, tb=None, vmem_limit=None):
    B = x.shape[0]
    d_tb, d_vmem = _device_defaults()
    if tb is None:
        # Fill the MXU M-dimension, but don't blow the tile past the batch.
        # For v7x megacore, feed batches >= 512 so the grid has >= 2 steps.
        tb = min(d_tb, max(128, -(-B // 128) * 128))
    if vmem_limit is None:
        vmem_limit = d_vmem

    Bp = -(-B // tb) * tb
    # bf16 input: half the per-tile DMA bytes; no in-kernel f32->bf16 pack.
    x_flat = x.reshape(B, IMG * IMG).astype(jnp.bfloat16)
    x_flat = jnp.pad(x_flat, ((0, Bp - B), (0, F_IN - IMG * IMG)))

    x_spec = pl.BlockSpec((tb, F_IN), lambda i: (i, 0))
    out_spec = pl.BlockSpec((tb, F_OUT), lambda i: (i, 0))

    def _resident(p):
        # Full-array block, constant index_map -> stays in VMEM across batch
        # tiles, no per-step re-DMA (~2.7 MiB bf16 total after banding).
        return pl.BlockSpec(p.shape, lambda i, _z=(0,) * p.ndim: _z)

    w_specs = [_resident(p) for p in params]

    out_flat = pl.pallas_call(
        autoencoder_kernel,
        out_shape=jax.ShapeDtypeStruct((Bp, F_OUT), jnp.float32),
        grid_spec=pltpu.PrefetchScalarGridSpec(
            num_scalar_prefetch=0,
            grid=(Bp // tb,),
            in_specs=[x_spec] + w_specs,
            out_specs=out_spec,
            scratch_shapes=[pltpu.VMEM((tb, F2), jnp.bfloat16)],   # a2 (14 groups)
        ),
        compiler_params=pltpu.CompilerParams(
            dimension_semantics=("parallel",),     # shard batch tiles across TCs
            vmem_limit_bytes=vmem_limit,
        ),
    )(x_flat, *params)

    return _degroup_output(out_flat, B)


# Pure-JAX reference: same bf16-rounded weights and layouts, but full (un-banded)
# scatter matrices -- validates the banded kernel against the dense formulation.
def reference_forward(x, ref_params):
    (encW, encb, W1, b1, W2, b2, M1g, c1g, M2g, c2g, M3g, c3g) = ref_params
    B = x.shape[0]
    f = lambda w: w.astype(jnp.float32)

    def relu_q(a):  # mimic the kernel's bf16 activations
        return jnp.maximum(a, 0.0).astype(jnp.bfloat16).astype(jnp.float32)

    h = x.reshape(B, IMG * IMG).astype(jnp.bfloat16).astype(jnp.float32)
    h = jnp.pad(h, ((0, 0), (0, F_IN - IMG * IMG)))
    h = relu_q(h @ f(encW) + encb)
    h = relu_q(h @ f(W1) + b1)
    h = relu_q(h @ f(W2) + b2)
    h = relu_q(h @ f(M1g) + c1g)
    h = relu_q(h @ f(M2g) + c2g)
    y = jax.nn.sigmoid(h @ f(M3g) + c3g)
    return _degroup_output(y, B)


if __name__ == "__main__":
    key = jax.random.PRNGKey(0)
    k_param, k_x = jax.random.split(key)
    kernel_params, ref_params = make_params(k_param)

    B = 2
    x = jax.random.uniform(k_x, (B, 1, IMG, IMG), jnp.float32)   # NCHW, like PyTorch

    y = jax.block_until_ready(autoencoder_forward(x, kernel_params))
    y_ref = jax.block_until_ready(reference_forward(x, ref_params))

    assert y.shape == (B, 1, IMG, IMG)
    assert bool(jnp.all(jnp.isfinite(y)))
    assert float(jnp.max(jnp.abs(y - y_ref))) < 2e-2

    print("KERNEL_OK")
</pallas_src>

<mosaic_0001>
module attributes {stable_mosaic.version = 11 : i64} {
  func.func @autoencoder_kernel(%arg0: i32, %arg1: memref<128x896xbf16, #tpu.memory_space<vmem>>, %arg2: memref<896x128xbf16, #tpu.memory_space<vmem>>, %arg3: memref<1x128xf32, #tpu.memory_space<vmem>>, %arg4: memref<128x128xbf16, #tpu.memory_space<vmem>>, %arg5: memref<1x128xf32, #tpu.memory_space<vmem>>, %arg6: memref<128x384xbf16, #tpu.memory_space<vmem>>, %arg7: memref<1x384xf32, #tpu.memory_space<vmem>>, %arg8: memref<384x896xbf16, #tpu.memory_space<vmem>>, %arg9: memref<1x896xf32, #tpu.memory_space<vmem>>, %arg10: memref<7x256x256xbf16, #tpu.memory_space<vmem>>, %arg11: memref<1x1792xf32, #tpu.memory_space<vmem>>, %arg12: memref<7x384x128xbf16, #tpu.memory_space<vmem>>, %arg13: memref<1x896xf32, #tpu.memory_space<vmem>>, %arg14: memref<128x896xf32, #tpu.memory_space<vmem>>, %arg15: memref<128x1792xbf16, #tpu.memory_space<vmem>>) attributes {dimension_semantics = [#tpu.dimension_semantics<parallel>], iteration_bounds = array<i64: 1>, scalar_prefetch = 0 : i64, scratch_operands = 1 : i64, tpu.core_type = #tpu.core_type<tc>, window_params = [{transform_indices = @transform_0, window_bounds = array<i64: 128, 896>}, {pipeline_mode = #tpu.pipeline_mode<synchronous>, transform_indices = @transform_1, window_bounds = array<i64: 896, 128>}, {pipeline_mode = #tpu.pipeline_mode<synchronous>, transform_indices = @transform_2, window_bounds = array<i64: 1, 128>}, {pipeline_mode = #tpu.pipeline_mode<synchronous>, transform_indices = @transform_3, window_bounds = array<i64: 128, 128>}, {pipeline_mode = #tpu.pipeline_mode<synchronous>, transform_indices = @transform_4, window_bounds = array<i64: 1, 128>}, {pipeline_mode = #tpu.pipeline_mode<synchronous>, transform_indices = @transform_5, window_bounds = array<i64: 128, 384>}, {pipeline_mode = #tpu.pipeline_mode<synchronous>, transform_indices = @transform_6, window_bounds = array<i64: 1, 384>}, {pipeline_mode = #tpu.pipeline_mode<synchronous>, transform_indices = @transform_7, window_bounds = array<i64: 384, 896>}, {pipeline_mode = #tpu.pipeline_mode<synchronous>, transform_indices = @transform_8, window_bounds = array<i64: 1, 896>}, {pipeline_mode = #tpu.pipeline_mode<synchronous>, transform_indices = @transform_9, window_bounds = array<i64: 7, 256, 256>}, {pipeline_mode = #tpu.pipeline_mode<synchronous>, transform_indices = @transform_10, window_bounds = array<i64: 1, 1792>}, {pipeline_mode = #tpu.pipeline_mode<synchronous>, transform_indices = @transform_11, window_bounds = array<i64: 7, 384, 128>}, {pipeline_mode = #tpu.pipeline_mode<synchronous>, transform_indices = @transform_12, window_bounds = array<i64: 1, 896>}, {transform_indices = @transform_13, window_bounds = array<i64: 128, 896>}]} {
    %c0 = arith.constant 0 : index
    %c0_0 = arith.constant 0 : index
    %0 = vector.load %arg1[%c0, %c0_0] : memref<128x896xbf16, #tpu.memory_space<vmem>>, vector<128x896xbf16>
    %c0_1 = arith.constant 0 : index
    %c0_2 = arith.constant 0 : index
    %1 = vector.load %arg2[%c0_1, %c0_2] : memref<896x128xbf16, #tpu.memory_space<vmem>>, vector<896x128xbf16>
    %c0_3 = arith.constant 0 : index
    %c0_4 = arith.constant 0 : index
    %2 = vector.load %arg3[%c0_3, %c0_4] : memref<1x128xf32, #tpu.memory_space<vmem>>, vector<1x128xf32>
    %cst = arith.constant dense<0.000000e+00> : vector<128x128xf32>
    %3 = tpu.matmul %0, %1, %cst {dimension_numbers = #tpu.dot_dimension_numbers<[1], [0], [0], [1], [0, 0, 1, 1], [], []>} : vector<128x896xbf16>, vector<896x128xbf16>, vector<128x128xf32> -> vector<128x128xf32>
    %4 = vector.broadcast %2 : vector<1x128xf32> to vector<128x128xf32>
    %5 = arith.addf %3, %4 : vector<128x128xf32>
    %cst_5 = arith.constant 0.000000e+00 : f32
    %6 = vector.broadcast %cst_5 : f32 to vector<128x128xf32>
    %7 = arith.maximumf %5, %6 : vector<128x128xf32>
    %8 = arith.truncf %7 : vector<128x128xf32> to vector<128x128xbf16>
    %c0_6 = arith.constant 0 : index
    %c0_7 = arith.constant 0 : index
    %9 = vector.load %arg4[%c0_6, %c0_7] : memref<128x128xbf16, #tpu.memory_space<vmem>>, vector<128x128xbf16>
    %c0_8 = arith.constant 0 : index
    %c0_9 = arith.constant 0 : index
    %10 = vector.load %arg5[%c0_8, %c0_9] : memref<1x128xf32, #tpu.memory_space<vmem>>, vector<1x128xf32>
    %cst_10 = arith.constant dense<0.000000e+00> : vector<128x128xf32>
    %11 = tpu.matmul %8, %9, %cst_10 {dimension_numbers = #tpu.dot_dimension_numbers<[1], [0], [0], [1], [0, 0, 1, 1], [], []>} : vector<128x128xbf16>, vector<128x128xbf16>, vector<128x128xf32> -> vector<128x128xf32>
    %12 = vector.broadcast %10 : vector<1x128xf32> to vector<128x128xf32>
    %13 = arith.addf %11, %12 : vector<128x128xf32>
    %cst_11 = arith.constant 0.000000e+00 : f32
    %14 = vector.broadcast %cst_11 : f32 to vector<128x128xf32>
    %15 = arith.maximumf %13, %14 : vector<128x128xf32>
    %16 = arith.truncf %15 : vector<128x128xf32> to vector<128x128xbf16>
    %c0_12 = arith.constant 0 : index
    %c0_13 = arith.constant 0 : index
    %17 = vector.load %arg6[%c0_12, %c0_13] : memref<128x384xbf16, #tpu.memory_space<vmem>>, vector<128x384xbf16>
    %c0_14 = arith.constant 0 : index
    %c0_15 = arith.constant 0 : index
    %18 = vector.load %arg7[%c0_14, %c0_15] : memref<1x384xf32, #tpu.memory_space<vmem>>, vector<1x384xf32>
    %cst_16 = arith.constant dense<0.000000e+00> : vector<128x384xf32>
    %19 = tpu.matmul %16, %17, %cst_16 {dimension_numbers = #tpu.dot_dimension_numbers<[1], [0], [0], [1], [0, 0, 1, 1], [], []>} : vector<128x128xbf16>, vector<128x384xbf16>, vector<128x384xf32> -> vector<128x384xf32>
    %20 = vector.broadcast %18 : vector<1x384xf32> to vector<128x384xf32>
    %21 = arith.addf %19, %20 : vector<128x384xf32>
    %cst_17 = arith.constant 0.000000e+00 : f32
    %22 = vector.broadcast %cst_17 : f32 to vector<128x384xf32>
    %23 = arith.maximumf %21, %22 : vector<128x384xf32>
    %24 = arith.truncf %23 : vector<128x384xf32> to vector<128x384xbf16>
    %c0_18 = arith.constant 0 : index
    %c0_19 = arith.constant 0 : index
    %25 = vector.load %arg8[%c0_18, %c0_19] : memref<384x896xbf16, #tpu.memory_space<vmem>>, vector<384x896xbf16>
    %c0_20 = arith.constant 0 : index
    %c0_21 = arith.constant 0 : index
    %26 = vector.load %arg9[%c0_20, %c0_21] : memref<1x896xf32, #tpu.memory_space<vmem>>, vector<1x896xf32>
    %cst_22 = arith.constant dense<0.000000e+00> : vector<128x896xf32>
    %27 = tpu.matmul %24, %25, %cst_22 {dimension_numbers = #tpu.dot_dimension_numbers<[1], [0], [0], [1], [0, 0, 1, 1], [], []>} : vector<128x384xbf16>, vector<384x896xbf16>, vector<128x896xf32> -> vector<128x896xf32>
    %28 = vector.broadcast %26 : vector<1x896xf32> to vector<128x896xf32>
    %29 = arith.addf %27, %28 : vector<128x896xf32>
    %cst_23 = arith.constant 0.000000e+00 : f32
    %30 = vector.broadcast %cst_23 : f32 to vector<128x896xf32>
    %31 = arith.maximumf %29, %30 : vector<128x896xf32>
    %32 = arith.truncf %31 : vector<128x896xf32> to vector<128x896xbf16>
    %33 = vector.extract_strided_slice %32 {offsets = [0, 0], sizes = [128, 256], strides = [1, 1]} : vector<128x896xbf16> to vector<128x256xbf16>
    %c0_24 = arith.constant 0 : index
    %c0_25 = arith.constant 0 : index
    %c0_26 = arith.constant 0 : index
    %34 = vector.load %arg10[%c0_24, %c0_25, %c0_26] : memref<7x256x256xbf16, #tpu.memory_space<vmem>>, vector<1x256x256xbf16>
    %35 = vector.shape_cast %34 : vector<1x256x256xbf16> to vector<256x256xbf16>
    %cst_27 = arith.constant dense<0.000000e+00> : vector<128x256xf32>
    %36 = tpu.matmul %33, %35, %cst_27 {dimension_numbers = #tpu.dot_dimension_numbers<[1], [0], [0], [1], [0, 0, 1, 1], [], []>} : vector<128x256xbf16>, vector<256x256xbf16>, vector<128x256xf32> -> vector<128x256xf32>
    %c0_28 = arith.constant 0 : index
    %c0_29 = arith.constant 0 : index
    %37 = vector.load %arg11[%c0_28, %c0_29] : memref<1x1792xf32, #tpu.memory_space<vmem>>, vector<1x256xf32>
    %38 = vector.broadcast %37 : vector<1x256xf32> to vector<128x256xf32>
    %39 = arith.addf %36, %38 : vector<128x256xf32>
    %cst_30 = arith.constant 0.000000e+00 : f32
    %40 = vector.broadcast %cst_30 : f32 to vector<128x256xf32>
    %41 = arith.maximumf %39, %40 : vector<128x256xf32>
    %42 = arith.truncf %41 : vector<128x256xf32> to vector<128x256xbf16>
    %c0_31 = arith.constant 0 : index
    %c0_32 = arith.constant 0 : index
    %43 = vector.load %arg15[%c0_31, %c0_32] : memref<128x1792xbf16, #tpu.memory_space<vmem>>, vector<128x256xbf16>
    tpu.vector_store %arg15[%c0_31, %c0_32], %42 {strides = array<i32>} : memref<128x1792xbf16, #tpu.memory_space<vmem>>, vector<128x256xbf16>,
    %44 = vector.extract_strided_slice %32 {offsets = [0, 128], sizes = [128, 256], strides = [1, 1]} : vector<128x896xbf16> to vector<128x256xbf16>
    %c1 = arith.constant 1 : index
    %c0_33 = arith.constant 0 : index
    %c0_34 = arith.constant 0 : index
    %45 = vector.load %arg10[%c1, %c0_33, %c0_34] : memref<7x256x256xbf16, #tpu.memory_space<vmem>>, vector<1x256x256xbf16>
    %46 = vector.shape_cast %45 : vector<1x256x256xbf16> to vector<256x256xbf16>
    %cst_35 = arith.constant dense<0.000000e+00> : vector<128x256xf32>
    %47 = tpu.matmul %44, %46, %cst_35 {dimension_numbers = #tpu.dot_dimension_numbers<[1], [0], [0], [1], [0, 0, 1, 1], [], []>} : vector<128x256xbf16>, vector<256x256xbf16>, vector<128x256xf32> -> vector<128x256xf32>
    %c0_36 = arith.constant 0 : index
    %c256 = arith.constant 256 : index
    %48 = vector.load %arg11[%c0_36, %c256] : memref<1x1792xf32, #tpu.memory_space<vmem>>, vector<1x256xf32>
    %49 = vector.broadcast %48 : vector<1x256xf32> to vector<128x256xf32>
    %50 = arith.addf %47, %49 : vector<128x256xf32>
    %cst_37 = arith.constant 0.000000e+00 : f32
    %51 = vector.broadcast %cst_37 : f32 to vector<128x256xf32>
    %52 = arith.maximumf %50, %51 : vector<128x256xf32>
    %53 = arith.truncf %52 : vector<128x256xf32> to vector<128x256xbf16>
    %c0_38 = arith.constant 0 : index
    %c256_39 = arith.constant 256 : index
    %54 = vector.load %arg15[%c0_38, %c256_39] : memref<128x1792xbf16, #tpu.memory_space<vmem>>, vector<128x256xbf16>
    tpu.vector_store %arg15[%c0_38, %c256_39], %53 {strides = array<i32>} : memref<128x1792xbf16, #tpu.memory_space<vmem>>, vector<128x256xbf16>,
    %55 = vector.extract_strided_slice %32 {offsets = [0, 256], sizes = [128, 256], strides = [1, 1]} : vector<128x896xbf16> to vector<128x256xbf16>
    %c2 = arith.constant 2 : index
    %c0_40 = arith.constant 0 : index
    %c0_41 = arith.constant 0 : index
    %56 = vector.load %arg10[%c2, %c0_40, %c0_41] : memref<7x256x256xbf16, #tpu.memory_space<vmem>>, vector<1x256x256xbf16>
    %57 = vector.shape_cast %56 : vector<1x256x256xbf16> to vector<256x256xbf16>
    %cst_42 = arith.constant dense<0.000000e+00> : vector<128x256xf32>
    %58 = tpu.matmul %55, %57, %cst_42 {dimension_numbers = #tpu.dot_dimension_numbers<[1], [0], [0], [1], [0, 0, 1, 1], [], []>} : vector<128x256xbf16>, vector<256x256xbf16>, vector<128x256xf32> -> vector<128x256xf32>
    %c0_43 = arith.constant 0 : index
    %c512 = arith.constant 512 : index
    %59 = vector.load %arg11[%c0_43, %c512] : memref<1x1792xf32, #tpu.memory_space<vmem>>, vector<1x256xf32>
    %60 = vector.broadcast %59 : vector<1x256xf32> to vector<128x256xf32>
    %61 = arith.addf %58, %60 : vector<128x256xf32>
    %cst_44 = arith.constant 0.000000e+00 : f32
    %62 = vector.broadcast %cst_44 : f32 to vector<128x256xf32>
    %63 = arith.maximumf %61, %62 : vector<128x256xf32>
    %64 = arith.truncf %63 : vector<128x256xf32> to vector<128x256xbf16>
    %c0_45 = arith.constant 0 : index
    %c512_46 = arith.constant 512 : index
    %65 = vector.load %arg15[%c0_45, %c512_46] : memref<128x1792xbf16, #tpu.memory_space<vmem>>, vector<128x256xbf16>
    tpu.vector_store %arg15[%c0_45, %c512_46], %64 {strides = array<i32>} : memref<128x1792xbf16, #tpu.memory_space<vmem>>, vector<128x256xbf16>,
    %66 = vector.extract_strided_slice %32 {offsets = [0, 384], sizes = [128, 256], strides = [1, 1]} : vector<128x896xbf16> to vector<128x256xbf16>
    %c3 = arith.constant 3 : index
    %c0_47 = arith.constant 0 : index
    %c0_48 = arith.constant 0 : index
    %67 = vector.load %arg10[%c3, %c0_47, %c0_48] : memref<7x256x256xbf16, #tpu.memory_space<vmem>>, vector<1x256x256xbf16>
    %68 = vector.shape_cast %67 : vector<1x256x256xbf16> to vector<256x256xbf16>
    %cst_49 = arith.constant dense<0.000000e+00> : vector<128x256xf32>
    %69 = tpu.matmul %66, %68, %cst_49 {dimension_numbers = #tpu.dot_dimension_numbers<[1], [0], [0], [1], [0, 0, 1, 1], [], []>} : vector<128x256xbf16>, vector<256x256xbf16>, vector<128x256xf32> -> vector<128x256xf32>
    %c0_50 = arith.constant 0 : index
    %c768 = arith.constant 768 : index
    %70 = vector.load %arg11[%c0_50, %c768] : memref<1x1792xf32, #tpu.memory_space<vmem>>, vector<1x256xf32>
    %71 = vector.broadcast %70 : vector<1x256xf32> to vector<128x256xf32>
    %72 = arith.addf %69, %71 : vector<128x256xf32>
    %cst_51 = arith.constant 0.000000e+00 : f32
    %73 = vector.broadcast %cst_51 : f32 to vector<128x256xf32>
    %74 = arith.maximumf %72, %73 : vector<128x256xf32>
    %75 = arith.truncf %74 : vector<128x256xf32> to vector<128x256xbf16>
    %c0_52 = arith.constant 0 : index
    %c768_53 = arith.constant 768 : index
    %76 = vector.load %arg15[%c0_52, %c768_53] : memref<128x1792xbf16, #tpu.memory_space<vmem>>, vector<128x256xbf16>
    tpu.vector_store %arg15[%c0_52, %c768_53], %75 {strides = array<i32>} : memref<128x1792xbf16, #tpu.memory_space<vmem>>, vector<128x256xbf16>,
    %77 = vector.extract_strided_slice %32 {offsets = [0, 512], sizes = [128, 256], strides = [1, 1]} : vector<128x896xbf16> to vector<128x256xbf16>
    %c4 = arith.constant 4 : index
    %c0_54 = arith.constant 0 : index
    %c0_55 = arith.constant 0 : index
    %78 = vector.load %arg10[%c4, %c0_54, %c0_55] : memref<7x256x256xbf16, #tpu.memory_space<vmem>>, vector<1x256x256xbf16>
    %79 = vector.shape_cast %78 : vector<1x256x256xbf16> to vector<256x256xbf16>
    %cst_56 = arith.constant dense<0.000000e+00> : vector<128x256xf32>
    %80 = tpu.matmul %77, %79, %cst_56 {dimension_numbers = #tpu.dot_dimension_numbers<[1], [0], [0], [1], [0, 0, 1, 1], [], []>} : vector<128x256xbf16>, vector<256x256xbf16>, vector<128x256xf32> -> vector<128x256xf32>
    %c0_57 = arith.constant 0 : index
    %c1024 = arith.constant 1024 : index
    %81 = vector.load %arg11[%c0_57, %c1024] : memref<1x1792xf32, #tpu.memory_space<vmem>>, vector<1x256xf32>
    %82 = vector.broadcast %81 : vector<1x256xf32> to vector<128x256xf32>
    %83 = arith.addf %80, %82 : vector<128x256xf32>
    %cst_58 = arith.constant 0.000000e+00 : f32
    %84 = vector.broadcast %cst_58 : f32 to vector<128x256xf32>
    %85 = arith.maximumf %83, %84 : vector<128x256xf32>
    %86 = arith.truncf %85 : vector<128x256xf32> to vector<128x256xbf16>
    %c0_59 = arith.constant 0 : index
    %c1024_60 = arith.constant 1024 : index
    %87 = vector.load %arg15[%c0_59, %c1024_60] : memref<128x1792xbf16, #tpu.memory_space<vmem>>, vector<128x256xbf16>
    tpu.vector_store %arg15[%c0_59, %c1024_60], %86 {strides = array<i32>} : memref<128x1792xbf16, #tpu.memory_space<vmem>>, vector<128x256xbf16>,
    %88 = vector.extract_strided_slice %32 {offsets = [0, 640], sizes = [128, 256], strides = [1, 1]} : vector<128x896xbf16> to vector<128x256xbf16>
    %c5 = arith.constant 5 : index
    %c0_61 = arith.constant 0 : index
    %c0_62 = arith.constant 0 : index
    %89 = vector.load %arg10[%c5, %c0_61, %c0_62] : memref<7x256x256xbf16, #tpu.memory_space<vmem>>, vector<1x256x256xbf16>
    %90 = vector.shape_cast %89 : vector<1x256x256xbf16> to vector<256x256xbf16>
    %cst_63 = arith.constant dense<0.000000e+00> : vector<128x256xf32>
    %91 = tpu.matmul %88, %90, %cst_63 {dimension_numbers = #tpu.dot_dimension_numbers<[1], [0], [0], [1], [0, 0, 1, 1], [], []>} : vector<128x256xbf16>, vector<256x256xbf16>, vector<128x256xf32> -> vector<128x256xf32>
    %c0_64 = arith.constant 0 : index
    %c1280 = arith.constant 1280 : index
    %92 = vector.load %arg11[%c0_64, %c1280] : memref<1x1792xf32, #tpu.memory_space<vmem>>, vector<1x256xf32>
    %93 = vector.broadcast %92 : vector<1x256xf32> to vector<128x256xf32>
    %94 = arith.addf %91, %93 : vector<128x256xf32>
    %cst_65 = arith.constant 0.000000e+00 : f32
    %95 = vector.broadcast %cst_65 : f32 to vector<128x256xf32>
    %96 = arith.maximumf %94, %95 : vector<128x256xf32>
    %97 = arith.truncf %96 : vector<128x256xf32> to vector<128x256xbf16>
    %c0_66 = arith.constant 0 : index
    %c1280_67 = arith.constant 1280 : index
    %98 = vector.load %arg15[%c0_66, %c1280_67] : memref<128x1792xbf16, #tpu.memory_space<vmem>>, vector<128x256xbf16>
    tpu.vector_store %arg15[%c0_66, %c1280_67], %97 {strides = array<i32>} : memref<128x1792xbf16, #tpu.memory_space<vmem>>, vector<128x256xbf16>,
    %99 = vector.extract_strided_slice %32 {offsets = [0, 640], sizes = [128, 256], strides = [1, 1]} : vector<128x896xbf16> to vector<128x256xbf16>
    %c6 = arith.constant 6 : index
    %c0_68 = arith.constant 0 : index
    %c0_69 = arith.constant 0 : index
    %100 = vector.load %arg10[%c6, %c0_68, %c0_69] : memref<7x256x256xbf16, #tpu.memory_space<vmem>>, vector<1x256x256xbf16>
    %101 = vector.shape_cast %100 : vector<1x256x256xbf16> to vector<256x256xbf16>
    %cst_70 = arith.constant dense<0.000000e+00> : vector<128x256xf32>
    %102 = tpu.matmul %99, %101, %cst_70 {dimension_numbers = #tpu.dot_dimension_numbers<[1], [0], [0], [1], [0, 0, 1, 1], [], []>} : vector<128x256xbf16>, vector<256x256xbf16>, vector<128x256xf32> -> vector<128x256xf32>
    %c0_71 = arith.constant 0 : index
    %c1536 = arith.constant 1536 : index
    %103 = vector.load %arg11[%c0_71, %c1536] : memref<1x1792xf32, #tpu.memory_space<vmem>>, vector<1x256xf32>
    %104 = vector.broadcast %103 : vector<1x256xf32> to vector<128x256xf32>
    %105 = arith.addf %102, %104 : vector<128x256xf32>
    %cst_72 = arith.constant 0.000000e+00 : f32
    %106 = vector.broadcast %cst_72 : f32 to vector<128x256xf32>
    %107 = arith.maximumf %105, %106 : vector<128x256xf32>
    %108 = arith.truncf %107 : vector<128x256xf32> to vector<128x256xbf16>
    %c0_73 = arith.constant 0 : index
    %c1536_74 = arith.constant 1536 : index
    %109 = vector.load %arg15[%c0_73, %c1536_74] : memref<128x1792xbf16, #tpu.memory_space<vmem>>, vector<128x256xbf16>
    tpu.vector_store %arg15[%c0_73, %c1536_74], %108 {strides = array<i32>} : memref<128x1792xbf16, #tpu.memory_space<vmem>>, vector<128x256xbf16>,
    %c0_75 = arith.constant 0 : index
    %c0_76 = arith.constant 0 : index
    %110 = vector.load %arg15[%c0_75, %c0_76] : memref<128x1792xbf16, #tpu.memory_space<vmem>>, vector<128x384xbf16>
    %c0_77 = arith.constant 0 : index
    %c0_78 = arith.constant 0 : index
    %c0_79 = arith.constant 0 : index
    %111 = vector.load %arg12[%c0_77, %c0_78, %c0_79] : memref<7x384x128xbf16, #tpu.memory_space<vmem>>, vector<1x384x128xbf16>
    %112 = vector.shape_cast %111 : vector<1x384x128xbf16> to vector<384x128xbf16>
    %cst_80 = arith.constant dense<0.000000e+00> : vector<128x128xf32>
    %113 = tpu.matmul %110, %112, %cst_80 {dimension_numbers = #tpu.dot_dimension_numbers<[1], [0], [0], [1], [0, 0, 1, 1], [], []>} : vector<128x384xbf16>, vector<384x128xbf16>, vector<128x128xf32> -> vector<128x128xf32>
    %c0_81 = arith.constant 0 : index
    %c0_82 = arith.constant 0 : index
    %114 = vector.load %arg13[%c0_81, %c0_82] : memref<1x896xf32, #tpu.memory_space<vmem>>, vector<1x128xf32>
    %115 = vector.broadcast %114 : vector<1x128xf32> to vector<128x128xf32>
    %116 = arith.addf %113, %115 : vector<128x128xf32>
    %cst_83 = arith.constant 0.000000e+00 : f32
    %117 = vector.broadcast %cst_83 : f32 to vector<128x128xf32>
    %118 = arith.subf %117, %116 : vector<128x128xf32>
    %119 = math.exp %118 : vector<128x128xf32>
    %cst_84 = arith.constant 1.000000e+00 : f32
    %120 = vector.broadcast %cst_84 : f32 to vector<128x128xf32>
    %121 = arith.addf %120, %119 : vector<128x128xf32>
    %122 = tpu.reciprocal %121 {approx = true} : vector<128x128xf32> -> vector<128x128xf32>
    %c0_85 = arith.constant 0 : index
    %c0_86 = arith.constant 0 : index
    %123 = vector.load %arg14[%c0_85, %c0_86] : memref<128x896xf32, #tpu.memory_space<vmem>>, vector<128x128xf32>
    tpu.vector_store %arg14[%c0_85, %c0_86], %122 {strides = array<i32>} : memref<128x896xf32, #tpu.memory_space<vmem>>, vector<128x128xf32>,
    %c0_87 = arith.constant 0 : index
    %c256_88 = arith.constant 256 : index
    %124 = vector.load %arg15[%c0_87, %c256_88] : memref<128x1792xbf16, #tpu.memory_space<vmem>>, vector<128x384xbf16>
    %c1_89 = arith.constant 1 : index
    %c0_90 = arith.constant 0 : index
    %c0_91 = arith.constant 0 : index
    %125 = vector.load %arg12[%c1_89, %c0_90, %c0_91] : memref<7x384x128xbf16, #tpu.memory_space<vmem>>, vector<1x384x128xbf16>
    %126 = vector.shape_cast %125 : vector<1x384x128xbf16> to vector<384x128xbf16>
    %cst_92 = arith.constant dense<0.000000e+00> : vector<128x128xf32>
    %127 = tpu.matmul %124, %126, %cst_92 {dimension_numbers = #tpu.dot_dimension_numbers<[1], [0], [0], [1], [0, 0, 1, 1], [], []>} : vector<128x384xbf16>, vector<384x128xbf16>, vector<128x128xf32> -> vector<128x128xf32>
    %c0_93 = arith.constant 0 : index
    %c128 = arith.constant 128 : index
    %128 = vector.load %arg13[%c0_93, %c128] : memref<1x896xf32, #tpu.memory_space<vmem>>, vector<1x128xf32>
    %129 = vector.broadcast %128 : vector<1x128xf32> to vector<128x128xf32>
    %130 = arith.addf %127, %129 : vector<128x128xf32>
    %cst_94 = arith.constant 0.000000e+00 : f32
    %131 = vector.broadcast %cst_94 : f32 to vector<128x128xf32>
    %132 = arith.subf %131, %130 : vector<128x128xf32>
    %133 = math.exp %132 : vector<128x128xf32>
    %cst_95 = arith.constant 1.000000e+00 : f32
    %134 = vector.broadcast %cst_95 : f32 to vector<128x128xf32>
    %135 = arith.addf %134, %133 : vector<128x128xf32>
    %136 = tpu.reciprocal %135 {approx = true} : vector<128x128xf32> -> vector<128x128xf32>
    %c0_96 = arith.constant 0 : index
    %c128_97 = arith.constant 128 : index
    %137 = vector.load %arg14[%c0_96, %c128_97] : memref<128x896xf32, #tpu.memory_space<vmem>>, vector<128x128xf32>
    tpu.vector_store %arg14[%c0_96, %c128_97], %136 {strides = array<i32>} : memref<128x896xf32, #tpu.memory_space<vmem>>, vector<128x128xf32>,
    %c0_98 = arith.constant 0 : index
    %c512_99 = arith.constant 512 : index
    %138 = vector.load %arg15[%c0_98, %c512_99] : memref<128x1792xbf16, #tpu.memory_space<vmem>>, vector<128x384xbf16>
    %c2_100 = arith.constant 2 : index
    %c0_101 = arith.constant 0 : index
    %c0_102 = arith.constant 0 : index
    %139 = vector.load %arg12[%c2_100, %c0_101, %c0_102] : memref<7x384x128xbf16, #tpu.memory_space<vmem>>, vector<1x384x128xbf16>
    %140 = vector.shape_cast %139 : vector<1x384x128xbf16> to vector<384x128xbf16>
    %cst_103 = arith.constant dense<0.000000e+00> : vector<128x128xf32>
    %141 = tpu.matmul %138, %140, %cst_103 {dimension_numbers = #tpu.dot_dimension_numbers<[1], [0], [0], [1], [0, 0, 1, 1], [], []>} : vector<128x384xbf16>, vector<384x128xbf16>, vector<128x128xf32> -> vector<128x128xf32>
    %c0_104 = arith.constant 0 : index
    %c256_105 = arith.constant 256 : index
    %142 = vector.load %arg13[%c0_104, %c256_105] : memref<1x896xf32, #tpu.memory_space<vmem>>, vector<1x128xf32>
    %143 = vector.broadcast %142 : vector<1x128xf32> to vector<128x128xf32>
    %144 = arith.addf %141, %143 : vector<128x128xf32>
    %cst_106 = arith.constant 0.000000e+00 : f32
    %145 = vector.broadcast %cst_106 : f32 to vector<128x128xf32>
    %146 = arith.subf %145, %144 : vector<128x128xf32>
    %147 = math.exp %146 : vector<128x128xf32>
    %cst_107 = arith.constant 1.000000e+00 : f32
    %148 = vector.broadcast %cst_107 : f32 to vector<128x128xf32>
    %149 = arith.addf %148, %147 : vector<128x128xf32>
    %150 = tpu.reciprocal %149 {approx = true} : vector<128x128xf32> -> vector<128x128xf32>
    %c0_108 = arith.constant 0 : index
    %c256_109 = arith.constant 256 : index
    %151 = vector.load %arg14[%c0_108, %c256_109] : memref<128x896xf32, #tpu.memory_space<vmem>>, vector<128x128xf32>
    tpu.vector_store %arg14[%c0_108, %c256_109], %150 {strides = array<i32>} : memref<128x896xf32, #tpu.memory_space<vmem>>, vector<128x128xf32>,
    %c0_110 = arith.constant 0 : index
    %c768_111 = arith.constant 768 : index
    %152 = vector.load %arg15[%c0_110, %c768_111] : memref<128x1792xbf16, #tpu.memory_space<vmem>>, vector<128x384xbf16>
    %c3_112 = arith.constant 3 : index
    %c0_113 = arith.constant 0 : index
    %c0_114 = arith.constant 0 : index
    %153 = vector.load %arg12[%c3_112, %c0_113, %c0_114] : memref<7x384x128xbf16, #tpu.memory_space<vmem>>, vector<1x384x128xbf16>
    %154 = vector.shape_cast %153 : vector<1x384x128xbf16> to vector<384x128xbf16>
    %cst_115 = arith.constant dense<0.000000e+00> : vector<128x128xf32>
    %155 = tpu.matmul %152, %154, %cst_115 {dimension_numbers = #tpu.dot_dimension_numbers<[1], [0], [0], [1], [0, 0, 1, 1], [], []>} : vector<128x384xbf16>, vector<384x128xbf16>, vector<128x128xf32> -> vector<128x128xf32>
    %c0_116 = arith.constant 0 : index
    %c384 = arith.constant 384 : index
    %156 = vector.load %arg13[%c0_116, %c384] : memref<1x896xf32, #tpu.memory_space<vmem>>, vector<1x128xf32>
    %157 = vector.broadcast %156 : vector<1x128xf32> to vector<128x128xf32>
    %158 = arith.addf %155, %157 : vector<128x128xf32>
    %cst_117 = arith.constant 0.000000e+00 : f32
    %159 = vector.broadcast %cst_117 : f32 to vector<128x128xf32>
    %160 = arith.subf %159, %158 : vector<128x128xf32>
    %161 = math.exp %160 : vector<128x128xf32>
    %cst_118 = arith.constant 1.000000e+00 : f32
    %162 = vector.broadcast %cst_118 : f32 to vector<128x128xf32>
    %163 = arith.addf %162, %161 : vector<128x128xf32>
    %164 = tpu.reciprocal %163 {approx = true} : vector<128x128xf32> -> vector<128x128xf32>
    %c0_119 = arith.constant 0 : index
    %c384_120 = arith.constant 384 : index
    %165 = vector.load %arg14[%c0_119, %c384_120] : memref<128x896xf32, #tpu.memory_space<vmem>>, vector<128x128xf32>
    tpu.vector_store %arg14[%c0_119, %c384_120], %164 {strides = array<i32>} : memref<128x896xf32, #tpu.memory_space<vmem>>, vector<128x128xf32>,
    %c0_121 = arith.constant 0 : index
    %c1024_122 = arith.constant 1024 : index
    %166 = vector.load %arg15[%c0_121, %c1024_122] : memref<128x1792xbf16, #tpu.memory_space<vmem>>, vector<128x384xbf16>
    %c4_123 = arith.constant 4 : index
    %c0_124 = arith.constant 0 : index
    %c0_125 = arith.constant 0 : index
    %167 = vector.load %arg12[%c4_123, %c0_124, %c0_125] : memref<7x384x128xbf16, #tpu.memory_space<vmem>>, vector<1x384x128xbf16>
    %168 = vector.shape_cast %167 : vector<1x384x128xbf16> to vector<384x128xbf16>
    %cst_126 = arith.constant dense<0.000000e+00> : vector<128x128xf32>
    %169 = tpu.matmul %166, %168, %cst_126 {dimension_numbers = #tpu.dot_dimension_numbers<[1], [0], [0], [1], [0, 0, 1, 1], [], []>} : vector<128x384xbf16>, vector<384x128xbf16>, vector<128x128xf32> -> vector<128x128xf32>
    %c0_127 = arith.constant 0 : index
    %c512_128 = arith.constant 512 : index
    %170 = vector.load %arg13[%c0_127, %c512_128] : memref<1x896xf32, #tpu.memory_space<vmem>>, vector<1x128xf32>
    %171 = vector.broadcast %170 : vector<1x128xf32> to vector<128x128xf32>
    %172 = arith.addf %169, %171 : vector<128x128xf32>
    %cst_129 = arith.constant 0.000000e+00 : f32
    %173 = vector.broadcast %cst_129 : f32 to vector<128x128xf32>
    %174 = arith.subf %173, %172 : vector<128x128xf32>
    %175 = math.exp %174 : vector<128x128xf32>
    %cst_130 = arith.constant 1.000000e+00 : f32
    %176 = vector.broadcast %cst_130 : f32 to vector<128x128xf32>
    %177 = arith.addf %176, %175 : vector<128x128xf32>
    %178 = tpu.reciprocal %177 {approx = true} : vector<128x128xf32> -> vector<128x128xf32>
    %c0_131 = arith.constant 0 : index
    %c512_132 = arith.constant 512 : index
    %179 = vector.load %arg14[%c0_131, %c512_132] : memref<128x896xf32, #tpu.memory_space<vmem>>, vector<128x128xf32>
    tpu.vector_store %arg14[%c0_131, %c512_132], %178 {strides = array<i32>} : memref<128x896xf32, #tpu.memory_space<vmem>>, vector<128x128xf32>,
    %c0_133 = arith.constant 0 : index
    %c1280_134 = arith.constant 1280 : index
    %180 = vector.load %arg15[%c0_133, %c1280_134] : memref<128x1792xbf16, #tpu.memory_space<vmem>>, vector<128x384xbf16>
    %c5_135 = arith.constant 5 : index
    %c0_136 = arith.constant 0 : index
    %c0_137 = arith.constant 0 : index
    %181 = vector.load %arg12[%c5_135, %c0_136, %c0_137] : memref<7x384x128xbf16, #tpu.memory_space<vmem>>, vector<1x384x128xbf16>
    %182 = vector.shape_cast %181 : vector<1x384x128xbf16> to vector<384x128xbf16>
    %cst_138 = arith.constant dense<0.000000e+00> : vector<128x128xf32>
    %183 = tpu.matmul %180, %182, %cst_138 {dimension_numbers = #tpu.dot_dimension_numbers<[1], [0], [0], [1], [0, 0, 1, 1], [], []>} : vector<128x384xbf16>, vector<384x128xbf16>, vector<128x128xf32> -> vector<128x128xf32>
    %c0_139 = arith.constant 0 : index
    %c640 = arith.constant 640 : index
    %184 = vector.load %arg13[%c0_139, %c640] : memref<1x896xf32, #tpu.memory_space<vmem>>, vector<1x128xf32>
    %185 = vector.broadcast %184 : vector<1x128xf32> to vector<128x128xf32>
    %186 = arith.addf %183, %185 : vector<128x128xf32>
    %cst_140 = arith.constant 0.000000e+00 : f32
    %187 = vector.broadcast %cst_140 : f32 to vector<128x128xf32>
    %188 = arith.subf %187, %186 : vector<128x128xf32>
    %189 = math.exp %188 : vector<128x128xf32>
    %cst_141 = arith.constant 1.000000e+00 : f32
    %190 = vector.broadcast %cst_141 : f32 to vector<128x128xf32>
    %191 = arith.addf %190, %189 : vector<128x128xf32>
    %192 = tpu.reciprocal %191 {approx = true} : vector<128x128xf32> -> vector<128x128xf32>
    %c0_142 = arith.constant 0 : index
    %c640_143 = arith.constant 640 : index
    %193 = vector.load %arg14[%c0_142, %c640_143] : memref<128x896xf32, #tpu.memory_space<vmem>>, vector<128x128xf32>
    tpu.vector_store %arg14[%c0_142, %c640_143], %192 {strides = array<i32>} : memref<128x896xf32, #tpu.memory_space<vmem>>, vector<128x128xf32>,
    %c0_144 = arith.constant 0 : index
    %c1408 = arith.constant 1408 : index
    %194 = vector.load %arg15[%c0_144, %c1408] : memref<128x1792xbf16, #tpu.memory_space<vmem>>, vector<128x384xbf16>
    %c6_145 = arith.constant 6 : index
    %c0_146 = arith.constant 0 : index
    %c0_147 = arith.constant 0 : index
    %195 = vector.load %arg12[%c6_145, %c0_146, %c0_147] : memref<7x384x128xbf16, #tpu.memory_space<vmem>>, vector<1x384x128xbf16>
    %196 = vector.shape_cast %195 : vector<1x384x128xbf16> to vector<384x128xbf16>
    %cst_148 = arith.constant dense<0.000000e+00> : vector<128x128xf32>
    %197 = tpu.matmul %194, %196, %cst_148 {dimension_numbers = #tpu.dot_dimension_numbers<[1], [0], [0], [1], [0, 0, 1, 1], [], []>} : vector<128x384xbf16>, vector<384x128xbf16>, vector<128x128xf32> -> vector<128x128xf32>
    %c0_149 = arith.constant 0 : index
    %c768_150 = arith.constant 768 : index
    %198 = vector.load %arg13[%c0_149, %c768_150] : memref<1x896xf32, #tpu.memory_space<vmem>>, vector<1x128xf32>
    %199 = vector.broadcast %198 : vector<1x128xf32> to vector<128x128xf32>
    %200 = arith.addf %197, %199 : vector<128x128xf32>
    %cst_151 = arith.constant 0.000000e+00 : f32
    %201 = vector.broadcast %cst_151 : f32 to vector<128x128xf32>
    %202 = arith.subf %201, %200 : vector<128x128xf32>
    %203 = math.exp %202 : vector<128x128xf32>
    %cst_152 = arith.constant 1.000000e+00 : f32
    %204 = vector.broadcast %cst_152 : f32 to vector<128x128xf32>
    %205 = arith.addf %204, %203 : vector<128x128xf32>
    %206 = tpu.reciprocal %205 {approx = true} : vector<128x128xf32> -> vector<128x128xf32>
    %c0_153 = arith.constant 0 : index
    %c768_154 = arith.constant 768 : index
    %207 = vector.load %arg14[%c0_153, %c768_154] : memref<128x896xf32, #tpu.memory_space<vmem>>, vector<128x128xf32>
    tpu.vector_store %arg14[%c0_153, %c768_154], %206 {strides = array<i32>} : memref<128x896xf32, #tpu.memory_space<vmem>>, vector<128x128xf32>,
    return
  }
  func.func @transform_0(%arg0: i32) -> (i32, i32) {
    %c0_i32 = arith.constant 0 : i32
    %c0_i32_0 = arith.constant 0 : i32
    return %arg0, %c0_i32 : i32, i32
  }
  func.func @transform_1(%arg0: i32) -> (i32, i32) {
    %c0_i32 = arith.constant 0 : i32
    %c0_i32_0 = arith.constant 0 : i32
    %c0_i32_1 = arith.constant 0 : i32
    return %c0_i32, %c0_i32_0 : i32, i32
  }
  func.func @transform_2(%arg0: i32) -> (i32, i32) {
    %c0_i32 = arith.constant 0 : i32
    %c0_i32_0 = arith.constant 0 : i32
    %c0_i32_1 = arith.constant 0 : i32
    return %c0_i32, %c0_i32_0 : i32, i32
  }
  func.func @transform_3(%arg0: i32) -> (i32, i32) {
    %c0_i32 = arith.constant 0 : i32
    %c0_i32_0 = arith.constant 0 : i32
    %c0_i32_1 = arith.constant 0 : i32
    return %c0_i32, %c0_i32_0 : i32, i32
  }
  func.func @transform_4(%arg0: i32) -> (i32, i32) {
    %c0_i32 = arith.constant 0 : i32
    %c0_i32_0 = arith.constant 0 : i32
    %c0_i32_1 = arith.constant 0 : i32
    return %c0_i32, %c0_i32_0 : i32, i32
  }
  func.func @transform_5(%arg0: i32) -> (i32, i32) {
    %c0_i32 = arith.constant 0 : i32
    %c0_i32_0 = arith.constant 0 : i32
    %c0_i32_1 = arith.constant 0 : i32
    return %c0_i32, %c0_i32_0 : i32, i32
  }
  func.func @transform_6(%arg0: i32) -> (i32, i32) {
    %c0_i32 = arith.constant 0 : i32
    %c0_i32_0 = arith.constant 0 : i32
    %c0_i32_1 = arith.constant 0 : i32
    return %c0_i32, %c0_i32_0 : i32, i32
  }
  func.func @transform_7(%arg0: i32) -> (i32, i32) {
    %c0_i32 = arith.constant 0 : i32
    %c0_i32_0 = arith.constant 0 : i32
    %c0_i32_1 = arith.constant 0 : i32
    return %c0_i32, %c0_i32_0 : i32, i32
  }
  func.func @transform_8(%arg0: i32) -> (i32, i32) {
    %c0_i32 = arith.constant 0 : i32
    %c0_i32_0 = arith.constant 0 : i32
    %c0_i32_1 = arith.constant 0 : i32
    return %c0_i32, %c0_i32_0 : i32, i32
  }
  func.func @transform_9(%arg0: i32) -> (i32, i32, i32) {
    %c0_i32 = arith.constant 0 : i32
    %c0_i32_0 = arith.constant 0 : i32
    %c0_i32_1 = arith.constant 0 : i32
    %c0_i32_2 = arith.constant 0 : i32
    return %c0_i32, %c0_i32_0, %c0_i32_1 : i32, i32, i32
  }
  func.func @transform_10(%arg0: i32) -> (i32, i32) {
    %c0_i32 = arith.constant 0 : i32
    %c0_i32_0 = arith.constant 0 : i32
    %c0_i32_1 = arith.constant 0 : i32
    return %c0_i32, %c0_i32_0 : i32, i32
  }
  func.func @transform_11(%arg0: i32) -> (i32, i32, i32) {
    %c0_i32 = arith.constant 0 : i32
    %c0_i32_0 = arith.constant 0 : i32
    %c0_i32_1 = arith.constant 0 : i32
    %c0_i32_2 = arith.constant 0 : i32
    return %c0_i32, %c0_i32_0, %c0_i32_1 : i32, i32, i32
  }
  func.func @transform_12(%arg0: i32) -> (i32, i32) {
    %c0_i32 = arith.constant 0 : i32
    %c0_i32_0 = arith.constant 0 : i32
    %c0_i32_1 = arith.constant 0 : i32
    return %c0_i32, %c0_i32_0 : i32, i32
  }
  func.func @transform_13(%arg0: i32) -> (i32, i32) {
    %c0_i32 = arith.constant 0 : i32
    %c0_i32_0 = arith.constant 0 : i32
    return %arg0, %c0_i32 : i32, i32
  }
}

</mosaic_0001>

<bundles_post_ra>
// kernel: tpu_custom_call.1
= control target key start
LH: loop header
LB: loop body
LE: loop exit
PB: predicated region body
PF: predicated region fallthrough
CT: control target
= control target key end

     0   :  { %18 = vsyncpa [#allocation4], 0  ;;  %s18464_s0 = inlined_call_operand.hbm [shape: bf16[128,896], index: 0, kind: input, shape index: {}]   ;;  %s18465_s1 = inlined_call_operand.hbm [shape: bf16[896,128], index: 1, kind: input, shape index: {}]   ;;  %s18466_s2 = inlined_call_operand.hbm [shape: f32[1,128], index: 2, kind: input, shape index: {}]   ;;  %s18467_s3 = inlined_call_operand.hbm [shape: bf16[128,128], index: 3, kind: input, shape index: {}]   ;;  %s18468_s4 = inlined_call_operand.hbm [shape: f32[1,128], index: 4, kind: input, shape index: {}]   ;;  %s18469_s5 = inlined_call_operand.hbm [shape: bf16[128,384], index: 5, kind: input, shape index: {}]   ;;  %s18470_s6 = inlined_call_operand.hbm [shape: f32[1,384], index: 6, kind: input, shape index: {}]   ;;  %s18471_s7 = inlined_call_operand.hbm [shape: bf16[384,896], index: 7, kind: input, shape index: {}]   ;;  %s18472_s8 = inlined_call_operand.hbm [shape: f32[1,896], index: 8, kind: input, shape index: {}]   ;;  %s18473_s9 = inlined_call_operand.hbm [shape: bf16[7,256,256], index: 9, kind: input, shape index: {}]   ;;  %s18474_s10 = inlined_call_operand.vmem [shape: f32[1,1792], index: 10, kind: input, shape index: {}]   ;;  %s18475_s11 = inlined_call_operand.hbm [shape: bf16[7,384,128], index: 11, kind: input, shape index: {}]   ;;  %s18476_s12 = inlined_call_operand.vmem [shape: f32[1,896], index: 12, kind: input, shape index: {}]   ;;  %s18477_s13 = inlined_call_operand.hbm [shape: f32[128,896], index: 13, kind: output, shape index: {}]  }
   0x1   :  { %19 = vsyncpa [#allocation7], 0 }
   0x2   :  { %20 = vsyncpa [#allocation10], 0 }
   0x3   :  { %21 = vsyncpa [#allocation13], 0 }
   0x4   :  { %22 = vsyncpa [#allocation16], 0 }
   0x5   :  { %23 = vsyncpa [#allocation19], 0 }
   0x6   :  { %24 = vsyncpa [#allocation5], 0  ;;  %s16186_s25 = smov [#allocation6]  }
   0x7   :  { %s42_s26 = sshll.u32 %s16186_s25, 4  ;;  %s43_s26 = int_to_ptr.vmem [resolvable:$true] %s42_s26 }
   0x8   :  { %s15940_s27 = scalar_lea.vmem %s43_s26, 7168  ;;  %p15945_p1 = scmp.lt.s32.totalorder %s43_s26, %s43_s26 }
   0x9   :  { %p15941_p0 = scmp.ne.s32.totalorder %s43_s26, %s15940_s27  ;;  %p15946_p2 = scmp.lt.s32.totalorder %s15940_s27, %s15940_s27 }
   0xb   :  { %p15947_p3 = por %p15946_p2, %p15945_p1 }
   0xd   :  { %p15948_p4 = pnand %p15947_p3, %p15941_p0 }
   0xf   :  { %15951 = shalt.err (!%p15948_p4)
}
  0x10   :  { %s16187_s28 = smov 64   ;;  %s16188_s29 = smov 4  }
  0x11   :  { %48 = dma.hbm_to_vmem [thread:$0]  %s18465_s1, 7168, %s43_s26, [#allocation7], %s16187_s28, %s16187_s28, %s16188_s29  }
  0x12   :  { %s16189_s15 = smov [#allocation9]   ;;  %s16190_s17 = smov [#allocation12]  }
  0x13   :  { %s64_s16 = sshll.u32 %s16189_s15, 4  ;;  %s86_s18 = sshll.u32 %s16190_s17, 4  ;;  %s65_s16 = int_to_ptr.vmem [resolvable:$true] %s64_s16  ;;  %s87_s18 = int_to_ptr.vmem [resolvable:$true] %s86_s18 }
  0x14   :  { %s15960_s19 = scalar_lea.vmem %s65_s16, 1024  ;;  %p15965_p6 = scmp.lt.s32.totalorder %s65_s16, %s65_s16 }
  0x15   :  { %p15961_p5 = scmp.ne.s32.totalorder %s65_s16, %s15960_s19  ;;  %p15966_p7 = scmp.lt.s32.totalorder %s15960_s19, %s15960_s19 }
  0x17   :  { %p15967_p8 = por %p15966_p7, %p15965_p6 }
  0x19   :  { %p15968_p9 = pnand %p15967_p8, %p15961_p5 }
  0x1b   :  { %15971 = shalt.err (!%p15968_p9)
}
  0x1c   :  { %70 = dma.hbm_to_vmem [thread:$0]  %s18467_s3, 1024, %s65_s16, [#allocation10], %s16187_s28, %s16187_s28, %s16188_s29  }
  0x1d   :  { %s15980_s1 = scalar_lea.vmem %s87_s18, 3072  ;;  %p15985_p11 = scmp.lt.s32.totalorder %s87_s18, %s87_s18 }
  0x1e   :  { %p15981_p10 = scmp.ne.s32.totalorder %s87_s18, %s15980_s1  ;;  %p15986_p12 = scmp.lt.s32.totalorder %s15980_s1, %s15980_s1 }
  0x20   :  { %p15987_p13 = por %p15986_p12, %p15985_p11 }
  0x22   :  { %p15988_p0 = pnand %p15987_p13, %p15981_p10 }
  0x24   :  { %15991 = shalt.err (!%p15988_p0)
}
  0x25   :  { %s16191_s22 = smov 192   ;;  %s16192_s23 = smov 12  }
  0x26   :  { %92 = dma.hbm_to_vmem [thread:$0]  %s18469_s5, 3072, %s87_s18, [#allocation13], %s16191_s22, %s16191_s22, %s16192_s23  }
  0x27   :  { %s16193_s26 = smov [#allocation15]   ;;  %s16194_s30 = smov [#allocation18]  }
  0x28   :  { %s108_s27 = sshll.u32 %s16193_s26, 4  ;;  %s130_s14 = sshll.u32 %s16194_s30, 4  ;;  %s109_s27 = int_to_ptr.vmem [resolvable:$true] %s108_s27  ;;  %s131_s14 = int_to_ptr.vmem [resolvable:$true] %s130_s14 }
  0x29   :  { %s16000_s3 = scalar_lea.vmem %s109_s27, 21504  ;;  %p16005_p2 = scmp.lt.s32.totalorder %s109_s27, %s109_s27 }
  0x2a   :  { %p16001_p1 = scmp.ne.s32.totalorder %s109_s27, %s16000_s3  ;;  %p16006_p3 = scmp.lt.s32.totalorder %s16000_s3, %s16000_s3 }
  0x2c   :  { %p16007_p4 = por %p16006_p3, %p16005_p2 }
  0x2e   :  { %p16008_p5 = pnand %p16007_p4, %p16001_p1 }
  0x30   :  { %16011 = shalt.err (!%p16008_p5)
}
  0x31   :  { %s16195_s15 = smov 448   ;;  %s16196_s16 = smov 28  }
  0x32   :  { %114 = dma.hbm_to_vmem [thread:$0]  %s18471_s7, 21504, %s109_s27, [#allocation16], %s16195_s15, %s16195_s15, %s16196_s16  }
  0x33   :  { %s16020_s5 = scalar_lea.vmem %s131_s14, 28672  ;;  %p16025_p7 = scmp.lt.s32.totalorder %s131_s14, %s131_s14 }
  0x34   :  { %p16021_p6 = scmp.ne.s32.totalorder %s131_s14, %s16020_s5  ;;  %p16026_p8 = scmp.lt.s32.totalorder %s16020_s5, %s16020_s5 }
  0x36   :  { %p16027_p9 = por %p16026_p8, %p16025_p7 }
  0x38   :  { %p16028_p10 = pnand %p16027_p9, %p16021_p6 }
  0x3a   :  { %16031 = shalt.err (!%p16028_p10)
}
  0x3b   :  { %s16197_s18 = smov 128   ;;  %s16198_s20 = smov 8  }
  0x3c   :  { %136 = dma.hbm_to_vmem [thread:$0]  %s18473_s9, 28672, %s131_s14, [#allocation19], %s16197_s18, %s16197_s18, %s16198_s20  }
  0x3d   :  { %s16199_s22 = smov [#allocation3]   ;;  %s16200_s24 = smov [#allocation8]  }
  0x3e   :  { %s30_s23 = sshll.u32 %s16199_s22, 4  ;;  %s55_s25 = sshll.u32 %s16200_s24, 4  ;;  %s31_s23 = int_to_ptr.vmem [resolvable:$true] %s30_s23  ;;  %s56_s25 = int_to_ptr.vmem [resolvable:$true] %s55_s25 }
  0x3f   :  { %s16040_s7 = scalar_lea.vmem %s31_s23, 7168  ;;  %p16045_p12 = scmp.lt.s32.totalorder %s31_s23, %s31_s23 }
  0x40   :  { %p16041_p11 = scmp.ne.s32.totalorder %s31_s23, %s16040_s7  ;;  %p16046_p13 = scmp.lt.s32.totalorder %s16040_s7, %s16040_s7 }
  0x42   :  { %p16047_p0 = por %p16046_p13, %p16045_p12 }
  0x44   :  { %p16048_p1 = pnand %p16047_p0, %p16041_p11 }
  0x46   :  { %16051 = shalt.err (!%p16048_p1)
}
  0x47   :  { %36 = dma.hbm_to_vmem [thread:$0]  %s18464_s0, 7168, %s31_s23, [#allocation4], %s16195_s15, %s16195_s15, %s16196_s16  }
  0x48   :  { %s16060_s30 = scalar_lea.vmem %s56_s25, 16  ;;  %s16064_s9 = scalar_lea.vmem %s56_s25, 32 }
  0x49   :  { %p16061_p2 = scmp.ne.s32.totalorder %s56_s25, %s16060_s30  ;;  %p16065_p3 = scmp.lt.s32.totalorder %s56_s25, %s56_s25 }
  0x4a   :  { %p16066_p4 = scmp.lt.s32.totalorder %s16064_s9, %s16060_s30 }
  0x4c   :  { %p16067_p5 = por %p16066_p4, %p16065_p3 }
  0x4e   :  { %p16068_p6 = pnand %p16067_p5, %p16061_p2 }
  0x50   :  { %16071 = shalt.err (!%p16068_p6)
}
  0x51   :  { %58 = dma.hbm_to_vmem [thread:$0]  %s18466_s2, 16, %s56_s25, [#allocation7]  }
  0x52   :  { %s16201_s17 = smov [#allocation11]   ;;  %s16202_s5 = smov [#allocation14]  }
  0x53   :  { %s77_s19 = sshll.u32 %s16201_s17, 4  ;;  %s99_s18 = sshll.u32 %s16202_s5, 4  ;;  %s78_s19 = int_to_ptr.vmem [resolvable:$true] %s77_s19  ;;  %s100_s18 = int_to_ptr.vmem [resolvable:$true] %s99_s18 }
  0x54   :  { %s16080_s20 = scalar_lea.vmem %s78_s19, 16  ;;  %s16084_s0 = scalar_lea.vmem %s78_s19, 32 }
  0x55   :  { %p16081_p7 = scmp.ne.s32.totalorder %s78_s19, %s16080_s20  ;;  %p16085_p8 = scmp.lt.s32.totalorder %s78_s19, %s78_s19 }
  0x56   :  { %p16086_p9 = scmp.lt.s32.totalorder %s16084_s0, %s16080_s20 }
  0x58   :  { %p16087_p10 = por %p16086_p9, %p16085_p8 }
  0x5a   :  { %p16088_p11 = pnand %p16087_p10, %p16081_p7 }
  0x5c   :  { %16091 = shalt.err (!%p16088_p11)
}
  0x5d   :  { %80 = dma.hbm_to_vmem [thread:$0]  %s18468_s4, 16, %s78_s19, [#allocation10]  }
  0x5e   :  { %s16100_s21 = scalar_lea.vmem %s100_s18, 48  ;;  %s16104_s2 = scalar_lea.vmem %s100_s18, 64 }
  0x5f   :  { %p16101_p12 = scmp.ne.s32.totalorder %s100_s18, %s16100_s21  ;;  %p16105_p13 = scmp.lt.s32.totalorder %s100_s18, %s100_s18 }
  0x60   :  { %p16106_p0 = scmp.lt.s32.totalorder %s16104_s2, %s16100_s21 }
  0x62   :  { %p16107_p1 = por %p16106_p0, %p16105_p13 }
  0x64   :  { %p16108_p2 = pnand %p16107_p1, %p16101_p12 }
  0x66   :  { %16111 = shalt.err (!%p16108_p2)
}
  0x67   :  { %102 = dma.hbm_to_vmem [thread:$0]  %s18470_s6, 48, %s100_s18, [#allocation13]  }
  0x68   :  { %s16203_s23 = smov [#allocation17]   ;;  %s16204_s25 = smov [#allocation20]  }
  0x69   :  { %s121_s24 = sshll.u32 %s16203_s23, 4  ;;  %s144_s7 = sshll.u32 %s16204_s25, 4  ;;  %s122_s24 = int_to_ptr.vmem [resolvable:$true] %s121_s24  ;;  %s145_s7 = int_to_ptr.vmem [resolvable:$true] %s144_s7 }
  0x6a   :  { %s16120_s26 = scalar_lea.vmem %s122_s24, 112  ;;  %s16124_s4 = scalar_lea.vmem %s122_s24, 128 }
  0x6b   :  { %p16121_p3 = scmp.ne.s32.totalorder %s122_s24, %s16120_s26  ;;  %p16125_p4 = scmp.lt.s32.totalorder %s122_s24, %s122_s24 }
  0x6c   :  { %p16126_p5 = scmp.lt.s32.totalorder %s16124_s4, %s16120_s26 }
  0x6e   :  { %p16127_p6 = por %p16126_p5, %p16125_p4 }
  0x70   :  { %p16128_p7 = pnand %p16127_p6, %p16121_p3 }
  0x72   :  { %16131 = shalt.err (!%p16128_p7)
}
  0x73   :  { %124 = dma.hbm_to_vmem [thread:$0]  %s18472_s8, 112, %s122_s24, [#allocation16]  }
  0x74   :  { %s16140_s9 = scalar_lea.vmem %s145_s7, 21504  ;;  %p16145_p9 = scmp.lt.s32.totalorder %s145_s7, %s145_s7 }
  0x75   :  { %p16141_p8 = scmp.ne.s32.totalorder %s145_s7, %s16140_s9  ;;  %p16146_p10 = scmp.lt.s32.totalorder %s16140_s9, %s16140_s9 }
  0x77   :  { %p16147_p11 = por %p16146_p10, %p16145_p9 }
  0x79   :  { %p16148_p12 = pnand %p16147_p11, %p16141_p8 }
  0x7b   :  { %16151 = shalt.err (!%p16148_p12)
}
  0x7c   :  { %150 = dma.hbm_to_vmem [thread:$0]  %s18475_s11, 21504, %s145_s7, [#allocation19], %s16187_s28, %s16187_s28, %s16188_s29  }
  0x7d   :  { %16172 = dma.done.wait [#allocation4], 7168  }
  0x7e   :  { %16173 = vsyncadd [#allocation4], 4294960128 }
  0x7f   :  { %16174 = dma.done.wait [#allocation7], 7184  }
  0x80   :  { %16175 = vsyncadd [#allocation7], 4294960112 }
  0x81   :  { %16176 = dma.done.wait [#allocation10], 1040  }
  0x82   :  { %16177 = vsyncadd [#allocation10], 4294966256 }
  0x83   :  { %16178 = dma.done.wait [#allocation13], 3120  }
  0x84   :  { %16179 = vsyncadd [#allocation13], 4294964176 }
  0x85   :  { %16180 = dma.done.wait [#allocation16], 21616  }
  0x86   :  { %16181 = vsyncadd [#allocation16], 4294945680 }
  0x87   :  { %16182 = dma.done.wait [#allocation19], 50176  }
  0x88   :  { %16183 = vsyncadd [#allocation19], 4294917120  ;;  %v14354_v0 = vld [vmem:[#allocation6 + $0x78] sm:$0xff]   ;;  %v14358_v4 = vld [vmem:[#allocation6 + $0x70] sm:$0xff]  }
  0x89   :  { %v14355_v1 = vld [vmem:[#allocation6 + $0x38] sm:$0xff]   ;;  %13099 = vmatprep.subr.bf16.mxu0 %v14354_v0  ;;  %v14359_v5 = vld [vmem:[#allocation6 + $0x30] sm:$0xff]   ;;  %v14362_v8 = vld [vmem:[#allocation6 + $0x68] sm:$0xff]  }
  0x8a   :  { %v14356_v2 = vld [vmem:[#allocation6 + $0xf8] sm:$0xff]   ;;  %13100 = vmatpush3.bf16.msra.mxu0 %v14355_v1  ;;  %v14360_v6 = vld [vmem:[#allocation6 + $0xf0] sm:$0xff]   ;;  %v14363_v9 = vld [vmem:[#allocation6 + $0x28] sm:$0xff]  }
  0x8b   :  { %v14357_v3 = vld [vmem:[#allocation6 + $0xb8] sm:$0xff]   ;;  %13163 = vmatprep.subr.bf16.mxu1 %v14356_v2  ;;  %13101 = vmatprep.subr.bf16.mxu0 %v14358_v4  ;;  %v14361_v7 = vld [vmem:[#allocation6 + $0xb0] sm:$0xff]   ;;  %v14364_v10 = vld [vmem:[#allocation6 + $0xe8] sm:$0xff]  }
  0x8c   :  { %13164 = vmatpush3.bf16.msra.mxu1 %v14357_v3  ;;  %v14365_v11 = vld [vmem:[#allocation6 + $0xa8] sm:$0xff]   ;;  %v14366_v12 = vld [vmem:[#allocation6 + $0x60] sm:$0xff]   ;;  %v14370_v16 = vld [vmem:[#allocation6 + $0x58] sm:$0xff]  }
  0x8d   :  { %13165 = vmatprep.subr.bf16.mxu1 %v14360_v6  ;;  %v14367_v13 = vld [vmem:[#allocation6 + $0x20] sm:$0xff]   ;;  %v14371_v17 = vld [vmem:[#allocation6 + $0x18] sm:$0xff]   ;;  %v14374_v20 = vld [vmem:[#allocation6 + $0x50] sm:$0xff]  }
  0x8e   :  { %13102 = vmatpush3.bf16.msra.mxu0 %v14359_v5  ;;  %v14368_v14 = vld [vmem:[#allocation6 + $0xe0] sm:$0xff]   ;;  %v14372_v18 = vld [vmem:[#allocation6 + $0xd8] sm:$0xff]   ;;  %v14375_v21 = vld [vmem:[#allocation6 + $0x10] sm:$0xff]  }
  0x8f   :  { %13103 = vmatprep.subr.bf16.mxu0 %v14362_v8  ;;  %v14369_v15 = vld [vmem:[#allocation6 + $0xa0] sm:$0xff]   ;;  %v14373_v19 = vld [vmem:[#allocation6 + $0x98] sm:$0xff]   ;;  %v14376_v22 = vld [vmem:[#allocation6 + $0xd0] sm:$0xff]  }
  0x90   :  { %13166 = vmatpush3.bf16.msra.mxu1 %v14361_v7  ;;  %v14377_v23 = vld [vmem:[#allocation6 + $0x90] sm:$0xff]   ;;  %v14378_v24 = vld [vmem:[#allocation6 + $0x48] sm:$0xff]   ;;  %v14382_v28 = vld [vmem:[#allocation6 + $0x40] sm:$0xff]  }
  0x91   :  { %13167 = vmatprep.subr.bf16.mxu1 %v14364_v10  ;;  %v14379_v25 = vld [vmem:[#allocation6 + $0x8] sm:$0xff]   ;;  %v14383_v29 = vld [vmem:[#allocation6] sm:$0xff]   ;;  %v14389_v34 = vld [vmem:[#allocation6 + $0x178] sm:$0xff]  }
  0x92   :  { %13104 = vmatpush3.bf16.msra.mxu0 %v14363_v9  ;;  %v14380_v26 = vld [vmem:[#allocation6 + $0xc8] sm:$0xff]   ;;  %v14384_v30 = vld [vmem:[#allocation6 + $0xc0] sm:$0xff]   ;;  %v14393_v37 = vld [vmem:[#allocation6 + $0x138] sm:$0xff]  }
  0x93   :  { %13105 = vmatprep.subr.bf16.mxu0 %v14366_v12  ;;  %v14381_v27 = vld [vmem:[#allocation6 + $0x88] sm:$0xff]   ;;  %v14385_v31 = vld [vmem:[#allocation3] ss:$28 sps:$4 sm:$0xff]   ;;  %v14396_v39 = vld [vmem:[#allocation3 + $0x38] ss:$28 sps:$4 sm:$0xff]  }
  0x94   :  { %13168 = vmatpush3.bf16.msra.mxu1 %v14365_v11  ;;  %v14387_v32 = vld [vmem:[#allocation3 + $0x4] ss:$28 sps:$4 sm:$0xff]   ;;  %v14392_v36 = vld [vmem:[#allocation3 + $0xc] ss:$28 sps:$4 sm:$0xff]   ;;  %v14394_v38 = vld [vmem:[#allocation3 + $0x3c] ss:$28 sps:$4 sm:$0xff]  }
  0x95   :  { %13169 = vmatprep.subr.bf16.mxu1 %v14368_v14  ;;  %v14388_v33 = vld [vmem:[#allocation6 + $0x80] sm:$0xff]   ;;  %1026 = vmatprep.mubr.bf16.mxu0 %v14387_v32  ;;  %v14397_v40 = vld [vmem:[#allocation6 + $0x170] sm:$0xff]   ;;  %v14402_v44 = vld [vmem:[#allocation6 + $0x1b8] sm:$0xff]  }
  0x96   :  { %13106 = vmatpush3.bf16.msra.mxu0 %v14367_v13  ;;  %v14390_v35 = vld [vmem:[#allocation3 + $0x8] ss:$28 sps:$4 sm:$0xff]   ;;  %1123 = vmatprep.mubr.bf16.mxu1 %v14392_v36  ;;  %v14400_v42 = vld [vmem:[#allocation6 + $0x130] sm:$0xff]   ;;  %v14401_v43 = vld [vmem:[#allocation3 + $0x40] ss:$28 sps:$4 sm:$0xff]  }
  0x97   :  { %13107 = vmatprep.subr.bf16.mxu0 %v14370_v16  ;;  %v14398_v41 = vld [vmem:[#allocation3 + $0x44] ss:$28 sps:$4 sm:$0xff]   ;;  %v14403_v45 = vld [vmem:[#allocation3 + $0x74] ss:$28 sps:$4 sm:$0xff]   ;;  %v14406_v46 = vld [vmem:[#allocation6 + $0x168] sm:$0xff]  }
  0x98   :  { %13170 = vmatpush3.bf16.msra.mxu1 %v14369_v15  ;;  %v14407_v47 = vld [vmem:[#allocation3 + $0x7c] ss:$28 sps:$4 sm:$0xff]   ;;  %v14405_v48 = vld [vmem:[#allocation3 + $0x70] ss:$28 sps:$4 sm:$0xff]   ;;  %v14415_v53 = vld [vmem:[#allocation6 + $0x160] sm:$0xff]  }
  0x99   :  { %13171 = vmatprep.subr.bf16.mxu1 %v14372_v18  ;;  %v14409_v49 = vld [vmem:[#allocation6 + $0x128] sm:$0xff]   ;;  %v14411_v50 = vld [vmem:[#allocation6 + $0x1b0] sm:$0xff]   ;;  %v14418_v55 = vld [vmem:[#allocation6 + $0x120] sm:$0xff]  }
  0x9a   :  { %13108 = vmatpush3.bf16.msra.mxu0 %v14371_v17  ;;  %v14412_v51 = vld [vmem:[#allocation3 + $0xac] ss:$28 sps:$4 sm:$0xff]   ;;  %v14410_v52 = vld [vmem:[#allocation3 + $0x78] ss:$28 sps:$4 sm:$0xff]   ;;  %v14421_v60 = vld [vmem:[#allocation3 + $0xe4] ss:$28 sps:$4 sm:$0xff]  }
  0x9b   :  { %13109 = vmatprep.subr.bf16.mxu0 %v14374_v20  ;;  %v14416_v54 = vld [vmem:[#allocation3 + $0xb4] ss:$28 sps:$4 sm:$0xff]   ;;  %v14420_v56 = vld [vmem:[#allocation6 + $0x1a8] sm:$0xff]   ;;  %v14424_v58 = vld [vmem:[#allocation6 + $0x158] sm:$0xff]  }
  0x9c   :  { %13172 = vmatpush3.bf16.msra.mxu1 %v14373_v19  ;;  %v14414_v57 = vld [vmem:[#allocation3 + $0xa8] ss:$28 sps:$4 sm:$0xff]   ;;  %v14419_v59 = vld [vmem:[#allocation3 + $0xb0] ss:$28 sps:$4 sm:$0xff]   ;;  %v14427_v61 = vld [vmem:[#allocation6 + $0x118] sm:$0xff]  }
  0x9d   :  { %13173 = vmatprep.subr.bf16.mxu1 %v14376_v22  ;;  %v14425_v62 = vld [vmem:[#allocation3 + $0xec] ss:$28 sps:$4 sm:$0xff]   ;;  %v14429_v63 = vld [vmem:[#allocation6 + $0x1a0] sm:$0xff]   ;;  %v14433_v0 = vld [vmem:[#allocation6 + $0x150] sm:$0xff]  }
  0x9e   :  { %13110 = vmatpush3.bf16.msra.mxu0 %v14375_v21  ;;  %v14423_v1 = vld [vmem:[#allocation3 + $0xe0] ss:$28 sps:$4 sm:$0xff]   ;;  %v14436_v3 = vld [vmem:[#allocation6 + $0x110] sm:$0xff]   ;;  %v14428_v5 = vld [vmem:[#allocation3 + $0xe8] ss:$28 sps:$4 sm:$0xff]  }
  0x9f   :  { %13111 = vmatprep.subr.bf16.mxu0 %v14378_v24  ;;  %v14430_v2 = vld [vmem:[#allocation3 + $0x11c] ss:$28 sps:$4 sm:$0xff]   ;;  %v14434_v6 = vld [vmem:[#allocation3 + $0x124] ss:$28 sps:$4 sm:$0xff]   ;;  %v14442_v7 = vld [vmem:[#allocation6 + $0x148] sm:$0xff]  }
  0xa0   :  { %13174 = vmatpush3.bf16.msra.mxu1 %v14377_v23  ;;  %v14438_v4 = vld [vmem:[#allocation6 + $0x198] sm:$0xff]   ;;  %v14445_v8 = vld [vmem:[#allocation6 + $0x108] sm:$0xff]   ;;  %v14447_v9 = vld [vmem:[#allocation6 + $0x190] sm:$0xff]  }
  0xa1   :  { %13175 = vmatprep.subr.bf16.mxu1 %v14380_v26  ;;  %v14432_v10 = vld [vmem:[#allocation3 + $0x118] ss:$28 sps:$4 sm:$0xff]   ;;  %v14451_v12 = vld [vmem:[#allocation6 + $0x140] sm:$0xff]   ;;  %v14456_v16 = vld [vmem:[#allocation6 + $0x188] sm:$0xff]  }
  0xa2   :  { %13112 = vmatpush3.bf16.msra.mxu0 %v14379_v25  ;;  %v14439_v11 = vld [vmem:[#allocation3 + $0x154] ss:$28 sps:$4 sm:$0xff]   ;;  %v14437_v13 = vld [vmem:[#allocation3 + $0x120] ss:$28 sps:$4 sm:$0xff]   ;;  %v14448_v19 = vld [vmem:[#allocation3 + $0x18c] ss:$28 sps:$4 sm:$0xff]  }
  0xa3   :  { %13113 = vmatprep.subr.bf16.mxu0 %v14382_v28  ;;  %v14454_v14 = vld [vmem:[#allocation6 + $0x100] sm:$0xff]   ;;  %v14443_v15 = vld [vmem:[#allocation3 + $0x15c] ss:$28 sps:$4 sm:$0xff]   ;;  %v14441_v18 = vld [vmem:[#allocation3 + $0x150] ss:$28 sps:$4 sm:$0xff]  }
  0xa4   :  { %13176 = vmatpush3.bf16.msra.mxu1 %v14381_v27  ;;  %v14460_v17 = vld [vmem:[#allocation6 + $0x180] sm:$0xff]   ;;  %v14446_v20 = vld [vmem:[#allocation3 + $0x158] ss:$28 sps:$4 sm:$0xff]   ;;  %v14455_v24 = vld [vmem:[#allocation3 + $0x190] ss:$28 sps:$4 sm:$0xff]  }
  0xa5   :  { %13177 = vmatprep.subr.bf16.mxu1 %v14384_v30  ;;  %v14452_v21 = vld [vmem:[#allocation3 + $0x194] ss:$28 sps:$4 sm:$0xff]   ;;  %v14450_v22 = vld [vmem:[#allocation3 + $0x188] ss:$28 sps:$4 sm:$0xff]   ;;  %v14470_v32 = vld [vmem:[#allocation3 + $0xc0] ss:$28 sps:$4 sm:$0xff]  }
  0xa6   :  { %13114 = vmatpush3.bf16.msra.mxu0 %v14383_v29  ;;  %v14459_v23 = vld [vmem:[#allocation3 + $0x14] ss:$28 sps:$4 sm:$0xff]   ;;  %v14463_v27 = vld [vmem:[#allocation3 + $0x4c] ss:$28 sps:$4 sm:$0xff]  }
  0xa7   :  { %13227 = vmatprep.subr.bf16.mxu0 %v14389_v34  ;;  %v14461_v25 = vld [vmem:[#allocation3 + $0x18] ss:$28 sps:$4 sm:$0xff]   ;;  %v14457_v26 = vld [vmem:[#allocation3 + $0x10] ss:$28 sps:$4 sm:$0xff]   ;;  %v14469_v29 = vld [vmem:[#allocation3 + $0x88] ss:$28 sps:$4 sm:$0xff]  }
  0xa8   :  { %13178 = vmatpush3.bf16.msra.mxu1 %v14388_v33  ;;  %v14462_v28 = vld [vmem:[#allocation3 + $0x50] ss:$28 sps:$4 sm:$0xff]   ;;  %v14465_v30 = vld [vmem:[#allocation3 + $0x48] ss:$28 sps:$4 sm:$0xff]   ;;  %v14477_v33 = vld [vmem:[#allocation3 + $0xf8] ss:$28 sps:$4 sm:$0xff]  }
  0xa9   :  { %1027 = vmatmul.mubr.bf16.vlgmr.msra.gmra.mxu0 %v14385_v31  ;;  %13979 = vmatprep.subr.bf16.mxu1 %v14402_v44  ;;  %v14466_v31 = vld [vmem:[#allocation3 + $0x84] ss:$28 sps:$4 sm:$0xff]   ;;  %v14478_v36 = vld [vmem:[#allocation3 + $0x130] ss:$28 sps:$4 sm:$0xff]  }
  0xaa   :  { %13228 = vmatpush3.bf16.msra.mxu0 %v14393_v37  ;;  %1034 = vmatprep.mubr.bf16.mxu0 %v14394_v38  ;;  %v14468_v34 = vld [vmem:[#allocation3 + $0x80] ss:$28 sps:$4 sm:$0xff]   ;;  %v14485_v37 = vld [vmem:[#allocation3 + $0x168] ss:$28 sps:$4 sm:$0xff]   ;;  %v14473_v38 = vld [vmem:[#allocation3 + $0xb8] ss:$28 sps:$4 sm:$0xff]  }
  0xab   :  { %1124 = vmatmul.mubr.bf16.vlgmr.msra.gmra.mxu1 %v14390_v35  ;;  %13229 = vmatprep.subr.bf16.mxu0 %v14397_v40  ;;  %v14471_v35 = vld [vmem:[#allocation3 + $0xbc] ss:$28 sps:$4 sm:$0xff]  }
  0xac   :  { %1131 = vmatprep.mubr.bf16.mxu1 %v14398_v41  ;;  %13980 = vmatpush3.bf16.msra.mxu1 %v14402_v44  ;;  %v14486_v40 = vld [vmem:[#allocation3 + $0x1a0] ss:$28 sps:$4 sm:$0xff]   ;;  %v14476_v41 = vld [vmem:[#allocation3 + $0xf0] ss:$28 sps:$4 sm:$0xff]  }
  0xad   :  { %13981 = vmatprep.subr.bf16.mxu1 %v14411_v50  ;;  %v14482_v44 = vld [vmem:[#allocation3 + $0x164] ss:$28 sps:$4 sm:$0xff]  }
  0xae   :  { %13230 = vmatpush3.bf16.msra.mxu0 %v14400_v42  ;;  %v14479_v42 = vld [vmem:[#allocation3 + $0x12c] ss:$28 sps:$4 sm:$0xff]  }
  0xaf   :  { %13231 = vmatprep.subr.bf16.mxu0 %v14406_v46  ;;  %v14487_v46 = vld [vmem:[#allocation3 + $0x19c] ss:$28 sps:$4 sm:$0xff]  }
  0xb0   :  { %13982 = vmatpush3.bf16.msra.mxu1 %v14411_v50  ;;  %v14492_v50 = vld [vmem:[#allocation9 + $0x28] sm:$0xff]  }
  0xb1   :  { %1035 = vmatmul.mubr.bf16.gmra.mxu0 %v14396_v39  ;;  %13983 = vmatprep.subr.bf16.mxu1 %v14420_v56  ;;  %v14474_v39 = vld [vmem:[#allocation3 + $0xf4] ss:$28 sps:$4 sm:$0xff]  }
  0xb2   :  { %1042 = vmatprep.mubr.bf16.mxu0 %v14403_v45  ;;  %13232 = vmatpush3.bf16.msra.mxu0 %v14409_v49  ;;  %v14484_v45 = vld [vmem:[#allocation3 + $0x160] ss:$28 sps:$4 sm:$0xff]   ;;  %v14491_v49 = vld [vmem:[#allocation9 + $0x30] sm:$0xff]  }
  0xb3   :  { %1132 = vmatmul.mubr.bf16.gmra.mxu1 %v14401_v43  ;;  %13233 = vmatprep.subr.bf16.mxu0 %v14415_v53  ;;  %v14481_v43 = vld [vmem:[#allocation3 + $0x128] ss:$28 sps:$4 sm:$0xff]   ;;  %v14495_v53 = vld [vmem:[#allocation9 + $0x10] sm:$0xff]  }
  0xb4   :  { %1139 = vmatprep.mubr.bf16.mxu1 %v14407_v47  ;;  %13984 = vmatpush3.bf16.msra.mxu1 %v14420_v56  ;;  %v14489_v47 = vld [vmem:[#allocation3 + $0x198] ss:$28 sps:$4 sm:$0xff]  }
  0xb5   :  { %13985 = vmatprep.subr.bf16.mxu1 %v14429_v63 }
  0xb6   :  { %13234 = vmatpush3.bf16.msra.mxu0 %v14418_v55  ;;  %v14497_v55 = vld [vmem:[#allocation9] sm:$0xff]  }
  0xb7   :  { %13235 = vmatprep.subr.bf16.mxu0 %v14424_v58 }
  0xb8   :  { %13986 = vmatpush3.bf16.msra.mxu1 %v14429_v63 }
  0xb9   :  { %1043 = vmatmul.mubr.bf16.gmra.mxu0 %v14405_v48  ;;  %13987 = vmatprep.subr.bf16.mxu1 %v14438_v4  ;;  %v14490_v48 = vld [vmem:[#allocation9 + $0x38] sm:$0xff]  }
  0xba   :  { %1050 = vmatprep.mubr.bf16.mxu0 %v14412_v51  ;;  %13236 = vmatpush3.bf16.msra.mxu0 %v14427_v61  ;;  %v14493_v51 = vld [vmem:[#allocation9 + $0x20] sm:$0xff]  }
  0xbb   :  { %1140 = vmatmul.mubr.bf16.gmra.mxu1 %v14410_v52  ;;  %13237 = vmatprep.subr.bf16.mxu0 %v14433_v0  ;;  %v14494_v52 = vld [vmem:[#allocation9 + $0x18] sm:$0xff]  }
  0xbc   :  { %1147 = vmatprep.mubr.bf16.mxu1 %v14416_v54  ;;  %13988 = vmatpush3.bf16.msra.mxu1 %v14438_v4  ;;  %v14496_v54 = vld [vmem:[#allocation9 + $0x8] sm:$0xff]  }
  0xbd   :  { %13989 = vmatprep.subr.bf16.mxu1 %v14447_v9 }
  0xbe   :  { %13238 = vmatpush3.bf16.msra.mxu0 %v14436_v3 }
  0xbf   :  { %13239 = vmatprep.subr.bf16.mxu0 %v14442_v7  ;;  %v14500_v7 = vld [vmem:[#allocation12 + $0xac] ss:$12 sps:$4 sm:$0xff]  }
  0xc0   :  { %13990 = vmatpush3.bf16.msra.mxu1 %v14447_v9  ;;  %v14503_v9 = vld [vmem:[#allocation12 + $0x94] ss:$12 sps:$4 sm:$0xff]  }
  0xc1   :  { %1051 = vmatmul.mubr.bf16.gmra.mxu0 %v14414_v57  ;;  %13991 = vmatprep.subr.bf16.mxu1 %v14456_v16  ;;  %v16321_v57 = vld [vmem:[#allocation8] ss:$0 sm:$0xff] }
  0xc2   :  { %1058 = vmatprep.mubr.bf16.mxu0 %v14421_v60  ;;  %13240 = vmatpush3.bf16.msra.mxu0 %v14445_v8 }
  0xc3   :  { %1148 = vmatmul.mubr.bf16.gmra.mxu1 %v14419_v59  ;;  %13241 = vmatprep.subr.bf16.mxu0 %v14451_v12 }
  0xc4   :  { %1155 = vmatprep.mubr.bf16.mxu1 %v14425_v62  ;;  %13992 = vmatpush3.bf16.msra.mxu1 %v14456_v16 }
  0xc5   :  { %13993 = vmatprep.subr.bf16.mxu1 %v14460_v17 }
  0xc6   :  { %13242 = vmatpush3.bf16.msra.mxu0 %v14454_v14  ;;  %v14501_v14 = vld [vmem:[#allocation12 + $0x90] ss:$12 sps:$4 sm:$0xff]  }
  0xc7   :  { %1775 = vmatprep.subr.bf16.mxu0 %v14500_v7 }
  0xc8   :  { %13994 = vmatpush3.bf16.msra.mxu1 %v14460_v17  ;;  %v14507_v17 = vld [vmem:[#allocation12 + $0x7c] ss:$12 sps:$4 sm:$0xff]  }
  0xc9   :  { %1059 = vmatmul.mubr.bf16.gmra.mxu0 %v14423_v1  ;;  %14011 = vmatprep.subr.bf16.mxu1 %v14490_v48 }
  0xca   :  { %1066 = vmatprep.mubr.bf16.mxu0 %v14430_v2 }
  0xcb   :  { %1156 = vmatmul.mubr.bf16.gmra.mxu1 %v14428_v5 }
  0xcc   :  { %1163 = vmatprep.mubr.bf16.mxu1 %v14434_v6  ;;  %v14498_v6 = vld [vmem:[#allocation12 + $0xa8] ss:$12 sps:$4 sm:$0xff]  }
  0xd1   :  { %1067 = vmatmul.mubr.bf16.gmra.mxu0 %v14432_v10  ;;  %v16334_v10 = vld [vmem:[#allocation12 + $0xb0] ss:$12 sps:$4 sm:$0xff]  }
  0xd2   :  { %1074 = vmatprep.mubr.bf16.mxu0 %v14439_v11 }
  0xd3   :  { %1164 = vmatmul.mubr.bf16.gmra.mxu1 %v14437_v13 }
  0xd4   :  { %1171 = vmatprep.mubr.bf16.mxu1 %v14443_v15 }
  0xd9   :  { %1075 = vmatmul.mubr.bf16.gmra.mxu0 %v14441_v18 }
  0xda   :  { %1082 = vmatprep.mubr.bf16.mxu0 %v14448_v19 }
  0xdb   :  { %1172 = vmatmul.mubr.bf16.gmra.mxu1 %v14446_v20  ;;  %v14505_v20 = vld [vmem:[#allocation12 + $0x78] ss:$12 sps:$4 sm:$0xff]  }
  0xdc   :  { %1179 = vmatprep.mubr.bf16.mxu1 %v14452_v21 }
  0xe1   :  { %1083 = vmatmul.mubr.bf16.gmra.mxu0 %v14450_v22  ;;  %v14512_v22 = vld [vmem:[#allocation12 + $0x64] ss:$12 sps:$4 sm:$0xff]  }
  0xe2   :  { %1220 = vmatprep.mubr.bf16.mxu0 %v14459_v23 }
  0xe3   :  { %1180 = vmatmul.mubr.bf16.gmra.mxu1 %v14455_v24 }
  0xe4   :  { %13995 = vmatprep.mubr.bf16.mxu1 %v14461_v25 }
  0xe9   :  { %1221 = vmatmul.mubr.bf16.vlgmr.msra.gmra.mxu0 %v14457_v26 }
  0xea   :  { %1228 = vmatprep.mubr.bf16.mxu0 %v14463_v27  ;;  %1776 = vmatpush1.bf16.msra.mxu0 %v14498_v6  ;;  %v14510_v27 = vld [vmem:[#allocation12 + $0x60] ss:$12 sps:$4 sm:$0xff]  }
  0xeb   :  { %13996 = vmatmul.mubr.bf16.vlgmr.msra.gmra.mxu1 %v14462_v28  ;;  %1777 = vmatprep.subr.bf16.mxu0 %v14503_v9 }
  0xec   :  { %13999 = vmatprep.mubr.bf16.mxu1 %v14469_v29  ;;  %14012 = vmatpush3.bf16.msra.mxu1 %v14490_v48 }
  0xed   :  { %14013 = vmatprep.subr.bf16.mxu1 %v14491_v49 }
  0xee   :  { %1778 = vmatpush1.bf16.msra.mxu0 %v14501_v14 }
  0xef   :  { %1779 = vmatprep.subr.bf16.mxu0 %v14507_v17 }
  0xf0   :  { %14014 = vmatpush3.bf16.msra.mxu1 %v14491_v49 }
  0xf1   :  { %1229 = vmatmul.mubr.bf16.gmra.mxu0 %v14465_v30  ;;  %14015 = vmatprep.subr.bf16.mxu1 %v14492_v50  ;;  %v14516_v30 = vld [vmem:[#allocation12 + $0x4c] ss:$12 sps:$4 sm:$0xff]  }
  0xf2   :  { %1236 = vmatprep.mubr.bf16.mxu0 %v14466_v31  ;;  %1780 = vmatpush1.bf16.msra.mxu0 %v14505_v20 }
  0xf3   :  { %14000 = vmatmul.mubr.bf16.gmra.mxu1 %v14470_v32  ;;  %1781 = vmatprep.subr.bf16.mxu0 %v14512_v22 }
  0xf4   :  { %14003 = vmatprep.mubr.bf16.mxu1 %v14477_v33  ;;  %14016 = vmatpush3.bf16.msra.mxu1 %v14492_v50 }
  0xf5   :  { %14017 = vmatprep.subr.bf16.mxu1 %v14493_v51 }
  0xf6   :  { %1782 = vmatpush1.bf16.msra.mxu0 %v14510_v27 }
  0xf7   :  { %1783 = vmatprep.subr.bf16.mxu0 %v14516_v30 }
  0xf8   :  { %14018 = vmatpush3.bf16.msra.mxu1 %v14493_v51 }
  0xf9   :  { %1237 = vmatmul.mubr.bf16.gmra.mxu0 %v14468_v34  ;;  %14019 = vmatprep.subr.bf16.mxu1 %v14494_v52 }
  0xfa   :  { %1244 = vmatprep.mubr.bf16.mxu0 %v14471_v35 }
  0xfb   :  { %14004 = vmatmul.mubr.bf16.gmra.mxu1 %v14478_v36  ;;  %v14514_v36 = vld [vmem:[#allocation12 + $0x48] ss:$12 sps:$4 sm:$0xff]  }
  0xfc   :  { %14007 = vmatprep.mubr.bf16.mxu1 %v14485_v37  ;;  %14020 = vmatpush3.bf16.msra.mxu1 %v14494_v52 }
  0xfd   :  { %14021 = vmatprep.subr.bf16.mxu1 %v14495_v53  ;;  %1784 = vmatpush1.bf16.msra.mxu0 %v14514_v36 }
 0x100   :  { %14022 = vmatpush3.bf16.msra.mxu1 %v14495_v53 }
 0x101   :  { %1245 = vmatmul.mubr.bf16.gmra.mxu0 %v14473_v38  ;;  %14023 = vmatprep.subr.bf16.mxu1 %v14496_v54 }
 0x102   :  { %1252 = vmatprep.mubr.bf16.mxu0 %v14474_v39 }
 0x103   :  { %14008 = vmatmul.mubr.bf16.gmra.mxu1 %v14486_v40 }
 0x104   :  { %14024 = vmatpush3.bf16.msra.mxu1 %v14496_v54 }
 0x105   :  { %14025 = vmatprep.subr.bf16.mxu1 %v14497_v55 }
 0x108   :  { %14026 = vmatpush3.bf16.msra.mxu1 %v14497_v55 }
 0x109   :  { %1253 = vmatmul.mubr.bf16.gmra.mxu0 %v14476_v41  ;;  %14043 = vmatprep.subr.bf16.mxu1 %v16334_v10 }
 0x10a   :  { %1260 = vmatprep.mubr.bf16.mxu0 %v14479_v42 }
 0x111   :  { %1261 = vmatmul.mubr.bf16.gmra.mxu0 %v14481_v43 }
 0x112   :  { %1268 = vmatprep.mubr.bf16.mxu0 %v14482_v44 }
 0x119   :  { %1269 = vmatmul.mubr.bf16.gmra.mxu0 %v14484_v45 }
 0x11a   :  { %1276 = vmatprep.mubr.bf16.mxu0 %v14487_v46 }
 0x121   :  { %1277 = vmatmul.mubr.bf16.gmra.mxu0 %v14489_v47 }
 0x169   :  { %v13115_v56 = vpop.f32.mrf.mxu0 }
 0x16b   :  { %v13116_v58 = vpop.f32.mrf.mxu0  ;;  %v13179_v60 = vpop.f32.mrf.mxu1 }
 0x16c   :  { %v13117_v59 = vadd.f32 %v13116_v58, %v13115_v56 }
 0x16d   :  { %v16323_v61 = vpop.f32.mrf.mxu0  ;;  %v13180_v63 = vpop.f32.mrf.mxu1 }
 0x16e   :  { %v1029_v62 = vadd.f32 %v13117_v59, %v16321_v57  ;;  %v13181_v0 = vadd.f32 %v13180_v63, %v13179_v60 }
 0x16f   :  { %v16326_v1 = vpop.f32.mrf.mxu0  ;;  %v16328_v2 = vpop.f32.mrf.mxu1 }
 0x170   :  { %v16330_v3 = vadd.f32 %v13181_v0, %v1029_v62 }
 0x171   :  { %v13121_v4 = vpop.f32.mrf.mxu0  ;;  %v16332_v5 = vpop.f32.mrf.mxu1 }
 0x173   :  { %v13122_v8 = vpop.f32.mrf.mxu0  ;;  %v13185_v12 = vpop.f32.mrf.mxu1 }
 0x174   :  { %v13123_v11 = vadd.f32 %v13122_v8, %v13121_v4 }
 0x175   :  { %v16336_v13 = vpop.f32.mrf.mxu0  ;;  %v13186_v16 = vpop.f32.mrf.mxu1 }
 0x176   :  { %v1037_v15 = vadd.f32 %v13123_v11, %v16321_v57  ;;  %v13187_v18 = vadd.f32 %v13186_v16, %v13185_v12 }
 0x177   :  { %v16340_v19 = vpop.f32.mrf.mxu0  ;;  %v16342_v21 = vpop.f32.mrf.mxu1 }
 0x178   :  { %v16344_v23 = vadd.f32 %v13187_v18, %v1037_v15 }
 0x179   :  { %v13127_v24 = vpop.f32.mrf.mxu0  ;;  %v16346_v25 = vpop.f32.mrf.mxu1 }
 0x17b   :  { %v13128_v26 = vpop.f32.mrf.mxu0  ;;  %v13191_v29 = vpop.f32.mrf.mxu1 }
 0x17c   :  { %v13129_v28 = vadd.f32 %v13128_v26, %v13127_v24 }
 0x17d   :  { %v16348_v31 = vpop.f32.mrf.mxu0  ;;  %v13192_v33 = vpop.f32.mrf.mxu1 }
 0x17e   :  { %v1045_v32 = vadd.f32 %v13129_v28, %v16321_v57  ;;  %v13193_v34 = vadd.f32 %v13192_v33, %v13191_v29 }
 0x17f   :  { %v16351_v35 = vpop.f32.mrf.mxu0  ;;  %v16353_v37 = vpop.f32.mrf.mxu1 }
 0x180   :  { %v16355_v38 = vadd.f32 %v13193_v34, %v1045_v32 }
 0x181   :  { %v13133_v39 = vpop.f32.mrf.mxu0  ;;  %v16357_v40 = vpop.f32.mrf.mxu1 }
 0x183   :  { %v13134_v41 = vpop.f32.mrf.mxu0  ;;  %v13197_v43 = vpop.f32.mrf.mxu1 }
 0x184   :  { %v13135_v42 = vadd.f32 %v13134_v41, %v13133_v39 }
 0x185   :  { %v16359_v44 = vpop.f32.mrf.mxu0  ;;  %v13198_v46 = vpop.f32.mrf.mxu1 }
 0x186   :  { %v1053_v45 = vadd.f32 %v13135_v42, %v16321_v57  ;;  %v13199_v47 = vadd.f32 %v13198_v46, %v13197_v43 }
 0x187   :  { %v16362_v48 = vpop.f32.mrf.mxu0  ;;  %v16364_v49 = vpop.f32.mrf.mxu1 }
 0x188   :  { %v16366_v50 = vadd.f32 %v13199_v47, %v1053_v45 }
 0x189   :  { %v13139_v51 = vpop.f32.mrf.mxu0  ;;  %v16368_v52 = vpop.f32.mrf.mxu1 }
 0x18b   :  { %v13140_v53 = vpop.f32.mrf.mxu0  ;;  %v13203_v55 = vpop.f32.mrf.mxu1 }
 0x18c   :  { %v13141_v54 = vadd.f32 %v13140_v53, %v13139_v51 }
 0x18d   :  { %v16370_v56 = vpop.f32.mrf.mxu0  ;;  %v13204_v59 = vpop.f32.mrf.mxu1 }
 0x18e   :  { %v1061_v58 = vadd.f32 %v13141_v54, %v16321_v57  ;;  %v13205_v60 = vadd.f32 %v13204_v59, %v13203_v55  ;;  %v13120_v55 = vadd.f32 %v16326_v1, %v16323_v61 }
 0x18f   :  { %v16373_v62 = vpop.f32.mrf.mxu0  ;;  %v16375_v63 = vpop.f32.mrf.mxu1 }
 0x190   :  { %v16377_v0 = vadd.f32 %v13205_v60, %v1061_v58 }
 0x191   :  { %v13145_v4 = vpop.f32.mrf.mxu0  ;;  %v16379_v6 = vpop.f32.mrf.mxu1 }
 0x193   :  { %v13146_v7 = vpop.f32.mrf.mxu0  ;;  %v13209_v9 = vpop.f32.mrf.mxu1 }
 0x194   :  { %v13147_v8 = vadd.f32 %v13146_v7, %v13145_v4 }
 0x195   :  { %v16381_v11 = vpop.f32.mrf.mxu0  ;;  %v13210_v14 = vpop.f32.mrf.mxu1 }
 0x196   :  { %v1069_v12 = vadd.f32 %v13147_v8, %v16321_v57  ;;  %v13211_v15 = vadd.f32 %v13210_v14, %v13209_v9  ;;  %v1032_v8 = vadd.f32 %v13120_v55, %v16321_v57  ;;  %v13184_v9 = vadd.f32 %v16332_v5, %v16328_v2 }
 0x197   :  { %v16384_v16 = vpop.f32.mrf.mxu0  ;;  %v16386_v17 = vpop.f32.mrf.mxu1  ;;  %v13190_v5 = vadd.f32 %v16346_v25, %v16342_v21 }
 0x198   :  { %v16388_v18 = vadd.f32 %v13211_v15, %v1069_v12  ;;  %v1129_v1 = vadd.f32 %v13184_v9, %v1032_v8 }
 0x199   :  { %v13151_v20 = vpop.f32.mrf.mxu0  ;;  %v16390_v22 = vpop.f32.mrf.mxu1 }
 0x19b   :  { %v13152_v24 = vpop.f32.mrf.mxu0  ;;  %v13215_v27 = vpop.f32.mrf.mxu1 }
 0x19c   :  { %v13153_v26 = vadd.f32 %v13152_v24, %v13151_v20 }
 0x19d   :  { %v16392_v28 = vpop.f32.mrf.mxu0  ;;  %v13216_v30 = vpop.f32.mrf.mxu1 }
 0x19e   :  { %v1077_v29 = vadd.f32 %v13153_v26, %v16321_v57  ;;  %v13217_v32 = vadd.f32 %v13216_v30, %v13215_v27  ;;  %v13126_v26 = vadd.f32 %v16340_v19, %v16336_v13 }
 0x19f   :  { %v16395_v33 = vpop.f32.mrf.mxu0  ;;  %v16397_v34 = vpop.f32.mrf.mxu1 }
 0x1a0   :  { %v16399_v36 = vadd.f32 %v13217_v32, %v1077_v29  ;;  %v1040_v2 = vadd.f32 %v13126_v26, %v16321_v57 }
 0x1a1   :  { %v13157_v39 = vpop.f32.mrf.mxu0  ;;  %v16401_v41 = vpop.f32.mrf.mxu1 }
 0x1a3   :  { %v13158_v42 = vpop.f32.mrf.mxu0  ;;  %v13221_v45 = vpop.f32.mrf.mxu1 }
 0x1a4   :  { %v13159_v43 = vadd.f32 %v13158_v42, %v13157_v39 }
 0x1a5   :  { %v16403_v46 = vpop.f32.mrf.mxu0  ;;  %v13222_v51 = vpop.f32.mrf.mxu1 }
 0x1a6   :  { %v1085_v47 = vadd.f32 %v13159_v43, %v16321_v57  ;;  %v13223_v53 = vadd.f32 %v13222_v51, %v13221_v45 }
 0x1a7   :  { %v16406_v54 = vpop.f32.mrf.mxu0  ;;  %v16410_v58 = vpop.f32.mrf.mxu1 }
 0x1a8   :  { %v16412_v59 = vadd.f32 %v13223_v53, %v1085_v47 }
 0x1a9   :  { %v13243_v60 = vpop.f32.mrf.mxu0  ;;  %v16414_v4 = vpop.f32.mrf.mxu1 }
 0x1ab   :  { %v13244_v7 = vpop.f32.mrf.mxu0  ;;  %v13997_v14 = vpop.f32.mrf.mxu1 }
 0x1ac   :  { %v13245_v12 = vadd.f32 %v13244_v7, %v13243_v60  ;;  %v1137_v60 = vadd.f32 %v13190_v5, %v1040_v2  ;;  %v13132_v7 = vadd.f32 %v16351_v35, %v16348_v31  ;;  %v14508_v35 = vld [vmem:[#allocation12 + $0x98] ss:$12 sps:$4 sm:$0xff]  }
 0x1ad   :  { %v13246_v15 = vpop.f32.mrf.mxu0  ;;  %v1319_v24 = vpop.f32.mrf.mxu1 }
 0x1ae   :  { %v1223_v20 = vadd.f32 %v13245_v12, %v16330_v3  ;;  %v1048_v25 = vadd.f32 %v13132_v7, %v16321_v57  ;;  %v14513_v7 = vld [vmem:[#allocation12 + $0x68] ss:$12 sps:$4 sm:$0xff]  }
 0x1af   :  { %v13247_v61 = vpop.f32.mrf.mxu0  ;;  %v13998_v29 = vpop.f32.mrf.mxu1 }
 0x1b0   :  { %v13248_v27 = vadd.f32 %v13247_v61, %v13246_v15  ;;  %v1320_v32 = vadd.f32 %v1319_v24, %v1223_v20  ;;  %v13196_v61 = vadd.f32 %v16357_v40, %v16353_v37  ;;  %v14509_v40 = vld [vmem:[#allocation12 + $0x80] ss:$12 sps:$4 sm:$0xff]  }
 0x1b1   :  { %v13249_v30 = vpop.f32.mrf.mxu0  ;;  %v1322_v42 = vpop.f32.mrf.mxu1 }
 0x1b2   :  { %v1226_v39 = vadd.f32 %v13248_v27, %v1129_v1  ;;  %v1382_v53 = vmax.f32 %v1320_v32, 0.0 }
 0x1b3   :  { %v13250_v43 = vpop.f32.mrf.mxu0  ;;  %v14001_v51 = vpop.f32.mrf.mxu1 }
 0x1b4   :  { %v13251_v45 = vadd.f32 %v13250_v43, %v13249_v30  ;;  %v1323_v3 = vadd.f32 %v1322_v42, %v1226_v39  ;;  %v1145_v42 = vadd.f32 %v13196_v61, %v1048_v25  ;;  %v13208_v61 = vadd.f32 %v16379_v6, %v16375_v63 }
 0x1b5   :  { %v13252_v47 = vpop.f32.mrf.mxu0  ;;  %v1335_v15 = vpop.f32.mrf.mxu1 }
 0x1b6   :  { %v1231_v55 = vadd.f32 %v13251_v45, %v16344_v23  ;;  %v1383_v13 = vmax.f32 %v1323_v3, 0.0 }
 0x1b7   :  { %v13253_v19 = vpop.f32.mrf.mxu0  ;;  %v14002_v27 = vpop.f32.mrf.mxu1 }
 0x1b8   :  { %v13254_v8 = vadd.f32 %v13253_v19, %v13252_v47  ;;  %v1398_v9 = vpack.c.bf16 %v1383_v13, %v1382_v53  ;;  %v1328_v20 = vadd.f32 %v13997_v14, %v1231_v55  ;;  %v13138_v14 = vadd.f32 %v16362_v48, %v16359_v44 }
 0x1b9   :  { %v13255_v12 = vpop.f32.mrf.mxu0  ;;  %v1338_v45 = vpop.f32.mrf.mxu1 }
 0x1ba   :  { %v1234_v24 = vadd.f32 %v13254_v8, %v1137_v60  ;;  %14027 = vmatprep.mubr.bf16.mxu1 %v1398_v9  ;;  %v1384_v30 = vmax.f32 %v1328_v20, 0.0  ;;  %v1056_v47 = vadd.f32 %v13138_v14, %v16321_v57 }
 0x1bb   :  { %v13256_v21 = vpop.f32.mrf.mxu0  ;;  %v14005_v48 = vpop.f32.mrf.mxu1 }
 0x1bc   :  { %v1331_v23 = vadd.f32 %v13998_v29, %v1234_v24  ;;  %v13257_v1 = vadd.f32 %v13256_v21, %v13255_v12  ;;  %v14517_v21 = vld [vmem:[#allocation12 + $0x50] ss:$12 sps:$4 sm:$0xff]  }
 0x1bd   :  { %v13258_v26 = vpop.f32.mrf.mxu0 }
 0x1be   :  { %v1385_v32 = vmax.f32 %v1331_v23, 0.0  ;;  %v1239_v31 = vadd.f32 %v13257_v1, %v16355_v38  ;;  %v13202_v38 = vadd.f32 %v16368_v52, %v16364_v49  ;;  %v1351_v52 = vpop.f32.mrf.mxu1 }
 0x1bf   :  { %v13259_v39 = vpop.f32.mrf.mxu0 }
 0x1c0   :  { %v1399_v43 = vpack.c.bf16 %v1385_v32, %v1384_v30  ;;  %v13260_v2 = vadd.f32 %v13259_v39, %v13258_v26  ;;  %v1336_v3 = vadd.f32 %v1335_v15, %v1239_v31  ;;  %v1153_v9 = vadd.f32 %v13202_v38, %v1056_v47 }
 0x1c1   :  { %v13261_v5 = vpop.f32.mrf.mxu0  ;;  %v13156_v38 = vadd.f32 %v16395_v33, %v16392_v28 }
 0x1c2   :  { %14028 = vmatmul.mubr.bf16.vlgmr.msra.gmra.mxu1 %v1399_v43  ;;  %v1242_v37 = vadd.f32 %v13260_v2, %v1145_v42  ;;  %v1386_v13 = vmax.f32 %v1336_v3, 0.0  ;;  %v15898_v43 = vld [vmem:[#allocation8] ss:$0 sm:$0xff] }
 0x1c3   :  { %v13262_v29 = vpop.f32.mrf.mxu0  ;;  %14044 = vmatpush3.bf16.msra.mxu1 %v16334_v10  ;;  %v13144_v10 = vadd.f32 %v16373_v62, %v16370_v56  ;;  %v14006_v62 = vpop.f32.mrf.mxu1 }
 0x1c4   :  { %v13263_v53 = vadd.f32 %v13262_v29, %v13261_v5  ;;  %v1339_v55 = vadd.f32 %v1338_v45, %v1242_v37  ;;  %14045 = vmatprep.subr.bf16.mxu1 %v14508_v35 }
 0x1c5   :  { %v13264_v44 = vpop.f32.mrf.mxu0  ;;  %v1354_v63 = vpop.f32.mrf.mxu1 }
 0x1c6   :  { %v1247_v19 = vadd.f32 %v13263_v53, %v16366_v50  ;;  %v1387_v60 = vmax.f32 %v1339_v55, 0.0  ;;  %v1064_v50 = vadd.f32 %v13144_v10, %v16321_v57 }
 0x1c7   :  { %v13265_v8 = vpop.f32.mrf.mxu0  ;;  %14046 = vmatpush3.bf16.msra.mxu1 %v14508_v35  ;;  %v13150_v35 = vadd.f32 %v16384_v16, %v16381_v11  ;;  %v14009_v37 = vpop.f32.mrf.mxu1 }
 0x1c8   :  { %v13266_v12 = vadd.f32 %v13265_v8, %v13264_v44  ;;  %v1400_v15 = vpack.c.bf16 %v1387_v60, %v1386_v13  ;;  %14047 = vmatprep.subr.bf16.mxu1 %v14509_v40  ;;  %v1344_v20 = vadd.f32 %v14001_v51, %v1247_v19  ;;  %v1161_v31 = vadd.f32 %v13208_v61, %v1064_v50 }
 0x1c9   :  { %v13267_v49 = vpop.f32.mrf.mxu0  ;;  %v1072_v2 = vadd.f32 %v15898_v43, %v13150_v35  ;;  %v1367_v13 = vpop.f32.mrf.mxu1  ;;  %v13226_v61 = vadd.f32 %v16414_v4, %v16410_v58  ;;  %v14520_v58 = vld [vmem:[#allocation12 + $0x34] ss:$12 sps:$4 sm:$0xff]   ;;  %v14518_v4 = vld [vmem:[#allocation12 + $0x30] ss:$12 sps:$4 sm:$0xff]  }
 0x1ca   :  { %v1250_v24 = vadd.f32 %v13266_v12, %v1153_v9  ;;  %14031 = vmatprep.mubr.bf16.mxu1 %v1400_v15  ;;  %v1388_v26 = vmax.f32 %v1344_v20, 0.0  ;;  %1785 = vmatprep.subr.bf16.mxu0 %v14520_v58  ;;  %v14548_v58 = vld [vmem:[#allocation15 + $0x38] ss:$28 sps:$4 sm:$0xff]  }
 0x1cb   :  { %v13268_v25 = vpop.f32.mrf.mxu0  ;;  %14048 = vmatpush3.bf16.msra.mxu1 %v14509_v40  ;;  %v14010_v10 = vpop.f32.mrf.mxu1  ;;  %1786 = vmatpush1.bf16.msra.mxu0 %v14518_v4 }
 0x1cc   :  { %v1347_v23 = vadd.f32 %v14002_v27, %v1250_v24  ;;  %v13269_v1 = vadd.f32 %v13268_v25, %v13267_v49  ;;  %14049 = vmatprep.subr.bf16.mxu1 %v14513_v7 }
 0x1cd   :  { %v13270_v56 = vpop.f32.mrf.mxu0 }
 0x1ce   :  { %v1255_v30 = vadd.f32 %v13269_v1, %v16377_v0  ;;  %v1389_v32 = vmax.f32 %v1347_v23, 0.0  ;;  %v13214_v0 = vadd.f32 %v16390_v22, %v16386_v17  ;;  %v1080_v22 = vadd.f32 %v15898_v43, %v13156_v38 }
 0x1cf   :  { %v13271_v51 = vpop.f32.mrf.mxu0  ;;  %14050 = vmatpush3.bf16.msra.mxu1 %v14513_v7  ;;  %v13220_v7 = vadd.f32 %v16401_v41, %v16397_v34 }
 0x1d0   :  { %v13272_v39 = vadd.f32 %v13271_v51, %v13270_v56  ;;  %v1401_v57 = vpack.c.bf16 %v1389_v32, %v1388_v26  ;;  %14051 = vmatprep.subr.bf16.mxu1 %v14517_v21  ;;  %v1352_v6 = vadd.f32 %v1351_v52, %v1255_v30  ;;  %v1169_v47 = vadd.f32 %v13214_v0, %v1072_v2  ;;  %v14529_v2 = vld [vmem:[#allocation12 + $0x8] ss:$12 sps:$4 sm:$0xff]  }
 0x1d1   :  { %v13273_v42 = vpop.f32.mrf.mxu0  ;;  %v1177_v49 = vadd.f32 %v13220_v7, %v1080_v22  ;;  %v16205_v0 = vmov 0   ;;  %v14557_v22 = vld [vmem:[#allocation15 + $0x508] ss:$28 sps:$4 sm:$0xff]  }
 0x1d2   :  { %14032 = vmatmul.mubr.bf16.gmra.mxu1 %v1401_v57  ;;  %v1258_v27 = vadd.f32 %v13272_v39, %v1161_v31  ;;  %v1390_v11 = vmax.f32 %v1352_v6, 0.0  ;;  %v14522_v6 = vld [vmem:[#allocation12 + $0x18] ss:$12 sps:$4 sm:$0xff]   ;;  %1807 = vmatprep.mubr.bf16.mxu0 %v16205_v0 }
 0x1d3   :  { %v13274_v14 = vpop.f32.mrf.mxu0  ;;  %14052 = vmatpush3.bf16.msra.mxu1 %v14517_v21  ;;  %v1370_v21 = vpop.f32.mrf.mxu1 }
 0x1d4   :  { %v13275_v5 = vadd.f32 %v13274_v14, %v13273_v42  ;;  %v1355_v45 = vadd.f32 %v1354_v63, %v1258_v27  ;;  %v14521_v63 = vld [vmem:[#allocation12 + $0x38] ss:$12 sps:$4 sm:$0xff]   ;;  %v14525_v27 = vld [vmem:[#allocation12 + $0x20] ss:$12 sps:$4 sm:$0xff]  }
 0x1d5   :  { %v13276_v3 = vpop.f32.mrf.mxu0  ;;  %14053 = vmatprep.subr.bf16.mxu1 %v14521_v63  ;;  %v14528_v14 = vld [vmem:[#allocation12 + $0x4] ss:$12 sps:$4 sm:$0xff]  }
 0x1d6   :  { %v1263_v16 = vadd.f32 %v13275_v5, %v16388_v18  ;;  %v1391_v40 = vmax.f32 %v1355_v45, 0.0  ;;  %v14532_v5 = vld [vmem:[#allocation15 + $0x18c] ss:$28 sps:$4 sm:$0xff]  }
 0x1d7   :  { %v13277_v29 = vpop.f32.mrf.mxu0  ;;  %14054 = vmatpush3.bf16.msra.mxu1 %v14521_v63  ;;  %v14559_v45 = vld [vmem:[#allocation15 + $0x50c] ss:$28 sps:$4 sm:$0xff]   ;;  %v14553_v63 = vld [vmem:[#allocation15 + $0x4] ss:$28 sps:$4 sm:$0xff]  }
 0x1d8   :  { %v13278_v53 = vadd.f32 %v13277_v29, %v13276_v3  ;;  %v1402_v55 = vpack.c.bf16 %v1391_v40, %v1390_v11  ;;  %v1360_v19 = vadd.f32 %v14005_v48, %v1263_v16  ;;  %v13162_v48 = vadd.f32 %v16406_v54, %v16403_v46  ;;  %14055 = vmatprep.subr.bf16.mxu1 %v14525_v27  ;;  %v16461_v11 = vld [vmem:[#allocation11] ss:$0 sm:$0xff] }
 0x1d9   :  { %v13279_v44 = vpop.f32.mrf.mxu0 }
 0x1da   :  { %v1266_v60 = vadd.f32 %v13278_v53, %v1169_v47  ;;  %14035 = vmatprep.mubr.bf16.mxu1 %v1402_v55  ;;  %v1392_v12 = vmax.f32 %v1360_v19, 0.0  ;;  %v1088_v50 = vadd.f32 %v15898_v43, %v13162_v48  ;;  %v14526_v43 = vld [vmem:[#allocation12] ss:$12 sps:$4 sm:$0xff]   ;;  %v14569_v48 = vld [vmem:[#allocation15 + $0x498] ss:$28 sps:$4 sm:$0xff]  }
 0x1db   :  { %v13280_v17 = vpop.f32.mrf.mxu0  ;;  %14056 = vmatpush3.bf16.msra.mxu1 %v14525_v27 }
 0x1dc   :  { %v1363_v8 = vadd.f32 %v14006_v62, %v1266_v60  ;;  %v13281_v18 = vadd.f32 %v13280_v17, %v13279_v44  ;;  %v1185_v54 = vadd.f32 %v13226_v61, %v1088_v50  ;;  %14057 = vmatprep.subr.bf16.mxu1 %v14529_v2  ;;  %v14530_v17 = vld [vmem:[#allocation15 + $0x188] ss:$28 sps:$4 sm:$0xff]   ;;  %v14539_v61 = vld [vmem:[#allocation15 + $0xe0] ss:$28 sps:$4 sm:$0xff]  }
 0x1dd   :  { %v13282_v9 = vpop.f32.mrf.mxu0 }
 0x1de   :  { %v1271_v15 = vadd.f32 %v13281_v18, %v16399_v36  ;;  %v1393_v28 = vmax.f32 %v1363_v8, 0.0  ;;  %v14535_v8 = vld [vmem:[#allocation15 + $0x154] ss:$28 sps:$4 sm:$0xff]  }
 0x1df   :  { %v13283_v33 = vpop.f32.mrf.mxu0  ;;  %14058 = vmatpush3.bf16.msra.mxu1 %v14529_v2  ;;  %v14565_v18 = vld [vmem:[#allocation15 + $0x4d4] ss:$28 sps:$4 sm:$0xff]   ;;  %v14551_v2 = vld [vmem:[#allocation15] ss:$28 sps:$4 sm:$0xff]  }
 0x1e0   :  { %v13284_v52 = vadd.f32 %v13283_v33, %v13282_v9  ;;  %v1403_v20 = vpack.c.bf16 %v1393_v28, %v1392_v12  ;;  %v1368_v25 = vadd.f32 %v1367_v13, %v1271_v15  ;;  %3263 = vmatprep.subr.bf16.mxu1 %v14559_v45  ;;  %v14533_v9 = vld [vmem:[#allocation15 + $0x150] ss:$28 sps:$4 sm:$0xff]   ;;  %v14538_v15 = vld [vmem:[#allocation15 + $0x11c] ss:$28 sps:$4 sm:$0xff]  }
 0x1e1   :  { %v13285_v24 = vpop.f32.mrf.mxu0  ;;  %v14571_v28 = vld [vmem:[#allocation15 + $0x49c] ss:$28 sps:$4 sm:$0xff]   ;;  %v14556_v45 = vld [vmem:[#allocation15 + $0x34c] ss:$28 sps:$4 sm:$0xff]  }
 0x1e2   :  { %14036 = vmatmul.mubr.bf16.gmra.mxu1 %v1403_v20  ;;  %v1274_v34 = vadd.f32 %v13284_v52, %v1177_v49  ;;  %v1394_v56 = vmax.f32 %v1368_v25, 0.0  ;;  %v14536_v49 = vld [vmem:[#allocation15 + $0x118] ss:$28 sps:$4 sm:$0xff]   ;;  %v14541_v20 = vld [vmem:[#allocation15 + $0xe4] ss:$28 sps:$4 sm:$0xff]  }
 0x1e3   :  { %v13286_v41 = vpop.f32.mrf.mxu0 }
 0x1e4   :  { %v13287_v23 = vadd.f32 %v13286_v41, %v13285_v24  ;;  %v1371_v36 = vadd.f32 %v1370_v21, %v1274_v34  ;;  %v14577_v24 = vld [vmem:[#allocation15 + $0x464] ss:$28 sps:$4 sm:$0xff]  }
 0x1e5   :  { %v13288_v1 = vpop.f32.mrf.mxu0 }
 0x1e6   :  { %v1279_v62 = vadd.f32 %v13287_v23, %v16412_v59  ;;  %v1395_v26 = vmax.f32 %v1371_v36, 0.0  ;;  %v14524_v59 = vld [vmem:[#allocation12 + $0x1c] ss:$12 sps:$4 sm:$0xff]   ;;  %v14575_v23 = vld [vmem:[#allocation15 + $0x460] ss:$28 sps:$4 sm:$0xff]  }
 0x1e7   :  { %v13289_v46 = vpop.f32.mrf.mxu0  ;;  %1787 = vmatprep.subr.bf16.mxu0 %v14524_v59 }
 0x1e8   :  { %v13290_v30 = vadd.f32 %v13289_v46, %v13288_v1  ;;  %v1404_v32 = vpack.c.bf16 %v1395_v26, %v1394_v56  ;;  %v1376_v51 = vadd.f32 %v14009_v37, %v1279_v62  ;;  %1788 = vmatpush1.bf16.msra.mxu0 %v14522_v6  ;;  %v14544_v1 = vld [vmem:[#allocation15 + $0xac] ss:$28 sps:$4 sm:$0xff]  }
 0x1e9   :  { %1789 = vmatprep.subr.bf16.mxu0 %v14528_v14  ;;  %v14583_v56 = vld [vmem:[#allocation15 + $0x42c] ss:$28 sps:$4 sm:$0xff]  }
 0x1ea   :  { %v1282_v31 = vadd.f32 %v13290_v30, %v1185_v54  ;;  %14039 = vmatprep.mubr.bf16.mxu1 %v1404_v32  ;;  %v1396_v39 = vmax.f32 %v1376_v51, 0.0  ;;  %v14542_v30 = vld [vmem:[#allocation15 + $0xa8] ss:$28 sps:$4 sm:$0xff]  }
 0x1eb   :  { %v14581_v32 = vld [vmem:[#allocation15 + $0x428] ss:$28 sps:$4 sm:$0xff]  }
 0x1ec   :  { %v1379_v35 = vadd.f32 %v14010_v10, %v1282_v31  ;;  %1790 = vmatpush1.bf16.msra.mxu0 %v14526_v43  ;;  %v14563_v10 = vld [vmem:[#allocation15 + $0x4d0] ss:$28 sps:$4 sm:$0xff]  }
 0x1ed   :  { %3150 = vmatprep.subr.bf16.mxu0 %v14532_v5  ;;  %v14547_v31 = vld [vmem:[#allocation15 + $0x74] ss:$28 sps:$4 sm:$0xff]  }
 0x1ee   :  { %v1397_v57 = vmax.f32 %v1379_v35, 0.0  ;;  %v14545_v35 = vld [vmem:[#allocation15 + $0x70] ss:$28 sps:$4 sm:$0xff]  }
 0x1f0   :  { %v1405_v42 = vpack.c.bf16 %v1397_v57, %v1396_v39  ;;  %v14550_v57 = vld [vmem:[#allocation15 + $0x3c] ss:$28 sps:$4 sm:$0xff]  }
 0x1f2   :  { %14040 = vmatmul.mubr.bf16.gmra.mxu1 %v1405_v42 }
 0x282   :  { %v14029_v3 = vpop.f32.mrf.mxu1 }
 0x283   :  { %v1520_v47 = vadd.f32 %v14029_v3, %v16461_v11 }
 0x284   :  { %v1511_v37 = vpop.f32.mrf.mxu1 }
 0x285   :  { %v1512_v40 = vadd.f32 %v16461_v11, %v1511_v37  ;;  %v1576_v19 = vmax.f32 %v1520_v47, 0.0 }
 0x286   :  { %v14030_v16 = vpop.f32.mrf.mxu1 }
 0x287   :  { %v1523_v29 = vadd.f32 %v14030_v16, %v16461_v11  ;;  %v1574_v44 = vmax.f32 %v1512_v40, 0.0 }
 0x288   :  { %v1514_v38 = vpop.f32.mrf.mxu1 }
 0x289   :  { %v1515_v53 = vadd.f32 %v16461_v11, %v1514_v38  ;;  %v1577_v55 = vmax.f32 %v1523_v29, 0.0  ;;  %v14554_v29 = vld [vmem:[#allocation15 + $0x348] ss:$28 sps:$4 sm:$0xff]   ;;  %v14562_v38 = vld [vmem:[#allocation15 + $0x314] ss:$28 sps:$4 sm:$0xff]  }
 0x28b   :  { %v1575_v13 = vmax.f32 %v1515_v53, 0.0  ;;  %v1591_v7 = vpack.c.bf16 %v1577_v55, %v1576_v19  ;;  %v14560_v53 = vld [vmem:[#allocation15 + $0x310] ss:$28 sps:$4 sm:$0xff]   ;;  %v14566_v19 = vld [vmem:[#allocation15 + $0x2d8] ss:$28 sps:$4 sm:$0xff]  }
 0x28d   :  { %v1590_v60 = vpack.c.bf16 %v1575_v13, %v1574_v44  ;;  %v14568_v44 = vld [vmem:[#allocation15 + $0x2dc] ss:$28 sps:$4 sm:$0xff]  }
 0x28f   :  { %1808 = vmatmul.mubr.bf16.vlgmr.msra.gmra.mxu0 %v1590_v60  ;;  %14059 = vmatprep.mubr.bf16.mxu1 %v1590_v60 }
 0x290   :  { %14060 = vmatmul.mubr.bf16.vlgmr.msra.gmra.mxu1 %v1591_v7  ;;  %1817 = vmatprep.mubr.bf16.mxu0 %v16205_v0 }
 0x291   :  { %3151 = vmatpush1.bf16.msra.mxu0 %v14530_v17  ;;  %3264 = vmatpush1.bf16.msra.mxu1 %v14557_v22  ;;  %v14574_v17 = vld [vmem:[#allocation15 + $0x2a4] ss:$28 sps:$4 sm:$0xff]  }
 0x292   :  { %v14033_v12 = vpop.f32.mrf.mxu1  ;;  %3152 = vmatprep.subr.bf16.mxu0 %v14535_v8  ;;  %3265 = vmatprep.subr.bf16.mxu1 %v14565_v18 }
 0x293   :  { %v1536_v34 = vadd.f32 %v14033_v12, %v16461_v11 }
 0x294   :  { %v1527_v33 = vpop.f32.mrf.mxu1 }
 0x295   :  { %3153 = vmatpush1.bf16.msra.mxu0 %v14533_v9  ;;  %3266 = vmatpush1.bf16.msra.mxu1 %v14563_v10  ;;  %v1528_v21 = vadd.f32 %v16461_v11, %v1527_v33  ;;  %v1580_v46 = vmax.f32 %v1536_v34, 0.0  ;;  %v14572_v10 = vld [vmem:[#allocation15 + $0x2a0] ss:$28 sps:$4 sm:$0xff]  }
 0x296   :  { %v14034_v52 = vpop.f32.mrf.mxu1  ;;  %3154 = vmatprep.subr.bf16.mxu0 %v14538_v15  ;;  %3267 = vmatprep.subr.bf16.mxu1 %v14571_v28  ;;  %v14580_v15 = vld [vmem:[#allocation15 + $0x26c] ss:$28 sps:$4 sm:$0xff]   ;;  %v14592_v34 = vld [vmem:[#allocation15 + $0x1fc] ss:$28 sps:$4 sm:$0xff]  }
 0x297   :  { %v1539_v25 = vadd.f32 %v14034_v52, %v16461_v11  ;;  %1818 = vmatmul.mubr.bf16.gmra.mxu0 %v1591_v7  ;;  %v1578_v62 = vmax.f32 %v1528_v21, 0.0  ;;  %v14578_v52 = vld [vmem:[#allocation15 + $0x268] ss:$28 sps:$4 sm:$0xff]   ;;  %v14584_v21 = vld [vmem:[#allocation15 + $0x230] ss:$28 sps:$4 sm:$0xff]  }
 0x298   :  { %v1530_v41 = vpop.f32.mrf.mxu1  ;;  %1827 = vmatprep.mubr.bf16.mxu0 %v16205_v0 }
 0x299   :  { %v1531_v50 = vadd.f32 %v16461_v11, %v1530_v41  ;;  %3155 = vmatpush1.bf16.msra.mxu0 %v14536_v49  ;;  %3268 = vmatpush1.bf16.msra.mxu1 %v14569_v48  ;;  %v1581_v36 = vmax.f32 %v1539_v25, 0.0  ;;  %v14587_v25 = vld [vmem:[#allocation15 + $0x3f0] ss:$28 sps:$4 sm:$0xff]   ;;  %v14595_v41 = vld [vmem:[#allocation15 + $0x3bc] ss:$28 sps:$4 sm:$0xff]  }
 0x29a   :  { %3156 = vmatprep.subr.bf16.mxu0 %v14541_v20  ;;  %3269 = vmatprep.subr.bf16.mxu1 %v14577_v24  ;;  %v14589_v24 = vld [vmem:[#allocation15 + $0x3f4] ss:$28 sps:$4 sm:$0xff]  }
 0x29b   :  { %v1579_v26 = vmax.f32 %v1531_v50, 0.0  ;;  %v1593_v51 = vpack.c.bf16 %v1581_v36, %v1580_v46  ;;  %v14590_v50 = vld [vmem:[#allocation15 + $0x1f8] ss:$28 sps:$4 sm:$0xff]   ;;  %v14601_v36 = vld [vmem:[#allocation15 + $0x384] ss:$28 sps:$4 sm:$0xff]   ;;  %v1632_v46 = vlaneseq }
 0x29d   :  { %v1592_v54 = vpack.c.bf16 %v1579_v26, %v1578_v62  ;;  %3157 = vmatpush1.bf16.msra.mxu0 %v14539_v61  ;;  %3270 = vmatpush1.bf16.msra.mxu1 %v14575_v23  ;;  %v14593_v61 = vld [vmem:[#allocation15 + $0x3b8] ss:$28 sps:$4 sm:$0xff]   ;;  %v14598_v23 = vld [vmem:[#allocation15 + $0x1c4] ss:$28 sps:$4 sm:$0xff]  }
 0x29e   :  { %3158 = vmatprep.subr.bf16.mxu0 %v14544_v1  ;;  %3271 = vmatprep.subr.bf16.mxu1 %v14583_v56  ;;  %v14596_v1 = vld [vmem:[#allocation15 + $0x1c0] ss:$28 sps:$4 sm:$0xff]   ;;  %v14604_v62 = vld [vmem:[#allocation15 + $0x194] ss:$28 sps:$4 sm:$0xff]  }
 0x29f   :  { %1828 = vmatmul.mubr.bf16.gmra.mxu0 %v1592_v54  ;;  %14063 = vmatprep.mubr.bf16.mxu1 %v1592_v54  ;;  %v14599_v56 = vld [vmem:[#allocation15 + $0x380] ss:$28 sps:$4 sm:$0xff]   ;;  %v14622_v26 = vld [vmem:[#allocation15 + $0x514] ss:$28 sps:$4 sm:$0xff]   ;;  %v16487_v54 = vshrl.u32 %v1632_v46, 7 }
 0x2a0   :  { %14064 = vmatmul.mubr.bf16.gmra.mxu1 %v1593_v51  ;;  %1837 = vmatprep.mubr.bf16.mxu0 %v16205_v0 }
 0x2a1   :  { %3159 = vmatpush1.bf16.msra.mxu0 %v14542_v30  ;;  %3272 = vmatpush1.bf16.msra.mxu1 %v14581_v32  ;;  %v16490_v30 = vsub.s32 1, %v16487_v54  ;;  %v16493_v32 = vsub.s32 0, %v16487_v54 }
 0x2a2   :  { %v14037_v39 = vpop.f32.mrf.mxu1  ;;  %3160 = vmatprep.subr.bf16.mxu0 %v14547_v31  ;;  %3273 = vmatprep.subr.bf16.mxu1 %v14589_v24  ;;  %v14610_v24 = vld [vmem:[#allocation15 + $0x124] ss:$28 sps:$4 sm:$0xff]  }
 0x2a3   :  { %v1552_v27 = vadd.f32 %v14037_v39, %v16461_v11  ;;  %18505 = vst [vmem:[#allocation29_spill] sm:$0xff] %v16490_v30  ;;  %18506 = vst [vmem:[#allocation30_spill] sm:$0xff] %v16493_v32 }
 0x2a4   :  { %v1543_v42 = vpop.f32.mrf.mxu1 }
 0x2a5   :  { %3161 = vmatpush1.bf16.msra.mxu0 %v14545_v35  ;;  %v1544_v59 = vadd.f32 %v16461_v11, %v1543_v42  ;;  %v1584_v16 = vmax.f32 %v1552_v27, 0.0  ;;  %3274 = vmatpush1.bf16.msra.mxu1 %v14587_v25  ;;  %v18478_v35 = vsub.s32 2, %v16487_v54 }
 0x2a6   :  { %v14038_v4 = vpop.f32.mrf.mxu1  ;;  %3162 = vmatprep.subr.bf16.mxu0 %v14550_v57  ;;  %3275 = vmatprep.subr.bf16.mxu1 %v14595_v41 }
 0x2a7   :  { %v1555_v6 = vadd.f32 %v14038_v4, %v16461_v11  ;;  %1838 = vmatmul.mubr.bf16.gmra.mxu0 %v1593_v51  ;;  %v1582_v3 = vmax.f32 %v1544_v59, 0.0  ;;  %v1630_v51 = vld [vmem:[#allocation14] sm:$0x7] }
 0x2a8   :  { %v1546_v14 = vpop.f32.mrf.mxu1  ;;  %1847 = vmatprep.mubr.bf16.mxu0 %v16205_v0  ;;  %v16497_v57 = vrot.slane %v1630_v51, %v16490_v30  ;;  %v16500_v42 = vrot.slane %v1630_v51, %v16493_v32 }
 0x2a9   :  { %v1547_v43 = vadd.f32 %v16461_v11, %v1546_v14  ;;  %3163 = vmatpush1.bf16.msra.mxu0 %v14548_v58  ;;  %v1585_v5 = vmax.f32 %v1555_v6, 0.0  ;;  %3276 = vmatpush1.bf16.msra.mxu1 %v14593_v61 }
 0x2aa   :  { %3164 = vmatprep.subr.bf16.mxu0 %v14553_v63  ;;  %3277 = vmatprep.subr.bf16.mxu1 %v14601_v36  ;;  %v16504_v63 = vrot.slane %v1630_v51, %v18478_v35 }
 0x2ab   :  { %v1583_v37 = vmax.f32 %v1547_v43, 0.0  ;;  %v1595_v47 = vpack.c.bf16 %v1585_v5, %v1584_v16 }
 0x2ad   :  { %v1594_v40 = vpack.c.bf16 %v1583_v37, %v1582_v3  ;;  %3165 = vmatpush1.bf16.msra.mxu0 %v14551_v2  ;;  %3278 = vmatpush1.bf16.msra.mxu1 %v14599_v56 }
 0x2ae   :  { %3166 = vmatprep.subr.bf16.mxu0 %v14556_v45  ;;  %3376 = vmatprep.subr.bf16.mxu1 %v14604_v62  ;;  %v14608_v62 = vld [vmem:[#allocation15 + $0x120] ss:$28 sps:$4 sm:$0xff]  }
 0x2af   :  { %1848 = vmatmul.mubr.bf16.gmra.mxu0 %v1594_v40  ;;  %14067 = vmatprep.mubr.bf16.mxu1 %v1594_v40 }
 0x2b0   :  { %14068 = vmatmul.mubr.bf16.gmra.mxu1 %v1595_v47  ;;  %1857 = vmatprep.mubr.bf16.mxu0 %v16205_v0 }
 0x2b1   :  { %3167 = vmatpush2.bf16.msra.mxu0 %v14554_v29 }
 0x2b2   :  { %v14041_v55 = vpop.f32.mrf.mxu1  ;;  %3168 = vmatprep.subr.bf16.mxu0 %v14562_v38 }
 0x2b3   :  { %v1568_v8 = vadd.f32 %v14041_v55, %v16461_v11 }
 0x2b4   :  { %v1559_v13 = vpop.f32.mrf.mxu1 }
 0x2b5   :  { %3169 = vmatpush2.bf16.msra.mxu0 %v14560_v53  ;;  %v1560_v22 = vadd.f32 %v16461_v11, %v1559_v13  ;;  %v1588_v49 = vmax.f32 %v1568_v8, 0.0  ;;  %v14607_v8 = vld [vmem:[#allocation15 + $0x15c] ss:$28 sps:$4 sm:$0xff]  }
 0x2b6   :  { %v14042_v60 = vpop.f32.mrf.mxu1  ;;  %3170 = vmatprep.subr.bf16.mxu0 %v14568_v44 }
 0x2b7   :  { %v1571_v7 = vadd.f32 %v14042_v60, %v16461_v11  ;;  %1858 = vmatmul.mubr.bf16.gmra.mxu0 %v1595_v47  ;;  %v1586_v28 = vmax.f32 %v1560_v22, 0.0 }
 0x2b8   :  { %v1562_v18 = vpop.f32.mrf.mxu1  ;;  %1867 = vmatprep.mubr.bf16.mxu0 %v16205_v0 }
 0x2b9   :  { %v1563_v9 = vadd.f32 %v16461_v11, %v1562_v18  ;;  %3171 = vmatpush2.bf16.msra.mxu0 %v14566_v19  ;;  %v1589_v12 = vmax.f32 %v1571_v7, 0.0  ;;  %v14586_v11 = vld [vmem:[#allocation15 + $0x234] ss:$28 sps:$4 sm:$0xff]  }
 0x2ba   :  { %3172 = vmatprep.subr.bf16.mxu0 %v14574_v17  ;;  %v14602_v19 = vld [vmem:[#allocation15 + $0x190] ss:$28 sps:$4 sm:$0xff]  }
 0x2bb   :  { %v1587_v33 = vmax.f32 %v1563_v9, 0.0  ;;  %v1597_v20 = vpack.c.bf16 %v1589_v12, %v1588_v49  ;;  %v14620_v18 = vld [vmem:[#allocation15 + $0x510] ss:$28 sps:$4 sm:$0xff]   ;;  %v14631_v12 = vld [vmem:[#allocation15 + $0x4dc] ss:$28 sps:$4 sm:$0xff]  }
 0x2bd   :  { %v1596_v48 = vpack.c.bf16 %v1587_v33, %v1586_v28  ;;  %3173 = vmatpush2.bf16.msra.mxu0 %v14572_v10 }
 0x2be   :  { %3174 = vmatprep.subr.bf16.mxu0 %v14580_v15 }
 0x2bf   :  { %1868 = vmatmul.mubr.bf16.gmra.mxu0 %v1596_v48  ;;  %14071 = vmatprep.mubr.bf16.mxu1 %v1596_v48  ;;  %v14605_v48 = vld [vmem:[#allocation15 + $0x158] ss:$28 sps:$4 sm:$0xff]  }
 0x2c0   :  { %14072 = vmatmul.mubr.bf16.gmra.mxu1 %v1597_v20  ;;  %1877 = vmatprep.mubr.bf16.mxu0 %v16205_v0 }
 0x2c1   :  { %3175 = vmatpush2.bf16.msra.mxu0 %v14578_v52  ;;  %3295 = vmatprep.mubr.bf16.mxu1 %v16205_v0 }
 0x2c2   :  { %3176 = vmatprep.subr.bf16.mxu0 %v14586_v11 }
 0x2c5   :  { %3177 = vmatpush2.bf16.msra.mxu0 %v14584_v21  ;;  %v14629_v21 = vld [vmem:[#allocation15 + $0x4d8] ss:$28 sps:$4 sm:$0xff]  }
 0x2c6   :  { %3178 = vmatprep.subr.bf16.mxu0 %v14592_v34 }
 0x2c7   :  { %1878 = vmatmul.mubr.bf16.gmra.mxu0 %v1597_v20 }
 0x2c9   :  { %3179 = vmatpush2.bf16.msra.mxu0 %v14590_v50  ;;  %v14640_v50 = vld [vmem:[#allocation15 + $0x4a4] ss:$28 sps:$4 sm:$0xff]  }
 0x2ca   :  { %3180 = vmatprep.subr.bf16.mxu0 %v14598_v23 }
 0x2cd   :  { %3181 = vmatpush2.bf16.msra.mxu0 %v14596_v1 }
 0x2ce   :  { %3489 = vmatprep.subr.bf16.mxu0 %v14622_v26 }
 0x34f   :  { %v1809_v31 = vpop.f32.mrf.mxu0 }
 0x350   :  { %v14061_v39 = vpop.f32.mrf.mxu1  ;;  %v1810_v43 = vadd.f32 %v1809_v31, %v16500_v42  ;;  %v14613_v31 = vld [vmem:[#allocation15 + $0xec] ss:$28 sps:$4 sm:$0xff]  }
 0x351   :  { %v1811_v58 = vpop.f32.mrf.mxu0  ;;  %v1931_v15 = vadd.f32 %v14061_v39, %v16504_v63  ;;  %v14638_v39 = vld [vmem:[#allocation15 + $0x4a0] ss:$28 sps:$4 sm:$0xff]  }
 0x352   :  { %v1922_v4 = vpop.f32.mrf.mxu1  ;;  %v1812_v6 = vadd.f32 %v1811_v58, %v16497_v57  ;;  %v1985_v38 = vmax.f32 %v1810_v43, 0.0 }
 0x353   :  { %v1813_v59 = vpop.f32.mrf.mxu0  ;;  %v1923_v2 = vadd.f32 %v1922_v4, %v16504_v63  ;;  %v1993_v61 = vmax.f32 %v1931_v15, 0.0  ;;  %v14619_v15 = vld [vmem:[#allocation15 + $0x7c] ss:$28 sps:$4 sm:$0xff]  }
 0x354   :  { %v1814_v27 = vadd.f32 %v1813_v59, %v16500_v42  ;;  %v14062_v14 = vpop.f32.mrf.mxu1  ;;  %v1986_v29 = vmax.f32 %v1812_v6, 0.0  ;;  %v14649_v6 = vld [vmem:[#allocation15 + $0x46c] ss:$28 sps:$4 sm:$0xff]  }
 0x355   :  { %v1815_v5 = vpop.f32.mrf.mxu0  ;;  %v1987_v53 = vmax.f32 %v1923_v2, 0.0  ;;  %v1934_v17 = vadd.f32 %v14062_v14, %v16504_v63 }
 0x356   :  { %v1816_v45 = vadd.f32 %v1815_v5, %v16497_v57  ;;  %v1925_v3 = vpop.f32.mrf.mxu1  ;;  %v1988_v37 = vmax.f32 %v1814_v27, 0.0 }
 0x357   :  { %v1926_v16 = vadd.f32 %v1925_v3, %v16504_v63  ;;  %v1819_v40 = vpop.f32.mrf.mxu0  ;;  %v1996_v52 = vmax.f32 %v1934_v17, 0.0 }
 0x358   :  { %v1989_v47 = vmax.f32 %v1816_v45, 0.0  ;;  %v16514_v60 = vpack.c.bf16 %v1988_v37, %v1985_v38  ;;  %v1820_v28 = vadd.f32 %v1819_v40, %v16500_v42  ;;  %v14611_v45 = vld [vmem:[#allocation15 + $0xe8] ss:$28 sps:$4 sm:$0xff]   ;;  %v14616_v40 = vld [vmem:[#allocation15 + $0xb4] ss:$28 sps:$4 sm:$0xff]  }
 0x359   :  { %v1990_v55 = vmax.f32 %v1926_v16, 0.0  ;;  %v1821_v44 = vpop.f32.mrf.mxu0  ;;  %v16532_v26 = vpack.c.bf16 %v1996_v52, %v1993_v61  ;;  %v14625_v61 = vld [vmem:[#allocation15 + $0x44] ss:$28 sps:$4 sm:$0xff]  }
 0x35a   :  { %v16512_v13 = vpack.c.bf16 %v1989_v47, %v1986_v29  ;;  %v1822_v9 = vadd.f32 %v1821_v44, %v16497_v57  ;;  %v1991_v23 = vmax.f32 %v1820_v28, 0.0  ;;  %v14647_v29 = vld [vmem:[#allocation15 + $0x468] ss:$28 sps:$4 sm:$0xff]   ;;  %v14653_v28 = vld [vmem:[#allocation15 + $0x430] ss:$28 sps:$4 sm:$0xff]  }
 0x35b   :  { %v16517_v22 = vpack.c.bf16 %v1990_v55, %v1987_v53  ;;  %v1823_v7 = vpop.f32.mrf.mxu0  ;;  %v14655_v53 = vld [vmem:[#allocation15 + $0x434] ss:$28 sps:$4 sm:$0xff]  }
 0x35c   :  { %v1824_v10 = vadd.f32 %v1823_v7, %v16500_v42  ;;  %3182 = vmatprep.mubr.bf16.mxu0 %v16512_v13  ;;  %v1992_v25 = vmax.f32 %v1822_v9, 0.0 }
 0x35d   :  { %v1825_v33 = vpop.f32.mrf.mxu0  ;;  %3183 = vmatmul.mubr.bf16.vlgmr.msra.gmra.mxu0 %v16514_v60  ;;  %3296 = vmatmul.mubr.bf16.vlgmr.msra.gmra.mxu1 %v16517_v22 }
 0x35e   :  { %v1826_v49 = vadd.f32 %v1825_v33, %v16497_v57  ;;  %3377 = vmatpush1.bf16.msra.mxu1 %v14602_v19  ;;  %3305 = vmatprep.mubr.bf16.mxu1 %v16205_v0  ;;  %v1994_v20 = vmax.f32 %v1824_v10, 0.0 }
 0x35f   :  { %v1829_v11 = vpop.f32.mrf.mxu0  ;;  %3378 = vmatprep.subr.bf16.mxu1 %v14607_v8  ;;  %3490 = vmatpush1.bf16.msra.mxu0 %v14620_v18  ;;  %v14614_v8 = vld [vmem:[#allocation15 + $0xb0] ss:$28 sps:$4 sm:$0xff]  }
 0x360   :  { %v1995_v34 = vmax.f32 %v1826_v49, 0.0  ;;  %v16528_v41 = vpop.f32.mrf.mxu1  ;;  %3491 = vmatprep.subr.bf16.mxu0 %v14631_v12  ;;  %v16534_v46 = vpack.c.bf16 %v1994_v20, %v1991_v23  ;;  %v1830_v27 = vadd.f32 %v1829_v11, %v16500_v42 }
 0x361   :  { %v1831_v36 = vpop.f32.mrf.mxu0  ;;  %v1947_v52 = vadd.f32 %v16528_v41, %v16504_v63  ;;  %v14659_v41 = vld [vmem:[#allocation15 + $0x3f8] ss:$28 sps:$4 sm:$0xff]  }
 0x362   :  { %v16530_v1 = vpack.c.bf16 %v1995_v34, %v1992_v25  ;;  %v1938_v56 = vpop.f32.mrf.mxu1  ;;  %3379 = vmatpush1.bf16.msra.mxu1 %v14605_v48  ;;  %v1832_v58 = vadd.f32 %v1831_v36, %v16497_v57  ;;  %v1997_v55 = vmax.f32 %v1830_v27, 0.0  ;;  %v14661_v48 = vld [vmem:[#allocation15 + $0x3fc] ss:$28 sps:$4 sm:$0xff]  }
 0x363   :  { %v1833_v51 = vpop.f32.mrf.mxu0  ;;  %3380 = vmatprep.subr.bf16.mxu1 %v14610_v24  ;;  %3492 = vmatpush1.bf16.msra.mxu0 %v14629_v21  ;;  %v1939_v14 = vadd.f32 %v1938_v56, %v16504_v63  ;;  %v14617_v21 = vld [vmem:[#allocation15 + $0x78] ss:$28 sps:$4 sm:$0xff]  }
 0x364   :  { %v1834_v4 = vadd.f32 %v1833_v51, %v16500_v42  ;;  %v14066_v59 = vpop.f32.mrf.mxu1  ;;  %3192 = vmatprep.mubr.bf16.mxu0 %v16530_v1  ;;  %3493 = vmatprep.subr.bf16.mxu0 %v14640_v50  ;;  %v1998_v47 = vmax.f32 %v1832_v58, 0.0  ;;  %v2005_v51 = vmax.f32 %v1947_v52, 0.0 }
 0x365   :  { %v1835_v43 = vpop.f32.mrf.mxu0  ;;  %3193 = vmatmul.mubr.bf16.gmra.mxu0 %v16534_v46  ;;  %3306 = vmatmul.mubr.bf16.gmra.mxu1 %v16532_v26  ;;  %v1999_v44 = vmax.f32 %v1939_v14, 0.0  ;;  %v1950_v9 = vadd.f32 %v14066_v59, %v16504_v63  ;;  %v14623_v59 = vld [vmem:[#allocation15 + $0x40] ss:$28 sps:$4 sm:$0xff]  }
 0x366   :  { %v1836_v2 = vadd.f32 %v1835_v43, %v16497_v57  ;;  %v1941_v5 = vpop.f32.mrf.mxu1  ;;  %3381 = vmatpush1.bf16.msra.mxu1 %v14608_v62  ;;  %3315 = vmatprep.mubr.bf16.mxu1 %v16205_v0  ;;  %v2000_v3 = vmax.f32 %v1834_v4, 0.0  ;;  %v14667_v62 = vld [vmem:[#allocation15 + $0x3c4] ss:$28 sps:$4 sm:$0xff]   ;;  %v14628_v43 = vld [vmem:[#allocation15 + $0xc] ss:$28 sps:$4 sm:$0xff]  }
 0x367   :  { %v1942_v37 = vadd.f32 %v1941_v5, %v16504_v63  ;;  %v1839_v16 = vpop.f32.mrf.mxu0  ;;  %3382 = vmatprep.subr.bf16.mxu1 %v14613_v31  ;;  %3494 = vmatpush1.bf16.msra.mxu0 %v14638_v39  ;;  %v2008_v25 = vmax.f32 %v1950_v9, 0.0 }
 0x368   :  { %v2001_v38 = vmax.f32 %v1836_v2, 0.0  ;;  %3495 = vmatprep.subr.bf16.mxu0 %v14649_v6  ;;  %v16548_v18 = vpack.c.bf16 %v2000_v3, %v1997_v55  ;;  %v1840_v20 = vadd.f32 %v1839_v16, %v16500_v42  ;;  %v14665_v2 = vld [vmem:[#allocation15 + $0x3c0] ss:$28 sps:$4 sm:$0xff]  }
 0x369   :  { %v2002_v19 = vmax.f32 %v1942_v37, 0.0  ;;  %v1841_v17 = vpop.f32.mrf.mxu0  ;;  %v16565_v6 = vpack.c.bf16 %v2008_v25, %v2005_v51  ;;  %v14673_v37 = vld [vmem:[#allocation15 + $0x38c] ss:$28 sps:$4 sm:$0xff]   ;;  %v14635_v51 = vld [vmem:[#allocation15 + $0x318] ss:$28 sps:$4 sm:$0xff]  }
 0x36a   :  { %v16546_v7 = vpack.c.bf16 %v2001_v38, %v1998_v47  ;;  %3383 = vmatpush1.bf16.msra.mxu1 %v14611_v45  ;;  %v1842_v33 = vadd.f32 %v1841_v17, %v16497_v57  ;;  %v2003_v31 = vmax.f32 %v1840_v20, 0.0  ;;  %v14634_v17 = vld [vmem:[#allocation15 + $0x354] ss:$28 sps:$4 sm:$0xff]  }
 0x36b   :  { %v16551_v10 = vpack.c.bf16 %v2002_v19, %v1999_v44  ;;  %v1843_v12 = vpop.f32.mrf.mxu0  ;;  %3384 = vmatprep.subr.bf16.mxu1 %v14616_v40  ;;  %3496 = vmatpush1.bf16.msra.mxu0 %v14647_v29  ;;  %v14632_v20 = vld [vmem:[#allocation15 + $0x350] ss:$28 sps:$4 sm:$0xff]  }
 0x36c   :  { %v1844_v49 = vadd.f32 %v1843_v12, %v16500_v42  ;;  %3202 = vmatprep.mubr.bf16.mxu0 %v16546_v7  ;;  %3497 = vmatprep.subr.bf16.mxu0 %v14655_v53  ;;  %v2004_v23 = vmax.f32 %v1842_v33, 0.0  ;;  %v14626_v53 = vld [vmem:[#allocation15 + $0x8] ss:$28 sps:$4 sm:$0xff]  }
 0x36d   :  { %v1845_v11 = vpop.f32.mrf.mxu0  ;;  %3203 = vmatmul.mubr.bf16.gmra.mxu0 %v16548_v18  ;;  %3316 = vmatmul.mubr.bf16.gmra.mxu1 %v16551_v10 }
 0x36e   :  { %v1846_v24 = vadd.f32 %v1845_v11, %v16497_v57  ;;  %3385 = vmatpush1.bf16.msra.mxu1 %v14614_v8  ;;  %3325 = vmatprep.mubr.bf16.mxu1 %v16205_v0  ;;  %v2006_v34 = vmax.f32 %v1844_v49, 0.0  ;;  %v14671_v8 = vld [vmem:[#allocation15 + $0x388] ss:$28 sps:$4 sm:$0xff]  }
 0x36f   :  { %v1849_v50 = vpop.f32.mrf.mxu0  ;;  %3386 = vmatprep.subr.bf16.mxu1 %v14619_v15  ;;  %3498 = vmatpush1.bf16.msra.mxu0 %v14653_v28  ;;  %v14703_v15 = vld [vmem:[#allocation15 + $0x51c] ss:$28 sps:$4 sm:$0xff]  }
 0x370   :  { %v2007_v36 = vmax.f32 %v1846_v24, 0.0  ;;  %v14069_v56 = vpop.f32.mrf.mxu1  ;;  %3499 = vmatprep.subr.bf16.mxu0 %v14661_v48  ;;  %v16567_v27 = vpack.c.bf16 %v2006_v34, %v2003_v31  ;;  %v1850_v16 = vadd.f32 %v1849_v50, %v16500_v42  ;;  %v14637_v34 = vld [vmem:[#allocation15 + $0x31c] ss:$28 sps:$4 sm:$0xff]  }
 0x371   :  { %v1851_v39 = vpop.f32.mrf.mxu0 }
 0x372   :  { %v16563_v58 = vpack.c.bf16 %v2007_v36, %v2004_v23  ;;  %v1954_v4 = vpop.f32.mrf.mxu1  ;;  %3387 = vmatpush1.bf16.msra.mxu1 %v14617_v21  ;;  %v1852_v5 = vadd.f32 %v1851_v39, %v16497_v57  ;;  %v2009_v28 = vmax.f32 %v1850_v16, 0.0  ;;  %v14641_v16 = vld [vmem:[#allocation15 + $0x2e0] ss:$28 sps:$4 sm:$0xff]  }
 0x373   :  { %v1853_v14 = vpop.f32.mrf.mxu0  ;;  %3388 = vmatprep.subr.bf16.mxu1 %v14625_v61  ;;  %3500 = vmatpush1.bf16.msra.mxu0 %v14659_v41  ;;  %v1955_v40 = vadd.f32 %v1954_v4, %v16504_v63  ;;  %v1963_v41 = vadd.f32 %v14069_v56, %v16504_v63 }
 0x374   :  { %v1854_v45 = vadd.f32 %v1853_v14, %v16500_v42  ;;  %v14070_v3 = vpop.f32.mrf.mxu1  ;;  %3212 = vmatprep.mubr.bf16.mxu0 %v16563_v58  ;;  %3501 = vmatprep.subr.bf16.mxu0 %v14667_v62  ;;  %v2010_v9 = vmax.f32 %v1852_v5, 0.0 }
 0x375   :  { %v1855_v29 = vpop.f32.mrf.mxu0  ;;  %3213 = vmatmul.mubr.bf16.gmra.mxu0 %v16567_v27  ;;  %3326 = vmatmul.mubr.bf16.gmra.mxu1 %v16565_v6  ;;  %v2011_v33 = vmax.f32 %v1955_v40, 0.0  ;;  %v1966_v24 = vadd.f32 %v14070_v3, %v16504_v63 }
 0x376   :  { %v1856_v47 = vadd.f32 %v1855_v29, %v16497_v57  ;;  %v1957_v38 = vpop.f32.mrf.mxu1  ;;  %3389 = vmatpush1.bf16.msra.mxu1 %v14623_v59  ;;  %3335 = vmatprep.mubr.bf16.mxu1 %v16205_v0  ;;  %v2012_v55 = vmax.f32 %v1854_v45, 0.0  ;;  %v14643_v59 = vld [vmem:[#allocation15 + $0x2e4] ss:$28 sps:$4 sm:$0xff]  }
 0x377   :  { %v1958_v44 = vadd.f32 %v1957_v38, %v16504_v63  ;;  %v1859_v19 = vpop.f32.mrf.mxu0  ;;  %3390 = vmatprep.subr.bf16.mxu1 %v14628_v43  ;;  %3502 = vmatpush1.bf16.msra.mxu0 %v14665_v2  ;;  %v2020_v31 = vmax.f32 %v1966_v24, 0.0  ;;  %v2017_v2 = vmax.f32 %v1963_v41, 0.0  ;;  %v14646_v38 = vld [vmem:[#allocation15 + $0x2ac] ss:$28 sps:$4 sm:$0xff]  }
 0x378   :  { %v2013_v12 = vmax.f32 %v1856_v47, 0.0  ;;  %3503 = vmatprep.subr.bf16.mxu0 %v14673_v37  ;;  %v16581_v11 = vpack.c.bf16 %v2012_v55, %v2009_v28  ;;  %v1860_v23 = vadd.f32 %v1859_v19, %v16500_v42 }
 0x379   :  { %v2014_v49 = vmax.f32 %v1958_v44, 0.0  ;;  %v1861_v48 = vpop.f32.mrf.mxu0  ;;  %v16597_v40 = vpack.c.bf16 %v2020_v31, %v2017_v2 }
 0x37a   :  { %v16579_v52 = vpack.c.bf16 %v2013_v12, %v2010_v9  ;;  %3391 = vmatpush1.bf16.msra.mxu1 %v14626_v53  ;;  %v1862_v50 = vadd.f32 %v1861_v48, %v16497_v57  ;;  %v2015_v5 = vmax.f32 %v1860_v23, 0.0  ;;  %v14652_v48 = vld [vmem:[#allocation15 + $0x274] ss:$28 sps:$4 sm:$0xff]  }
 0x37b   :  { %v16584_v21 = vpack.c.bf16 %v2014_v49, %v2011_v33  ;;  %v1863_v25 = vpop.f32.mrf.mxu0  ;;  %3392 = vmatprep.subr.bf16.mxu1 %v14634_v17  ;;  %3504 = vmatpush1.bf16.msra.mxu0 %v14671_v8  ;;  %v14650_v23 = vld [vmem:[#allocation15 + $0x270] ss:$28 sps:$4 sm:$0xff]  }
 0x37c   :  { %v1864_v61 = vadd.f32 %v1863_v25, %v16500_v42  ;;  %3222 = vmatprep.mubr.bf16.mxu0 %v16579_v52  ;;  %3715 = vmatprep.subr.bf16.mxu0 %v14703_v15  ;;  %v2016_v14 = vmax.f32 %v1862_v50, 0.0  ;;  %v14644_v15 = vld [vmem:[#allocation15 + $0x2a8] ss:$28 sps:$4 sm:$0xff]  }
 0x37d   :  { %v1865_v36 = vpop.f32.mrf.mxu0  ;;  %3223 = vmatmul.mubr.bf16.gmra.mxu0 %v16581_v11  ;;  %3336 = vmatmul.mubr.bf16.gmra.mxu1 %v16584_v21 }
 0x37e   :  { %v1866_v62 = vadd.f32 %v1865_v36, %v16497_v57  ;;  %3393 = vmatpush2.bf16.msra.mxu1 %v14632_v20  ;;  %3345 = vmatprep.mubr.bf16.mxu1 %v16205_v0  ;;  %v2018_v39 = vmax.f32 %v1864_v61, 0.0 }
 0x37f   :  { %v1869_v4 = vpop.f32.mrf.mxu0  ;;  %3394 = vmatprep.subr.bf16.mxu1 %v14637_v34 }
 0x380   :  { %v2019_v56 = vmax.f32 %v1866_v62, 0.0  ;;  %v14073_v43 = vpop.f32.mrf.mxu1  ;;  %v16599_v29 = vpack.c.bf16 %v2018_v39, %v2015_v5  ;;  %v1870_v19 = vadd.f32 %v1869_v4, %v16500_v42  ;;  %v14658_v39 = vld [vmem:[#allocation15 + $0x23c] ss:$28 sps:$4 sm:$0xff]  }
 0x381   :  { %v1871_v45 = vpop.f32.mrf.mxu0 }
 0x382   :  { %v16595_v3 = vpack.c.bf16 %v2019_v56, %v2016_v14  ;;  %v1970_v37 = vpop.f32.mrf.mxu1  ;;  %3395 = vmatpush2.bf16.msra.mxu1 %v14635_v51  ;;  %v1872_v53 = vadd.f32 %v1871_v45, %v16497_v57  ;;  %v2021_v25 = vmax.f32 %v1870_v19, 0.0  ;;  %v1979_v14 = vadd.f32 %v14073_v43, %v16504_v63  ;;  %v14656_v45 = vld [vmem:[#allocation15 + $0x238] ss:$28 sps:$4 sm:$0xff]  }
 0x383   :  { %v1873_v47 = vpop.f32.mrf.mxu0  ;;  %3396 = vmatprep.subr.bf16.mxu1 %v14643_v59  ;;  %v1971_v17 = vadd.f32 %v1970_v37, %v16504_v63 }
 0x384   :  { %v1874_v55 = vadd.f32 %v1873_v47, %v16500_v42  ;;  %v14074_v44 = vpop.f32.mrf.mxu1  ;;  %3232 = vmatprep.mubr.bf16.mxu0 %v16595_v3  ;;  %v2022_v20 = vmax.f32 %v1872_v53, 0.0  ;;  %v14664_v47 = vld [vmem:[#allocation15 + $0x204] ss:$28 sps:$4 sm:$0xff]  }
 0x385   :  { %v1875_v8 = vpop.f32.mrf.mxu0  ;;  %3233 = vmatmul.mubr.bf16.gmra.mxu0 %v16599_v29  ;;  %3346 = vmatmul.mubr.bf16.gmra.mxu1 %v16597_v40  ;;  %v2023_v34 = vmax.f32 %v1971_v17, 0.0  ;;  %v1982_v62 = vadd.f32 %v14074_v44, %v16504_v63  ;;  %v14668_v17 = vld [vmem:[#allocation15 + $0x1c8] ss:$28 sps:$4 sm:$0xff]  }
 0x386   :  { %v1876_v9 = vadd.f32 %v1875_v8, %v16497_v57  ;;  %v1973_v12 = vpop.f32.mrf.mxu1  ;;  %3397 = vmatpush2.bf16.msra.mxu1 %v14641_v16  ;;  %3355 = vmatprep.mubr.bf16.mxu1 %v16205_v0  ;;  %v2024_v28 = vmax.f32 %v1874_v55, 0.0  ;;  %v14662_v55 = vld [vmem:[#allocation15 + $0x200] ss:$28 sps:$4 sm:$0xff]  }
 0x387   :  { %v1974_v33 = vadd.f32 %v1973_v12, %v16504_v63  ;;  %v1879_v49 = vpop.f32.mrf.mxu0  ;;  %3398 = vmatprep.subr.bf16.mxu1 %v14646_v38  ;;  %v2032_v37 = vmax.f32 %v1982_v62, 0.0  ;;  %v2029_v63 = vmax.f32 %v1979_v14, 0.0  ;;  %v14676_v8 = vld [vmem:[#allocation15 + $0x19c] ss:$28 sps:$4 sm:$0xff]   ;;  %v14679_v12 = vld [vmem:[#allocation15 + $0x164] ss:$28 sps:$4 sm:$0xff]  }
 0x388   :  { %v2025_v24 = vmax.f32 %v1876_v9, 0.0  ;;  %v16613_v36 = vpack.c.bf16 %v2024_v28, %v2021_v25  ;;  %v1880_v56 = vadd.f32 %v1879_v49, %v16500_v42  ;;  %v14674_v9 = vld [vmem:[#allocation15 + $0x198] ss:$28 sps:$4 sm:$0xff]   ;;  %v14709_v28 = vld [vmem:[#allocation15 + $0x4e4] ss:$28 sps:$4 sm:$0xff]  }
 0x389   :  { %v2026_v50 = vmax.f32 %v1974_v33, 0.0  ;;  %v1881_v61 = vpop.f32.mrf.mxu0  ;;  %v16629_v44 = vpack.c.bf16 %v2032_v37, %v2029_v63  ;;  %v14677_v33 = vld [vmem:[#allocation15 + $0x160] ss:$28 sps:$4 sm:$0xff]   ;;  %v14682_v49 = vld [vmem:[#allocation15 + $0x12c] ss:$28 sps:$4 sm:$0xff]  }
 0x38a   :  { %v16611_v41 = vpack.c.bf16 %v2025_v24, %v2022_v20  ;;  %3399 = vmatpush2.bf16.msra.mxu1 %v14644_v15  ;;  %v1882_v4 = vadd.f32 %v1881_v61, %v16497_v57  ;;  %v2027_v43 = vmax.f32 %v1880_v56, 0.0  ;;  %v14701_v15 = vld [vmem:[#allocation15 + $0x518] ss:$28 sps:$4 sm:$0xff]   ;;  %v14680_v20 = vld [vmem:[#allocation15 + $0x128] ss:$28 sps:$4 sm:$0xff]  }
 0x38b   :  { %v16616_v51 = vpack.c.bf16 %v2026_v50, %v2023_v34  ;;  %v1883_v31 = vpop.f32.mrf.mxu0  ;;  %3400 = vmatprep.subr.bf16.mxu1 %v14652_v48  ;;  %v14707_v48 = vld [vmem:[#allocation15 + $0x4e0] ss:$28 sps:$4 sm:$0xff]   ;;  %v14685_v24 = vld [vmem:[#allocation15 + $0xf4] ss:$28 sps:$4 sm:$0xff]   ;;  %v14715_v25 = vld [vmem:[#allocation15 + $0x4ac] ss:$28 sps:$4 sm:$0xff]  }
 0x38c   :  { %v1884_v59 = vadd.f32 %v1883_v31, %v16500_v42  ;;  %3242 = vmatprep.mubr.bf16.mxu0 %v16611_v41  ;;  %v2028_v38 = vmax.f32 %v1882_v4, 0.0  ;;  %v14713_v34 = vld [vmem:[#allocation15 + $0x4a8] ss:$28 sps:$4 sm:$0xff]   ;;  %v14683_v50 = vld [vmem:[#allocation15 + $0xf0] ss:$28 sps:$4 sm:$0xff]  }
 0x38d   :  { %v1885_v2 = vpop.f32.mrf.mxu0  ;;  %3243 = vmatmul.mubr.bf16.gmra.mxu0 %v16613_v36  ;;  %3356 = vmatmul.mubr.bf16.gmra.mxu1 %v16616_v51  ;;  %v14721_v61 = vld [vmem:[#allocation15 + $0x474] ss:$28 sps:$4 sm:$0xff]   ;;  %v14691_v31 = vld [vmem:[#allocation15 + $0x84] ss:$28 sps:$4 sm:$0xff]   ;;  %v14727_v4 = vld [vmem:[#allocation15 + $0x43c] ss:$28 sps:$4 sm:$0xff]  }
 0x38e   :  { %v1886_v5 = vadd.f32 %v1885_v2, %v16497_v57  ;;  %3401 = vmatpush2.bf16.msra.mxu1 %v14650_v23  ;;  %3365 = vmatprep.mubr.bf16.mxu1 %v16205_v0  ;;  %v2030_v16 = vmax.f32 %v1884_v59, 0.0  ;;  %v14670_v57 = vld [vmem:[#allocation15 + $0x1cc] ss:$28 sps:$4 sm:$0xff]   ;;  %v14688_v23 = vld [vmem:[#allocation15 + $0xbc] ss:$28 sps:$4 sm:$0xff]  }
 0x38f   :  { %3402 = vmatprep.subr.bf16.mxu1 %v14658_v39  ;;  %v14686_v62 = vld [vmem:[#allocation15 + $0xb8] ss:$28 sps:$4 sm:$0xff]   ;;  %v14719_v39 = vld [vmem:[#allocation15 + $0x470] ss:$28 sps:$4 sm:$0xff]   ;;  %v14689_v59 = vld [vmem:[#allocation15 + $0x80] ss:$28 sps:$4 sm:$0xff]  }
 0x390   :  { %v2031_v53 = vmax.f32 %v1886_v5, 0.0  ;;  %v16631_v19 = vpack.c.bf16 %v2030_v16, %v2027_v43  ;;  %v14694_v14 = vld [vmem:[#allocation15 + $0x4c] ss:$28 sps:$4 sm:$0xff]   ;;  %v14725_v56 = vld [vmem:[#allocation15 + $0x438] ss:$28 sps:$4 sm:$0xff]  }
 0x391   :  { %v14692_v2 = vld [vmem:[#allocation15 + $0x48] ss:$28 sps:$4 sm:$0xff]   ;;  %v14697_v5 = vld [vmem:[#allocation15 + $0x14] ss:$28 sps:$4 sm:$0xff]   ;;  %v14731_v37 = vld [vmem:[#allocation15 + $0x400] ss:$28 sps:$4 sm:$0xff]  }
 0x392   :  { %v16627_v42 = vpack.c.bf16 %v2031_v53, %v2028_v38  ;;  %3403 = vmatpush2.bf16.msra.mxu1 %v14656_v45  ;;  %v14733_v45 = vld [vmem:[#allocation15 + $0x404] ss:$28 sps:$4 sm:$0xff]   ;;  %v14695_v16 = vld [vmem:[#allocation15 + $0x10] ss:$28 sps:$4 sm:$0xff]   ;;  %v14700_v38 = vld [vmem:[#allocation15 + $0x35c] ss:$28 sps:$4 sm:$0xff]  }
 0x393   :  { %3404 = vmatprep.subr.bf16.mxu1 %v14664_v47  ;;  %v14739_v47 = vld [vmem:[#allocation15 + $0x3cc] ss:$28 sps:$4 sm:$0xff]   ;;  %v14698_v53 = vld [vmem:[#allocation15 + $0x358] ss:$28 sps:$4 sm:$0xff]   ;;  %v14706_v63 = vld [vmem:[#allocation15 + $0x324] ss:$28 sps:$4 sm:$0xff]  }
 0x394   :  { %3252 = vmatprep.mubr.bf16.mxu0 %v16627_v42  ;;  %v14737_v43 = vld [vmem:[#allocation15 + $0x3c8] ss:$28 sps:$4 sm:$0xff]  }
 0x395   :  { %3253 = vmatmul.mubr.bf16.gmra.mxu0 %v16631_v19  ;;  %3366 = vmatmul.mubr.bf16.gmra.mxu1 %v16629_v44 }
 0x396   :  { %3405 = vmatpush2.bf16.msra.mxu1 %v14662_v55  ;;  %3408 = vmatprep.mubr.bf16.mxu1 %v16512_v13  ;;  %v14745_v55 = vld [vmem:[#allocation15 + $0x394] ss:$28 sps:$4 sm:$0xff]  }
 0x397   :  { %3406 = vmatprep.subr.bf16.mxu1 %v14670_v57  ;;  %3521 = vmatprep.mubr.bf16.mxu0 %v16205_v0  ;;  %v14704_v57 = vld [vmem:[#allocation15 + $0x320] ss:$28 sps:$4 sm:$0xff]  }
 0x39a   :  { %3407 = vmatpush2.bf16.msra.mxu1 %v14668_v17  ;;  %v14712_v17 = vld [vmem:[#allocation15 + $0x2ec] ss:$28 sps:$4 sm:$0xff]  }
 0x39b   :  { %3602 = vmatprep.subr.bf16.mxu1 %v14676_v8  ;;  %v14743_v8 = vld [vmem:[#allocation15 + $0x390] ss:$28 sps:$4 sm:$0xff]  }
 0x39d   :  { %3409 = vmatmul.mubr.bf16.vlgmr.msra.gmra.mxu1 %v16514_v60  ;;  %3522 = vmatmul.mubr.bf16.vlgmr.msra.gmra.mxu0 %v16517_v22 }
 0x39e   :  { %3418 = vmatprep.mubr.bf16.mxu1 %v16530_v1  ;;  %3603 = vmatpush1.bf16.msra.mxu1 %v14674_v9  ;;  %v14710_v9 = vld [vmem:[#allocation15 + $0x2e8] ss:$28 sps:$4 sm:$0xff]  }
 0x39f   :  { %3604 = vmatprep.subr.bf16.mxu1 %v14679_v12  ;;  %3531 = vmatprep.mubr.bf16.mxu0 %v16205_v0  ;;  %v14718_v12 = vld [vmem:[#allocation15 + $0x2b4] ss:$28 sps:$4 sm:$0xff]  }
 0x3a0   :  { %3716 = vmatpush1.bf16.msra.mxu0 %v14701_v15  ;;  %v14755_v15 = vld [vmem:[#allocation15 + $0x520] ss:$28 sps:$4 sm:$0xff]  }
 0x3a1   :  { %3717 = vmatprep.subr.bf16.mxu0 %v14709_v28  ;;  %v14716_v28 = vld [vmem:[#allocation15 + $0x2b0] ss:$28 sps:$4 sm:$0xff]  }
 0x3a2   :  { %3605 = vmatpush1.bf16.msra.mxu1 %v14677_v33  ;;  %v14724_v33 = vld [vmem:[#allocation15 + $0x27c] ss:$28 sps:$4 sm:$0xff]  }
 0x3a3   :  { %3606 = vmatprep.subr.bf16.mxu1 %v14682_v49  ;;  %v14722_v49 = vld [vmem:[#allocation15 + $0x278] ss:$28 sps:$4 sm:$0xff]  }
 0x3a4   :  { %3718 = vmatpush1.bf16.msra.mxu0 %v14707_v48  ;;  %v14730_v48 = vld [vmem:[#allocation15 + $0x244] ss:$28 sps:$4 sm:$0xff]  }
 0x3a5   :  { %3419 = vmatmul.mubr.bf16.gmra.mxu1 %v16534_v46  ;;  %3532 = vmatmul.mubr.bf16.gmra.mxu0 %v16532_v26 }
 0x3a6   :  { %3428 = vmatprep.mubr.bf16.mxu1 %v16546_v7  ;;  %3607 = vmatpush1.bf16.msra.mxu1 %v14680_v20  ;;  %v14728_v20 = vld [vmem:[#allocation15 + $0x240] ss:$28 sps:$4 sm:$0xff]  }
 0x3a7   :  { %3608 = vmatprep.subr.bf16.mxu1 %v14685_v24  ;;  %3541 = vmatprep.mubr.bf16.mxu0 %v16205_v0  ;;  %v14736_v24 = vld [vmem:[#allocation15 + $0x20c] ss:$28 sps:$4 sm:$0xff]  }
 0x3a8   :  { %3719 = vmatprep.subr.bf16.mxu0 %v14715_v25  ;;  %v14734_v25 = vld [vmem:[#allocation15 + $0x208] ss:$28 sps:$4 sm:$0xff]  }
 0x3a9   :  { %3720 = vmatpush1.bf16.msra.mxu0 %v14713_v34  ;;  %v14742_v34 = vld [vmem:[#allocation15 + $0x1d4] ss:$28 sps:$4 sm:$0xff]  }
 0x3aa   :  { %3609 = vmatpush1.bf16.msra.mxu1 %v14683_v50  ;;  %3721 = vmatprep.subr.bf16.mxu0 %v14721_v61  ;;  %v14740_v50 = vld [vmem:[#allocation15 + $0x1d0] ss:$28 sps:$4 sm:$0xff]   ;;  %v14746_v61 = vld [vmem:[#allocation15 + $0x360] ss:$28 sps:$4 sm:$0xff]  }
 0x3ab   :  { %3610 = vmatprep.subr.bf16.mxu1 %v14688_v23  ;;  %v14747_v23 = vld [vmem:[#allocation15 + $0x1a0] ss:$28 sps:$4 sm:$0xff]  }
 0x3ad   :  { %3429 = vmatmul.mubr.bf16.gmra.mxu1 %v16548_v18  ;;  %3542 = vmatmul.mubr.bf16.gmra.mxu0 %v16551_v10 }
 0x3ae   :  { %3438 = vmatprep.mubr.bf16.mxu1 %v16563_v58  ;;  %3611 = vmatpush1.bf16.msra.mxu1 %v14686_v62  ;;  %v14748_v62 = vld [vmem:[#allocation15 + $0x328] ss:$28 sps:$4 sm:$0xff]  }
 0x3af   :  { %3612 = vmatprep.subr.bf16.mxu1 %v14691_v31  ;;  %3551 = vmatprep.mubr.bf16.mxu0 %v16205_v0  ;;  %v14757_v31 = vld [vmem:[#allocation15 + $0x4e8] ss:$28 sps:$4 sm:$0xff]  }
 0x3b0   :  { %3722 = vmatpush1.bf16.msra.mxu0 %v14719_v39  ;;  %v14749_v39 = vld [vmem:[#allocation15 + $0x168] ss:$28 sps:$4 sm:$0xff]  }
 0x3b1   :  { %3723 = vmatprep.subr.bf16.mxu0 %v14727_v4  ;;  %v14750_v4 = vld [vmem:[#allocation15 + $0x2f0] ss:$28 sps:$4 sm:$0xff]  }
 0x3b2   :  { %3613 = vmatpush1.bf16.msra.mxu1 %v14689_v59  ;;  %v14751_v59 = vld [vmem:[#allocation15 + $0x130] ss:$28 sps:$4 sm:$0xff]  }
 0x3b3   :  { %3614 = vmatprep.subr.bf16.mxu1 %v14694_v14  ;;  %v14759_v14 = vld [vmem:[#allocation15 + $0x4b0] ss:$28 sps:$4 sm:$0xff]  }
 0x3b4   :  { %3724 = vmatpush1.bf16.msra.mxu0 %v14725_v56  ;;  %v14752_v56 = vld [vmem:[#allocation15 + $0x2b8] ss:$28 sps:$4 sm:$0xff]  }
 0x3b5   :  { %3439 = vmatmul.mubr.bf16.gmra.mxu1 %v16567_v27  ;;  %3552 = vmatmul.mubr.bf16.gmra.mxu0 %v16565_v6 }
 0x3b6   :  { %3448 = vmatprep.mubr.bf16.mxu1 %v16579_v52  ;;  %3615 = vmatpush1.bf16.msra.mxu1 %v14692_v2  ;;  %v14761_v2 = vld [vmem:[#allocation15 + $0x478] ss:$28 sps:$4 sm:$0xff]  }
 0x3b7   :  { %3616 = vmatprep.subr.bf16.mxu1 %v14697_v5  ;;  %3561 = vmatprep.mubr.bf16.mxu0 %v16205_v0  ;;  %v14753_v5 = vld [vmem:[#allocation15 + $0xf8] ss:$28 sps:$4 sm:$0xff]  }
 0x3b8   :  { %3725 = vmatprep.subr.bf16.mxu0 %v14733_v45  ;;  %v14754_v45 = vld [vmem:[#allocation15 + $0x280] ss:$28 sps:$4 sm:$0xff]  }
 0x3b9   :  { %3726 = vmatpush1.bf16.msra.mxu0 %v14731_v37  ;;  %v14756_v37 = vld [vmem:[#allocation15 + $0xc0] ss:$28 sps:$4 sm:$0xff]  }
 0x3ba   :  { %3617 = vmatpush1.bf16.msra.mxu1 %v14695_v16  ;;  %3727 = vmatprep.subr.bf16.mxu0 %v14739_v47  ;;  %v14763_v16 = vld [vmem:[#allocation15 + $0x440] ss:$28 sps:$4 sm:$0xff]   ;;  %v14758_v47 = vld [vmem:[#allocation15 + $0x248] ss:$28 sps:$4 sm:$0xff]  }
 0x3bb   :  { %3618 = vmatprep.subr.bf16.mxu1 %v14700_v38  ;;  %v14765_v38 = vld [vmem:[#allocation15 + $0x408] ss:$28 sps:$4 sm:$0xff]  }
 0x3bd   :  { %3449 = vmatmul.mubr.bf16.gmra.mxu1 %v16581_v11  ;;  %3562 = vmatmul.mubr.bf16.gmra.mxu0 %v16584_v21 }
 0x3be   :  { %3458 = vmatprep.mubr.bf16.mxu1 %v16595_v3  ;;  %3619 = vmatpush2.bf16.msra.mxu1 %v14698_v53  ;;  %v14760_v53 = vld [vmem:[#allocation15 + $0x88] ss:$28 sps:$4 sm:$0xff]  }
 0x3bf   :  { %3620 = vmatprep.subr.bf16.mxu1 %v14706_v63  ;;  %3571 = vmatprep.mubr.bf16.mxu0 %v16205_v0  ;;  %v14762_v63 = vld [vmem:[#allocation15 + $0x210] ss:$28 sps:$4 sm:$0xff]  }
 0x3c0   :  { %3728 = vmatpush1.bf16.msra.mxu0 %v14737_v43  ;;  %v14764_v43 = vld [vmem:[#allocation15 + $0x50] ss:$28 sps:$4 sm:$0xff]  }
 0x3c1   :  { %3729 = vmatprep.subr.bf16.mxu0 %v14745_v55  ;;  %v14767_v55 = vld [vmem:[#allocation15 + $0x3d0] ss:$28 sps:$4 sm:$0xff]  }
 0x3c2   :  { %3621 = vmatpush2.bf16.msra.mxu1 %v14704_v57  ;;  %v14766_v57 = vld [vmem:[#allocation15 + $0x1d8] ss:$28 sps:$4 sm:$0xff]  }
 0x3c3   :  { %3622 = vmatprep.subr.bf16.mxu1 %v14712_v17  ;;  %v14769_v17 = vld [vmem:[#allocation15 + $0x398] ss:$28 sps:$4 sm:$0xff]  }
 0x3c4   :  { %3730 = vmatpush1.bf16.msra.mxu0 %v14743_v8  ;;  %v14768_v8 = vld [vmem:[#allocation15 + $0x18] ss:$28 sps:$4 sm:$0xff]  }
 0x3c5   :  { %3459 = vmatmul.mubr.bf16.gmra.mxu1 %v16599_v29  ;;  %3572 = vmatmul.mubr.bf16.gmra.mxu0 %v16597_v40 }
 0x3c6   :  { %3468 = vmatprep.mubr.bf16.mxu1 %v16611_v41  ;;  %3623 = vmatpush2.bf16.msra.mxu1 %v14710_v9  ;;  %v14772_v9 = vld [vmem:[#allocation18 + $0x74] ss:$8 sps:$4 sm:$0xff]  }
 0x3c7   :  { %3624 = vmatprep.subr.bf16.mxu1 %v14718_v12  ;;  %3581 = vmatprep.mubr.bf16.mxu0 %v16205_v0  ;;  %v14784_v12 = vld [vmem:[#allocation18 + $0x174] ss:$8 sps:$4 sm:$0xff]  }
 0x3c8   :  { %14075 = vmatprep.subr.bf16.mxu0 %v14755_v15 }
 0x3ca   :  { %3625 = vmatpush2.bf16.msra.mxu1 %v14716_v28  ;;  %v14782_v28 = vld [vmem:[#allocation18 + $0x170] ss:$8 sps:$4 sm:$0xff]  }
 0x3cb   :  { %3626 = vmatprep.subr.bf16.mxu1 %v14724_v33  ;;  %v14775_v33 = vld [vmem:[#allocation18 + $0x64] ss:$8 sps:$4 sm:$0xff]  }
 0x3cd   :  { %3469 = vmatmul.mubr.bf16.gmra.mxu1 %v16613_v36  ;;  %3582 = vmatmul.mubr.bf16.gmra.mxu0 %v16616_v51 }
 0x3ce   :  { %3478 = vmatprep.mubr.bf16.mxu1 %v16627_v42  ;;  %3627 = vmatpush2.bf16.msra.mxu1 %v14722_v49  ;;  %v14790_v49 = vld [vmem:[#allocation18 + $0x164] ss:$8 sps:$4 sm:$0xff]  }
 0x3cf   :  { %3628 = vmatprep.subr.bf16.mxu1 %v14730_v48  ;;  %3591 = vmatprep.mubr.bf16.mxu0 %v16205_v0 }
 0x3d2   :  { %3629 = vmatpush2.bf16.msra.mxu1 %v14728_v20 }
 0x3d3   :  { %3630 = vmatprep.subr.bf16.mxu1 %v14736_v24  ;;  %v14788_v24 = vld [vmem:[#allocation18 + $0x160] ss:$8 sps:$4 sm:$0xff]  }
 0x3d5   :  { %3479 = vmatmul.mubr.bf16.gmra.mxu1 %v16631_v19  ;;  %3592 = vmatmul.mubr.bf16.gmra.mxu0 %v16629_v44 }
 0x3d6   :  { %3631 = vmatpush2.bf16.msra.mxu1 %v14734_v25  ;;  %3634 = vmatprep.mubr.bf16.mxu1 %v16512_v13  ;;  %v14778_v25 = vld [vmem:[#allocation18 + $0x54] ss:$8 sps:$4 sm:$0xff]  }
 0x3d7   :  { %3632 = vmatprep.subr.bf16.mxu1 %v14742_v34  ;;  %3747 = vmatprep.mubr.bf16.mxu0 %v16205_v0  ;;  %v14796_v34 = vld [vmem:[#allocation18 + $0x154] ss:$8 sps:$4 sm:$0xff]  }
 0x3da   :  { %3633 = vmatpush2.bf16.msra.mxu1 %v14740_v50 }
 0x3db   :  { %13339 = vmatprep.subr.bf16.mxu1 %v14746_v61  ;;  %v14794_v61 = vld [vmem:[#allocation18 + $0x150] ss:$8 sps:$4 sm:$0xff]  }
 0x3dd   :  { %3635 = vmatmul.mubr.bf16.vlgmr.msra.gmra.mxu1 %v16514_v60  ;;  %3748 = vmatmul.mubr.bf16.vlgmr.msra.gmra.mxu0 %v16517_v22 }
 0x3de   :  { %3644 = vmatprep.mubr.bf16.mxu1 %v16530_v1  ;;  %13340 = vmatpush3.bf16.msra.mxu1 %v14747_v23  ;;  %v14781_v23 = vld [vmem:[#allocation18 + $0x44] ss:$8 sps:$4 sm:$0xff]  }
 0x3df   :  { %3757 = vmatprep.mubr.bf16.mxu0 %v16205_v0  ;;  %13341 = vmatprep.subr.bf16.mxu1 %v14748_v62  ;;  %v14802_v62 = vld [vmem:[#allocation18 + $0x144] ss:$8 sps:$4 sm:$0xff]  }
 0x3e0   :  { %14076 = vmatpush3.bf16.msra.mxu0 %v14755_v15  ;;  %v14770_v15 = vld [vmem:[#allocation18 + $0x70] ss:$8 sps:$4 sm:$0xff]  }
 0x3e1   :  { %14077 = vmatprep.subr.bf16.mxu0 %v14757_v31 }
 0x3e2   :  { %13342 = vmatpush3.bf16.msra.mxu1 %v14749_v39 }
 0x3e3   :  { %13343 = vmatprep.subr.bf16.mxu1 %v14750_v4 }
 0x3e4   :  { %14078 = vmatpush3.bf16.msra.mxu0 %v14757_v31 }
 0x3e5   :  { %3645 = vmatmul.mubr.bf16.gmra.mxu1 %v16534_v46  ;;  %3758 = vmatmul.mubr.bf16.gmra.mxu0 %v16532_v26 }
 0x3e6   :  { %3654 = vmatprep.mubr.bf16.mxu1 %v16546_v7  ;;  %3767 = vmatprep.mubr.bf16.mxu0 %v16205_v0 }
 0x3e7   :  { %13344 = vmatpush3.bf16.msra.mxu1 %v14751_v59  ;;  %14079 = vmatprep.subr.bf16.mxu0 %v14759_v14 }
 0x3e8   :  { %13345 = vmatprep.subr.bf16.mxu1 %v14752_v56  ;;  %14080 = vmatpush3.bf16.msra.mxu0 %v14759_v14  ;;  %v14779_v14 = vld [vmem:[#allocation18 + $0x40] ss:$8 sps:$4 sm:$0xff]  }
 0x3e9   :  { %14081 = vmatprep.subr.bf16.mxu0 %v14761_v2  ;;  %v14800_v56 = vld [vmem:[#allocation18 + $0x140] ss:$8 sps:$4 sm:$0xff]  }
 0x3eb   :  { %13346 = vmatpush3.bf16.msra.mxu1 %v14753_v5  ;;  %v14808_v5 = vld [vmem:[#allocation18 + $0x134] ss:$8 sps:$4 sm:$0xff]  }
 0x3ec   :  { %13347 = vmatprep.subr.bf16.mxu1 %v14754_v45  ;;  %14082 = vmatpush3.bf16.msra.mxu0 %v14761_v2  ;;  %v14787_v2 = vld [vmem:[#allocation18 + $0x34] ss:$8 sps:$4 sm:$0xff]  }
 0x3ed   :  { %3655 = vmatmul.mubr.bf16.gmra.mxu1 %v16548_v18  ;;  %3768 = vmatmul.mubr.bf16.gmra.mxu0 %v16551_v10 }
 0x3ee   :  { %3664 = vmatprep.mubr.bf16.mxu1 %v16563_v58  ;;  %3777 = vmatprep.mubr.bf16.mxu0 %v16205_v0 }
 0x3ef   :  { %13348 = vmatpush3.bf16.msra.mxu1 %v14756_v37  ;;  %14083 = vmatprep.subr.bf16.mxu0 %v14763_v16  ;;  %v14806_v37 = vld [vmem:[#allocation18 + $0x130] ss:$8 sps:$4 sm:$0xff]  }
 0x3f0   :  { %13349 = vmatprep.subr.bf16.mxu1 %v14758_v47  ;;  %14084 = vmatpush3.bf16.msra.mxu0 %v14763_v16  ;;  %v14793_v16 = vld [vmem:[#allocation18 + $0x24] ss:$8 sps:$4 sm:$0xff]  }
 0x3f1   :  { %14085 = vmatprep.subr.bf16.mxu0 %v14765_v38  ;;  %v14814_v47 = vld [vmem:[#allocation18 + $0x124] ss:$8 sps:$4 sm:$0xff]  }
 0x3f3   :  { %13350 = vmatpush3.bf16.msra.mxu1 %v14760_v53 }
 0x3f4   :  { %13351 = vmatprep.subr.bf16.mxu1 %v14762_v63  ;;  %14086 = vmatpush3.bf16.msra.mxu0 %v14765_v38 }
 0x3f5   :  { %3665 = vmatmul.mubr.bf16.gmra.mxu1 %v16567_v27  ;;  %3778 = vmatmul.mubr.bf16.gmra.mxu0 %v16565_v6 }
 0x3f6   :  { %3674 = vmatprep.mubr.bf16.mxu1 %v16579_v52  ;;  %3787 = vmatprep.mubr.bf16.mxu0 %v16205_v0 }
 0x3f7   :  { %13352 = vmatpush3.bf16.msra.mxu1 %v14764_v43  ;;  %14087 = vmatprep.subr.bf16.mxu0 %v14767_v55 }
 0x3f8   :  { %13353 = vmatprep.subr.bf16.mxu1 %v14766_v57  ;;  %14088 = vmatpush3.bf16.msra.mxu0 %v14767_v55  ;;  %v14791_v55 = vld [vmem:[#allocation18 + $0x20] ss:$8 sps:$4 sm:$0xff]  }
 0x3f9   :  { %14089 = vmatprep.subr.bf16.mxu0 %v14769_v17  ;;  %v14812_v57 = vld [vmem:[#allocation18 + $0x120] ss:$8 sps:$4 sm:$0xff]  }
 0x3fb   :  { %13354 = vmatpush3.bf16.msra.mxu1 %v14768_v8  ;;  %v14820_v8 = vld [vmem:[#allocation18 + $0x114] ss:$8 sps:$4 sm:$0xff]  }
 0x3fc   :  { %14090 = vmatpush3.bf16.msra.mxu0 %v14769_v17  ;;  %4394 = vmatprep.subr.bf16.mxu1 %v14772_v9  ;;  %v14799_v17 = vld [vmem:[#allocation18 + $0x14] ss:$8 sps:$4 sm:$0xff]  }
 0x3fd   :  { %3675 = vmatmul.mubr.bf16.gmra.mxu1 %v16581_v11  ;;  %3788 = vmatmul.mubr.bf16.gmra.mxu0 %v16584_v21 }
 0x3fe   :  { %3684 = vmatprep.mubr.bf16.mxu1 %v16595_v3  ;;  %3797 = vmatprep.mubr.bf16.mxu0 %v16205_v0 }
 0x3ff   :  { %4856 = vmatprep.subr.bf16.mxu0 %v14784_v12  ;;  %v14818_v12 = vld [vmem:[#allocation18 + $0x110] ss:$8 sps:$4 sm:$0xff]  }
 0x405   :  { %3685 = vmatmul.mubr.bf16.gmra.mxu1 %v16599_v29  ;;  %3798 = vmatmul.mubr.bf16.gmra.mxu0 %v16597_v40 }
 0x406   :  { %3694 = vmatprep.mubr.bf16.mxu1 %v16611_v41  ;;  %3807 = vmatprep.mubr.bf16.mxu0 %v16205_v0 }
 0x40d   :  { %3695 = vmatmul.mubr.bf16.gmra.mxu1 %v16613_v36  ;;  %3808 = vmatmul.mubr.bf16.gmra.mxu0 %v16616_v51 }
 0x40e   :  { %3704 = vmatprep.mubr.bf16.mxu1 %v16627_v42  ;;  %3817 = vmatprep.mubr.bf16.mxu0 %v16205_v0 }
 0x415   :  { %3705 = vmatmul.mubr.bf16.gmra.mxu1 %v16631_v19  ;;  %3818 = vmatmul.mubr.bf16.gmra.mxu0 %v16629_v44 }
 0x416   :  { %3860 = vmatprep.mubr.bf16.mxu1 %v16512_v13  ;;  %14091 = vmatprep.mubr.bf16.mxu0 %v16517_v22  ;;  %v14773_v22 = vld [vmem:[#allocation18 + $0x60] ss:$8 sps:$4 sm:$0xff]  }
 0x41d   :  { %v16702_v48 = vpop.f32.mrf.mxu0  ;;  %v16704_v20 = vpop.f32.mrf.mxu1  ;;  %3861 = vmatmul.mubr.bf16.vlgmr.msra.gmra.mxu1 %v16514_v60  ;;  %14092 = vmatmul.mubr.bf16.vlgmr.msra.gmra.mxu0 %v16532_v26 }
 0x41e   :  { %3868 = vmatprep.mubr.bf16.mxu1 %v16530_v1  ;;  %14095 = vmatprep.mubr.bf16.mxu0 %v16551_v10  ;;  %v14776_v10 = vld [vmem:[#allocation18 + $0x50] ss:$8 sps:$4 sm:$0xff]  }
 0x41f   :  { %4395 = vmatpush1.bf16.msra.mxu1 %v14770_v15  ;;  %v16710_v0 = vpop.f32.mrf.mxu0  ;;  %v16712_v13 = vpop.f32.mrf.mxu1  ;;  %4857 = vmatpush1.bf16.msra.mxu0 %v14782_v28  ;;  %v14805_v15 = vld [vmem:[#allocation18 + $0x4] ss:$8 sps:$4 sm:$0xff]  }
 0x420   :  { %4396 = vmatprep.subr.bf16.mxu1 %v14775_v33  ;;  %4858 = vmatprep.subr.bf16.mxu0 %v14790_v49  ;;  %v14826_v28 = vld [vmem:[#allocation18 + $0x104] ss:$8 sps:$4 sm:$0xff]  }
 0x421   :  { %v16714_v50 = vpop.f32.mrf.mxu0  ;;  %v16716_v60 = vpop.f32.mrf.mxu1 }
 0x423   :  { %4397 = vmatpush1.bf16.msra.mxu1 %v14773_v22  ;;  %v16718_v1 = vpop.f32.mrf.mxu0  ;;  %v16720_v26 = vpop.f32.mrf.mxu1  ;;  %4859 = vmatpush1.bf16.msra.mxu0 %v14788_v24 }
 0x424   :  { %4398 = vmatprep.subr.bf16.mxu1 %v14778_v25  ;;  %4860 = vmatprep.subr.bf16.mxu0 %v14796_v34  ;;  %v14803_v25 = vld [vmem:[#allocation18] ss:$8 sps:$4 sm:$0xff]  }
 0x425   :  { %v16722_v31 = vpop.f32.mrf.mxu0  ;;  %v16724_v39 = vpop.f32.mrf.mxu1  ;;  %3869 = vmatmul.mubr.bf16.gmra.mxu1 %v16534_v46  ;;  %14096 = vmatmul.mubr.bf16.gmra.mxu0 %v16565_v6  ;;  %v14824_v34 = vld [vmem:[#allocation18 + $0x100] ss:$8 sps:$4 sm:$0xff]  }
 0x426   :  { %3876 = vmatprep.mubr.bf16.mxu1 %v16546_v7  ;;  %14099 = vmatprep.mubr.bf16.mxu0 %v16584_v21  ;;  %v14785_v21 = vld [vmem:[#allocation18 + $0x30] ss:$8 sps:$4 sm:$0xff]  }
 0x427   :  { %4399 = vmatpush1.bf16.msra.mxu1 %v14776_v10  ;;  %v16730_v4 = vpop.f32.mrf.mxu0  ;;  %v16732_v59 = vpop.f32.mrf.mxu1  ;;  %4861 = vmatpush1.bf16.msra.mxu0 %v14794_v61  ;;  %v14811_v10 = vld [vmem:[#allocation18 + $0xf4] ss:$8 sps:$4 sm:$0xff]  }
 0x428   :  { %4400 = vmatprep.subr.bf16.mxu1 %v14781_v23  ;;  %4862 = vmatprep.subr.bf16.mxu0 %v14802_v62  ;;  %v14832_v61 = vld [vmem:[#allocation18 + $0x1f4] ss:$8 sps:$4 sm:$0xff]  }
 0x429   :  { %v16734_v45 = vpop.f32.mrf.mxu0  ;;  %v16736_v46 = vpop.f32.mrf.mxu1 }
 0x42b   :  { %4401 = vmatpush1.bf16.msra.mxu1 %v14779_v14  ;;  %v16738_v7 = vpop.f32.mrf.mxu0  ;;  %v16740_v6 = vpop.f32.mrf.mxu1  ;;  %4863 = vmatpush1.bf16.msra.mxu0 %v14800_v56  ;;  %v14830_v14 = vld [vmem:[#allocation18 + $0x1f0] ss:$8 sps:$4 sm:$0xff]   ;;  %v14817_v56 = vld [vmem:[#allocation18 + $0xe4] ss:$8 sps:$4 sm:$0xff]  }
 0x42c   :  { %4402 = vmatprep.subr.bf16.mxu1 %v14787_v2  ;;  %4864 = vmatprep.subr.bf16.mxu0 %v14808_v5  ;;  %v14838_v2 = vld [vmem:[#allocation18 + $0x1e4] ss:$8 sps:$4 sm:$0xff]  }
 0x42d   :  { %v16742_v38 = vpop.f32.mrf.mxu0  ;;  %v16744_v53 = vpop.f32.mrf.mxu1  ;;  %3877 = vmatmul.mubr.bf16.gmra.mxu1 %v16548_v18  ;;  %14100 = vmatmul.mubr.bf16.gmra.mxu0 %v16597_v40 }
 0x42e   :  { %3884 = vmatprep.mubr.bf16.mxu1 %v16563_v58  ;;  %14103 = vmatprep.mubr.bf16.mxu0 %v16616_v51  ;;  %v14797_v51 = vld [vmem:[#allocation18 + $0x10] ss:$8 sps:$4 sm:$0xff]  }
 0x42f   :  { %4403 = vmatpush1.bf16.msra.mxu1 %v14785_v21  ;;  %v16750_v63 = vpop.f32.mrf.mxu0  ;;  %v16752_v43 = vpop.f32.mrf.mxu1  ;;  %4865 = vmatpush1.bf16.msra.mxu0 %v14806_v37 }
 0x430   :  { %4404 = vmatprep.subr.bf16.mxu1 %v14793_v16  ;;  %4866 = vmatprep.subr.bf16.mxu0 %v14814_v47  ;;  %v14815_v47 = vld [vmem:[#allocation18 + $0xe0] ss:$8 sps:$4 sm:$0xff]  }
 0x431   :  { %v16754_v9 = vpop.f32.mrf.mxu0  ;;  %v16756_v18 = vpop.f32.mrf.mxu1 }
 0x433   :  { %4405 = vmatpush1.bf16.msra.mxu1 %v14791_v55  ;;  %v16758_v58 = vpop.f32.mrf.mxu0  ;;  %v16760_v40 = vpop.f32.mrf.mxu1  ;;  %4867 = vmatpush1.bf16.msra.mxu0 %v14812_v57  ;;  %v14836_v55 = vld [vmem:[#allocation18 + $0x1e0] ss:$8 sps:$4 sm:$0xff]   ;;  %v14823_v57 = vld [vmem:[#allocation18 + $0xd4] ss:$8 sps:$4 sm:$0xff]  }
 0x434   :  { %4406 = vmatprep.subr.bf16.mxu1 %v14799_v17  ;;  %4868 = vmatprep.subr.bf16.mxu0 %v14820_v8  ;;  %v14844_v17 = vld [vmem:[#allocation18 + $0x1d4] ss:$8 sps:$4 sm:$0xff]  }
 0x435   :  { %v16762_v33 = vpop.f32.mrf.mxu0  ;;  %v16764_v49 = vpop.f32.mrf.mxu1  ;;  %3885 = vmatmul.mubr.bf16.gmra.mxu1 %v16567_v27  ;;  %14104 = vmatmul.mubr.bf16.gmra.mxu0 %v16629_v44  ;;  %v14809_v44 = vld [vmem:[#allocation18 + $0xf0] ss:$8 sps:$4 sm:$0xff]  }
 0x436   :  { %3892 = vmatprep.mubr.bf16.mxu1 %v16579_v52 }
 0x437   :  { %4407 = vmatpush1.bf16.msra.mxu1 %v14797_v51  ;;  %v16769_v22 = vpop.f32.mrf.mxu0  ;;  %v16771_v24 = vpop.f32.mrf.mxu1  ;;  %4869 = vmatpush1.bf16.msra.mxu0 %v14818_v12  ;;  %v14821_v12 = vld [vmem:[#allocation18 + $0xd0] ss:$8 sps:$4 sm:$0xff]  }
 0x438   :  { %4408 = vmatprep.subr.bf16.mxu1 %v14805_v15  ;;  %4870 = vmatprep.subr.bf16.mxu0 %v14826_v28  ;;  %v14842_v15 = vld [vmem:[#allocation18 + $0x1d0] ss:$8 sps:$4 sm:$0xff]   ;;  %v14829_v28 = vld [vmem:[#allocation18 + $0xc4] ss:$8 sps:$4 sm:$0xff]  }
 0x439   :  { %v16773_v23 = vpop.f32.mrf.mxu0  ;;  %v16775_v62 = vpop.f32.mrf.mxu1 }
 0x43b   :  { %4409 = vmatpush1.bf16.msra.mxu1 %v14803_v25  ;;  %v16777_v27 = vpop.f32.mrf.mxu0  ;;  %v16779_v52 = vpop.f32.mrf.mxu1  ;;  %4871 = vmatpush1.bf16.msra.mxu0 %v14824_v34  ;;  %v14850_v25 = vld [vmem:[#allocation18 + $0x1c4] ss:$8 sps:$4 sm:$0xff]   ;;  %v16799_v34 = vld [vmem:[#allocation17] sm:$0xff] }
 0x43c   :  { %4410 = vmatprep.subr.bf16.mxu1 %v14811_v10  ;;  %4872 = vmatprep.subr.bf16.mxu0 %v14832_v61 }
 0x43d   :  { %v16781_v5 = vpop.f32.mrf.mxu0  ;;  %v16783_v21 = vpop.f32.mrf.mxu1  ;;  %3893 = vmatmul.mubr.bf16.gmra.mxu1 %v16581_v11 }
 0x43e   :  { %3900 = vmatprep.mubr.bf16.mxu1 %v16595_v3 }
 0x43f   :  { %4411 = vmatpush2.bf16.msra.mxu1 %v14809_v44  ;;  %v16787_v37 = vpop.f32.mrf.mxu0  ;;  %v16789_v16 = vpop.f32.mrf.mxu1  ;;  %4873 = vmatpush2.bf16.msra.mxu0 %v14830_v14  ;;  %v16808_v44 = vrot.slane %v16799_v34, %v16490_v30 }
 0x440   :  { %4412 = vmatprep.subr.bf16.mxu1 %v14817_v56  ;;  %4874 = vmatprep.subr.bf16.mxu0 %v14838_v2  ;;  %v14827_v2 = vld [vmem:[#allocation18 + $0xc0] ss:$8 sps:$4 sm:$0xff]  }
 0x441   :  { %v16791_v8 = vpop.f32.mrf.mxu0  ;;  %v16793_v51 = vpop.f32.mrf.mxu1 }
 0x443   :  { %4413 = vmatpush2.bf16.msra.mxu1 %v14815_v47  ;;  %v16795_v11 = vpop.f32.mrf.mxu0  ;;  %v16797_v3 = vpop.f32.mrf.mxu1  ;;  %4875 = vmatpush2.bf16.msra.mxu0 %v14836_v55  ;;  %v14848_v47 = vld [vmem:[#allocation18 + $0x1c0] ss:$8 sps:$4 sm:$0xff]   ;;  %v3191_v55 = vadd.f32 %v16718_v1, %v16808_v44 }
 0x444   :  { %4414 = vmatprep.subr.bf16.mxu1 %v14823_v57  ;;  %4876 = vmatprep.subr.bf16.mxu0 %v14844_v17  ;;  %v14835_v57 = vld [vmem:[#allocation18 + $0xb4] ss:$8 sps:$4 sm:$0xff]  }
 0x445   :  { %v16801_v10 = vpop.f32.mrf.mxu0  ;;  %v16803_v61 = vpop.f32.mrf.mxu1  ;;  %3901 = vmatmul.mubr.bf16.gmra.mxu1 %v16599_v29  ;;  %v14856_v29 = vld [vmem:[#allocation18 + $0x1b4] ss:$8 sps:$4 sm:$0xff]   ;;  %v3304_v1 = vadd.f32 %v16720_v26, %v3191_v55  ;;  %v14839_v55 = vld [vmem:[#allocation18 + $0xa0] ss:$8 sps:$4 sm:$0xff]  }
 0x446   :  { %18507 = vst [vmem:[#allocation31_spill] sm:$0xff] %v16801_v10  ;;  %18508 = vst [vmem:[#allocation32_spill] sm:$0xff] %v16803_v61  ;;  %3908 = vmatprep.mubr.bf16.mxu1 %v16611_v41  ;;  %v3187_v41 = vadd.f32 %v16710_v0, %v16808_v44  ;;  %v14854_v61 = vld [vmem:[#allocation18 + $0x1b0] ss:$8 sps:$4 sm:$0xff]   ;;  %v16835_v0 = vrot.slane %v16799_v34, %v16493_v32  ;;  %v14868_v32 = vld [vmem:[#allocation18 + $0x194] ss:$8 sps:$4 sm:$0xff]  }
 0x447   :  { %4415 = vmatpush2.bf16.msra.mxu1 %v14821_v12  ;;  %v16811_v14 = vpop.f32.mrf.mxu0  ;;  %v16813_v56 = vpop.f32.mrf.mxu1  ;;  %4877 = vmatpush2.bf16.msra.mxu0 %v14842_v15  ;;  %v14833_v15 = vld [vmem:[#allocation18 + $0xb0] ss:$8 sps:$4 sm:$0xff]  }
 0x448   :  { %4416 = vmatprep.subr.bf16.mxu1 %v14829_v28  ;;  %4878 = vmatprep.subr.bf16.mxu0 %v14850_v25  ;;  %v14841_v28 = vld [vmem:[#allocation18 + $0xa4] ss:$8 sps:$4 sm:$0xff]  }
 0x449   :  { %v16817_v17 = vpop.f32.mrf.mxu0  ;;  %v16819_v35 = vpop.f32.mrf.mxu1  ;;  %v14862_v25 = vld [vmem:[#allocation18 + $0x1a4] ss:$8 sps:$4 sm:$0xff]  }
 0x44a   :  { %18509 = vst [vmem:[#allocation33_spill] sm:$0xff] %v16819_v35 }
 0x44b   :  { %4417 = vmatpush2.bf16.msra.mxu1 %v14827_v2  ;;  %v16823_v12 = vpop.f32.mrf.mxu0  ;;  %v16825_v30 = vpop.f32.mrf.mxu1  ;;  %4879 = vmatpush2.bf16.msra.mxu0 %v14848_v47  ;;  %v3300_v2 = vadd.f32 %v16712_v13, %v3187_v41  ;;  %v3201_v13 = vadd.f32 %v16738_v7, %v16808_v44 }
 0x44c   :  { %4418 = vmatprep.subr.bf16.mxu1 %v14835_v57  ;;  %4880 = vmatprep.subr.bf16.mxu0 %v14856_v29  ;;  %v14860_v57 = vld [vmem:[#allocation18 + $0x1a0] ss:$8 sps:$4 sm:$0xff]   ;;  %v3189_v29 = vadd.f32 %v16714_v50, %v16835_v0 }
 0x44d   :  { %v16828_v10 = vpop.f32.mrf.mxu0  ;;  %v16830_v35 = vpop.f32.mrf.mxu1  ;;  %3909 = vmatmul.mubr.bf16.gmra.mxu1 %v16613_v36  ;;  %v4030_v36 = vmax.f32 %v3304_v1, 0.0 }
 0x44e   :  { %18510 = vst [vmem:[#allocation34_spill] sm:$0xff] %v16828_v10  ;;  %18511 = vst [vmem:[#allocation35_spill] sm:$0xff] %v16830_v35  ;;  %3916 = vmatprep.mubr.bf16.mxu1 %v16627_v42  ;;  %v14847_v35 = vld [vmem:[#allocation18 + $0x94] ss:$8 sps:$4 sm:$0xff]   ;;  %v3197_v10 = vadd.f32 %v16730_v4, %v16808_v44  ;;  %v3302_v7 = vadd.f32 %v16716_v60, %v3189_v29 }
 0x44f   :  { %4419 = vmatpush2.bf16.msra.mxu1 %v14833_v15  ;;  %v16839_v26 = vpop.f32.mrf.mxu0  ;;  %v16841_v47 = vpop.f32.mrf.mxu1  ;;  %4881 = vmatpush2.bf16.msra.mxu0 %v14854_v61  ;;  %v3185_v15 = vadd.f32 %v16702_v48, %v16835_v0  ;;  %v4023_v61 = vmax.f32 %v3300_v2, 0.0  ;;  %v14874_v48 = vld [vmem:[#allocation18 + $0x184] ss:$8 sps:$4 sm:$0xff]   ;;  %v3314_v2 = vadd.f32 %v16740_v6, %v3201_v13  ;;  %v14872_v6 = vld [vmem:[#allocation18 + $0x180] ss:$8 sps:$4 sm:$0xff]  }
 0x450   :  { %18512 = vst [vmem:[#allocation36_spill] sm:$0xff] %v16841_v47  ;;  %4420 = vmatprep.subr.bf16.mxu1 %v14841_v28  ;;  %4882 = vmatprep.subr.bf16.mxu0 %v14862_v25  ;;  %v14845_v28 = vld [vmem:[#allocation18 + $0x90] ss:$8 sps:$4 sm:$0xff]   ;;  %v3310_v60 = vadd.f32 %v16732_v59, %v3197_v10  ;;  %v4029_v29 = vmax.f32 %v3302_v7, 0.0  ;;  %v3211_v59 = vadd.f32 %v16758_v58, %v16808_v44 }
 0x451   :  { %v16847_v42 = vpop.f32.mrf.mxu0  ;;  %v16849_v41 = vpop.f32.mrf.mxu1  ;;  %v14866_v25 = vld [vmem:[#allocation18 + $0x190] ss:$8 sps:$4 sm:$0xff]   ;;  %v4044_v13 = vmax.f32 %v3314_v2, 0.0  ;;  %v3207_v7 = vadd.f32 %v16750_v63, %v16808_v44 }
 0x452   :  { %18513 = vst [vmem:[#allocation37_spill] sm:$0xff] %v16847_v42  ;;  %18514 = vst [vmem:[#allocation38_spill] sm:$0xff] %v16849_v41  ;;  %v16860_v42 = vpack.c.bf16 %v4030_v36, %v4023_v61  ;;  %v14853_v41 = vld [vmem:[#allocation18 + $0x84] ss:$8 sps:$4 sm:$0xff]   ;;  %v3199_v36 = vadd.f32 %v16734_v45, %v16835_v0  ;;  %v14857_v2 = vld [vmem:[#allocation18 + $0x270] ss:$8 sps:$4 sm:$0xff]  }
 0x453   :  { %4421 = vmatpush2.bf16.msra.mxu1 %v14839_v55  ;;  %v16855_v50 = vpop.f32.mrf.mxu0  ;;  %v16857_v1 = vpop.f32.mrf.mxu1  ;;  %4883 = vmatpush2.bf16.msra.mxu0 %v14860_v57  ;;  %v3298_v55 = vadd.f32 %v16704_v20, %v3185_v15  ;;  %v14880_v20 = vld [vmem:[#allocation18 + $0x374] ss:$8 sps:$4 sm:$0xff]  }
 0x454   :  { %4422 = vmatprep.subr.bf16.mxu1 %v14847_v35  ;;  %4884 = vmatprep.subr.bf16.mxu0 %v14868_v32  ;;  %v14851_v32 = vld [vmem:[#allocation18 + $0x80] ss:$8 sps:$4 sm:$0xff]  }
 0x455   :  { %v16863_v47 = vpop.f32.mrf.mxu0  ;;  %v16865_v4 = vpop.f32.mrf.mxu1  ;;  %3917 = vmatmul.mubr.bf16.gmra.mxu1 %v16631_v19  ;;  %v14859_v19 = vld [vmem:[#allocation18 + $0x274] ss:$8 sps:$4 sm:$0xff]   ;;  %v4022_v61 = vmax.f32 %v3298_v55, 0.0 }
 0x456   :  { %18515 = vst [vmem:[#allocation39_spill] sm:$0xff] %v16863_v47  ;;  %18516 = vst [vmem:[#allocation40_spill] sm:$0xff] %v16865_v4  ;;  %4426 = vmatprep.mubr.bf16.mxu1 %v16860_v42  ;;  %v3312_v4 = vadd.f32 %v16736_v46, %v3199_v36  ;;  %v3209_v36 = vadd.f32 %v16754_v9, %v16835_v0 }
 0x457   :  { %4423 = vmatpush2.bf16.msra.mxu1 %v14845_v28  ;;  %v16871_v35 = vpop.f32.mrf.mxu0  ;;  %v16873_v57 = vpop.f32.mrf.mxu1  ;;  %4885 = vmatpush2.bf16.msra.mxu0 %v14866_v25  ;;  %v3195_v28 = vadd.f32 %v16722_v31, %v16835_v0  ;;  %v18519_v25 = vsub.s32 2, %v16487_v54  ;;  %v4134_v55 = vpack.c.bf16 %v4029_v29, %v4022_v61  ;;  %v14865_v31 = vld [vmem:[#allocation18 + $0x264] ss:$8 sps:$4 sm:$0xff]   ;;  %v14863_v29 = vld [vmem:[#allocation18 + $0x260] ss:$8 sps:$4 sm:$0xff]  }
 0x458   :  { %4424 = vmatprep.subr.bf16.mxu1 %v14853_v41  ;;  %4886 = vmatprep.subr.bf16.mxu0 %v14874_v48  ;;  %v4037_v41 = vmax.f32 %v3310_v60, 0.0 }
 0x459   :  { %v16879_v10 = vpop.f32.mrf.mxu0  ;;  %v16881_v15 = vpop.f32.mrf.mxu1  ;;  %v16888_v45 = vrot.slane %v16799_v34, %v18519_v25  ;;  %v3324_v25 = vadd.f32 %v16760_v40, %v3211_v59  ;;  %v3308_v63 = vadd.f32 %v16724_v39, %v3195_v28  ;;  %v4043_v40 = vmax.f32 %v3312_v4, 0.0 }
 0x45a   :  { %18517 = vst [vmem:[#allocation41_spill] sm:$0xff] %v16879_v10  ;;  %18518 = vst [vmem:[#allocation42_spill] sm:$0xff] %v16881_v15  ;;  %v16898_v47 = vpack.c.bf16 %v4044_v13, %v4037_v41  ;;  %v3320_v10 = vadd.f32 %v16752_v43, %v3207_v7  ;;  %v3217_v4 = vadd.f32 %v16769_v22, %v16808_v44 }
 0x45b   :  { %4425 = vmatpush2.bf16.msra.mxu1 %v14851_v32  ;;  %v16892_v48 = vpop.f32.mrf.mxu0  ;;  %v16894_v58 = vpop.f32.mrf.mxu1  ;;  %4887 = vmatpush2.bf16.msra.mxu0 %v14872_v6  ;;  %v4058_v39 = vmax.f32 %v3324_v25, 0.0  ;;  %v4036_v59 = vmax.f32 %v3308_v63, 0.0  ;;  %v14877_v25 = vld [vmem:[#allocation18 + $0x244] ss:$8 sps:$4 sm:$0xff]  }
 0x45c   :  { %5318 = vmatprep.subr.bf16.mxu1 %v14859_v19  ;;  %5780 = vmatprep.subr.bf16.mxu0 %v14880_v20  ;;  %v14871_v19 = vld [vmem:[#allocation18 + $0x254] ss:$8 sps:$4 sm:$0xff]   ;;  %v3221_v20 = vadd.f32 %v16777_v27, %v16808_v44  ;;  %v4051_v41 = vmax.f32 %v3320_v10, 0.0 }
 0x45d   :  { %v3410_v15 = vpop.f32.mrf.mxu1  ;;  %v3523_v60 = vpop.f32.mrf.mxu0  ;;  %v4141_v27 = vpack.c.bf16 %v4043_v40, %v4036_v59  ;;  %v3330_v40 = vadd.f32 %v16771_v24, %v3217_v4  ;;  %v3231_v24 = vadd.f32 %v16795_v11, %v16808_v44  ;;  %v3215_v4 = vadd.f32 %v16762_v33, %v16835_v0 }
 0x45e   :  { %v3411_v32 = vadd.f32 %v3410_v15, %v16888_v45  ;;  %4427 = vmatmul.mubr.bf16.vlgmr.msra.gmra.mxu1 %v4134_v55  ;;  %v3205_v15 = vadd.f32 %v16742_v38, %v16835_v0  ;;  %v3322_v55 = vadd.f32 %v16756_v18, %v3209_v36  ;;  %v3334_v38 = vadd.f32 %v16779_v52, %v3221_v20  ;;  %v14875_v52 = vld [vmem:[#allocation18 + $0x240] ss:$8 sps:$4 sm:$0xff]   ;;  %v14878_v20 = vld [vmem:[#allocation18 + $0x370] ss:$8 sps:$4 sm:$0xff]  }
 0x45f   :  { %4436 = vmatprep.mubr.bf16.mxu1 %v16898_v47  ;;  %5319 = vmatpush1.bf16.msra.mxu1 %v14857_v2  ;;  %v16904_v46 = vpop.f32.mrf.mxu1  ;;  %v16906_v6 = vpop.f32.mrf.mxu0  ;;  %v14869_v2 = vld [vmem:[#allocation18 + $0x250] ss:$8 sps:$4 sm:$0xff]   ;;  %v16923_v10 = vpack.c.bf16 %v4058_v39, %v4051_v41  ;;  %v3219_v39 = vadd.f32 %v16773_v23, %v16835_v0  ;;  %v4065_v23 = vmax.f32 %v3330_v40, 0.0  ;;  %v14892_v40 = vld [vmem:[#allocation18 + $0x354] ss:$8 sps:$4 sm:$0xff]  }
 0x460   :  { %5320 = vmatprep.subr.bf16.mxu1 %v14865_v31  ;;  %v3524_v61 = vadd.f32 %v3523_v60, %v3411_v32  ;;  %v3318_v22 = vadd.f32 %v16744_v53, %v3205_v15  ;;  %v4072_v59 = vmax.f32 %v3334_v38, 0.0 }
 0x461   :  { %v3414_v13 = vpop.f32.mrf.mxu1  ;;  %v3527_v43 = vpop.f32.mrf.mxu0  ;;  %v3332_v33 = vadd.f32 %v16775_v62, %v3219_v39 }
 0x462   :  { %v3415_v28 = vadd.f32 %v3414_v13, %v16888_v45  ;;  %v4024_v32 = vmax.f32 %v3524_v61, 0.0  ;;  %v4050_v41 = vmax.f32 %v3318_v22, 0.0  ;;  %v14889_v22 = vld [vmem:[#allocation18 + $0x224] ss:$8 sps:$4 sm:$0xff]  }
 0x463   :  { %5321 = vmatpush1.bf16.msra.mxu1 %v14863_v29  ;;  %v16917_v9 = vpop.f32.mrf.mxu1  ;;  %v16919_v7 = vpop.f32.mrf.mxu0 }
 0x464   :  { %v3528_v31 = vadd.f32 %v3527_v43, %v3415_v28  ;;  %5322 = vmatprep.subr.bf16.mxu1 %v14871_v19  ;;  %v4057_v19 = vmax.f32 %v3322_v55, 0.0  ;;  %v14883_v43 = vld [vmem:[#allocation18 + $0x234] ss:$8 sps:$4 sm:$0xff]   ;;  %v14886_v28 = vld [vmem:[#allocation18 + $0x364] ss:$8 sps:$4 sm:$0xff]   ;;  %v3227_v55 = vadd.f32 %v16787_v37, %v16808_v44 }
 0x465   :  { %v3420_v60 = vpop.f32.mrf.mxu1  ;;  %v3533_v63 = vpop.f32.mrf.mxu0 }
 0x466   :  { %v4031_v29 = vmax.f32 %v3528_v31, 0.0  ;;  %v3421_v13 = vadd.f32 %v3420_v60, %v16888_v45  ;;  %4437 = vmatmul.mubr.bf16.gmra.mxu1 %v4141_v27  ;;  %v4148_v38 = vpack.c.bf16 %v4057_v19, %v4050_v41  ;;  %v3340_v62 = vadd.f32 %v16789_v16, %v3227_v55 }
 0x467   :  { %4446 = vmatprep.mubr.bf16.mxu1 %v16923_v10  ;;  %5323 = vmatpush1.bf16.msra.mxu1 %v14869_v2  ;;  %v16929_v18 = vpop.f32.mrf.mxu1  ;;  %v16931_v36 = vpop.f32.mrf.mxu0  ;;  %v3241_v16 = vadd.f32 %v16823_v12, %v16808_v44 }
 0x468   :  { %v16935_v53 = vpack.c.bf16 %v4031_v29, %v4024_v32  ;;  %5324 = vmatprep.subr.bf16.mxu1 %v14877_v25  ;;  %v3534_v2 = vadd.f32 %v3533_v63, %v3421_v13  ;;  %v14881_v25 = vld [vmem:[#allocation18 + $0x230] ss:$8 sps:$4 sm:$0xff]   ;;  %v14884_v63 = vld [vmem:[#allocation18 + $0x360] ss:$8 sps:$4 sm:$0xff]   ;;  %v3344_v32 = vadd.f32 %v16797_v3, %v3231_v24  ;;  %v16952_v13 = vpack.c.bf16 %v4072_v59, %v4065_v23 }
 0x469   :  { %v3424_v15 = vpop.f32.mrf.mxu1  ;;  %v3537_v61 = vpop.f32.mrf.mxu0  ;;  %v3229_v59 = vadd.f32 %v16791_v8, %v16835_v0  ;;  %v14890_v24 = vld [vmem:[#allocation18 + $0x350] ss:$8 sps:$4 sm:$0xff]   ;;  %v3225_v23 = vadd.f32 %v16781_v5, %v16835_v0 }
 0x46a   :  { %v3425_v27 = vadd.f32 %v3424_v15, %v16888_v45  ;;  %4888 = vmatprep.mubr.bf16.mxu0 %v16935_v53 }
 0x46b   :  { %5325 = vmatpush1.bf16.msra.mxu1 %v14875_v52  ;;  %v16945_v31 = vpop.f32.mrf.mxu1  ;;  %v16947_v11 = vpop.f32.mrf.mxu0  ;;  %4889 = vmatmul.mubr.bf16.vlgmr.msra.gmra.mxu0 %v16860_v42  ;;  %v3328_v52 = vadd.f32 %v16764_v49, %v3215_v4  ;;  %v4038_v42 = vmax.f32 %v3534_v2, 0.0  ;;  %v14898_v2 = vld [vmem:[#allocation18 + $0x344] ss:$8 sps:$4 sm:$0xff]   ;;  %v3342_v5 = vadd.f32 %v16793_v51, %v3229_v59 }
 0x46c   :  { %v3538_v60 = vadd.f32 %v3537_v61, %v3425_v27  ;;  %5781 = vmatpush1.bf16.msra.mxu0 %v14878_v20  ;;  %5326 = vmatprep.subr.bf16.mxu1 %v14883_v43  ;;  %v14887_v20 = vld [vmem:[#allocation18 + $0x220] ss:$8 sps:$4 sm:$0xff]   ;;  %v4071_v43 = vmax.f32 %v3332_v33, 0.0  ;;  %v14895_v61 = vld [vmem:[#allocation18 + $0x214] ss:$8 sps:$4 sm:$0xff]  }
 0x46d   :  { %v3430_v29 = vpop.f32.mrf.mxu1  ;;  %v3543_v37 = vpop.f32.mrf.mxu0  ;;  %5782 = vmatprep.subr.bf16.mxu0 %v14886_v28  ;;  %v4086_v28 = vmax.f32 %v3344_v32, 0.0  ;;  %v4064_v27 = vmax.f32 %v3328_v52, 0.0  ;;  %v14896_v32 = vld [vmem:[#allocation18 + $0x340] ss:$8 sps:$4 sm:$0xff]   ;;  %v4085_v59 = vmax.f32 %v3342_v5, 0.0 }
 0x46e   :  { %v4045_v15 = vmax.f32 %v3538_v60, 0.0  ;;  %v3431_v19 = vadd.f32 %v3430_v29, %v16888_v45  ;;  %4447 = vmatmul.mubr.bf16.gmra.mxu1 %v4148_v38  ;;  %v3237_v38 = vadd.f32 %v16811_v14, %v16808_v44  ;;  %v14893_v60 = vld [vmem:[#allocation18 + $0x210] ss:$8 sps:$4 sm:$0xff]   ;;  %v14901_v29 = vld [vmem:[#allocation18 + $0x204] ss:$8 sps:$4 sm:$0xff]  }
 0x46f   :  { %4456 = vmatprep.mubr.bf16.mxu1 %v16952_v13  ;;  %5327 = vmatpush1.bf16.msra.mxu1 %v14881_v25  ;;  %v16958_v39 = vpop.f32.mrf.mxu1  ;;  %v16960_v3 = vpop.f32.mrf.mxu0  ;;  %v4079_v25 = vmax.f32 %v3340_v62, 0.0 }
 0x470   :  { %v16964_v49 = vpack.c.bf16 %v4045_v15, %v4038_v42  ;;  %5783 = vmatpush1.bf16.msra.mxu0 %v14884_v63  ;;  %5328 = vmatprep.subr.bf16.mxu1 %v14889_v22  ;;  %v3544_v55 = vadd.f32 %v3543_v37, %v3431_v19  ;;  %v4155_v63 = vpack.c.bf16 %v4071_v43, %v4064_v27  ;;  %v14904_v42 = vld [vmem:[#allocation18 + $0x334] ss:$8 sps:$4 sm:$0xff]   ;;  %v14899_v43 = vld [vmem:[#allocation18 + $0x200] ss:$8 sps:$4 sm:$0xff]  }
 0x471   :  { %v3434_v41 = vpop.f32.mrf.mxu1  ;;  %v3547_v4 = vpop.f32.mrf.mxu0  ;;  %5784 = vmatprep.subr.bf16.mxu0 %v14892_v40  ;;  %v3354_v37 = vadd.f32 %v16825_v30, %v3241_v16  ;;  %v16981_v52 = vpack.c.bf16 %v4086_v28, %v4079_v25  ;;  %v3338_v15 = vadd.f32 %v16783_v21, %v3225_v23  ;;  %v3350_v51 = vadd.f32 %v16813_v56, %v3237_v38  ;;  %v14907_v28 = vld [vmem:[#allocation18 + $0x2f4] ss:$8 sps:$4 sm:$0xff]  }
 0x472   :  { %v3435_v8 = vadd.f32 %v3434_v41, %v16888_v45  ;;  %4898 = vmatprep.mubr.bf16.mxu0 %v16964_v49  ;;  %v3251_v56 = vadd.f32 %v16855_v50, %v16808_v44  ;;  %v18520_v23 = vld [vmem:[#allocation31_spill] sm:$0xff]  ;;  %v3247_v38 = vadd.f32 %v16839_v26, %v16808_v44 }
 0x473   :  { %5329 = vmatpush1.bf16.msra.mxu1 %v14887_v20  ;;  %v16974_v33 = vpop.f32.mrf.mxu1  ;;  %v16976_v12 = vpop.f32.mrf.mxu0  ;;  %4899 = vmatmul.mubr.bf16.gmra.mxu0 %v16898_v47  ;;  %v4052_v47 = vmax.f32 %v3544_v55, 0.0  ;;  %v4100_v16 = vmax.f32 %v3354_v37, 0.0  ;;  %v4078_v27 = vmax.f32 %v3338_v15, 0.0  ;;  %v3235_v55 = vadd.f32 %v18520_v23, %v16835_v0  ;;  %v14908_v37 = vld [vmem:[#allocation18 + $0x320] ss:$8 sps:$4 sm:$0xff]  }
 0x474   :  { %v3548_v22 = vadd.f32 %v3547_v4, %v3435_v8  ;;  %5785 = vmatpush1.bf16.msra.mxu0 %v14890_v24  ;;  %5330 = vmatprep.subr.bf16.mxu1 %v14895_v61  ;;  %v3239_v24 = vadd.f32 %v16817_v17, %v16835_v0  ;;  %v14902_v61 = vld [vmem:[#allocation18 + $0x330] ss:$8 sps:$4 sm:$0xff]   ;;  %v4093_v25 = vmax.f32 %v3350_v51, 0.0 }
 0x475   :  { %v3440_v40 = vpop.f32.mrf.mxu1  ;;  %v3553_v14 = vpop.f32.mrf.mxu0  ;;  %5786 = vmatprep.subr.bf16.mxu0 %v14898_v2  ;;  %v14910_v2 = vld [vmem:[#allocation18 + $0x324] ss:$8 sps:$4 sm:$0xff]   ;;  %v4162_v5 = vpack.c.bf16 %v4085_v59, %v4078_v27  ;;  %v18523_v59 = vld [vmem:[#allocation36_spill] sm:$0xff] }
 0x476   :  { %v4059_v19 = vmax.f32 %v3548_v22, 0.0  ;;  %v3441_v62 = vadd.f32 %v3440_v40, %v16888_v45  ;;  %4457 = vmatmul.mubr.bf16.gmra.mxu1 %v4155_v63  ;;  %v14905_v63 = vld [vmem:[#allocation18 + $0x2f0] ss:$8 sps:$4 sm:$0xff]   ;;  %v18521_v22 = vld [vmem:[#allocation33_spill] sm:$0xff]  ;;  %v17010_v15 = vpack.c.bf16 %v4100_v16, %v4093_v25  ;;  %v14919_v27 = vld [vmem:[#allocation18 + $0x2d4] ss:$8 sps:$4 sm:$0xff]  }
 0x477   :  { %4466 = vmatprep.mubr.bf16.mxu1 %v16981_v52  ;;  %5331 = vmatpush1.bf16.msra.mxu1 %v14893_v60  ;;  %v16987_v20 = vpop.f32.mrf.mxu1  ;;  %v16989_v30 = vpop.f32.mrf.mxu0  ;;  %v14913_v40 = vld [vmem:[#allocation18 + $0x2e4] ss:$8 sps:$4 sm:$0xff]  }
 0x478   :  { %v16993_v21 = vpack.c.bf16 %v4059_v19, %v4052_v47  ;;  %5787 = vmatpush1.bf16.msra.mxu0 %v14896_v32  ;;  %5332 = vmatprep.subr.bf16.mxu1 %v14901_v29  ;;  %v3554_v8 = vadd.f32 %v3553_v14, %v3441_v62  ;;  %v3352_v32 = vadd.f32 %v18521_v22, %v3239_v24  ;;  %v14916_v47 = vld [vmem:[#allocation18 + $0x314] ss:$8 sps:$4 sm:$0xff]   ;;  %v14922_v25 = vld [vmem:[#allocation18 + $0x304] ss:$8 sps:$4 sm:$0xff]  }
 0x479   :  { %v3444_v41 = vpop.f32.mrf.mxu1  ;;  %v3557_v4 = vpop.f32.mrf.mxu0  ;;  %5788 = vmatprep.subr.bf16.mxu0 %v14904_v42  ;;  %v3364_v14 = vadd.f32 %v16857_v1, %v3251_v56  ;;  %v18522_v19 = vld [vmem:[#allocation32_spill] sm:$0xff]  ;;  %v3360_v24 = vadd.f32 %v18523_v59, %v3247_v38  ;;  %v18524_v56 = vld [vmem:[#allocation37_spill] sm:$0xff] }
 0x47a   :  { %v3445_v17 = vadd.f32 %v3444_v41, %v16888_v45  ;;  %4908 = vmatprep.mubr.bf16.mxu0 %v16993_v21  ;;  %v3348_v62 = vadd.f32 %v18522_v19, %v3235_v55  ;;  %v4099_v16 = vmax.f32 %v3352_v32, 0.0  ;;  %v3249_v41 = vadd.f32 %v18524_v56, %v16835_v0 }
 0x47b   :  { %5333 = vmatpush1.bf16.msra.mxu1 %v14899_v43  ;;  %v17003_v60 = vpop.f32.mrf.mxu1  ;;  %v17005_v50 = vpop.f32.mrf.mxu0  ;;  %4909 = vmatmul.mubr.bf16.gmra.mxu0 %v16923_v10  ;;  %v4066_v10 = vmax.f32 %v3554_v8, 0.0  ;;  %v4114_v23 = vmax.f32 %v3364_v14, 0.0  ;;  %v3261_v55 = vadd.f32 %v16892_v48, %v16808_v44 }
 0x47c   :  { %v3558_v29 = vadd.f32 %v3557_v4, %v3445_v17  ;;  %5789 = vmatpush1.bf16.msra.mxu0 %v14902_v61  ;;  %5334 = vmatprep.subr.bf16.mxu1 %v14907_v28  ;;  %v14911_v28 = vld [vmem:[#allocation18 + $0x2e0] ss:$8 sps:$4 sm:$0xff]   ;;  %v4092_v38 = vmax.f32 %v3348_v62, 0.0 }
 0x47d   :  { %v3450_v42 = vpop.f32.mrf.mxu1  ;;  %v3563_v26 = vpop.f32.mrf.mxu0  ;;  %5790 = vmatprep.subr.bf16.mxu0 %v14910_v2  ;;  %v14914_v2 = vld [vmem:[#allocation18 + $0x310] ss:$8 sps:$4 sm:$0xff]  }
 0x47e   :  { %v4073_v51 = vmax.f32 %v3558_v29, 0.0  ;;  %v3451_v43 = vadd.f32 %v3450_v42, %v16888_v45  ;;  %4467 = vmatmul.mubr.bf16.gmra.mxu1 %v4162_v5  ;;  %v4107_v29 = vmax.f32 %v3360_v24, 0.0  ;;  %v14917_v42 = vld [vmem:[#allocation18 + $0x2d0] ss:$8 sps:$4 sm:$0xff]   ;;  %v14928_v24 = vld [vmem:[#allocation18 + $0x3f4] ss:$8 sps:$4 sm:$0xff]  }
 0x47f   :  { %4476 = vmatprep.mubr.bf16.mxu1 %v17010_v15  ;;  %5335 = vmatpush2.bf16.msra.mxu1 %v14905_v63  ;;  %v17016_v61 = vpop.f32.mrf.mxu1  ;;  %v17018_v1 = vpop.f32.mrf.mxu0  ;;  %v18525_v63 = vld [vmem:[#allocation34_spill] sm:$0xff] }
 0x480   :  { %v17022_v4 = vpack.c.bf16 %v4073_v51, %v4066_v10  ;;  %5791 = vmatpush1.bf16.msra.mxu0 %v14908_v37  ;;  %5336 = vmatprep.subr.bf16.mxu1 %v14913_v40  ;;  %v3245_v5 = vadd.f32 %v18525_v63, %v16835_v0  ;;  %v3564_v22 = vadd.f32 %v3563_v26, %v3451_v43  ;;  %v2265_v40 = vsub.s32 3, %v16487_v54  ;;  %v18526_v26 = vld [vmem:[#allocation38_spill] sm:$0xff]  ;;  %v14931_v63 = vld [vmem:[#allocation18 + $0x2b4] ss:$8 sps:$4 sm:$0xff]  }
 0x481   :  { %v3454_v8 = vpop.f32.mrf.mxu1  ;;  %v3567_v17 = vpop.f32.mrf.mxu0  ;;  %5792 = vmatprep.subr.bf16.mxu0 %v14916_v47  ;;  %v3257_v37 = vadd.f32 %v16871_v35, %v16808_v44  ;;  %v4169_v47 = vpack.c.bf16 %v4099_v16, %v4092_v38  ;;  %v3362_v19 = vadd.f32 %v18526_v26, %v3249_v41  ;;  %v14920_v10 = vld [vmem:[#allocation18 + $0x300] ss:$8 sps:$4 sm:$0xff]   ;;  %v14925_v51 = vld [vmem:[#allocation18 + $0x2c4] ss:$8 sps:$4 sm:$0xff]   ;;  %v3374_v44 = vadd.f32 %v16894_v58, %v3261_v55 }
 0x482   :  { %v3455_v32 = vadd.f32 %v3454_v8, %v16888_v45  ;;  %4918 = vmatprep.mubr.bf16.mxu0 %v17022_v4  ;;  %v17040_v59 = vpack.c.bf16 %v4114_v23, %v4107_v29  ;;  %v14923_v23 = vld [vmem:[#allocation18 + $0x2c0] ss:$8 sps:$4 sm:$0xff]  }
 0x483   :  { %5337 = vmatpush2.bf16.msra.mxu1 %v14911_v28  ;;  %v17033_v48 = vpop.f32.mrf.mxu1  ;;  %v17035_v14 = vpop.f32.mrf.mxu0  ;;  %4919 = vmatmul.mubr.bf16.gmra.mxu0 %v16952_v13  ;;  %v18527_v28 = vld [vmem:[#allocation35_spill] sm:$0xff]  ;;  %v4080_v13 = vmax.f32 %v3564_v22, 0.0  ;;  %v3370_v41 = vadd.f32 %v16873_v57, %v3257_v37  ;;  %v4113_v55 = vmax.f32 %v3362_v19, 0.0  ;;  %v14934_v37 = vld [vmem:[#allocation18 + $0x3e4] ss:$8 sps:$4 sm:$0xff]  }
 0x484   :  { %v3568_v62 = vadd.f32 %v3567_v17, %v3455_v32  ;;  %5793 = vmatpush1.bf16.msra.mxu0 %v14914_v2  ;;  %5338 = vmatprep.subr.bf16.mxu1 %v14919_v27  ;;  %v3358_v56 = vadd.f32 %v18527_v28, %v3245_v5  ;;  %v17046_v2 = vrot.slane %v16799_v34, %v2265_v40  ;;  %v18528_v17 = vld [vmem:[#allocation41_spill] sm:$0xff]  ;;  %v14926_v57 = vld [vmem:[#allocation18 + $0x3f0] ss:$8 sps:$4 sm:$0xff]   ;;  %v4128_v5 = vmax.f32 %v3374_v44, 0.0 }
 0x485   :  { %v3460_v35 = vpop.f32.mrf.mxu1  ;;  %v3573_v43 = vpop.f32.mrf.mxu0  ;;  %5794 = vmatprep.subr.bf16.mxu0 %v14922_v25  ;;  %v3259_v25 = vadd.f32 %v18528_v17, %v16835_v0  ;;  %v14929_v44 = vld [vmem:[#allocation18 + $0x2b0] ss:$8 sps:$4 sm:$0xff]   ;;  %v14932_v28 = vld [vmem:[#allocation18 + $0x3e0] ss:$8 sps:$4 sm:$0xff]  }
 0x486   :  { %v4087_v8 = vmax.f32 %v3568_v62, 0.0  ;;  %v3461_v16 = vadd.f32 %v3460_v35, %v16888_v45  ;;  %4477 = vmatmul.mubr.bf16.gmra.mxu1 %v4169_v47  ;;  %v3417_v22 = vadd.f32 %v16917_v9, %v17046_v2  ;;  %v4106_v40 = vmax.f32 %v3358_v56, 0.0  ;;  %v14937_v56 = vld [vmem:[#allocation18 + $0x2a4] ss:$8 sps:$4 sm:$0xff]  }
 0x487   :  { %4486 = vmatprep.mubr.bf16.mxu1 %v17040_v59  ;;  %5339 = vmatpush2.bf16.msra.mxu1 %v14917_v42  ;;  %v17049_v58 = vpop.f32.mrf.mxu1  ;;  %v17051_v27 = vpop.f32.mrf.mxu0  ;;  %v18529_v42 = vld [vmem:[#allocation39_spill] sm:$0xff]  ;;  %v4121_v62 = vmax.f32 %v3370_v41, 0.0 }
 0x488   :  { %v17055_v38 = vpack.c.bf16 %v4087_v8, %v4080_v13  ;;  %5795 = vmatpush1.bf16.msra.mxu0 %v14920_v10  ;;  %5340 = vmatprep.subr.bf16.mxu1 %v14925_v51  ;;  %v3255_v47 = vadd.f32 %v18529_v42, %v16835_v0  ;;  %v3574_v26 = vadd.f32 %v3573_v43, %v3461_v16  ;;  %v14940_v41 = vld [vmem:[#allocation18 + $0x3d4] ss:$8 sps:$4 sm:$0xff]  }
 0x489   :  { %v3464_v32 = vpop.f32.mrf.mxu1  ;;  %v3577_v29 = vpop.f32.mrf.mxu0  ;;  %5796 = vmatprep.subr.bf16.mxu0 %v14928_v24  ;;  %v3413_v10 = vadd.f32 %v16904_v46, %v17046_v2  ;;  %v4176_v35 = vpack.c.bf16 %v4113_v55, %v4106_v40  ;;  %v18530_v24 = vld [vmem:[#allocation42_spill] sm:$0xff]  ;;  %v3530_v13 = vadd.f32 %v16919_v7, %v3417_v22  ;;  %v17072_v16 = vpack.c.bf16 %v4128_v5, %v4121_v62 }
 0x48a   :  { %v3465_v19 = vadd.f32 %v3464_v32, %v16888_v45  ;;  %4928 = vmatprep.mubr.bf16.mxu0 %v17055_v38  ;;  %v3372_v0 = vadd.f32 %v18530_v24, %v3259_v25  ;;  %v3427_v42 = vadd.f32 %v16945_v31, %v17046_v2  ;;  %v14941_v31 = vld [vmem:[#allocation18 + $0x290] ss:$8 sps:$4 sm:$0xff]  }
 0x48b   :  { %5341 = vmatpush2.bf16.msra.mxu1 %v14923_v23  ;;  %v17065_v51 = vpop.f32.mrf.mxu1  ;;  %v17067_v9 = vpop.f32.mrf.mxu0  ;;  %4929 = vmatmul.mubr.bf16.gmra.mxu0 %v16981_v52  ;;  %v18531_v23 = vld [vmem:[#allocation40_spill] sm:$0xff]  ;;  %v4094_v52 = vmax.f32 %v3574_v26, 0.0  ;;  %v3526_v25 = vadd.f32 %v16906_v6, %v3413_v10  ;;  %v4032_v40 = vmax.f32 %v3530_v13, 0.0  ;;  %v14946_v26 = vld [vmem:[#allocation18 + $0x3c4] ss:$8 sps:$4 sm:$0xff]  }
 0x48c   :  { %v3578_v43 = vadd.f32 %v3577_v29, %v3465_v19  ;;  %5797 = vmatpush2.bf16.msra.mxu0 %v14926_v57  ;;  %5342 = vmatprep.subr.bf16.mxu1 %v14931_v63  ;;  %v3368_v17 = vadd.f32 %v18531_v23, %v3255_v47  ;;  %v14935_v63 = vld [vmem:[#allocation18 + $0x2a0] ss:$8 sps:$4 sm:$0xff]   ;;  %v4127_v5 = vmax.f32 %v3372_v0, 0.0  ;;  %v14938_v29 = vld [vmem:[#allocation18 + $0x3d0] ss:$8 sps:$4 sm:$0xff]  }
 0x48d   :  { %v3470_v8 = vpop.f32.mrf.mxu1  ;;  %v3583_v46 = vpop.f32.mrf.mxu0  ;;  %5798 = vmatprep.subr.bf16.mxu0 %v14934_v37  ;;  %v14943_v37 = vld [vmem:[#allocation18 + $0x294] ss:$8 sps:$4 sm:$0xff]   ;;  %v14949_v13 = vld [vmem:[#allocation18 + $0x284] ss:$8 sps:$4 sm:$0xff]  }
 0x48e   :  { %v4101_v32 = vmax.f32 %v3578_v43, 0.0  ;;  %v3471_v55 = vadd.f32 %v3470_v8, %v16888_v45  ;;  %4487 = vmatmul.mubr.bf16.gmra.mxu1 %v4176_v35  ;;  %v4120_v19 = vmax.f32 %v3368_v17, 0.0  ;;  %v3423_v35 = vadd.f32 %v16929_v18, %v17046_v2  ;;  %v14952_v18 = vld [vmem:[#allocation18 + $0x3b4] ss:$8 sps:$4 sm:$0xff]  }
 0x48f   :  { %4496 = vmatprep.mubr.bf16.mxu1 %v17072_v16  ;;  %5343 = vmatpush2.bf16.msra.mxu1 %v14929_v44  ;;  %v17078_v57 = vpop.f32.mrf.mxu1  ;;  %v17080_v7 = vpop.f32.mrf.mxu0  ;;  %v4025_v44 = vmax.f32 %v3526_v25, 0.0  ;;  %v3540_v8 = vadd.f32 %v16947_v11, %v3427_v42  ;;  %v3437_v42 = vadd.f32 %v16974_v33, %v17046_v2 }
 0x490   :  { %v17082_v22 = vpack.c.bf16 %v4101_v32, %v4094_v52  ;;  %5799 = vmatpush2.bf16.msra.mxu0 %v14932_v28  ;;  %5344 = vmatprep.subr.bf16.mxu1 %v14937_v56  ;;  %v3584_v62 = vadd.f32 %v3583_v46, %v3471_v55  ;;  %v4183_v43 = vpack.c.bf16 %v4127_v5, %v4120_v19  ;;  %v14944_v56 = vld [vmem:[#allocation18 + $0x3c0] ss:$8 sps:$4 sm:$0xff]  }
 0x491   :  { %v3474_v6 = vpop.f32.mrf.mxu1  ;;  %v3587_v47 = vpop.f32.mrf.mxu0  ;;  %5800 = vmatprep.subr.bf16.mxu0 %v14940_v41  ;;  %v17096_v23 = vpack.c.bf16 %v4032_v40, %v4025_v44  ;;  %v3536_v55 = vadd.f32 %v16931_v36, %v3423_v35  ;;  %v4046_v40 = vmax.f32 %v3540_v8, 0.0  ;;  %v3433_v44 = vadd.f32 %v16958_v39, %v17046_v2  ;;  %v14964_v39 = vld [vmem:[#allocation18 + $0x394] ss:$8 sps:$4 sm:$0xff]  }
 0x492   :  { %v3475_v10 = vadd.f32 %v3474_v6, %v16888_v45  ;;  %4938 = vmatprep.mubr.bf16.mxu0 %v17082_v22  ;;  %v4108_v17 = vmax.f32 %v3584_v62, 0.0 }
 0x493   :  { %5345 = vmatpush2.bf16.msra.mxu1 %v14935_v63  ;;  %v17090_v24 = vpop.f32.mrf.mxu1  ;;  %v17092_v0 = vpop.f32.mrf.mxu0  ;;  %4939 = vmatmul.mubr.bf16.gmra.mxu0 %v17010_v15  ;;  %v2269_v15 = vsub.s32 4, %v16487_v54  ;;  %v14947_v63 = vld [vmem:[#allocation18 + $0x280] ss:$8 sps:$4 sm:$0xff]  }
 0x494   :  { %v3588_v28 = vadd.f32 %v3587_v47, %v3475_v10  ;;  %5801 = vmatpush2.bf16.msra.mxu0 %v14938_v29  ;;  %5346 = vmatprep.subr.bf16.mxu1 %v14943_v37  ;;  %v14950_v29 = vld [vmem:[#allocation18 + $0x3b0] ss:$8 sps:$4 sm:$0xff]   ;;  %v14955_v37 = vld [vmem:[#allocation18 + $0x474] ss:$8 sps:$4 sm:$0xff]   ;;  %v14958_v47 = vld [vmem:[#allocation18 + $0x3a4] ss:$8 sps:$4 sm:$0xff]  }
 0x495   :  { %v3480_v46 = vpop.f32.mrf.mxu1  ;;  %v3593_v41 = vpop.f32.mrf.mxu0  ;;  %5802 = vmatprep.subr.bf16.mxu0 %v14946_v26  ;;  %v17113_v62 = vrot.slane %v16799_v34, %v2269_v15  ;;  %v4039_v10 = vmax.f32 %v3536_v55, 0.0  ;;  %v3550_v34 = vadd.f32 %v16976_v12, %v3437_v42  ;;  %v14962_v15 = vld [vmem:[#allocation18 + $0x390] ss:$8 sps:$4 sm:$0xff]   ;;  %v14967_v55 = vld [vmem:[#allocation18 + $0x454] ss:$8 sps:$4 sm:$0xff]  }
 0x496   :  { %v4115_v52 = vmax.f32 %v3588_v28, 0.0  ;;  %v3481_v32 = vadd.f32 %v3480_v46, %v16888_v45  ;;  %4497 = vmatmul.mubr.bf16.gmra.mxu1 %v4183_v43  ;;  %v14961_v28 = vld [vmem:[#allocation18 + $0x464] ss:$8 sps:$4 sm:$0xff]  }
 0x497   :  { %5347 = vmatpush2.bf16.msra.mxu1 %v14941_v31  ;;  %5350 = vmatprep.mubr.bf16.mxu1 %v17096_v23  ;;  %v17102_v25 = vpop.f32.mrf.mxu1  ;;  %v17104_v11 = vpop.f32.mrf.mxu0  ;;  %v14953_v31 = vld [vmem:[#allocation18 + $0x470] ss:$8 sps:$4 sm:$0xff]   ;;  %v17123_v8 = vpack.c.bf16 %v4046_v40, %v4039_v10  ;;  %v14968_v10 = vld [vmem:[#allocation18 + $0x380] ss:$8 sps:$4 sm:$0xff]  }
 0x498   :  { %v17106_v5 = vpack.c.bf16 %v4115_v52, %v4108_v17  ;;  %5803 = vmatpush2.bf16.msra.mxu0 %v14944_v56  ;;  %5348 = vmatprep.subr.bf16.mxu1 %v14949_v13  ;;  %v3594_v26 = vadd.f32 %v3593_v41, %v3481_v32  ;;  %v14959_v52 = vld [vmem:[#allocation18 + $0x460] ss:$8 sps:$4 sm:$0xff]  }
 0x499   :  { %v3484_v6 = vpop.f32.mrf.mxu1  ;;  %v3597_v36 = vpop.f32.mrf.mxu0  ;;  %5804 = vmatprep.subr.bf16.mxu0 %v14952_v18 }
 0x49a   :  { %v3485_v19 = vadd.f32 %v3484_v6, %v16888_v45  ;;  %4948 = vmatprep.mubr.bf16.mxu0 %v17106_v5  ;;  %v14956_v45 = vld [vmem:[#allocation18 + $0x3a0] ss:$8 sps:$4 sm:$0xff]   ;;  %v4122_v46 = vmax.f32 %v3594_v26, 0.0 }
 0x49b   :  { %5349 = vmatpush2.bf16.msra.mxu1 %v14947_v63  ;;  %v17117_v35 = vpop.f32.mrf.mxu1  ;;  %v17119_v33 = vpop.f32.mrf.mxu0  ;;  %4949 = vmatmul.mubr.bf16.gmra.mxu0 %v17040_v59  ;;  %v3546_v59 = vadd.f32 %v16960_v3, %v3433_v44  ;;  %v4060_v63 = vmax.f32 %v3550_v34, 0.0  ;;  %v14973_v44 = vld [vmem:[#allocation18 + $0x444] ss:$8 sps:$4 sm:$0xff]  }
 0x49c   :  { %v3598_v43 = vadd.f32 %v3597_v36, %v3485_v19  ;;  %5805 = vmatpush2.bf16.msra.mxu0 %v14950_v29  ;;  %6242 = vmatprep.subr.bf16.mxu1 %v14955_v37  ;;  %v14970_v37 = vld [vmem:[#allocation18 + $0x384] ss:$8 sps:$4 sm:$0xff]   ;;  %v3443_v36 = vadd.f32 %v16987_v20, %v17046_v2  ;;  %v14979_v20 = vld [vmem:[#allocation18 + $0x574] ss:$8 sps:$4 sm:$0xff]  }
 0x49d   :  { %v3636_v56 = vpop.f32.mrf.mxu1  ;;  %v3749_v13 = vpop.f32.mrf.mxu0  ;;  %5806 = vmatprep.subr.bf16.mxu0 %v14958_v47  ;;  %v4053_v6 = vmax.f32 %v3546_v59, 0.0  ;;  %v14977_v59 = vld [vmem:[#allocation18 + $0x570] ss:$8 sps:$4 sm:$0xff]  }
 0x49e   :  { %v4129_v41 = vmax.f32 %v3598_v43, 0.0  ;;  %v3637_v18 = vadd.f32 %v3636_v56, %v17113_v62  ;;  %5351 = vmatmul.mubr.bf16.vlgmr.msra.gmra.mxu1 %v16935_v53  ;;  %v3447_v53 = vadd.f32 %v17003_v60, %v17046_v2  ;;  %v14965_v60 = vld [vmem:[#allocation18 + $0x450] ss:$8 sps:$4 sm:$0xff]  }
 0x49f   :  { %5360 = vmatprep.mubr.bf16.mxu1 %v17123_v8  ;;  %6243 = vmatpush1.bf16.msra.mxu1 %v14953_v31  ;;  %v17129_v17 = vpop.f32.mrf.mxu1  ;;  %v17131_v12 = vpop.f32.mrf.mxu0 }
 0x4a0   :  { %v17133_v32 = vpack.c.bf16 %v4129_v41, %v4122_v46  ;;  %5807 = vmatpush2.bf16.msra.mxu0 %v14956_v45  ;;  %6244 = vmatprep.subr.bf16.mxu1 %v14961_v28  ;;  %v3750_v40 = vadd.f32 %v3749_v13, %v3637_v18  ;;  %v3560_v31 = vadd.f32 %v17005_v50, %v3447_v53  ;;  %v14971_v46 = vld [vmem:[#allocation18 + $0x440] ss:$8 sps:$4 sm:$0xff]   ;;  %v14976_v18 = vld [vmem:[#allocation18 + $0x434] ss:$8 sps:$4 sm:$0xff]  }
 0x4a1   :  { %v3640_v29 = vpop.f32.mrf.mxu1  ;;  %v3753_v3 = vpop.f32.mrf.mxu0  ;;  %5808 = vmatprep.subr.bf16.mxu0 %v14964_v39  ;;  %v17147_v28 = vpack.c.bf16 %v4060_v63, %v4053_v6  ;;  %v14982_v6 = vld [vmem:[#allocation18 + $0x424] ss:$8 sps:$4 sm:$0xff]  }
 0x4a2   :  { %v3641_v42 = vadd.f32 %v3640_v29, %v17113_v62  ;;  %4958 = vmatprep.mubr.bf16.mxu0 %v17133_v32  ;;  %v4026_v34 = vmax.f32 %v3750_v40, 0.0 }
 0x4a3   :  { %6245 = vmatpush1.bf16.msra.mxu1 %v14959_v52  ;;  %v17141_v47 = vpop.f32.mrf.mxu1  ;;  %v17143_v26 = vpop.f32.mrf.mxu0  ;;  %4959 = vmatmul.mubr.bf16.gmra.mxu0 %v17072_v16  ;;  %v3556_v16 = vadd.f32 %v16989_v30, %v3443_v36  ;;  %v4074_v52 = vmax.f32 %v3560_v31, 0.0  ;;  %v14983_v36 = vld [vmem:[#allocation18 + $0x560] ss:$8 sps:$4 sm:$0xff]  }
 0x4a4   :  { %v3754_v19 = vadd.f32 %v3753_v3, %v3641_v42  ;;  %5809 = vmatpush2.bf16.msra.mxu0 %v14962_v15  ;;  %6246 = vmatprep.subr.bf16.mxu1 %v14967_v55  ;;  %v14985_v55 = vld [vmem:[#allocation18 + $0x564] ss:$8 sps:$4 sm:$0xff]   ;;  %v3453_v3 = vadd.f32 %v17016_v61, %v17046_v2  ;;  %v14991_v61 = vld [vmem:[#allocation18 + $0x554] ss:$8 sps:$4 sm:$0xff]  }
 0x4a5   :  { %v3646_v43 = vpop.f32.mrf.mxu1  ;;  %v3759_v45 = vpop.f32.mrf.mxu0  ;;  %5810 = vmatprep.subr.bf16.mxu0 %v14970_v37  ;;  %v4067_v29 = vmax.f32 %v3556_v16, 0.0  ;;  %v14989_v16 = vld [vmem:[#allocation18 + $0x550] ss:$8 sps:$4 sm:$0xff]  }
 0x4a6   :  { %v4033_v56 = vmax.f32 %v3754_v19, 0.0  ;;  %v3647_v13 = vadd.f32 %v3646_v43, %v17113_v62  ;;  %5361 = vmatmul.mubr.bf16.gmra.mxu1 %v16964_v49  ;;  %v3457_v49 = vadd.f32 %v17033_v48, %v17046_v2  ;;  %v14974_v48 = vld [vmem:[#allocation18 + $0x430] ss:$8 sps:$4 sm:$0xff]  }
 0x4a7   :  { %5370 = vmatprep.mubr.bf16.mxu1 %v17147_v28  ;;  %6247 = vmatpush1.bf16.msra.mxu1 %v14965_v60  ;;  %v17153_v39 = vpop.f32.mrf.mxu1  ;;  %v17155_v50 = vpop.f32.mrf.mxu0 }
 0x4a8   :  { %v17157_v41 = vpack.c.bf16 %v4033_v56, %v4026_v34  ;;  %5811 = vmatpush2.bf16.msra.mxu0 %v14968_v10  ;;  %6248 = vmatprep.subr.bf16.mxu1 %v14973_v44  ;;  %v3760_v63 = vadd.f32 %v3759_v45, %v3647_v13  ;;  %v3570_v60 = vadd.f32 %v17035_v14, %v3457_v49  ;;  %v14980_v34 = vld [vmem:[#allocation18 + $0x420] ss:$8 sps:$4 sm:$0xff]   ;;  %v14988_v13 = vld [vmem:[#allocation18 + $0x414] ss:$8 sps:$4 sm:$0xff]  }
 0x4a9   :  { %v3650_v15 = vpop.f32.mrf.mxu1  ;;  %v3763_v30 = vpop.f32.mrf.mxu0  ;;  %6704 = vmatprep.subr.bf16.mxu0 %v14979_v20  ;;  %v17171_v44 = vpack.c.bf16 %v4074_v52, %v4067_v29  ;;  %v14994_v29 = vld [vmem:[#allocation18 + $0x404] ss:$8 sps:$4 sm:$0xff]  }
 0x4aa   :  { %v3651_v53 = vadd.f32 %v3650_v15, %v17113_v62  ;;  %5812 = vmatprep.mubr.bf16.mxu0 %v17157_v41  ;;  %v4040_v31 = vmax.f32 %v3760_v63, 0.0 }
 0x4ab   :  { %6249 = vmatpush1.bf16.msra.mxu1 %v14971_v46  ;;  %v17165_v37 = vpop.f32.mrf.mxu1  ;;  %v17167_v40 = vpop.f32.mrf.mxu0  ;;  %5813 = vmatmul.mubr.bf16.vlgmr.msra.gmra.mxu0 %v17096_v23  ;;  %v3566_v23 = vadd.f32 %v17018_v1, %v3453_v3  ;;  %v4088_v46 = vmax.f32 %v3570_v60, 0.0  ;;  %v14995_v3 = vld [vmem:[#allocation18 + $0x540] ss:$8 sps:$4 sm:$0xff]  }
 0x4ac   :  { %v3764_v42 = vadd.f32 %v3763_v30, %v3651_v53  ;;  %6250 = vmatprep.subr.bf16.mxu1 %v14976_v18  ;;  %6705 = vmatpush1.bf16.msra.mxu0 %v14977_v59  ;;  %v14997_v59 = vld [vmem:[#allocation18 + $0x544] ss:$8 sps:$4 sm:$0xff]   ;;  %v3463_v30 = vadd.f32 %v17049_v58, %v17046_v2  ;;  %v15003_v58 = vld [vmem:[#allocation18 + $0x534] ss:$8 sps:$4 sm:$0xff]  }
 0x4ad   :  { %v3656_v19 = vpop.f32.mrf.mxu1  ;;  %v3769_v10 = vpop.f32.mrf.mxu0  ;;  %6706 = vmatprep.subr.bf16.mxu0 %v14985_v55  ;;  %v4081_v15 = vmax.f32 %v3566_v23, 0.0  ;;  %v15001_v23 = vld [vmem:[#allocation18 + $0x530] ss:$8 sps:$4 sm:$0xff]  }
 0x4ae   :  { %v4047_v43 = vmax.f32 %v3764_v42, 0.0  ;;  %v3657_v45 = vadd.f32 %v3656_v19, %v17113_v62  ;;  %5371 = vmatmul.mubr.bf16.gmra.mxu1 %v16993_v21  ;;  %v3467_v21 = vadd.f32 %v17065_v51, %v17046_v2  ;;  %v14986_v51 = vld [vmem:[#allocation18 + $0x410] ss:$8 sps:$4 sm:$0xff]  }
 0x4af   :  { %5380 = vmatprep.mubr.bf16.mxu1 %v17171_v44  ;;  %6251 = vmatpush1.bf16.msra.mxu1 %v14974_v48  ;;  %v17177_v20 = vpop.f32.mrf.mxu1  ;;  %v17179_v14 = vpop.f32.mrf.mxu0 }
 0x4b0   :  { %v17181_v56 = vpack.c.bf16 %v4047_v43, %v4040_v31  ;;  %6252 = vmatprep.subr.bf16.mxu1 %v14982_v6  ;;  %6707 = vmatpush1.bf16.msra.mxu0 %v14983_v36  ;;  %v3770_v52 = vadd.f32 %v3769_v10, %v3657_v45  ;;  %v3580_v48 = vadd.f32 %v17067_v9, %v3467_v21  ;;  %v14992_v31 = vld [vmem:[#allocation18 + $0x400] ss:$8 sps:$4 sm:$0xff]   ;;  %v15000_v45 = vld [vmem:[#allocation18 + $0x4f4] ss:$8 sps:$4 sm:$0xff]  }
 0x4b1   :  { %v3660_v18 = vpop.f32.mrf.mxu1  ;;  %v3773_v1 = vpop.f32.mrf.mxu0  ;;  %6708 = vmatprep.subr.bf16.mxu0 %v14991_v61  ;;  %v17195_v36 = vpack.c.bf16 %v4088_v46, %v4081_v15  ;;  %v15006_v15 = vld [vmem:[#allocation18 + $0x4e4] ss:$8 sps:$4 sm:$0xff]  }
 0x4b2   :  { %v3661_v49 = vadd.f32 %v3660_v18, %v17113_v62  ;;  %5822 = vmatprep.mubr.bf16.mxu0 %v17181_v56  ;;  %v4054_v60 = vmax.f32 %v3770_v52, 0.0 }
 0x4b3   :  { %6253 = vmatpush1.bf16.msra.mxu1 %v14980_v34  ;;  %v17189_v55 = vpop.f32.mrf.mxu1  ;;  %v17191_v63 = vpop.f32.mrf.mxu0  ;;  %5823 = vmatmul.mubr.bf16.gmra.mxu0 %v17123_v8  ;;  %v3576_v8 = vadd.f32 %v17051_v27, %v3463_v30  ;;  %v4102_v34 = vmax.f32 %v3580_v48, 0.0  ;;  %v15007_v30 = vld [vmem:[#allocation18 + $0x520] ss:$8 sps:$4 sm:$0xff]  }
 0x4b4   :  { %v3774_v53 = vadd.f32 %v3773_v1, %v3661_v49  ;;  %6254 = vmatprep.subr.bf16.mxu1 %v14988_v13  ;;  %6709 = vmatpush1.bf16.msra.mxu0 %v14989_v16  ;;  %v15009_v16 = vld [vmem:[#allocation18 + $0x524] ss:$8 sps:$4 sm:$0xff]   ;;  %v3473_v1 = vadd.f32 %v17078_v57, %v17046_v2  ;;  %v15015_v57 = vld [vmem:[#allocation18 + $0x514] ss:$8 sps:$4 sm:$0xff]  }
 0x4b5   :  { %v3666_v42 = vpop.f32.mrf.mxu1  ;;  %v3779_v6 = vpop.f32.mrf.mxu0  ;;  %6710 = vmatprep.subr.bf16.mxu0 %v14997_v59  ;;  %v4095_v18 = vmax.f32 %v3576_v8, 0.0  ;;  %v15013_v8 = vld [vmem:[#allocation18 + $0x510] ss:$8 sps:$4 sm:$0xff]  }
 0x4b6   :  { %v4061_v19 = vmax.f32 %v3774_v53, 0.0  ;;  %v3667_v10 = vadd.f32 %v3666_v42, %v17113_v62  ;;  %5381 = vmatmul.mubr.bf16.gmra.mxu1 %v17022_v4  ;;  %v3477_v4 = vadd.f32 %v17090_v24, %v17046_v2  ;;  %v14998_v24 = vld [vmem:[#allocation18 + $0x4f0] ss:$8 sps:$4 sm:$0xff]  }
 0x4b7   :  { %5390 = vmatprep.mubr.bf16.mxu1 %v17195_v36  ;;  %6255 = vmatpush1.bf16.msra.mxu1 %v14986_v51  ;;  %v17201_v61 = vpop.f32.mrf.mxu1  ;;  %v17203_v9 = vpop.f32.mrf.mxu0 }
 0x4b8   :  { %v17205_v43 = vpack.c.bf16 %v4061_v19, %v4054_v60  ;;  %6256 = vmatprep.subr.bf16.mxu1 %v14994_v29  ;;  %6711 = vmatpush1.bf16.msra.mxu0 %v14995_v3  ;;  %v3780_v46 = vadd.f32 %v3779_v6, %v3667_v10  ;;  %v3590_v51 = vadd.f32 %v17092_v0, %v3477_v4  ;;  %v15004_v60 = vld [vmem:[#allocation18 + $0x4e0] ss:$8 sps:$4 sm:$0xff]   ;;  %v15012_v10 = vld [vmem:[#allocation18 + $0x4d4] ss:$8 sps:$4 sm:$0xff]  }
 0x4b9   :  { %v3670_v13 = vpop.f32.mrf.mxu1  ;;  %v3783_v27 = vpop.f32.mrf.mxu0  ;;  %6712 = vmatprep.subr.bf16.mxu0 %v15003_v58  ;;  %v17219_v3 = vpack.c.bf16 %v4102_v34, %v4095_v18 }
 0x4ba   :  { %v3671_v21 = vadd.f32 %v3670_v13, %v17113_v62  ;;  %5832 = vmatprep.mubr.bf16.mxu0 %v17205_v43  ;;  %v4068_v48 = vmax.f32 %v3780_v46, 0.0 }
 0x4bb   :  { %6257 = vmatpush1.bf16.msra.mxu1 %v14992_v31  ;;  %v17213_v59 = vpop.f32.mrf.mxu1  ;;  %v17215_v52 = vpop.f32.mrf.mxu0  ;;  %5833 = vmatmul.mubr.bf16.gmra.mxu0 %v17147_v28  ;;  %v3586_v28 = vadd.f32 %v17080_v7, %v3473_v1  ;;  %v4116_v31 = vmax.f32 %v3590_v51, 0.0  ;;  %v15018_v1 = vld [vmem:[#allocation18 + $0x4c4] ss:$8 sps:$4 sm:$0xff]  }
 0x4bc   :  { %v3784_v49 = vadd.f32 %v3783_v27, %v3671_v21  ;;  %6258 = vmatprep.subr.bf16.mxu1 %v15000_v45  ;;  %6713 = vmatpush1.bf16.msra.mxu0 %v15001_v23  ;;  %v15021_v23 = vld [vmem:[#allocation18 + $0x504] ss:$8 sps:$4 sm:$0xff]   ;;  %v3483_v27 = vadd.f32 %v17102_v25, %v17046_v2  ;;  %v15027_v25 = vld [vmem:[#allocation18 + $0x5f4] ss:$8 sps:$4 sm:$0xff]  }
 0x4bd   :  { %v3676_v53 = vpop.f32.mrf.mxu1  ;;  %v3789_v29 = vpop.f32.mrf.mxu0  ;;  %6714 = vmatprep.subr.bf16.mxu0 %v15009_v16  ;;  %v4109_v13 = vmax.f32 %v3586_v28, 0.0  ;;  %v2273_v16 = vsub.s32 5, %v16487_v54 }
 0x4be   :  { %v4075_v42 = vmax.f32 %v3784_v49, 0.0  ;;  %v3677_v6 = vadd.f32 %v3676_v53, %v17113_v62  ;;  %5391 = vmatmul.mubr.bf16.gmra.mxu1 %v17055_v38  ;;  %v3487_v38 = vadd.f32 %v17117_v35, %v17046_v2  ;;  %v15010_v35 = vld [vmem:[#allocation18 + $0x4d0] ss:$8 sps:$4 sm:$0xff]  }
 0x4bf   :  { %5400 = vmatprep.mubr.bf16.mxu1 %v17219_v3  ;;  %6259 = vmatpush2.bf16.msra.mxu1 %v14998_v24  ;;  %v17225_v58 = vpop.f32.mrf.mxu1  ;;  %v17227_v0 = vpop.f32.mrf.mxu0  ;;  %v15019_v24 = vld [vmem:[#allocation18 + $0x500] ss:$8 sps:$4 sm:$0xff]   ;;  %v17244_v2 = vpack.c.bf16 %v4116_v31, %v4109_v13 }
 0x4c0   :  { %v17229_v19 = vpack.c.bf16 %v4075_v42, %v4068_v48  ;;  %6260 = vmatprep.subr.bf16.mxu1 %v15006_v15  ;;  %6715 = vmatpush1.bf16.msra.mxu0 %v15007_v30  ;;  %v3790_v34 = vadd.f32 %v3789_v29, %v3677_v6  ;;  %v3600_v49 = vadd.f32 %v17119_v33, %v3487_v38  ;;  %v15016_v6 = vld [vmem:[#allocation18 + $0x4c0] ss:$8 sps:$4 sm:$0xff]   ;;  %v15033_v38 = vld [vmem:[#allocation18 + $0x5e4] ss:$8 sps:$4 sm:$0xff]  }
 0x4c1   :  { %v3680_v45 = vpop.f32.mrf.mxu1  ;;  %v3793_v7 = vpop.f32.mrf.mxu0  ;;  %6716 = vmatprep.subr.bf16.mxu0 %v15015_v57  ;;  %v17249_v57 = vld [vmem:[#allocation17] sm:$0xff] }
 0x4c2   :  { %v3681_v4 = vadd.f32 %v3680_v45, %v17113_v62  ;;  %5842 = vmatprep.mubr.bf16.mxu0 %v17229_v19  ;;  %v4082_v51 = vmax.f32 %v3790_v34, 0.0  ;;  %v17252_v48 = vrot.slane %v17249_v57, %v2273_v16  ;;  %v15030_v16 = vld [vmem:[#allocation18 + $0x4a4] ss:$8 sps:$4 sm:$0xff]  }
 0x4c3   :  { %6261 = vmatpush2.bf16.msra.mxu1 %v15004_v60  ;;  %v17238_v46 = vpop.f32.mrf.mxu1  ;;  %v17240_v21 = vpop.f32.mrf.mxu0  ;;  %5843 = vmatmul.mubr.bf16.gmra.mxu0 %v17171_v44  ;;  %v3596_v44 = vadd.f32 %v17104_v11, %v3483_v27  ;;  %v15025_v60 = vld [vmem:[#allocation18 + $0x5f0] ss:$8 sps:$4 sm:$0xff]   ;;  %v4130_v11 = vmax.f32 %v3600_v49, 0.0 }
 0x4c4   :  { %v3794_v18 = vadd.f32 %v3793_v7, %v3681_v4  ;;  %6262 = vmatprep.subr.bf16.mxu1 %v15012_v10  ;;  %6717 = vmatpush1.bf16.msra.mxu0 %v15013_v8  ;;  %v3643_v10 = vadd.f32 %v17141_v47, %v17252_v48  ;;  %v3639_v34 = vadd.f32 %v17129_v17, %v17252_v48  ;;  %v15022_v47 = vld [vmem:[#allocation18 + $0x4b0] ss:$8 sps:$4 sm:$0xff]   ;;  %v15039_v17 = vld [vmem:[#allocation18 + $0x5d4] ss:$8 sps:$4 sm:$0xff]  }
 0x4c5   :  { %v3686_v15 = vpop.f32.mrf.mxu1  ;;  %v3799_v30 = vpop.f32.mrf.mxu0  ;;  %6718 = vmatprep.subr.bf16.mxu0 %v15021_v23  ;;  %v4123_v23 = vmax.f32 %v3596_v44, 0.0  ;;  %v15036_v44 = vld [vmem:[#allocation18 + $0x494] ss:$8 sps:$4 sm:$0xff]  }
 0x4c6   :  { %v4089_v53 = vmax.f32 %v3794_v18, 0.0  ;;  %v3687_v29 = vadd.f32 %v3686_v15, %v17113_v62  ;;  %5401 = vmatmul.mubr.bf16.gmra.mxu1 %v17082_v22  ;;  %v15024_v22 = vld [vmem:[#allocation18 + $0x4b4] ss:$8 sps:$4 sm:$0xff]   ;;  %v3756_v18 = vadd.f32 %v17143_v26, %v3643_v10 }
 0x4c7   :  { %5410 = vmatprep.mubr.bf16.mxu1 %v17244_v2  ;;  %6263 = vmatpush2.bf16.msra.mxu1 %v15010_v35  ;;  %v17255_v33 = vpop.f32.mrf.mxu1  ;;  %v17257_v42 = vpop.f32.mrf.mxu0  ;;  %v15031_v35 = vld [vmem:[#allocation18 + $0x5e0] ss:$8 sps:$4 sm:$0xff]   ;;  %v17273_v49 = vpack.c.bf16 %v4130_v11, %v4123_v23  ;;  %v15045_v11 = vld [vmem:[#allocation18 + $0x5c4] ss:$8 sps:$4 sm:$0xff]  }
 0x4c8   :  { %v17259_v28 = vpack.c.bf16 %v4089_v53, %v4082_v51  ;;  %6264 = vmatprep.subr.bf16.mxu1 %v15018_v1  ;;  %6719 = vmatpush1.bf16.msra.mxu0 %v15019_v24  ;;  %v3800_v45 = vadd.f32 %v3799_v30, %v3687_v29  ;;  %v15028_v53 = vld [vmem:[#allocation18 + $0x4a0] ss:$8 sps:$4 sm:$0xff]  }
 0x4c9   :  { %v3690_v8 = vpop.f32.mrf.mxu1  ;;  %v3803_v31 = vpop.f32.mrf.mxu0  ;;  %6720 = vmatprep.subr.bf16.mxu0 %v15027_v25 }
 0x4ca   :  { %v3691_v7 = vadd.f32 %v3690_v8, %v17113_v62  ;;  %5852 = vmatprep.mubr.bf16.mxu0 %v17259_v28  ;;  %v4096_v15 = vmax.f32 %v3800_v45, 0.0 }
 0x4cb   :  { %6265 = vmatpush2.bf16.msra.mxu1 %v15016_v6  ;;  %v17267_v4 = vpop.f32.mrf.mxu1  ;;  %v17269_v13 = vpop.f32.mrf.mxu0  ;;  %5853 = vmatmul.mubr.bf16.gmra.mxu0 %v17195_v36  ;;  %v3752_v36 = vadd.f32 %v17131_v12, %v3639_v34  ;;  %v15037_v6 = vld [vmem:[#allocation18 + $0x5d0] ss:$8 sps:$4 sm:$0xff]   ;;  %v15042_v34 = vld [vmem:[#allocation18 + $0x484] ss:$8 sps:$4 sm:$0xff]  }
 0x4cc   :  { %v3804_v27 = vadd.f32 %v3803_v31, %v3691_v7  ;;  %6266 = vmatprep.subr.bf16.mxu1 %v15024_v22  ;;  %6721 = vmatpush2.bf16.msra.mxu0 %v15025_v60  ;;  %v4034_v22 = vmax.f32 %v3756_v18, 0.0 }
 0x4cd   :  { %v3696_v1 = vpop.f32.mrf.mxu1  ;;  %v3809_v24 = vpop.f32.mrf.mxu0  ;;  %6722 = vmatprep.subr.bf16.mxu0 %v15033_v38  ;;  %v4027_v31 = vmax.f32 %v3752_v36, 0.0  ;;  %v3649_v38 = vadd.f32 %v17153_v39, %v17252_v48  ;;  %v15051_v39 = vld [vmem:[#allocation18 + $0x5b4] ss:$8 sps:$4 sm:$0xff]  }
 0x4ce   :  { %v4103_v30 = vmax.f32 %v3804_v27, 0.0  ;;  %v3697_v25 = vadd.f32 %v3696_v1, %v17113_v62  ;;  %5411 = vmatmul.mubr.bf16.gmra.mxu1 %v17106_v5  ;;  %v3653_v5 = vadd.f32 %v17165_v37, %v17252_v48  ;;  %v15034_v37 = vld [vmem:[#allocation18 + $0x490] ss:$8 sps:$4 sm:$0xff]   ;;  %v15048_v36 = vld [vmem:[#allocation18 + $0x674] ss:$8 sps:$4 sm:$0xff]  }
 0x4cf   :  { %5420 = vmatprep.mubr.bf16.mxu1 %v17273_v49  ;;  %6267 = vmatpush2.bf16.msra.mxu1 %v15022_v47  ;;  %v17279_v51 = vpop.f32.mrf.mxu1  ;;  %v17281_v26 = vpop.f32.mrf.mxu0  ;;  %v15043_v47 = vld [vmem:[#allocation18 + $0x5c0] ss:$8 sps:$4 sm:$0xff]   ;;  %v17297_v18 = vpack.c.bf16 %v4034_v22, %v4027_v31  ;;  %v15057_v22 = vld [vmem:[#allocation18 + $0x5a4] ss:$8 sps:$4 sm:$0xff]  }
 0x4d0   :  { %v17283_v29 = vpack.c.bf16 %v4103_v30, %v4096_v15  ;;  %6268 = vmatprep.subr.bf16.mxu1 %v15030_v16  ;;  %6723 = vmatpush2.bf16.msra.mxu0 %v15031_v35  ;;  %v3810_v10 = vadd.f32 %v3809_v24, %v3697_v25  ;;  %v3766_v27 = vadd.f32 %v17167_v40, %v3653_v5  ;;  %v15040_v30 = vld [vmem:[#allocation18 + $0x480] ss:$8 sps:$4 sm:$0xff]  }
 0x4d1   :  { %v3700_v60 = vpop.f32.mrf.mxu1  ;;  %v3813_v12 = vpop.f32.mrf.mxu0  ;;  %6724 = vmatprep.subr.bf16.mxu0 %v15039_v17 }
 0x4d2   :  { %v3701_v8 = vadd.f32 %v3700_v60, %v17113_v62  ;;  %5862 = vmatprep.mubr.bf16.mxu0 %v17283_v29  ;;  %v4110_v1 = vmax.f32 %v3810_v10, 0.0  ;;  %v3659_v10 = vadd.f32 %v17177_v20, %v17252_v48  ;;  %v15063_v20 = vld [vmem:[#allocation18 + $0x594] ss:$8 sps:$4 sm:$0xff]  }
 0x4d3   :  { %6269 = vmatpush2.bf16.msra.mxu1 %v15028_v53  ;;  %v17291_v45 = vpop.f32.mrf.mxu1  ;;  %v17293_v7 = vpop.f32.mrf.mxu0  ;;  %5863 = vmatmul.mubr.bf16.gmra.mxu0 %v17219_v3  ;;  %v3762_v3 = vadd.f32 %v17155_v50, %v3649_v38  ;;  %v15049_v53 = vld [vmem:[#allocation18 + $0x5b0] ss:$8 sps:$4 sm:$0xff]  }
 0x4d4   :  { %v3814_v23 = vadd.f32 %v3813_v12, %v3701_v8  ;;  %6270 = vmatprep.subr.bf16.mxu1 %v15036_v44  ;;  %6725 = vmatpush2.bf16.msra.mxu0 %v15037_v6  ;;  %v4048_v44 = vmax.f32 %v3766_v27, 0.0  ;;  %v2277_v12 = vsub.s32 6, %v16487_v54 }
 0x4d5   :  { %v3706_v16 = vpop.f32.mrf.mxu1  ;;  %v3819_v35 = vpop.f32.mrf.mxu0  ;;  %6726 = vmatprep.subr.bf16.mxu0 %v15045_v11  ;;  %v4041_v11 = vmax.f32 %v3762_v3, 0.0  ;;  %v15060_v3 = vld [vmem:[#allocation18 + $0x654] ss:$8 sps:$4 sm:$0xff]  }
 0x4d6   :  { %v4117_v24 = vmax.f32 %v3814_v23, 0.0  ;;  %v3707_v17 = vadd.f32 %v3706_v16, %v17113_v62  ;;  %5421 = vmatmul.mubr.bf16.gmra.mxu1 %v17133_v32  ;;  %v3663_v32 = vadd.f32 %v17189_v55, %v17252_v48  ;;  %v15046_v55 = vld [vmem:[#allocation18 + $0x670] ss:$8 sps:$4 sm:$0xff]  }
 0x4d7   :  { %6271 = vmatpush2.bf16.msra.mxu1 %v15034_v37  ;;  %6274 = vmatprep.mubr.bf16.mxu1 %v17297_v18  ;;  %v17303_v15 = vpop.f32.mrf.mxu1  ;;  %v17305_v40 = vpop.f32.mrf.mxu0  ;;  %v15055_v37 = vld [vmem:[#allocation18 + $0x5a0] ss:$8 sps:$4 sm:$0xff]  }
 0x4d8   :  { %v17307_v25 = vpack.c.bf16 %v4117_v24, %v4110_v1  ;;  %6272 = vmatprep.subr.bf16.mxu1 %v15042_v34  ;;  %6727 = vmatpush2.bf16.msra.mxu0 %v15043_v47  ;;  %v3820_v5 = vadd.f32 %v3819_v35, %v3707_v17  ;;  %v3776_v23 = vadd.f32 %v17191_v63, %v3663_v32  ;;  %v15052_v1 = vld [vmem:[#allocation18 + $0x660] ss:$8 sps:$4 sm:$0xff]  }
 0x4d9   :  { %v3710_v6 = vpop.f32.mrf.mxu1  ;;  %v3823_v50 = vpop.f32.mrf.mxu0  ;;  %6728 = vmatprep.subr.bf16.mxu0 %v15051_v39  ;;  %v17324_v47 = vpack.c.bf16 %v4048_v44, %v4041_v11  ;;  %v3772_v35 = vadd.f32 %v17179_v14, %v3659_v10  ;;  %v15069_v14 = vld [vmem:[#allocation18 + $0x584] ss:$8 sps:$4 sm:$0xff]   ;;  %v3669_v32 = vadd.f32 %v17201_v61, %v17252_v48 }
 0x4da   :  { %v3711_v60 = vadd.f32 %v3710_v6, %v17113_v62  ;;  %5872 = vmatprep.mubr.bf16.mxu0 %v17307_v25  ;;  %v15054_v62 = vld [vmem:[#allocation18 + $0x664] ss:$8 sps:$4 sm:$0xff]   ;;  %v4124_v27 = vmax.f32 %v3820_v5, 0.0 }
 0x4db   :  { %6273 = vmatpush2.bf16.msra.mxu1 %v15040_v30  ;;  %v17316_v8 = vpop.f32.mrf.mxu1  ;;  %v17318_v31 = vpop.f32.mrf.mxu0  ;;  %5873 = vmatmul.mubr.bf16.gmra.mxu0 %v17244_v2  ;;  %v17328_v2 = vrot.slane %v17249_v57, %v2277_v12  ;;  %v15061_v30 = vld [vmem:[#allocation18 + $0x590] ss:$8 sps:$4 sm:$0xff]   ;;  %v4055_v44 = vmax.f32 %v3772_v35, 0.0 }
 0x4dc   :  { %v3824_v38 = vadd.f32 %v3823_v50, %v3711_v60  ;;  %7166 = vmatprep.subr.bf16.mxu1 %v15048_v36  ;;  %6729 = vmatpush2.bf16.msra.mxu0 %v15049_v53  ;;  %v4062_v36 = vmax.f32 %v3776_v23, 0.0  ;;  %v15067_v60 = vld [vmem:[#allocation18 + $0x580] ss:$8 sps:$4 sm:$0xff]  }
 0x4dd   :  { %v13355_v54 = vpop.f32.mrf.mxu1  ;;  %v17322_v34 = vpop.f32.mrf.mxu0  ;;  %6730 = vmatprep.subr.bf16.mxu0 %v15057_v22  ;;  %v15058_v22 = vld [vmem:[#allocation18 + $0x650] ss:$8 sps:$4 sm:$0xff]   ;;  %v15064_v23 = vld [vmem:[#allocation18 + $0x640] ss:$8 sps:$4 sm:$0xff]  }
 0x4de   :  { %v4131_v16 = vmax.f32 %v3824_v38, 0.0  ;;  %6275 = vmatmul.mubr.bf16.vlgmr.msra.gmra.mxu1 %v17157_v41  ;;  %v3673_v41 = vadd.f32 %v17213_v59, %v17252_v48  ;;  %v15066_v59 = vld [vmem:[#allocation18 + $0x644] ss:$8 sps:$4 sm:$0xff]   ;;  %v17342_v10 = vpack.c.bf16 %v4062_v36, %v4055_v44  ;;  %v15104_v44 = vld [vmem:[#allocation20 + $0x38] sm:$0xff]  }
 0x4df   :  { %6284 = vmatprep.mubr.bf16.mxu1 %v17324_v47  ;;  %7167 = vmatpush1.bf16.msra.mxu1 %v15046_v55  ;;  %v13356_v63 = vpop.f32.mrf.mxu1  ;;  %v3959_v39 = vpop.f32.mrf.mxu0  ;;  %v15103_v55 = vld [vmem:[#allocation20 + $0x78] sm:$0xff]  }
 0x4e0   :  { %v17332_v24 = vpack.c.bf16 %v4131_v16, %v4124_v27  ;;  %v13357_v17 = vadd.f32 %v13356_v63, %v13355_v54  ;;  %7168 = vmatprep.subr.bf16.mxu1 %v15054_v62  ;;  %6731 = vmatpush2.bf16.msra.mxu0 %v15055_v37  ;;  %v3786_v12 = vadd.f32 %v17215_v52, %v3673_v41 }
 0x4e1   :  { %v13358_v57 = vpop.f32.mrf.mxu1  ;;  %6732 = vmatprep.subr.bf16.mxu0 %v15063_v20  ;;  %v14094_v6 = vpop.f32.mrf.mxu0  ;;  %v15072_v20 = vld [vmem:[#allocation18 + $0x634] ss:$8 sps:$4 sm:$0xff]   ;;  %v3683_v16 = vadd.f32 %v17238_v46, %v17252_v48  ;;  %v15075_v46 = vld [vmem:[#allocation18 + $0x624] ss:$8 sps:$4 sm:$0xff]  }
 0x4e2   :  { %v3863_v53 = vadd.f32 %v13357_v17, %v17328_v2  ;;  %5882 = vmatprep.mubr.bf16.mxu0 %v17332_v24  ;;  %v4076_v27 = vmax.f32 %v3786_v12, 0.0 }
 0x4e3   :  { %7169 = vmatpush1.bf16.msra.mxu1 %v15052_v1  ;;  %v13359_v50 = vpop.f32.mrf.mxu1  ;;  %5883 = vmatmul.mubr.bf16.gmra.mxu0 %v17273_v49  ;;  %v3782_v49 = vadd.f32 %v17203_v9, %v3669_v32  ;;  %v3962_v62 = vpop.f32.mrf.mxu0  ;;  %v3679_v1 = vadd.f32 %v17225_v58, %v17252_v48 }
 0x4e4   :  { %v13360_v5 = vadd.f32 %v13359_v50, %v13358_v57  ;;  %7170 = vmatprep.subr.bf16.mxu1 %v15060_v3  ;;  %6733 = vmatpush2.bf16.msra.mxu0 %v15061_v30  ;;  %v3960_v38 = vadd.f32 %v3959_v39, %v3863_v53  ;;  %v15070_v30 = vld [vmem:[#allocation18 + $0x630] ss:$8 sps:$4 sm:$0xff]   ;;  %v3796_v57 = vadd.f32 %v17240_v21, %v3683_v16 }
 0x4e5   :  { %v13361_v11 = vpop.f32.mrf.mxu1  ;;  %6734 = vmatprep.subr.bf16.mxu0 %v15069_v14  ;;  %v4069_v39 = vmax.f32 %v3782_v49, 0.0  ;;  %v17353_v17 = vpop.f32.mrf.mxu0  ;;  %v15108_v50 = vld [vmem:[#allocation20 + $0x70] sm:$0xff]  }
 0x4e6   :  { %v3866_v61 = vadd.f32 %v13360_v5, %v17328_v2  ;;  %6285 = vmatmul.mubr.bf16.gmra.mxu1 %v17181_v56  ;;  %v4028_v56 = vmax.f32 %v3960_v38, 0.0  ;;  %v15109_v38 = vld [vmem:[#allocation20 + $0x30] sm:$0xff]  }
 0x4e7   :  { %6294 = vmatprep.mubr.bf16.mxu1 %v17342_v10  ;;  %7171 = vmatpush1.bf16.msra.mxu1 %v15058_v22  ;;  %v13362_v37 = vpop.f32.mrf.mxu1  ;;  %v17358_v53 = vpack.c.bf16 %v4076_v27, %v4069_v39  ;;  %v3792_v22 = vadd.f32 %v17227_v0, %v3679_v1  ;;  %v3975_v5 = vpop.f32.mrf.mxu0 }
 0x4e8   :  { %v3963_v54 = vadd.f32 %v3962_v62, %v3866_v61  ;;  %v13363_v52 = vadd.f32 %v13362_v37, %v13361_v11  ;;  %7172 = vmatprep.subr.bf16.mxu1 %v15066_v59  ;;  %6735 = vmatpush2.bf16.msra.mxu0 %v15067_v60  ;;  %v15073_v59 = vld [vmem:[#allocation18 + $0x620] ss:$8 sps:$4 sm:$0xff]   ;;  %v4090_v11 = vmax.f32 %v3796_v57, 0.0  ;;  %v15084_v57 = vld [vmem:[#allocation18 + $0x6f4] ss:$8 sps:$4 sm:$0xff]  }
 0x4e9   :  { %v13364_v35 = vpop.f32.mrf.mxu1  ;;  %13419 = vmatprep.subr.bf16.mxu0 %v15103_v55  ;;  %v4083_v62 = vmax.f32 %v3792_v22, 0.0  ;;  %v17372_v37 = vpop.f32.mrf.mxu0  ;;  %v3699_v22 = vadd.f32 %v17279_v51, %v17252_v48 }
 0x4ea   :  { %v4035_v63 = vmax.f32 %v3963_v54, 0.0  ;;  %v3871_v9 = vadd.f32 %v13363_v52, %v17328_v2  ;;  %v15076_v54 = vld [vmem:[#allocation18 + $0x610] ss:$8 sps:$4 sm:$0xff]  }
 0x4eb   :  { %7173 = vmatpush1.bf16.msra.mxu1 %v15064_v23  ;;  %v13365_v3 = vpop.f32.mrf.mxu1  ;;  %v3978_v1 = vpop.f32.mrf.mxu0 }
 0x4ec   :  { %v13366_v36 = vadd.f32 %v13365_v3, %v13364_v35  ;;  %7174 = vmatprep.subr.bf16.mxu1 %v15072_v20  ;;  %v17355_v41 = vpack.c.bf16 %v4035_v63, %v4028_v56  ;;  %v3968_v32 = vadd.f32 %v17322_v34, %v3871_v9  ;;  %v15078_v34 = vld [vmem:[#allocation18 + $0x614] ss:$8 sps:$4 sm:$0xff]   ;;  %v15081_v20 = vld [vmem:[#allocation18 + $0x604] ss:$8 sps:$4 sm:$0xff]   ;;  %v17377_v35 = vpack.c.bf16 %v4090_v11, %v4083_v62  ;;  %v15079_v3 = vld [vmem:[#allocation18 + $0x600] ss:$8 sps:$4 sm:$0xff]  }
 0x4ed   :  { %v13367_v14 = vpop.f32.mrf.mxu1  ;;  %v15110_v56 = vld [vmem:[#allocation20 + $0x68] sm:$0xff]  }
 0x4ee   :  { %v3874_v58 = vadd.f32 %v13366_v36, %v17328_v2  ;;  %6295 = vmatmul.mubr.bf16.gmra.mxu1 %v17205_v43  ;;  %6736 = vmatprep.mubr.bf16.mxu0 %v17355_v41  ;;  %v3693_v43 = vadd.f32 %v17267_v4, %v17252_v48  ;;  %v4042_v0 = vmax.f32 %v3968_v32, 0.0  ;;  %v15111_v9 = vld [vmem:[#allocation20 + $0x28] sm:$0xff]  }
 0x4ef   :  { %6304 = vmatprep.mubr.bf16.mxu1 %v17358_v53  ;;  %7175 = vmatpush1.bf16.msra.mxu1 %v15070_v30  ;;  %v13368_v21 = vpop.f32.mrf.mxu1  ;;  %v15112_v30 = vld [vmem:[#allocation20 + $0x60] sm:$0xff]  }
 0x4f0   :  { %v3971_v60 = vadd.f32 %v14094_v6, %v3874_v58  ;;  %v13369_v12 = vadd.f32 %v13368_v21, %v13367_v14  ;;  %6737 = vmatmul.mubr.bf16.vlgmr.msra.gmra.mxu0 %v17297_v18  ;;  %7176 = vmatprep.subr.bf16.mxu1 %v15075_v46  ;;  %v3689_v6 = vadd.f32 %v17255_v33, %v17252_v48  ;;  %v15085_v62 = vld [vmem:[#allocation18 + $0x6e0] ss:$8 sps:$4 sm:$0xff]  }
 0x4f1   :  { %v13370_v55 = vpop.f32.mrf.mxu1  ;;  %13420 = vmatpush3.bf16.msra.mxu0 %v15104_v44  ;;  %v3806_v27 = vadd.f32 %v17269_v13, %v3693_v43 }
 0x4f2   :  { %v3879_v61 = vadd.f32 %v13369_v12, %v17328_v2  ;;  %v4049_v49 = vmax.f32 %v3971_v60, 0.0  ;;  %13421 = vmatprep.subr.bf16.mxu0 %v15108_v50  ;;  %v3802_v39 = vadd.f32 %v17257_v42, %v3689_v6  ;;  %v15087_v12 = vld [vmem:[#allocation18 + $0x6e4] ss:$8 sps:$4 sm:$0xff]  }
 0x4f3   :  { %7177 = vmatpush1.bf16.msra.mxu1 %v15073_v59  ;;  %v13371_v23 = vpop.f32.mrf.mxu1  ;;  %v4104_v14 = vmax.f32 %v3806_v27, 0.0  ;;  %v15082_v59 = vld [vmem:[#allocation18 + $0x6f0] ss:$8 sps:$4 sm:$0xff]  }
 0x4f4   :  { %v13372_v52 = vadd.f32 %v13371_v23, %v13370_v55  ;;  %7178 = vmatprep.subr.bf16.mxu1 %v15078_v34  ;;  %v17374_v4 = vpack.c.bf16 %v4049_v49, %v4042_v0  ;;  %v3976_v63 = vadd.f32 %v3975_v5, %v3879_v61  ;;  %v4097_v50 = vmax.f32 %v3802_v39, 0.0  ;;  %v17390_v5 = vpop.f32.mrf.mxu0  ;;  %v15113_v55 = vld [vmem:[#allocation20 + $0x20] sm:$0xff]   ;;  %v15114_v0 = vld [vmem:[#allocation20 + $0x58] sm:$0xff]  }
 0x4f5   :  { %v13373_v16 = vpop.f32.mrf.mxu1  ;;  %13422 = vmatpush3.bf16.msra.mxu0 %v15109_v38  ;;  %v3812_v61 = vadd.f32 %v17281_v26, %v3699_v22  ;;  %v15115_v26 = vld [vmem:[#allocation20 + $0x18] sm:$0xff]  }
 0x4f6   :  { %v3882_v33 = vadd.f32 %v13372_v52, %v17328_v2  ;;  %6305 = vmatmul.mubr.bf16.gmra.mxu1 %v17229_v19  ;;  %6746 = vmatprep.mubr.bf16.mxu0 %v17374_v4  ;;  %v3703_v19 = vadd.f32 %v17291_v45, %v17252_v48  ;;  %v4056_v42 = vmax.f32 %v3976_v63, 0.0  ;;  %v17395_v43 = vpack.c.bf16 %v4104_v14, %v4097_v50  ;;  %v3991_v49 = vpop.f32.mrf.mxu0 }
 0x4f7   :  { %6314 = vmatprep.mubr.bf16.mxu1 %v17377_v35  ;;  %7179 = vmatpush1.bf16.msra.mxu1 %v15076_v54  ;;  %v13374_v13 = vpop.f32.mrf.mxu1 }
 0x4f8   :  { %v3979_v36 = vadd.f32 %v3978_v1, %v3882_v33  ;;  %v13375_v46 = vadd.f32 %v13374_v13, %v13373_v16  ;;  %6747 = vmatmul.mubr.bf16.gmra.mxu0 %v17324_v47  ;;  %7180 = vmatprep.subr.bf16.mxu1 %v15081_v20  ;;  %v3816_v34 = vadd.f32 %v17293_v7, %v3703_v19  ;;  %v14102_v63 = vpop.f32.mrf.mxu0  ;;  %v15091_v19 = vld [vmem:[#allocation18 + $0x6c0] ss:$8 sps:$4 sm:$0xff]  }
 0x4f9   :  { %v13376_v44 = vpop.f32.mrf.mxu1  ;;  %13423 = vmatprep.subr.bf16.mxu0 %v15110_v56  ;;  %v4111_v56 = vmax.f32 %v3812_v61, 0.0  ;;  %v15119_v61 = vld [vmem:[#allocation20 + $0x8] sm:$0xff]  }
 0x4fa   :  { %v3887_v32 = vadd.f32 %v13375_v46, %v17328_v2  ;;  %v4063_v58 = vmax.f32 %v3979_v36, 0.0  ;;  %13424 = vmatpush3.bf16.msra.mxu0 %v15111_v9  ;;  %v4118_v54 = vmax.f32 %v3816_v34, 0.0  ;;  %v15088_v9 = vld [vmem:[#allocation18 + $0x6d0] ss:$8 sps:$4 sm:$0xff]   ;;  %v3994_v14 = vpop.f32.mrf.mxu0 }
 0x4fb   :  { %7181 = vmatpush1.bf16.msra.mxu1 %v15079_v3  ;;  %v13377_v21 = vpop.f32.mrf.mxu1  ;;  %13425 = vmatprep.subr.bf16.mxu0 %v15112_v30  ;;  %v15116_v36 = vld [vmem:[#allocation20 + $0x50] sm:$0xff]  }
 0x4fc   :  { %v13378_v60 = vadd.f32 %v13377_v21, %v13376_v44  ;;  %7182 = vmatprep.subr.bf16.mxu1 %v15084_v57  ;;  %v17392_v45 = vpack.c.bf16 %v4063_v58, %v4056_v42  ;;  %v3984_v38 = vadd.f32 %v17353_v17, %v3887_v32  ;;  %v15090_v17 = vld [vmem:[#allocation18 + $0x6d4] ss:$8 sps:$4 sm:$0xff]   ;;  %v17413_v30 = vpack.c.bf16 %v4118_v54, %v4111_v56  ;;  %v15118_v44 = vld [vmem:[#allocation20 + $0x48] sm:$0xff]   ;;  %v15094_v34 = vld [vmem:[#allocation18 + $0x6b0] ss:$8 sps:$4 sm:$0xff]  }
 0x4fd   :  { %v13379_v11 = vpop.f32.mrf.mxu1  ;;  %v15096_v58 = vld [vmem:[#allocation18 + $0x6b4] ss:$8 sps:$4 sm:$0xff]  }
 0x4fe   :  { %v3890_v51 = vadd.f32 %v13378_v60, %v17328_v2  ;;  %6315 = vmatmul.mubr.bf16.gmra.mxu1 %v17259_v28  ;;  %6756 = vmatprep.mubr.bf16.mxu0 %v17392_v45  ;;  %v3713_v28 = vadd.f32 %v17316_v8, %v17252_v48  ;;  %v4070_v20 = vmax.f32 %v3984_v38, 0.0  ;;  %v15093_v8 = vld [vmem:[#allocation18 + $0x6c4] ss:$8 sps:$4 sm:$0xff]   ;;  %v17422_v60 = vpop.f32.mrf.mxu0 }
 0x4ff   :  { %6324 = vmatprep.mubr.bf16.mxu1 %v17395_v43  ;;  %7183 = vmatpush2.bf16.msra.mxu1 %v15082_v59  ;;  %v13380_v7 = vpop.f32.mrf.mxu1  ;;  %v15099_v38 = vld [vmem:[#allocation18 + $0x6a4] ss:$8 sps:$4 sm:$0xff]  }
 0x500   :  { %v3987_v6 = vadd.f32 %v17372_v37, %v3890_v51  ;;  %v13381_v23 = vadd.f32 %v13380_v7, %v13379_v11  ;;  %6757 = vmatmul.mubr.bf16.gmra.mxu0 %v17342_v10  ;;  %7184 = vmatprep.subr.bf16.mxu1 %v15087_v12  ;;  %v3709_v37 = vadd.f32 %v17303_v15, %v17252_v48  ;;  %v15117_v48 = vld [vmem:[#allocation20 + $0x10] sm:$0xff]  }
 0x501   :  { %v13382_v52 = vpop.f32.mrf.mxu1  ;;  %13426 = vmatpush3.bf16.msra.mxu0 %v15113_v55  ;;  %v3826_v13 = vadd.f32 %v17318_v31, %v3713_v28 }
 0x502   :  { %v3895_v27 = vadd.f32 %v13381_v23, %v17328_v2  ;;  %v4077_v16 = vmax.f32 %v3987_v6, 0.0  ;;  %13427 = vmatprep.subr.bf16.mxu0 %v15114_v0  ;;  %v3822_v15 = vadd.f32 %v17305_v40, %v3709_v37  ;;  %v4007_v6 = vpop.f32.mrf.mxu0  ;;  %v15100_v37 = vld [vmem:[#allocation18 + $0x690] ss:$8 sps:$4 sm:$0xff]  }
 0x503   :  { %7185 = vmatpush2.bf16.msra.mxu1 %v15085_v62  ;;  %v13383_v33 = vpop.f32.mrf.mxu1  ;;  %v4132_v50 = vmax.f32 %v3826_v13, 0.0  ;;  %v15120_v62 = vld [vmem:[#allocation20 + $0x40] sm:$0xff]  }
 0x504   :  { %v13384_v39 = vadd.f32 %v13383_v33, %v13382_v52  ;;  %7186 = vmatprep.subr.bf16.mxu1 %v15090_v17  ;;  %v17410_v1 = vpack.c.bf16 %v4077_v16, %v4070_v20  ;;  %v3992_v46 = vadd.f32 %v3991_v49, %v3895_v27  ;;  %v4125_v59 = vmax.f32 %v3822_v15, 0.0  ;;  %v15097_v17 = vld [vmem:[#allocation18 + $0x6a0] ss:$8 sps:$4 sm:$0xff]   ;;  %v15102_v52 = vld [vmem:[#allocation18 + $0x694] ss:$8 sps:$4 sm:$0xff]   ;;  %v14106_v16 = vpop.f32.mrf.mxu0 }
 0x505   :  { %v13385_v3 = vpop.f32.mrf.mxu1  ;;  %13428 = vmatpush3.bf16.msra.mxu0 %v15115_v26  ;;  %v15121_v26 = vld [vmem:[#allocation20] sm:$0xff]  }
 0x506   :  { %v3898_v57 = vadd.f32 %v13384_v39, %v17328_v2  ;;  %6325 = vmatmul.mubr.bf16.gmra.mxu1 %v17283_v29  ;;  %6766 = vmatprep.mubr.bf16.mxu0 %v17410_v1  ;;  %v4084_v22 = vmax.f32 %v3992_v46, 0.0  ;;  %v17426_v0 = vpack.c.bf16 %v4132_v50, %v4125_v59 }
 0x507   :  { %6334 = vmatprep.mubr.bf16.mxu1 %v17413_v30  ;;  %7187 = vmatpush2.bf16.msra.mxu1 %v15088_v9  ;;  %v13386_v31 = vpop.f32.mrf.mxu1  ;;  %v15107_v9 = vld [vmem:[#allocation18 + $0x684] ss:$8 sps:$4 sm:$0xff]  }
 0x508   :  { %v3995_v42 = vadd.f32 %v3994_v14, %v3898_v57  ;;  %v13387_v32 = vadd.f32 %v13386_v31, %v13385_v3  ;;  %6767 = vmatmul.mubr.bf16.gmra.mxu0 %v17358_v53  ;;  %7188 = vmatprep.subr.bf16.mxu1 %v15093_v8  ;;  %v15129_v8 = vld [vmem:[#allocation20 + $0x138] sm:$0xff]   ;;  %v15105_v57 = vld [vmem:[#allocation18 + $0x680] ss:$8 sps:$4 sm:$0xff]   ;;  %v4222_v14 = vld [vmem:[%s18474_s10] sm:$0x3] }
 0x509   :  { %v13388_v29 = vpop.f32.mrf.mxu1  ;;  %13429 = vmatprep.subr.bf16.mxu0 %v15116_v36  ;;  %v4010_v36 = vpop.f32.mrf.mxu0  ;;  %v15122_v31 = vld [vmem:[#allocation20 + $0xb8] sm:$0xff]  }
 0x50a   :  { %v3903_v21 = vadd.f32 %v13387_v32, %v17328_v2  ;;  %v4091_v40 = vmax.f32 %v3995_v42, 0.0  ;;  %13430 = vmatpush3.bf16.msra.mxu0 %v15117_v48  ;;  %v18532_v32 = vld [vmem:[#allocation30_spill] sm:$0xff] }
 0x50b   :  { %7189 = vmatpush2.bf16.msra.mxu1 %v15091_v19  ;;  %v13389_v12 = vpop.f32.mrf.mxu1  ;;  %13431 = vmatprep.subr.bf16.mxu0 %v15118_v44 }
 0x50c   :  { %v13390_v11 = vadd.f32 %v13389_v12, %v13388_v29  ;;  %7190 = vmatprep.subr.bf16.mxu1 %v15096_v58  ;;  %v17424_v55 = vpack.c.bf16 %v4091_v40, %v4084_v22  ;;  %v4000_v49 = vadd.f32 %v17390_v5, %v3903_v21  ;;  %v17447_v58 = vrot.slane %v4222_v14, %v18532_v32  ;;  %v15123_v22 = vld [vmem:[#allocation20 + $0xb0] sm:$0xff]   ;;  %v18533_v21 = vld [vmem:[#allocation29_spill] sm:$0xff] }
 0x50d   :  { %v13391_v51 = vpop.f32.mrf.mxu1  ;;  %v17452_v40 = vrot.slane %v4222_v14, %v18533_v21 }
 0x50e   :  { %v3906_v7 = vadd.f32 %v13390_v11, %v17328_v2  ;;  %6335 = vmatmul.mubr.bf16.gmra.mxu1 %v17307_v25  ;;  %6776 = vmatprep.mubr.bf16.mxu0 %v17424_v55  ;;  %v4098_v20 = vmax.f32 %v4000_v49, 0.0 }
 0x50f   :  { %6344 = vmatprep.mubr.bf16.mxu1 %v17426_v0  ;;  %7191 = vmatpush2.bf16.msra.mxu1 %v15094_v34  ;;  %v13392_v23 = vpop.f32.mrf.mxu1 }
 0x510   :  { %v4003_v54 = vadd.f32 %v14102_v63, %v3906_v7  ;;  %v13393_v28 = vadd.f32 %v13392_v23, %v13391_v51  ;;  %6777 = vmatmul.mubr.bf16.gmra.mxu0 %v17377_v35  ;;  %7192 = vmatprep.subr.bf16.mxu1 %v15099_v38 }
 0x511   :  { %v13394_v5 = vpop.f32.mrf.mxu1  ;;  %13432 = vmatpush3.bf16.msra.mxu0 %v15119_v61  ;;  %v15124_v61 = vld [vmem:[#allocation20 + $0xa8] sm:$0xff]  }
 0x512   :  { %v3911_v25 = vadd.f32 %v13393_v28, %v17328_v2  ;;  %v4105_v27 = vmax.f32 %v4003_v54, 0.0  ;;  %13433 = vmatprep.subr.bf16.mxu0 %v15120_v62  ;;  %v4684_v28 = vld [vmem:[%s18474_s10 + $0x2] sm:$0x3] }
 0x513   :  { %7193 = vmatpush2.bf16.msra.mxu1 %v15097_v17  ;;  %v13395_v56 = vpop.f32.mrf.mxu1 }
 0x514   :  { %v13396_v33 = vadd.f32 %v13395_v56, %v13394_v5  ;;  %7194 = vmatprep.subr.bf16.mxu1 %v15102_v52  ;;  %v17435_v63 = vpack.c.bf16 %v4105_v27, %v4098_v20  ;;  %v4008_v13 = vadd.f32 %v4007_v6, %v3911_v25  ;;  %v17477_v27 = vrot.slane %v4684_v28, %v18532_v32 }
 0x515   :  { %v13397_v39 = vpop.f32.mrf.mxu1  ;;  %13434 = vmatpush3.bf16.msra.mxu0 %v15121_v26 }
 0x516   :  { %v3914_v3 = vadd.f32 %v13396_v33, %v17328_v2  ;;  %6345 = vmatmul.mubr.bf16.gmra.mxu1 %v17332_v24  ;;  %6786 = vmatprep.mubr.bf16.mxu0 %v17435_v63  ;;  %v4112_v24 = vmax.f32 %v4008_v13, 0.0 }
 0x517   :  { %7195 = vmatpush2.bf16.msra.mxu1 %v15100_v37  ;;  %7198 = vmatprep.mubr.bf16.mxu1 %v17355_v41  ;;  %v13398_v46 = vpop.f32.mrf.mxu1  ;;  %v17481_v37 = vrot.slane %v4684_v28, %v18533_v21  ;;  %v15132_v28 = vld [vmem:[#allocation20 + $0x80] sm:$0xff]  }
 0x518   :  { %v4011_v48 = vadd.f32 %v4010_v36, %v3914_v3  ;;  %v13399_v15 = vadd.f32 %v13398_v46, %v13397_v39  ;;  %6787 = vmatmul.mubr.bf16.gmra.mxu0 %v17395_v43  ;;  %7196 = vmatprep.subr.bf16.mxu1 %v15107_v9  ;;  %v15127_v36 = vld [vmem:[#allocation20 + $0x90] sm:$0xff]  }
 0x519   :  { %v13400_v19 = vpop.f32.mrf.mxu1  ;;  %13499 = vmatprep.subr.bf16.mxu0 %v15129_v8 }
 0x51a   :  { %v3919_v44 = vadd.f32 %v13399_v15, %v17328_v2  ;;  %v4119_v42 = vmax.f32 %v4011_v48, 0.0  ;;  %v15131_v48 = vld [vmem:[#allocation20 + $0xf8] sm:$0xff]  }
 0x51b   :  { %7197 = vmatpush2.bf16.msra.mxu1 %v15105_v57  ;;  %v13401_v41 = vpop.f32.mrf.mxu1 }
 0x51c   :  { %v13402_v50 = vadd.f32 %v13401_v41, %v13400_v19  ;;  %v17449_v29 = vpack.c.bf16 %v4119_v42, %v4112_v24  ;;  %14107 = vmatprep.subr.bf16.mxu1 %v15122_v31  ;;  %v4016_v59 = vadd.f32 %v17422_v60, %v3919_v44  ;;  %v15133_v19 = vld [vmem:[#allocation20 + $0x130] sm:$0xff]  }
 0x51e   :  { %v3922_v12 = vadd.f32 %v13402_v50, %v17328_v2  ;;  %v4428_v34 = vpop.f32.mrf.mxu1  ;;  %7199 = vmatmul.mubr.bf16.vlgmr.msra.gmra.mxu1 %v17297_v18  ;;  %6796 = vmatprep.mubr.bf16.mxu0 %v17449_v29  ;;  %v4126_v49 = vmax.f32 %v4016_v59, 0.0 }
 0x51f   :  { %v4429_v11 = vadd.f32 %v4428_v34, %v17447_v58  ;;  %7208 = vmatprep.mubr.bf16.mxu1 %v17374_v4  ;;  %14108 = vmatpush3.bf16.msra.mxu1 %v15122_v31  ;;  %v15125_v4 = vld [vmem:[#allocation20 + $0xa0] sm:$0xff]  }
 0x520   :  { %v4019_v38 = vadd.f32 %v14106_v16, %v3922_v12  ;;  %v4430_v51 = vpop.f32.mrf.mxu1  ;;  %6797 = vmatmul.mubr.bf16.gmra.mxu0 %v17413_v30  ;;  %14109 = vmatprep.subr.bf16.mxu1 %v15123_v22  ;;  %v15126_v16 = vld [vmem:[#allocation20 + $0x98] sm:$0xff]  }
 0x521   :  { %v4431_v60 = vadd.f32 %v4430_v51, %v17452_v40  ;;  %v4507_v62 = vmax.f32 %v4429_v11, 0.0 }
 0x522   :  { %v4432_v2 = vpop.f32.mrf.mxu1  ;;  %v4133_v7 = vmax.f32 %v4019_v38, 0.0  ;;  %v15134_v38 = vld [vmem:[#allocation20 + $0xf0] sm:$0xff]  }
 0x523   :  { %v4508_v18 = vmax.f32 %v4431_v60, 0.0  ;;  %v4433_v6 = vadd.f32 %v4432_v2, %v17447_v58  ;;  %14110 = vmatpush3.bf16.msra.mxu1 %v15123_v22  ;;  %v15136_v60 = vld [vmem:[#allocation20 + $0x128] sm:$0xff]  }
 0x524   :  { %v4434_v23 = vpop.f32.mrf.mxu1  ;;  %v17463_v17 = vpack.c.bf16 %v4133_v7, %v4126_v49  ;;  %14111 = vmatprep.subr.bf16.mxu1 %v15124_v61 }
 0x525   :  { %v4435_v54 = vadd.f32 %v4434_v23, %v17452_v40  ;;  %v4509_v5 = vmax.f32 %v4433_v6, 0.0 }
 0x526   :  { %v4438_v52 = vpop.f32.mrf.mxu1  ;;  %7209 = vmatmul.mubr.bf16.gmra.mxu1 %v17324_v47  ;;  %6806 = vmatprep.mubr.bf16.mxu0 %v17463_v17 }
 0x527   :  { %v4510_v26 = vmax.f32 %v4435_v54, 0.0  ;;  %v17472_v20 = vadd.f32 %v4438_v52, %v17447_v58  ;;  %7218 = vmatprep.mubr.bf16.mxu1 %v17392_v45  ;;  %14112 = vmatpush3.bf16.msra.mxu1 %v15124_v61  ;;  %v15901_v31 = vpack.c.bf16 %v4509_v5, %v4507_v62 }
 0x528   :  { %v4440_v25 = vpop.f32.mrf.mxu1  ;;  %6807 = vmatmul.mubr.bf16.gmra.mxu0 %v17426_v0  ;;  %14113 = vmatprep.subr.bf16.mxu1 %v15125_v4 }
 0x529   :  { %v4441_v47 = vadd.f32 %v4440_v25, %v17452_v40  ;;  %v4511_v33 = vmax.f32 %v17472_v20, 0.0  ;;  %v15900_v8 = vpack.c.bf16 %v4510_v26, %v4508_v18  ;;  %v15138_v26 = vld [vmem:[#allocation20 + $0xe8] sm:$0xff]  }
 0x52a   :  { %v4442_v56 = vpop.f32.mrf.mxu1 }
 0x52b   :  { %v4512_v9 = vmax.f32 %v4441_v47, 0.0  ;;  %v4443_v45 = vadd.f32 %v4442_v56, %v17447_v58  ;;  %v4890_v39 = vpop.f32.mrf.mxu0  ;;  %14114 = vmatpush3.bf16.msra.mxu1 %v15125_v4  ;;  %7814 = vmatprep.mubr.bf16.mxu0 %v15900_v8 }
 0x52c   :  { %v4444_v13 = vpop.f32.mrf.mxu1  ;;  %v17486_v3 = vadd.f32 %v4890_v39, %v17477_v27  ;;  %14115 = vmatprep.subr.bf16.mxu1 %v15126_v16 }
 0x52d   :  { %v4445_v46 = vadd.f32 %v4444_v13, %v17452_v40  ;;  %v4892_v57 = vpop.f32.mrf.mxu0  ;;  %v4513_v24 = vmax.f32 %v4443_v45, 0.0 }
 0x52e   :  { %v4448_v15 = vpop.f32.mrf.mxu1  ;;  %v17490_v14 = vadd.f32 %v4892_v57, %v17481_v37  ;;  %7219 = vmatmul.mubr.bf16.gmra.mxu1 %v17342_v10  ;;  %v4969_v50 = vmax.f32 %v17486_v3, 0.0  ;;  %v15128_v10 = vld [vmem:[#allocation20 + $0x88] sm:$0xff]  }
 0x52f   :  { %v4514_v44 = vmax.f32 %v4445_v46, 0.0  ;;  %v17494_v42 = vadd.f32 %v4448_v15, %v17447_v58  ;;  %7228 = vmatprep.mubr.bf16.mxu1 %v17410_v1  ;;  %v4894_v41 = vpop.f32.mrf.mxu0  ;;  %14116 = vmatpush3.bf16.msra.mxu1 %v15126_v16  ;;  %v15903_v56 = vpack.c.bf16 %v4513_v24, %v4511_v33  ;;  %v17540_v33 = vld [vmem:[#allocation20 + $0x178] sm:$0xff]  }
 0x530   :  { %v4970_v22 = vmax.f32 %v17490_v14, 0.0  ;;  %v4450_v59 = vpop.f32.mrf.mxu1  ;;  %v17500_v12 = vadd.f32 %v4894_v41, %v17477_v27  ;;  %7815 = vmatmul.mubr.bf16.vlgmr.msra.gmra.mxu0 %v15901_v31  ;;  %14117 = vmatprep.subr.bf16.mxu1 %v15127_v36  ;;  %v15143_v24 = vld [vmem:[#allocation20 + $0x118] sm:$0xff]  }
 0x531   :  { %v4451_v34 = vadd.f32 %v4450_v59, %v17452_v40  ;;  %v4896_v11 = vpop.f32.mrf.mxu0  ;;  %13500 = vmatpush3.bf16.msra.mxu0 %v15131_v48  ;;  %v4515_v49 = vmax.f32 %v17494_v42, 0.0  ;;  %v15902_v18 = vpack.c.bf16 %v4514_v44, %v4512_v9  ;;  %v15139_v9 = vld [vmem:[#allocation20 + $0x120] sm:$0xff]  }
 0x532   :  { %v13003_v1 = vpack.c.bf16 %v4970_v22, %v4969_v50  ;;  %v4452_v51 = vpop.f32.mrf.mxu1  ;;  %v17508_v61 = vadd.f32 %v4896_v11, %v17481_v37  ;;  %13501 = vmatprep.subr.bf16.mxu0 %v15133_v19  ;;  %v4971_v6 = vmax.f32 %v17500_v12, 0.0  ;;  %v15160_v12 = vld [vmem:[#allocation20 + $0x148] sm:$0xff]  }
 0x533   :  { %v4516_v2 = vmax.f32 %v4451_v34, 0.0  ;;  %v17512_v7 = vadd.f32 %v4452_v51, %v17447_v58  ;;  %v4900_v62 = vpop.f32.mrf.mxu0  ;;  %14118 = vmatpush3.bf16.msra.mxu1 %v15127_v36  ;;  %7822 = vmatprep.mubr.bf16.mxu0 %v15902_v18 }
 0x534   :  { %5097 = vst [vmem:[#allocation2 + $0x8] sm:$0xff] %v13003_v1  ;;  %v4972_v23 = vmax.f32 %v17508_v61, 0.0  ;;  %v4454_v4 = vpop.f32.mrf.mxu1  ;;  %v17517_v54 = vadd.f32 %v4900_v62, %v17477_v27  ;;  %14119 = vmatprep.subr.bf16.mxu1 %v15128_v10  ;;  %v15145_v62 = vld [vmem:[#allocation20 + $0xd8] sm:$0xff]  }
 0x535   :  { %v4455_v52 = vadd.f32 %v4454_v4, %v17452_v40  ;;  %v4902_v5 = vpop.f32.mrf.mxu0  ;;  %13502 = vmatpush3.bf16.msra.mxu0 %v15134_v38  ;;  %v4517_v45 = vmax.f32 %v17512_v7, 0.0 }
 0x536   :  { %v13004_v25 = vpack.c.bf16 %v4972_v23, %v4971_v6  ;;  %v4458_v16 = vpop.f32.mrf.mxu1  ;;  %v17525_v47 = vadd.f32 %v4902_v5, %v17481_v37  ;;  %7229 = vmatmul.mubr.bf16.gmra.mxu1 %v17358_v53  ;;  %13503 = vmatprep.subr.bf16.mxu0 %v15136_v60  ;;  %v18502_v36 = vmax.f32 %v17517_v54, 0.0 }
 0x537   :  { %v4518_v39 = vmax.f32 %v4455_v52, 0.0  ;;  %v17532_v8 = vadd.f32 %v4458_v16, %v17447_v58  ;;  %7238 = vmatprep.mubr.bf16.mxu1 %v17424_v55  ;;  %v4904_v13 = vpop.f32.mrf.mxu0  ;;  %14120 = vmatpush3.bf16.msra.mxu1 %v15128_v10  ;;  %v15140_v55 = vld [vmem:[#allocation20 + $0xe0] sm:$0xff]   ;;  %v15147_v52 = vld [vmem:[#allocation20 + $0x110] sm:$0xff]  }
 0x538   :  { %5098 = vst [vmem:[#allocation2 + $0x40] sm:$0xff] %v13004_v25  ;;  %v4974_v53 = vmax.f32 %v17525_v47, 0.0  ;;  %v4460_v46 = vpop.f32.mrf.mxu1  ;;  %v17538_v20 = vadd.f32 %v4904_v13, %v17477_v27  ;;  %7823 = vmatmul.mubr.bf16.gmra.mxu0 %v15903_v56  ;;  %14121 = vmatprep.subr.bf16.mxu1 %v15132_v28 }
 0x539   :  { %v4461_v57 = vadd.f32 %v4460_v46, %v17452_v40  ;;  %v4906_v48 = vpop.f32.mrf.mxu0  ;;  %13504 = vmatpush3.bf16.msra.mxu0 %v15138_v26  ;;  %v4519_v44 = vmax.f32 %v17532_v8, 0.0  ;;  %v15904_v34 = vpack.c.bf16 %v4518_v39, %v4516_v2 }
 0x53a   :  { %v13005_v15 = vpack.c.bf16 %v4974_v53, %v18502_v36  ;;  %v4462_v31 = vpop.f32.mrf.mxu1  ;;  %v17548_v19 = vadd.f32 %v4906_v48, %v17481_v37  ;;  %13505 = vmatprep.subr.bf16.mxu0 %v15139_v9  ;;  %v18499_v11 = vmax.f32 %v17538_v20, 0.0 }
 0x53b   :  { %v4520_v41 = vmax.f32 %v4461_v57, 0.0  ;;  %v4463_v59 = vadd.f32 %v4462_v31, %v17447_v58  ;;  %v4910_v10 = vpop.f32.mrf.mxu0  ;;  %14122 = vmatpush3.bf16.msra.mxu1 %v15132_v28  ;;  %7830 = vmatprep.mubr.bf16.mxu0 %v15904_v34  ;;  %v15905_v28 = vpack.c.bf16 %v4517_v45, %v4515_v49  ;;  %v15148_v45 = vld [vmem:[#allocation20 + $0xd0] sm:$0xff]   ;;  %v15151_v57 = vld [vmem:[#allocation20 + $0x108] sm:$0xff]  }
 0x53c   :  { %5099 = vst [vmem:[#allocation2 + $0x78] sm:$0xff] %v13005_v15  ;;  %v4976_v38 = vmax.f32 %v17548_v19, 0.0  ;;  %v4464_v1 = vpop.f32.mrf.mxu1  ;;  %v17555_v51 = vadd.f32 %v4910_v10, %v17477_v27  ;;  %14139 = vmatprep.subr.bf16.mxu1 %v17540_v33 }
 0x53d   :  { %v4465_v60 = vadd.f32 %v4464_v1, %v17452_v40  ;;  %v4912_v7 = vpop.f32.mrf.mxu0  ;;  %13506 = vmatpush3.bf16.msra.mxu0 %v15140_v55  ;;  %v4521_v5 = vmax.f32 %v4463_v59, 0.0 }
 0x53e   :  { %v13006_v2 = vpack.c.bf16 %v4976_v38, %v18499_v11  ;;  %v4468_v18 = vpop.f32.mrf.mxu1  ;;  %v17564_v4 = vadd.f32 %v4912_v7, %v17481_v37  ;;  %7239 = vmatmul.mubr.bf16.gmra.mxu1 %v17377_v35  ;;  %13507 = vmatprep.subr.bf16.mxu0 %v15143_v24  ;;  %v18494_v56 = vmax.f32 %v17555_v51, 0.0 }
 0x53f   :  { %v4522_v26 = vmax.f32 %v4465_v60, 0.0  ;;  %v17570_v25 = vadd.f32 %v4468_v18, %v17447_v58  ;;  %7248 = vmatprep.mubr.bf16.mxu1 %v17435_v63  ;;  %v4914_v16 = vpop.f32.mrf.mxu0 }
 0x540   :  { %5100 = vst [vmem:[#allocation2 + $0xb0] sm:$0xff] %v13006_v2  ;;  %v18498_v9 = vmax.f32 %v17564_v4, 0.0  ;;  %v4470_v39 = vpop.f32.mrf.mxu1  ;;  %v17576_v35 = vadd.f32 %v4914_v16, %v17477_v27  ;;  %7831 = vmatmul.mubr.bf16.gmra.mxu0 %v15905_v28  ;;  %v15907_v28 = vpack.c.bf16 %v4521_v5, %v4519_v44  ;;  %v15156_v5 = vld [vmem:[#allocation20 + $0xc0] sm:$0xff]  }
 0x541   :  { %v4471_v42 = vadd.f32 %v4470_v39, %v17452_v40  ;;  %v4916_v49 = vpop.f32.mrf.mxu0  ;;  %13508 = vmatpush3.bf16.msra.mxu0 %v15145_v62  ;;  %v4523_v48 = vmax.f32 %v17570_v25, 0.0  ;;  %v15906_v24 = vpack.c.bf16 %v4522_v26, %v4520_v41  ;;  %v15152_v62 = vld [vmem:[#allocation20 + $0xc8] sm:$0xff]  }
 0x542   :  { %v13007_v63 = vpack.c.bf16 %v18498_v9, %v18494_v56  ;;  %v4472_v13 = vpop.f32.mrf.mxu1  ;;  %v17584_v46 = vadd.f32 %v4916_v49, %v17481_v37  ;;  %13509 = vmatprep.subr.bf16.mxu0 %v15147_v52  ;;  %v18493_v59 = vmax.f32 %v17576_v35, 0.0  ;;  %v15154_v52 = vld [vmem:[#allocation20 + $0x100] sm:$0xff]  }
 0x543   :  { %v4524_v55 = vmax.f32 %v4471_v42, 0.0  ;;  %v4473_v15 = vadd.f32 %v4472_v13, %v17447_v58  ;;  %v4920_v31 = vpop.f32.mrf.mxu0  ;;  %7838 = vmatprep.mubr.bf16.mxu0 %v15906_v24 }
 0x544   :  { %5101 = vst [vmem:[#allocation2 + $0xe8] sm:$0xff] %v13007_v63  ;;  %v18495_v10 = vmax.f32 %v17584_v46, 0.0  ;;  %v4474_v34 = vpop.f32.mrf.mxu1  ;;  %v17591_v1 = vadd.f32 %v4920_v31, %v17477_v27 }
 0x545   :  { %v4475_v60 = vadd.f32 %v4474_v34, %v17452_v40  ;;  %v4922_v7 = vpop.f32.mrf.mxu0  ;;  %13510 = vmatpush3.bf16.msra.mxu0 %v15148_v45  ;;  %v4525_v26 = vmax.f32 %v4473_v15, 0.0 }
 0x546   :  { %v13008_v41 = vpack.c.bf16 %v18495_v10, %v18493_v59  ;;  %v4478_v2 = vpop.f32.mrf.mxu1  ;;  %v17599_v18 = vadd.f32 %v4922_v7, %v17481_v37  ;;  %7249 = vmatmul.mubr.bf16.gmra.mxu1 %v17395_v43  ;;  %13511 = vmatprep.subr.bf16.mxu0 %v15151_v57  ;;  %v18488_v42 = vmax.f32 %v17591_v1, 0.0  ;;  %v17621_v57 = vld [vmem:[#allocation20 + $0x238] sm:$0xff]   ;;  %v15146_v59 = vld [vmem:[#allocation20 + $0x170] sm:$0xff]  }
 0x547   :  { %v4526_v25 = vmax.f32 %v4475_v60, 0.0  ;;  %v17605_v16 = vadd.f32 %v4478_v2, %v17447_v58  ;;  %7258 = vmatprep.mubr.bf16.mxu1 %v17449_v29  ;;  %v4924_v39 = vpop.f32.mrf.mxu0 }
 0x548   :  { %5102 = vst [vmem:[#allocation2 + $0x120] sm:$0xff] %v13008_v41  ;;  %v18492_v49 = vmax.f32 %v17599_v18, 0.0  ;;  %v4480_v45 = vpop.f32.mrf.mxu1  ;;  %v17611_v43 = vadd.f32 %v4924_v39, %v17477_v27  ;;  %7839 = vmatmul.mubr.bf16.gmra.mxu0 %v15907_v28  ;;  %v15909_v39 = vpack.c.bf16 %v4525_v26, %v4523_v48 }
 0x549   :  { %v4481_v8 = vadd.f32 %v4480_v45, %v17452_v40  ;;  %v4926_v44 = vpop.f32.mrf.mxu0  ;;  %13512 = vmatpush3.bf16.msra.mxu0 %v15152_v62  ;;  %v4527_v15 = vmax.f32 %v17605_v16, 0.0  ;;  %v15908_v60 = vpack.c.bf16 %v4526_v25, %v4524_v55 }
 0x54a   :  { %v13009_v29 = vpack.c.bf16 %v18492_v49, %v18488_v42  ;;  %v4482_v63 = vpop.f32.mrf.mxu1  ;;  %v17619_v13 = vadd.f32 %v4926_v44, %v17481_v37  ;;  %13513 = vmatprep.subr.bf16.mxu0 %v15154_v52  ;;  %v18483_v7 = vmax.f32 %v17611_v43, 0.0  ;;  %v15135_v49 = vld [vmem:[#allocation2 + $0x78] ss:$56 sps:$4 sm:$0xff]  }
 0x54b   :  { %v4528_v31 = vmax.f32 %v4481_v8, 0.0  ;;  %v4483_v24 = vadd.f32 %v4482_v63, %v17447_v58  ;;  %v4930_v34 = vpop.f32.mrf.mxu0  ;;  %7846 = vmatprep.mubr.bf16.mxu0 %v15908_v60 }
 0x54c   :  { %5103 = vst [vmem:[#allocation2 + $0x158] sm:$0xff] %v13009_v29  ;;  %v18489_v62 = vmax.f32 %v17619_v13, 0.0  ;;  %v4484_v41 = vpop.f32.mrf.mxu1  ;;  %v17628_v2 = vadd.f32 %v4930_v34, %v17477_v27 }
 0x54d   :  { %v4485_v28 = vadd.f32 %v4484_v41, %v17452_v40  ;;  %v4932_v52 = vpop.f32.mrf.mxu0  ;;  %13514 = vmatpush3.bf16.msra.mxu0 %v15156_v5  ;;  %v4529_v45 = vmax.f32 %v4483_v24, 0.0 }
 0x54e   :  { %v13010_v16 = vpack.c.bf16 %v18489_v62, %v18483_v7  ;;  %v4488_v55 = vpop.f32.mrf.mxu1  ;;  %v17636_v25 = vadd.f32 %v4932_v52, %v17481_v37  ;;  %7259 = vmatmul.mubr.bf16.gmra.mxu1 %v17413_v30  ;;  %14171 = vmatprep.subr.bf16.mxu0 %v17621_v57  ;;  %v18484_v29 = vmax.f32 %v17628_v2, 0.0 }
 0x54f   :  { %v4530_v8 = vmax.f32 %v4485_v28, 0.0  ;;  %v17641_v44 = vadd.f32 %v4488_v55, %v17447_v58  ;;  %7268 = vmatprep.mubr.bf16.mxu1 %v17463_v17  ;;  %v4934_v5 = vpop.f32.mrf.mxu0 }
 0x550   :  { %5104 = vst [vmem:[#allocation2 + $0x190] sm:$0xff] %v13010_v16  ;;  %v18485_v63 = vmax.f32 %v17636_v25, 0.0  ;;  %v4490_v34 = vpop.f32.mrf.mxu1  ;;  %v17647_v60 = vadd.f32 %v4934_v5, %v17477_v27  ;;  %7847 = vmatmul.mubr.bf16.gmra.mxu0 %v15909_v39 }
 0x551   :  { %v4491_v30 = vadd.f32 %v4490_v34, %v17452_v40  ;;  %v4936_v48 = vpop.f32.mrf.mxu0  ;;  %v4531_v41 = vmax.f32 %v17641_v44, 0.0  ;;  %v15910_v55 = vpack.c.bf16 %v4530_v8, %v4528_v31 }
 0x552   :  { %v13011_v26 = vpack.c.bf16 %v18485_v63, %v18484_v29  ;;  %v4492_v17 = vpop.f32.mrf.mxu1  ;;  %v17655_v24 = vadd.f32 %v4936_v48, %v17481_v37  ;;  %v18486_v39 = vmax.f32 %v17647_v60, 0.0  ;;  %v15130_v63 = vld [vmem:[#allocation2 + $0x8] ss:$56 sps:$4 sm:$0xff]  }
 0x553   :  { %v4532_v28 = vmax.f32 %v4491_v30, 0.0  ;;  %v4493_v52 = vadd.f32 %v4492_v17, %v17447_v58  ;;  %v4940_v16 = vpop.f32.mrf.mxu0  ;;  %7854 = vmatprep.mubr.bf16.mxu0 %v15910_v55  ;;  %v15911_v30 = vpack.c.bf16 %v4529_v45, %v4527_v15  ;;  %v5146_v55 = vld [vmem:[%s18474_s10 + $0x4] sm:$0x3] }
 0x554   :  { %5105 = vst [vmem:[#allocation2 + $0x1c8] sm:$0xff] %v13011_v26  ;;  %v18487_v5 = vmax.f32 %v17655_v24, 0.0  ;;  %v4494_v34 = vpop.f32.mrf.mxu1  ;;  %v17662_v7 = vadd.f32 %v4940_v16, %v17477_v27 }
 0x555   :  { %v4495_v29 = vadd.f32 %v4494_v34, %v17452_v40  ;;  %v4942_v48 = vpop.f32.mrf.mxu0  ;;  %v4533_v26 = vmax.f32 %v4493_v52, 0.0 }
 0x556   :  { %v13012_v44 = vpack.c.bf16 %v18487_v5, %v18486_v39  ;;  %v4498_v31 = vpop.f32.mrf.mxu1  ;;  %v17670_v8 = vadd.f32 %v4942_v48, %v17481_v37  ;;  %7269 = vmatmul.mubr.bf16.gmra.mxu1 %v17426_v0  ;;  %v18490_v39 = vmax.f32 %v17662_v7, 0.0 }
 0x557   :  { %v4534_v17 = vmax.f32 %v4495_v29, 0.0  ;;  %v17674_v16 = vadd.f32 %v4498_v31, %v17447_v58  ;;  %14123 = vmatprep.mubr.bf16.mxu1 %v15130_v63  ;;  %v4944_v34 = vpop.f32.mrf.mxu0 }
 0x558   :  { %5106 = vst [vmem:[#allocation2 + $0x200] sm:$0xff] %v13012_v44  ;;  %v18491_v48 = vmax.f32 %v17670_v8, 0.0  ;;  %v4500_v5 = vpop.f32.mrf.mxu1  ;;  %v17682_v0 = vadd.f32 %v4944_v34, %v17477_v27  ;;  %7855 = vmatmul.mubr.bf16.gmra.mxu0 %v15911_v30  ;;  %v17693_v44 = vrot.slane %v5146_v55, %v18532_v32 }
 0x559   :  { %v4501_v15 = vadd.f32 %v4500_v5, %v17452_v40  ;;  %v4946_v45 = vpop.f32.mrf.mxu0  ;;  %v4535_v31 = vmax.f32 %v17674_v16, 0.0  ;;  %v15912_v42 = vpack.c.bf16 %v4534_v17, %v4532_v28 }
 0x55a   :  { %v13013_v29 = vpack.c.bf16 %v18491_v48, %v18490_v39  ;;  %v4502_v63 = vpop.f32.mrf.mxu1  ;;  %v17690_v52 = vadd.f32 %v4946_v45, %v17481_v37  ;;  %v18496_v62 = vmax.f32 %v17682_v0, 0.0 }
 0x55b   :  { %v4536_v34 = vmax.f32 %v4501_v15, 0.0  ;;  %v17697_v30 = vadd.f32 %v4502_v63, %v17447_v58  ;;  %v4950_v5 = vpop.f32.mrf.mxu0  ;;  %v15137_v15 = vld [vmem:[#allocation2 + $0xe8] ss:$56 sps:$4 sm:$0xff]   ;;  %v17706_v58 = vrot.slane %v5146_v55, %v18533_v21  ;;  %7862 = vmatprep.mubr.bf16.mxu0 %v15912_v42  ;;  %v15913_v63 = vpack.c.bf16 %v4533_v26, %v4531_v41 }
 0x55c   :  { %5107 = vst [vmem:[#allocation2 + $0x238] sm:$0xff] %v13013_v29  ;;  %v18497_v39 = vmax.f32 %v17690_v52, 0.0  ;;  %v4504_v48 = vpop.f32.mrf.mxu1  ;;  %v17702_v45 = vadd.f32 %v4950_v5, %v17477_v27 }
 0x55d   :  { %v4505_v56 = vadd.f32 %v4504_v48, %v17452_v40  ;;  %v4952_v10 = vpop.f32.mrf.mxu0  ;;  %v4537_v5 = vmax.f32 %v17697_v30, 0.0 }
 0x55e   :  { %v13014_v28 = vpack.c.bf16 %v18497_v39, %v18496_v62  ;;  %v17713_v17 = vadd.f32 %v4952_v10, %v17481_v37  ;;  %v5352_v29 = vpop.f32.mrf.mxu1  ;;  %14124 = vmatmul.mubr.bf16.vlgmr.msra.gmra.mxu1 %v15135_v49  ;;  %v18500_v42 = vmax.f32 %v17702_v45, 0.0  ;;  %v15149_v49 = vld [vmem:[#allocation20 + $0x168] sm:$0xff]  }
 0x55f   :  { %v4538_v40 = vmax.f32 %v4505_v56, 0.0  ;;  %v5353_v48 = vadd.f32 %v5352_v29, %v17693_v44  ;;  %14127 = vmatprep.mubr.bf16.mxu1 %v15137_v15  ;;  %v4954_v55 = vpop.f32.mrf.mxu0  ;;  %14140 = vmatpush3.bf16.msra.mxu1 %v17540_v33 }
 0x560   :  { %5108 = vst [vmem:[#allocation2 + $0x270] sm:$0xff] %v13014_v28  ;;  %v18501_v62 = vmax.f32 %v17713_v17, 0.0  ;;  %v17721_v10 = vadd.f32 %v4954_v55, %v17477_v27  ;;  %v5354_v39 = vpop.f32.mrf.mxu1  ;;  %7863 = vmatmul.mubr.bf16.gmra.mxu0 %v15913_v63  ;;  %14141 = vmatprep.subr.bf16.mxu1 %v15146_v59 }
 0x561   :  { %v5355_v56 = vadd.f32 %v5354_v39, %v17706_v58  ;;  %v4956_v41 = vpop.f32.mrf.mxu0  ;;  %v5431_v15 = vmax.f32 %v5353_v48, 0.0  ;;  %v15914_v63 = vpack.c.bf16 %v4538_v40, %v4536_v34 }
 0x562   :  { %v13015_v33 = vpack.c.bf16 %v18501_v62, %v18500_v42  ;;  %v17729_v26 = vadd.f32 %v4956_v41, %v17481_v37  ;;  %v5356_v30 = vpop.f32.mrf.mxu1  ;;  %v18503_v39 = vmax.f32 %v17721_v10, 0.0  ;;  %v15142_v62 = vld [vmem:[#allocation2 + $0x158] ss:$56 sps:$4 sm:$0xff]  }
 0x563   :  { %v5432_v28 = vmax.f32 %v5355_v56, 0.0  ;;  %v5357_v29 = vadd.f32 %v5356_v30, %v17693_v44  ;;  %v4960_v55 = vpop.f32.mrf.mxu0  ;;  %14142 = vmatpush3.bf16.msra.mxu1 %v15146_v59  ;;  %v15153_v41 = vld [vmem:[#allocation20 + $0x160] sm:$0xff]   ;;  %v15144_v30 = vld [vmem:[#allocation2 + $0x1c8] ss:$56 sps:$4 sm:$0xff]   ;;  %v5608_v59 = vld [vmem:[%s18474_s10 + $0x6] sm:$0x3]  ;;  %7870 = vmatprep.mubr.bf16.mxu0 %v15914_v63 }
 0x564   :  { %5109 = vst [vmem:[#allocation2 + $0x2a8] sm:$0xff] %v13015_v33  ;;  %v4996_v9 = vmax.f32 %v17729_v26, 0.0  ;;  %v17735_v11 = vadd.f32 %v4960_v55, %v17477_v27  ;;  %v5358_v42 = vpop.f32.mrf.mxu1  ;;  %14143 = vmatprep.subr.bf16.mxu1 %v15149_v49  ;;  %v15196_v26 = vld [vmem:[#allocation20 + $0x180] sm:$0xff]  }
 0x565   :  { %v13019_v36 = vpack.c.bf16 %v5432_v28, %v5431_v15  ;;  %v5359_v48 = vadd.f32 %v5358_v42, %v17706_v58  ;;  %v4962_v56 = vpop.f32.mrf.mxu0  ;;  %v15915_v42 = vpack.c.bf16 %v4537_v5, %v4535_v31  ;;  %v5433_v15 = vmax.f32 %v5357_v29, 0.0  ;;  %v15157_v5 = vld [vmem:[#allocation20 + $0x158] sm:$0xff]  }
 0x566   :  { %v13016_v34 = vpack.c.bf16 %v4996_v9, %v18503_v39  ;;  %v17746_v40 = vadd.f32 %v4962_v56, %v17481_v37  ;;  %v5362_v33 = vpop.f32.mrf.mxu1  ;;  %14128 = vmatmul.mubr.bf16.gmra.mxu1 %v15142_v62  ;;  %v15916_v39 = vpack.c.bf16 %v4972_v23, %v4970_v22  ;;  %v4997_v56 = vmax.f32 %v17735_v11, 0.0 }
 0x567   :  { %5559 = vst [vmem:[#allocation2 + $0x10] sm:$0xff] %v13019_v36  ;;  %v5434_v28 = vmax.f32 %v5359_v48, 0.0  ;;  %v5363_v55 = vadd.f32 %v5362_v33, %v17693_v44  ;;  %14131 = vmatprep.mubr.bf16.mxu1 %v15144_v30  ;;  %v4964_v63 = vpop.f32.mrf.mxu0  ;;  %14144 = vmatpush3.bf16.msra.mxu1 %v15149_v49  ;;  %v17761_v31 = vrot.slane %v5608_v59, %v18532_v32 }
 0x568   :  { %5110 = vst [vmem:[#allocation2 + $0x2e0] sm:$0xff] %v13016_v34  ;;  %v4998_v62 = vmax.f32 %v17746_v40, 0.0  ;;  %v17758_v16 = vadd.f32 %v4964_v63, %v17477_v27  ;;  %v5364_v36 = vpop.f32.mrf.mxu1  ;;  %7871 = vmatmul.mubr.bf16.gmra.mxu0 %v15915_v42  ;;  %14145 = vmatprep.subr.bf16.mxu1 %v15153_v41  ;;  %v17772_v29 = vrot.slane %v5608_v59, %v18533_v21  ;;  %v15158_v63 = vld [vmem:[#allocation20 + $0x150] sm:$0xff]  }
 0x569   :  { %v13020_v49 = vpack.c.bf16 %v5434_v28, %v5433_v15  ;;  %v5365_v14 = vadd.f32 %v5364_v36, %v17706_v58  ;;  %v4966_v61 = vpop.f32.mrf.mxu0  ;;  %8464 = vmatprep.mubr.bf16.mxu0 %v15916_v39  ;;  %v5435_v48 = vmax.f32 %v5363_v55, 0.0  ;;  %v15150_v28 = vld [vmem:[#allocation2 + $0x238] ss:$56 sps:$4 sm:$0xff]  }
 0x56a   :  { %v13017_v22 = vpack.c.bf16 %v4998_v62, %v4997_v56  ;;  %v17769_v27 = vadd.f32 %v4966_v61, %v17481_v37  ;;  %v5366_v23 = vpop.f32.mrf.mxu1  ;;  %v18504_v39 = vmax.f32 %v17758_v16, 0.0  ;;  %v15917_v61 = vpack.c.bf16 %v4971_v6, %v4969_v50 }
 0x56b   :  { %5560 = vst [vmem:[#allocation2 + $0x48] sm:$0xff] %v13020_v49  ;;  %v5436_v30 = vmax.f32 %v5365_v14, 0.0  ;;  %v5367_v34 = vadd.f32 %v5366_v23, %v17693_v44  ;;  %v5814_v33 = vpop.f32.mrf.mxu0  ;;  %14146 = vmatpush3.bf16.msra.mxu1 %v15153_v41 }
 0x56c   :  { %5111 = vst [vmem:[#allocation2 + $0x318] sm:$0xff] %v13017_v22  ;;  %v5000_v42 = vmax.f32 %v17769_v27, 0.0  ;;  %v5368_v15 = vpop.f32.mrf.mxu1  ;;  %v5815_v37 = vadd.f32 %v5814_v33, %v17761_v31  ;;  %14147 = vmatprep.subr.bf16.mxu1 %v15157_v5  ;;  %v15172_v22 = vld [vmem:[#allocation20 + $0x230] sm:$0xff]  }
 0x56d   :  { %v13021_v59 = vpack.c.bf16 %v5436_v30, %v5435_v48  ;;  %v5369_v36 = vadd.f32 %v5368_v15, %v17706_v58  ;;  %v5816_v55 = vpop.f32.mrf.mxu0  ;;  %v5437_v23 = vmax.f32 %v5367_v34, 0.0 }
 0x56e   :  { %v13018_v41 = vpack.c.bf16 %v5000_v42, %v18504_v39  ;;  %v5372_v49 = vpop.f32.mrf.mxu1  ;;  %v5817_v14 = vadd.f32 %v5816_v55, %v17772_v29  ;;  %14132 = vmatmul.mubr.bf16.gmra.mxu1 %v15150_v28  ;;  %v15918_v55 = vpack.c.bf16 %v4976_v38, %v4974_v53  ;;  %v5893_v28 = vmax.f32 %v5815_v37, 0.0 }
 0x56f   :  { %5561 = vst [vmem:[#allocation2 + $0x80] sm:$0xff] %v13021_v59  ;;  %v5438_v48 = vmax.f32 %v5369_v36, 0.0  ;;  %v5373_v30 = vadd.f32 %v5372_v49, %v17693_v44  ;;  %v5818_v33 = vpop.f32.mrf.mxu0  ;;  %v15155_v15 = vld [vmem:[#allocation2 + $0x2a8] ss:$56 sps:$4 sm:$0xff]   ;;  %14148 = vmatpush3.bf16.msra.mxu1 %v15157_v5 }
 0x570   :  { %5112 = vst [vmem:[#allocation2 + $0x350] sm:$0xff] %v13018_v41  ;;  %v5894_v3 = vmax.f32 %v5817_v14, 0.0  ;;  %v5374_v39 = vpop.f32.mrf.mxu1  ;;  %v5819_v50 = vadd.f32 %v5818_v33, %v17761_v31  ;;  %8465 = vmatmul.mubr.bf16.vlgmr.msra.gmra.mxu0 %v15917_v61  ;;  %14149 = vmatprep.subr.bf16.mxu1 %v15158_v63  ;;  %v15176_v41 = vld [vmem:[#allocation20 + $0x228] sm:$0xff]  }
 0x571   :  { %v13022_v6 = vpack.c.bf16 %v5438_v48, %v5437_v23  ;;  %v5375_v34 = vadd.f32 %v5374_v39, %v17706_v58  ;;  %v5820_v59 = vpop.f32.mrf.mxu0  ;;  %14135 = vmatprep.mubr.bf16.mxu1 %v15155_v15  ;;  %8472 = vmatprep.mubr.bf16.mxu0 %v15918_v55  ;;  %v5439_v53 = vmax.f32 %v5373_v30, 0.0  ;;  %v15162_v23 = vld [vmem:[#allocation20 + $0x140] sm:$0xff]  }
 0x572   :  { %v13035_v5 = vpack.c.bf16 %v5894_v3, %v5893_v28  ;;  %v5376_v47 = vpop.f32.mrf.mxu1  ;;  %v5821_v19 = vadd.f32 %v5820_v59, %v17772_v29  ;;  %14172 = vmatpush3.bf16.msra.mxu0 %v17621_v57  ;;  %v5895_v39 = vmax.f32 %v5819_v50, 0.0  ;;  %v18535_v28 = vmax.f32 %v17538_v20, 0.0  ;;  %v15179_v50 = vld [vmem:[#allocation20 + $0x220] sm:$0xff]  }
 0x573   :  { %5562 = vst [vmem:[#allocation2 + $0xb8] sm:$0xff] %v13022_v6  ;;  %v5440_v38 = vmax.f32 %v5375_v34, 0.0  ;;  %v5377_v37 = vadd.f32 %v5376_v47, %v17693_v44  ;;  %v5824_v36 = vpop.f32.mrf.mxu0  ;;  %14150 = vmatpush3.bf16.msra.mxu1 %v15158_v63  ;;  %14173 = vmatprep.subr.bf16.mxu0 %v15172_v22  ;;  %v18534_v63 = vmax.f32 %v17517_v54, 0.0 }
 0x574   :  { %6021 = vst [vmem:[#allocation2 + $0x18] sm:$0xff] %v13035_v5  ;;  %v5896_v49 = vmax.f32 %v5821_v19, 0.0  ;;  %v5378_v14 = vpop.f32.mrf.mxu1  ;;  %v5825_v61 = vadd.f32 %v5824_v36, %v17761_v31  ;;  %14151 = vmatprep.subr.bf16.mxu1 %v15160_v12  ;;  %v18536_v19 = vmax.f32 %v17564_v4, 0.0 }
 0x575   :  { %v13023_v48 = vpack.c.bf16 %v5440_v38, %v5439_v53  ;;  %v5379_v57 = vadd.f32 %v5378_v14, %v17706_v58  ;;  %v5826_v33 = vpop.f32.mrf.mxu0  ;;  %v15919_v3 = vpack.c.bf16 %v18535_v28, %v18534_v63  ;;  %v5441_v6 = vmax.f32 %v5377_v37, 0.0  ;;  %v15167_v37 = vld [vmem:[#allocation20 + $0x1f8] sm:$0xff]  }
 0x576   :  { %v13036_v30 = vpack.c.bf16 %v5896_v49, %v5895_v39  ;;  %v5382_v15 = vpop.f32.mrf.mxu1  ;;  %v5827_v55 = vadd.f32 %v5826_v33, %v17772_v29  ;;  %14174 = vmatpush3.bf16.msra.mxu0 %v15172_v22  ;;  %v18537_v53 = vmax.f32 %v17584_v46, 0.0  ;;  %v5897_v54 = vmax.f32 %v5825_v61, 0.0  ;;  %v15161_v39 = vld [vmem:[#allocation2 + $0x10] ss:$56 sps:$4 sm:$0xff]  }
 0x577   :  { %5563 = vst [vmem:[#allocation2 + $0xf0] sm:$0xff] %v13023_v48  ;;  %v5442_v34 = vmax.f32 %v5379_v57, 0.0  ;;  %v5383_v59 = vadd.f32 %v5382_v15, %v17693_v44  ;;  %v5828_v5 = vpop.f32.mrf.mxu0  ;;  %v15159_v47 = vld [vmem:[#allocation2 + $0x318] ss:$56 sps:$4 sm:$0xff]   ;;  %14152 = vmatpush3.bf16.msra.mxu1 %v15160_v12  ;;  %14175 = vmatprep.subr.bf16.mxu0 %v15176_v41  ;;  %v15183_v15 = vld [vmem:[#allocation20 + $0x218] sm:$0xff]  }
 0x578   :  { %v15920_v38 = vpack.c.bf16 %v18537_v53, %v18536_v19  ;;  %6022 = vst [vmem:[#allocation2 + $0x50] sm:$0xff] %v13036_v30  ;;  %v5898_v20 = vmax.f32 %v5827_v55, 0.0  ;;  %v5384_v36 = vpop.f32.mrf.mxu1  ;;  %v5829_v22 = vadd.f32 %v5828_v5, %v17761_v31  ;;  %8473 = vmatmul.mubr.bf16.gmra.mxu0 %v15919_v3  ;;  %14153 = vmatprep.subr.bf16.mxu1 %v15162_v23  ;;  %v15168_v5 = vld [vmem:[#allocation20 + $0x1b8] sm:$0xff]  }
 0x579   :  { %v13024_v49 = vpack.c.bf16 %v5442_v34, %v5441_v6  ;;  %v5385_v14 = vadd.f32 %v5384_v36, %v17706_v58  ;;  %v5830_v12 = vpop.f32.mrf.mxu0  ;;  %14136 = vmatmul.mubr.bf16.gmra.mxu1 %v15159_v47  ;;  %v5443_v61 = vmax.f32 %v5383_v59, 0.0  ;;  %v15170_v59 = vld [vmem:[#allocation20 + $0x1f0] sm:$0xff]  }
 0x57a   :  { %8480 = vmatprep.mubr.bf16.mxu0 %v15920_v38  ;;  %v13037_v4 = vpack.c.bf16 %v5898_v20, %v5897_v54  ;;  %v5386_v46 = vpop.f32.mrf.mxu1  ;;  %v5831_v48 = vadd.f32 %v5830_v12, %v17772_v29  ;;  %14155 = vmatprep.mubr.bf16.mxu1 %v15161_v39  ;;  %v5899_v55 = vmax.f32 %v5829_v22, 0.0  ;;  %v18539_v38 = vmax.f32 %v17576_v35, 0.0  ;;  %v15163_v20 = vld [vmem:[#allocation2 + $0x80] ss:$56 sps:$4 sm:$0xff]  }
 0x57b   :  { %14176 = vmatpush3.bf16.msra.mxu0 %v15176_v41  ;;  %5564 = vst [vmem:[#allocation2 + $0x128] sm:$0xff] %v13024_v49  ;;  %v5444_v57 = vmax.f32 %v5385_v14, 0.0  ;;  %v5387_v33 = vadd.f32 %v5386_v46, %v17693_v44  ;;  %v5834_v30 = vpop.f32.mrf.mxu0  ;;  %14154 = vmatpush3.bf16.msra.mxu1 %v15162_v23  ;;  %v18538_v23 = vmax.f32 %v17555_v51, 0.0  ;;  %v18540_v49 = vmax.f32 %v17599_v18, 0.0  ;;  %v15174_v18 = vld [vmem:[#allocation20 + $0x1e8] sm:$0xff]  }
 0x57c   :  { %14177 = vmatprep.subr.bf16.mxu0 %v15179_v50  ;;  %6023 = vst [vmem:[#allocation2 + $0x88] sm:$0xff] %v13037_v4  ;;  %v5900_v63 = vmax.f32 %v5831_v48, 0.0  ;;  %v5388_v28 = vpop.f32.mrf.mxu1  ;;  %v5835_v3 = vadd.f32 %v5834_v30, %v17761_v31  ;;  %13579 = vmatprep.subr.bf16.mxu1 %v15167_v37  ;;  %v18541_v14 = vmax.f32 %v17619_v13, 0.0  ;;  %v15186_v4 = vld [vmem:[#allocation20 + $0x210] sm:$0xff]  }
 0x57d   :  { %v13025_v6 = vpack.c.bf16 %v5444_v57, %v5443_v61  ;;  %v5389_v34 = vadd.f32 %v5388_v28, %v17706_v58  ;;  %v5836_v41 = vpop.f32.mrf.mxu0  ;;  %v15921_v54 = vpack.c.bf16 %v18539_v38, %v18538_v23  ;;  %v5445_v36 = vmax.f32 %v5387_v33, 0.0  ;;  %v15171_v33 = vld [vmem:[#allocation20 + $0x1b0] sm:$0xff]  }
 0x57e   :  { %v13038_v47 = vpack.c.bf16 %v5900_v63, %v5899_v55  ;;  %v5392_v19 = vpop.f32.mrf.mxu1  ;;  %v5837_v53 = vadd.f32 %v5836_v41, %v17772_v29  ;;  %v15922_v12 = vpack.c.bf16 %v18541_v14, %v18540_v49  ;;  %v5901_v51 = vmax.f32 %v5835_v3, 0.0  ;;  %v15193_v41 = vld [vmem:[#allocation20 + $0x208] sm:$0xff]   ;;  %v15177_v49 = vld [vmem:[#allocation20 + $0x1e0] sm:$0xff]  }
 0x57f   :  { %14178 = vmatpush3.bf16.msra.mxu0 %v15179_v50  ;;  %5565 = vst [vmem:[#allocation2 + $0x160] sm:$0xff] %v13025_v6  ;;  %v5446_v22 = vmax.f32 %v5389_v34, 0.0  ;;  %v5393_v39 = vadd.f32 %v5392_v19, %v17693_v44  ;;  %v5838_v37 = vpop.f32.mrf.mxu0 }
 0x580   :  { %14179 = vmatprep.subr.bf16.mxu0 %v15183_v15  ;;  %6024 = vst [vmem:[#allocation2 + $0xc0] sm:$0xff] %v13038_v47  ;;  %v5902_v46 = vmax.f32 %v5837_v53, 0.0  ;;  %v5394_v35 = vpop.f32.mrf.mxu1  ;;  %v5839_v48 = vadd.f32 %v5838_v37, %v17761_v31  ;;  %8481 = vmatmul.mubr.bf16.gmra.mxu0 %v15921_v54  ;;  %v15175_v54 = vld [vmem:[#allocation20 + $0x1a8] sm:$0xff]  }
 0x581   :  { %v13026_v50 = vpack.c.bf16 %v5446_v22, %v5445_v36  ;;  %v5395_v61 = vadd.f32 %v5394_v35, %v17706_v58  ;;  %v5840_v57 = vpop.f32.mrf.mxu0  ;;  %14156 = vmatmul.mubr.bf16.vlgmr.msra.gmra.mxu1 %v15163_v20  ;;  %8488 = vmatprep.mubr.bf16.mxu0 %v15922_v12  ;;  %v5447_v28 = vmax.f32 %v5393_v39, 0.0  ;;  %v18543_v39 = vmax.f32 %v17611_v43, 0.0 }
 0x582   :  { %v13039_v30 = vpack.c.bf16 %v5902_v46, %v5901_v51  ;;  %v5396_v13 = vpop.f32.mrf.mxu1  ;;  %v5841_v55 = vadd.f32 %v5840_v57, %v17772_v29  ;;  %v15164_v63 = vld [vmem:[#allocation2 + $0xf0] ss:$56 sps:$4 sm:$0xff]   ;;  %13580 = vmatpush3.bf16.msra.mxu1 %v15168_v5  ;;  %v5903_v47 = vmax.f32 %v5839_v48, 0.0  ;;  %v18544_v35 = vmax.f32 %v17636_v25, 0.0 }
 0x583   :  { %14180 = vmatpush3.bf16.msra.mxu0 %v15183_v15  ;;  %5566 = vst [vmem:[#allocation2 + $0x198] sm:$0xff] %v13026_v50  ;;  %v5448_v3 = vmax.f32 %v5395_v61, 0.0  ;;  %v5397_v6 = vadd.f32 %v5396_v13, %v17693_v44  ;;  %v5844_v34 = vpop.f32.mrf.mxu0  ;;  %13581 = vmatprep.subr.bf16.mxu1 %v15170_v59  ;;  %v18542_v59 = vmax.f32 %v17591_v1, 0.0  ;;  %v18545_v48 = vmax.f32 %v17655_v24, 0.0  ;;  %v15197_v1 = vld [vmem:[#allocation20 + $0x200] sm:$0xff]   ;;  %v15181_v25 = vld [vmem:[#allocation20 + $0x1d8] sm:$0xff]  }
 0x584   :  { %14181 = vmatprep.subr.bf16.mxu0 %v15186_v4  ;;  %6025 = vst [vmem:[#allocation2 + $0xf8] sm:$0xff] %v13039_v30  ;;  %v5904_v19 = vmax.f32 %v5841_v55, 0.0  ;;  %v5398_v53 = vpop.f32.mrf.mxu1  ;;  %v5845_v23 = vadd.f32 %v5844_v34, %v17761_v31  ;;  %14159 = vmatprep.mubr.bf16.mxu1 %v15164_v63  ;;  %v15178_v55 = vld [vmem:[#allocation20 + $0x1a0] sm:$0xff]  }
 0x585   :  { %v13027_v38 = vpack.c.bf16 %v5448_v3, %v5447_v28  ;;  %v5399_v5 = vadd.f32 %v5398_v53, %v17706_v58  ;;  %v5846_v15 = vpop.f32.mrf.mxu0  ;;  %v15923_v37 = vpack.c.bf16 %v18543_v39, %v18542_v59  ;;  %v5449_v14 = vmax.f32 %v5397_v6, 0.0 }
 0x586   :  { %v13040_v20 = vpack.c.bf16 %v5904_v19, %v5903_v47  ;;  %v5402_v36 = vpop.f32.mrf.mxu1  ;;  %v5847_v22 = vadd.f32 %v5846_v15, %v17772_v29  ;;  %13582 = vmatpush3.bf16.msra.mxu1 %v15171_v33  ;;  %v15924_v50 = vpack.c.bf16 %v18545_v48, %v18544_v35  ;;  %v5905_v43 = vmax.f32 %v5845_v23, 0.0  ;;  %v15203_v19 = vld [vmem:[#allocation20 + $0x2b8] sm:$0xff]  }
 0x587   :  { %14182 = vmatpush3.bf16.msra.mxu0 %v15186_v4  ;;  %5567 = vst [vmem:[#allocation2 + $0x1d0] sm:$0xff] %v13027_v38  ;;  %v5450_v12 = vmax.f32 %v5399_v5, 0.0  ;;  %v5403_v51 = vadd.f32 %v5402_v36, %v17693_v44  ;;  %v5848_v46 = vpop.f32.mrf.mxu0  ;;  %13583 = vmatprep.subr.bf16.mxu1 %v15174_v18  ;;  %v18546_v59 = vmax.f32 %v17628_v2, 0.0  ;;  %v18547_v39 = vmax.f32 %v17647_v60, 0.0 }
 0x588   :  { %14183 = vmatprep.subr.bf16.mxu0 %v15193_v41  ;;  %6026 = vst [vmem:[#allocation2 + $0x130] sm:$0xff] %v13040_v20  ;;  %v5906_v61 = vmax.f32 %v5847_v22, 0.0  ;;  %v5404_v57 = vpop.f32.mrf.mxu1  ;;  %v5849_v4 = vadd.f32 %v5848_v46, %v17761_v31  ;;  %8489 = vmatmul.mubr.bf16.gmra.mxu0 %v15923_v37  ;;  %v18548_v35 = vmax.f32 %v17670_v8, 0.0  ;;  %v18549_v48 = vmax.f32 %v17690_v52, 0.0 }
 0x589   :  { %v13028_v33 = vpack.c.bf16 %v5450_v12, %v5449_v14  ;;  %v5405_v30 = vadd.f32 %v5404_v57, %v17706_v58  ;;  %v5850_v13 = vpop.f32.mrf.mxu0  ;;  %8496 = vmatprep.mubr.bf16.mxu0 %v15924_v50  ;;  %v5451_v3 = vmax.f32 %v5403_v51, 0.0  ;;  %v15925_v37 = vpack.c.bf16 %v18547_v39, %v18546_v59 }
 0x58a   :  { %v13041_v63 = vpack.c.bf16 %v5906_v61, %v5905_v43  ;;  %v5406_v24 = vpop.f32.mrf.mxu1  ;;  %v5851_v18 = vadd.f32 %v5850_v13, %v17772_v29  ;;  %v15165_v28 = vld [vmem:[#allocation2 + $0x160] ss:$56 sps:$4 sm:$0xff]   ;;  %13584 = vmatpush3.bf16.msra.mxu1 %v15175_v54  ;;  %v5907_v53 = vmax.f32 %v5849_v4, 0.0  ;;  %v15926_v50 = vpack.c.bf16 %v18549_v48, %v18548_v35  ;;  %v6070_v35 = vld [vmem:[%s18474_s10 + $0x8] sm:$0x3] }
 0x58b   :  { %14184 = vmatpush3.bf16.msra.mxu0 %v15193_v41  ;;  %5568 = vst [vmem:[#allocation2 + $0x208] sm:$0xff] %v13028_v33  ;;  %v5452_v6 = vmax.f32 %v5405_v30, 0.0  ;;  %v5407_v34 = vadd.f32 %v5406_v24, %v17693_v44  ;;  %v5854_v47 = vpop.f32.mrf.mxu0  ;;  %13585 = vmatprep.subr.bf16.mxu1 %v15177_v49  ;;  %v15182_v49 = vld [vmem:[#allocation20 + $0x198] sm:$0xff]   ;;  %v15184_v43 = vld [vmem:[#allocation20 + $0x1d0] sm:$0xff]  }
 0x58c   :  { %14185 = vmatprep.subr.bf16.mxu0 %v15197_v1  ;;  %6027 = vst [vmem:[#allocation2 + $0x168] sm:$0xff] %v13041_v63  ;;  %v5908_v23 = vmax.f32 %v5851_v18, 0.0  ;;  %v5408_v38 = vpop.f32.mrf.mxu1  ;;  %v5855_v5 = vadd.f32 %v5854_v47, %v17761_v31  ;;  %14160 = vmatmul.mubr.bf16.gmra.mxu1 %v15165_v28  ;;  %v15185_v30 = vld [vmem:[#allocation20 + $0x190] sm:$0xff]   ;;  %v15188_v28 = vld [vmem:[#allocation20 + $0x1c8] sm:$0xff]  }
 0x58d   :  { %v13029_v15 = vpack.c.bf16 %v5452_v6, %v5451_v3  ;;  %v5409_v54 = vadd.f32 %v5408_v38, %v17706_v58  ;;  %v5856_v41 = vpop.f32.mrf.mxu0  ;;  %v5453_v14 = vmax.f32 %v5407_v34, 0.0 }
 0x58e   :  { %v13042_v20 = vpack.c.bf16 %v5908_v23, %v5907_v53  ;;  %v5412_v36 = vpop.f32.mrf.mxu1  ;;  %v5857_v22 = vadd.f32 %v5856_v41, %v17772_v29  ;;  %13586 = vmatpush3.bf16.msra.mxu1 %v15178_v55  ;;  %v5909_v2 = vmax.f32 %v5855_v5, 0.0  ;;  %v18551_v41 = vmax.f32 %v17682_v0, 0.0 }
 0x58f   :  { %14186 = vmatpush3.bf16.msra.mxu0 %v15197_v1  ;;  %5569 = vst [vmem:[#allocation2 + $0x240] sm:$0xff] %v13029_v15  ;;  %v5454_v12 = vmax.f32 %v5409_v54, 0.0  ;;  %v5413_v51 = vadd.f32 %v5412_v36, %v17693_v44  ;;  %v5858_v46 = vpop.f32.mrf.mxu0  ;;  %13587 = vmatprep.subr.bf16.mxu1 %v15181_v25  ;;  %v18550_v54 = vmax.f32 %v17662_v7, 0.0  ;;  %v15189_v36 = vld [vmem:[#allocation20 + $0x188] sm:$0xff]  }
 0x590   :  { %13659 = vmatprep.subr.bf16.mxu0 %v15203_v19  ;;  %6028 = vst [vmem:[#allocation2 + $0x1a0] sm:$0xff] %v13042_v20  ;;  %v5910_v60 = vmax.f32 %v5857_v22, 0.0  ;;  %v5414_v61 = vpop.f32.mrf.mxu1  ;;  %v5859_v1 = vadd.f32 %v5858_v46, %v17761_v31  ;;  %8497 = vmatmul.mubr.bf16.gmra.mxu0 %v15925_v37 }
 0x591   :  { %v13030_v57 = vpack.c.bf16 %v5454_v12, %v5453_v14  ;;  %v5415_v4 = vadd.f32 %v5414_v61, %v17706_v58  ;;  %v5860_v33 = vpop.f32.mrf.mxu0  ;;  %8504 = vmatprep.mubr.bf16.mxu0 %v15926_v50  ;;  %v5455_v25 = vmax.f32 %v5413_v51, 0.0  ;;  %v15927_v20 = vpack.c.bf16 %v18551_v41, %v18550_v54  ;;  %v15195_v12 = vld [vmem:[#allocation20 + $0x1c0] sm:$0xff]  }
 0x592   :  { %v13043_v8 = vpack.c.bf16 %v5910_v60, %v5909_v2  ;;  %v5416_v13 = vpop.f32.mrf.mxu1  ;;  %v5861_v52 = vadd.f32 %v5860_v33, %v17772_v29  ;;  %v15166_v55 = vld [vmem:[#allocation2 + $0x1d0] ss:$56 sps:$4 sm:$0xff]   ;;  %13588 = vmatpush3.bf16.msra.mxu1 %v15182_v49  ;;  %v5911_v3 = vmax.f32 %v5859_v1, 0.0  ;;  %v18552_v49 = vmax.f32 %v17713_v17, 0.0 }
 0x593   :  { %5570 = vst [vmem:[#allocation2 + $0x278] sm:$0xff] %v13030_v57  ;;  %v5456_v63 = vmax.f32 %v5415_v4, 0.0  ;;  %v5417_v24 = vadd.f32 %v5416_v13, %v17693_v44  ;;  %v5864_v18 = vpop.f32.mrf.mxu0  ;;  %13589 = vmatprep.subr.bf16.mxu1 %v15184_v43  ;;  %14163 = vmatprep.mubr.bf16.mxu1 %v15166_v55  ;;  %v17882_v33 = vrot.slane %v6070_v35, %v18532_v32 }
 0x594   :  { %6029 = vst [vmem:[#allocation2 + $0x1d8] sm:$0xff] %v13043_v8  ;;  %v5912_v6 = vmax.f32 %v5861_v52, 0.0  ;;  %v5418_v34 = vpop.f32.mrf.mxu1  ;;  %v5865_v47 = vadd.f32 %v5864_v18, %v17761_v31  ;;  %v15928_v14 = vpack.c.bf16 %v4996_v9, %v18552_v49 }
 0x595   :  { %v13031_v19 = vpack.c.bf16 %v5456_v63, %v5455_v25  ;;  %v5419_v53 = vadd.f32 %v5418_v34, %v17706_v58  ;;  %v5866_v23 = vpop.f32.mrf.mxu0  ;;  %v5457_v22 = vmax.f32 %v5417_v24, 0.0  ;;  %v18554_v34 = vmax.f32 %v17721_v10, 0.0 }
 0x596   :  { %v13044_v38 = vpack.c.bf16 %v5912_v6, %v5911_v3  ;;  %v5422_v5 = vpop.f32.mrf.mxu1  ;;  %v5867_v15 = vadd.f32 %v5866_v23, %v17772_v29  ;;  %13590 = vmatpush3.bf16.msra.mxu1 %v15185_v30  ;;  %v5913_v7 = vmax.f32 %v5865_v47, 0.0  ;;  %v17884_v30 = vld [vmem:[#allocation20 + $0x2f8] sm:$0xff]   ;;  %v18553_v6 = vmax.f32 %v17702_v45, 0.0 }
 0x597   :  { %5571 = vst [vmem:[#allocation2 + $0x2b0] sm:$0xff] %v13031_v19  ;;  %v5458_v59 = vmax.f32 %v5419_v53, 0.0  ;;  %v5423_v39 = vadd.f32 %v5422_v5, %v17693_v44  ;;  %v5868_v37 = vpop.f32.mrf.mxu0  ;;  %13591 = vmatprep.subr.bf16.mxu1 %v15188_v28 }
 0x598   :  { %6030 = vst [vmem:[#allocation2 + $0x210] sm:$0xff] %v13044_v38  ;;  %v5914_v51 = vmax.f32 %v5867_v15, 0.0  ;;  %v5424_v0 = vpop.f32.mrf.mxu1  ;;  %v5869_v46 = vadd.f32 %v5868_v37, %v17761_v31  ;;  %8505 = vmatmul.mubr.bf16.gmra.mxu0 %v15927_v20  ;;  %v15929_v47 = vpack.c.bf16 %v18554_v34, %v18553_v6  ;;  %v15930_v38 = vpack.c.bf16 %v5000_v42, %v4998_v62 }
 0x599   :  { %v13032_v48 = vpack.c.bf16 %v5458_v59, %v5457_v22  ;;  %v5425_v50 = vadd.f32 %v5424_v0, %v17706_v58  ;;  %v5870_v17 = vpop.f32.mrf.mxu0  ;;  %8512 = vmatprep.mubr.bf16.mxu0 %v15928_v14  ;;  %v5459_v61 = vmax.f32 %v5423_v39, 0.0 }
 0x59a   :  { %v13045_v9 = vpack.c.bf16 %v5914_v51, %v5913_v7  ;;  %v5426_v43 = vpop.f32.mrf.mxu1  ;;  %v5871_v2 = vadd.f32 %v5870_v17, %v17772_v29  ;;  %v15173_v60 = vld [vmem:[#allocation2 + $0x240] ss:$56 sps:$4 sm:$0xff]   ;;  %13592 = vmatpush3.bf16.msra.mxu1 %v15189_v36  ;;  %v5915_v8 = vmax.f32 %v5869_v46, 0.0 }
 0x59b   :  { %5572 = vst [vmem:[#allocation2 + $0x2e8] sm:$0xff] %v13032_v48  ;;  %v5460_v1 = vmax.f32 %v5425_v50, 0.0  ;;  %v5427_v57 = vadd.f32 %v5426_v43, %v17693_v44  ;;  %v5874_v4 = vpop.f32.mrf.mxu0  ;;  %13593 = vmatprep.subr.bf16.mxu1 %v15195_v12  ;;  %14164 = vmatmul.mubr.bf16.gmra.mxu1 %v15173_v60  ;;  %v17889_v44 = vrot.slane %v6070_v35, %v18533_v21  ;;  %v18555_v50 = vmax.f32 %v17758_v16, 0.0  ;;  %v15192_v16 = vld [vmem:[#allocation2 + $0x14] ss:$56 sps:$4 sm:$0xff]  }
 0x59c   :  { %6031 = vst [vmem:[#allocation2 + $0x248] sm:$0xff] %v13045_v9  ;;  %v5916_v13 = vmax.f32 %v5871_v2, 0.0  ;;  %v5428_v52 = vpop.f32.mrf.mxu1  ;;  %v5875_v55 = vadd.f32 %v5874_v4, %v17761_v31 }
 0x59d   :  { %v13033_v25 = vpack.c.bf16 %v5460_v1, %v5459_v61  ;;  %v5429_v63 = vadd.f32 %v5428_v52, %v17706_v58  ;;  %v5876_v24 = vpop.f32.mrf.mxu0  ;;  %v5461_v19 = vmax.f32 %v5427_v57, 0.0  ;;  %v15931_v17 = vpack.c.bf16 %v18555_v50, %v4997_v56  ;;  %v6532_v56 = vld [vmem:[%s18474_s10 + $0xa] sm:$0x3] }
 0x59e   :  { %v13046_v18 = vpack.c.bf16 %v5916_v13, %v5915_v8  ;;  %v5877_v28 = vadd.f32 %v5876_v24, %v17772_v29  ;;  %v6276_v3 = vpop.f32.mrf.mxu1  ;;  %13594 = vmatpush3.bf16.msra.mxu1 %v15196_v26  ;;  %v5917_v5 = vmax.f32 %v5875_v55, 0.0  ;;  %v15194_v26 = vld [vmem:[#allocation2 + $0x18] ss:$56 sps:$4 sm:$0xff]  }
 0x59f   :  { %5573 = vst [vmem:[#allocation2 + $0x320] sm:$0xff] %v13033_v25  ;;  %v5462_v53 = vmax.f32 %v5429_v63, 0.0  ;;  %v6277_v23 = vadd.f32 %v6276_v3, %v17882_v33  ;;  %v5878_v58 = vpop.f32.mrf.mxu0  ;;  %14203 = vmatprep.subr.bf16.mxu1 %v17884_v30 }
 0x5a0   :  { %6032 = vst [vmem:[#allocation2 + $0x280] sm:$0xff] %v13046_v18  ;;  %v5918_v45 = vmax.f32 %v5877_v28, 0.0  ;;  %v5879_v10 = vadd.f32 %v5878_v58, %v17761_v31  ;;  %v6278_v15 = vpop.f32.mrf.mxu1  ;;  %8513 = vmatmul.mubr.bf16.gmra.mxu0 %v15929_v47 }
 0x5a1   :  { %v13034_v54 = vpack.c.bf16 %v5462_v53, %v5461_v19  ;;  %v6279_v41 = vadd.f32 %v6278_v15, %v17889_v44  ;;  %v5880_v20 = vpop.f32.mrf.mxu0  ;;  %8520 = vmatprep.mubr.bf16.mxu0 %v15930_v38  ;;  %v6355_v62 = vmax.f32 %v6277_v23, 0.0  ;;  %v17923_v19 = vrot.slane %v6532_v56, %v18532_v32  ;;  %v15205_v53 = vld [vmem:[#allocation20 + $0x278] sm:$0xff]   ;;  %v15206_v23 = vld [vmem:[#allocation20 + $0x2b0] sm:$0xff]  }
 0x5a2   :  { %v13047_v36 = vpack.c.bf16 %v5918_v45, %v5917_v5  ;;  %v5881_v40 = vadd.f32 %v5880_v20, %v17772_v29  ;;  %v6280_v22 = vpop.f32.mrf.mxu1  ;;  %v15180_v27 = vld [vmem:[#allocation2 + $0x2b0] ss:$56 sps:$4 sm:$0xff]   ;;  %v5919_v37 = vmax.f32 %v5879_v10, 0.0 }
 0x5a3   :  { %5574 = vst [vmem:[#allocation2 + $0x358] sm:$0xff] %v13034_v54  ;;  %v6356_v42 = vmax.f32 %v6279_v41, 0.0  ;;  %v6281_v59 = vadd.f32 %v6280_v22, %v17882_v33  ;;  %v5884_v39 = vpop.f32.mrf.mxu0  ;;  %14167 = vmatprep.mubr.bf16.mxu1 %v15180_v27  ;;  %v15204_v5 = vld [vmem:[#allocation2 + $0xf8] ss:$56 sps:$4 sm:$0xff]   ;;  %v17927_v54 = vrot.slane %v6532_v56, %v18533_v21 }
 0x5a4   :  { %6033 = vst [vmem:[#allocation2 + $0x2b8] sm:$0xff] %v13047_v36  ;;  %v5920_v49 = vmax.f32 %v5881_v40, 0.0  ;;  %v5885_v14 = vadd.f32 %v5884_v39, %v17761_v31  ;;  %v6282_v12 = vpop.f32.mrf.mxu1  ;;  %v15190_v40 = vld [vmem:[#allocation2 + $0x10] ss:$56 sps:$4 sm:$0xff]  }
 0x5a5   :  { %v13051_v7 = vpack.c.bf16 %v6356_v42, %v6355_v62  ;;  %v6283_v51 = vadd.f32 %v6282_v12, %v17889_v44  ;;  %v5886_v0 = vpop.f32.mrf.mxu0  ;;  %v6357_v9 = vmax.f32 %v6281_v59, 0.0  ;;  %v15207_v62 = vld [vmem:[#allocation20 + $0x270] sm:$0xff]  }
 0x5a6   :  { %v13048_v46 = vpack.c.bf16 %v5920_v49, %v5919_v37  ;;  %v5887_v35 = vadd.f32 %v5886_v0, %v17772_v29  ;;  %v6286_v48 = vpop.f32.mrf.mxu1  ;;  %v5921_v61 = vmax.f32 %v5885_v14, 0.0  ;;  %v15208_v42 = vld [vmem:[#allocation20 + $0x2f0] sm:$0xff]  }
 0x5a7   :  { %6483 = vst [vmem:[#allocation2 + $0x20] sm:$0xff] %v13051_v7  ;;  %v6358_v43 = vmax.f32 %v6283_v51, 0.0  ;;  %v6287_v2 = vadd.f32 %v6286_v48, %v17882_v33  ;;  %v5888_v60 = vpop.f32.mrf.mxu0  ;;  %v15201_v37 = vld [vmem:[#allocation2 + $0x84] ss:$56 sps:$4 sm:$0xff]  }
 0x5a8   :  { %6034 = vst [vmem:[#allocation2 + $0x2f0] sm:$0xff] %v13048_v46  ;;  %v5922_v1 = vmax.f32 %v5887_v35, 0.0  ;;  %v5889_v57 = vadd.f32 %v5888_v60, %v17761_v31  ;;  %v6288_v4 = vpop.f32.mrf.mxu1  ;;  %8521 = vmatmul.mubr.bf16.gmra.mxu0 %v15931_v17  ;;  %v15213_v51 = vld [vmem:[#allocation20 + $0x2a8] sm:$0xff]  }
 0x5a9   :  { %v13052_v8 = vpack.c.bf16 %v6358_v43, %v6357_v9  ;;  %v6289_v11 = vadd.f32 %v6288_v4, %v17889_v44  ;;  %v5890_v13 = vpop.f32.mrf.mxu0  ;;  %14187 = vmatprep.mubr.bf16.mxu0 %v15194_v26  ;;  %v6359_v24 = vmax.f32 %v6287_v2, 0.0  ;;  %v15215_v26 = vld [vmem:[#allocation20 + $0x268] sm:$0xff]   ;;  %v15216_v9 = vld [vmem:[#allocation20 + $0x2a0] sm:$0xff]  }
 0x5aa   :  { %v13049_v52 = vpack.c.bf16 %v5922_v1, %v5921_v61  ;;  %v5891_v55 = vadd.f32 %v5890_v13, %v17772_v29  ;;  %v6290_v25 = vpop.f32.mrf.mxu1  ;;  %v15187_v63 = vld [vmem:[#allocation2 + $0x320] ss:$56 sps:$4 sm:$0xff]   ;;  %v5923_v28 = vmax.f32 %v5889_v57, 0.0 }
 0x5ab   :  { %6484 = vst [vmem:[#allocation2 + $0x58] sm:$0xff] %v13052_v8  ;;  %v6360_v31 = vmax.f32 %v6289_v11, 0.0  ;;  %v6291_v18 = vadd.f32 %v6290_v25, %v17882_v33  ;;  %14168 = vmatmul.mubr.bf16.gmra.mxu1 %v15187_v63  ;;  %v15202_v29 = vld [vmem:[#allocation2 + $0x88] ss:$56 sps:$4 sm:$0xff]   ;;  %v15218_v43 = vld [vmem:[#allocation20 + $0x2e8] sm:$0xff]  }
 0x5ac   :  { %6035 = vst [vmem:[#allocation2 + $0x328] sm:$0xff] %v13049_v52  ;;  %v5924_v3 = vmax.f32 %v5891_v55, 0.0  ;;  %v6292_v6 = vpop.f32.mrf.mxu1  ;;  %9114 = vmatprep.mubr.bf16.mxu1 %v15192_v16  ;;  %v15212_v57 = vld [vmem:[#allocation2 + $0x168] ss:$56 sps:$4 sm:$0xff]  }
 0x5ad   :  { %v13053_v34 = vpack.c.bf16 %v6360_v31, %v6359_v24  ;;  %v6293_v47 = vadd.f32 %v6292_v6, %v17889_v44  ;;  %v6361_v45 = vmax.f32 %v6291_v18, 0.0  ;;  %v15217_v24 = vld [vmem:[#allocation20 + $0x260] sm:$0xff]  }
 0x5ae   :  { %v13050_v58 = vpack.c.bf16 %v5924_v3, %v5923_v28  ;;  %v6296_v38 = vpop.f32.mrf.mxu1  ;;  %v15228_v31 = vld [vmem:[#allocation20 + $0x2e0] sm:$0xff]   ;;  %v15199_v28 = vld [vmem:[#allocation2 + $0x80] ss:$56 sps:$4 sm:$0xff]  }
 0x5af   :  { %6485 = vst [vmem:[#allocation2 + $0x90] sm:$0xff] %v13053_v34  ;;  %v6362_v10 = vmax.f32 %v6293_v47, 0.0  ;;  %v6297_v15 = vadd.f32 %v6296_v38, %v17882_v33  ;;  %v15223_v38 = vld [vmem:[#allocation20 + $0x298] sm:$0xff]  }
 0x5b0   :  { %6036 = vst [vmem:[#allocation2 + $0x360] sm:$0xff] %v13050_v58  ;;  %v6298_v41 = vpop.f32.mrf.mxu1  ;;  %v6738_v20 = vpop.f32.mrf.mxu0  ;;  %14188 = vmatmul.mubr.bf16.vlgmr.msra.gmra.mxu0 %v15202_v29  ;;  %v15211_v58 = vld [vmem:[#allocation2 + $0xf4] ss:$56 sps:$4 sm:$0xff]  }
 0x5b1   :  { %v13054_v36 = vpack.c.bf16 %v6362_v10, %v6361_v45  ;;  %v6299_v22 = vadd.f32 %v6298_v41, %v17889_v44  ;;  %v6739_v27 = vadd.f32 %v6738_v20, %v17923_v19  ;;  %14191 = vmatprep.mubr.bf16.mxu0 %v15204_v5  ;;  %13660 = vmatpush3.bf16.msra.mxu0 %v15205_v53  ;;  %v6363_v49 = vmax.f32 %v6297_v15, 0.0 }
 0x5b2   :  { %v6300_v59 = vpop.f32.mrf.mxu1  ;;  %v6740_v39 = vpop.f32.mrf.mxu0  ;;  %13661 = vmatprep.subr.bf16.mxu0 %v15206_v23 }
 0x5b3   :  { %6486 = vst [vmem:[#allocation2 + $0xc8] sm:$0xff] %v13054_v36  ;;  %v6364_v14 = vmax.f32 %v6299_v22, 0.0  ;;  %v6301_v12 = vadd.f32 %v6300_v59, %v17882_v33  ;;  %v6741_v7 = vadd.f32 %v6740_v39, %v17927_v54  ;;  %9115 = vmatmul.mubr.bf16.vlgmr.msra.gmra.mxu1 %v15190_v40  ;;  %v6817_v48 = vmax.f32 %v6739_v27, 0.0  ;;  %v15225_v36 = vld [vmem:[#allocation20 + $0x258] sm:$0xff]  }
 0x5b4   :  { %v6302_v0 = vpop.f32.mrf.mxu1  ;;  %v6742_v46 = vpop.f32.mrf.mxu0  ;;  %9122 = vmatprep.mubr.bf16.mxu1 %v15201_v37  ;;  %14204 = vmatpush3.bf16.msra.mxu1 %v17884_v30  ;;  %v15214_v30 = vld [vmem:[#allocation2 + $0x1d8] ss:$56 sps:$4 sm:$0xff]   ;;  %v15240_v40 = vld [vmem:[#allocation20 + $0x2d8] sm:$0xff]  }
 0x5b5   :  { %v13055_v35 = vpack.c.bf16 %v6364_v14, %v6363_v49  ;;  %v6818_v50 = vmax.f32 %v6741_v7, 0.0  ;;  %v6303_v17 = vadd.f32 %v6302_v0, %v17889_v44  ;;  %v6365_v2 = vmax.f32 %v6301_v12, 0.0  ;;  %13662 = vmatpush3.bf16.msra.mxu0 %v15207_v62  ;;  %14205 = vmatprep.subr.bf16.mxu1 %v15208_v42  ;;  %v15222_v59 = vld [vmem:[#allocation2 + $0x248] ss:$56 sps:$4 sm:$0xff]   ;;  %v15224_v12 = vld [vmem:[#allocation2 + $0x2b8] ss:$56 sps:$4 sm:$0xff]  }
 0x5b6   :  { %v6743_v60 = vadd.f32 %v6742_v46, %v17923_v19  ;;  %v6306_v61 = vpop.f32.mrf.mxu1  ;;  %v6744_v1 = vpop.f32.mrf.mxu0  ;;  %13663 = vmatprep.subr.bf16.mxu0 %v15213_v51  ;;  %v15226_v7 = vld [vmem:[#allocation20 + $0x290] sm:$0xff]  }
 0x5b7   :  { %6487 = vst [vmem:[#allocation2 + $0x100] sm:$0xff] %v13055_v35  ;;  %v13067_v4 = vpack.c.bf16 %v6818_v50, %v6817_v48  ;;  %v6366_v8 = vmax.f32 %v6303_v17, 0.0  ;;  %v6307_v11 = vadd.f32 %v6306_v61, %v17882_v33  ;;  %v6745_v13 = vadd.f32 %v6744_v1, %v17927_v54  ;;  %v15227_v17 = vld [vmem:[#allocation20 + $0x250] sm:$0xff]  }
 0x5b8   :  { %v6308_v16 = vpop.f32.mrf.mxu1  ;;  %v6748_v56 = vpop.f32.mrf.mxu0  ;;  %14192 = vmatmul.mubr.bf16.gmra.mxu0 %v15212_v57  ;;  %v6819_v55 = vmax.f32 %v6743_v60, 0.0  ;;  %14206 = vmatpush3.bf16.msra.mxu1 %v15208_v42 }
 0x5b9   :  { %6945 = vst [vmem:[#allocation2 + $0x28] sm:$0xff] %v13067_v4  ;;  %v13056_v52 = vpack.c.bf16 %v6366_v8, %v6365_v2  ;;  %v6820_v25 = vmax.f32 %v6745_v13, 0.0  ;;  %v6309_v63 = vadd.f32 %v6308_v16, %v17889_v44  ;;  %14195 = vmatprep.mubr.bf16.mxu0 %v15214_v30  ;;  %v6367_v18 = vmax.f32 %v6307_v11, 0.0  ;;  %13664 = vmatpush3.bf16.msra.mxu0 %v15215_v26  ;;  %v15247_v26 = vld [vmem:[#allocation20 + $0x2d0] sm:$0xff]   ;;  %v15233_v13 = vld [vmem:[#allocation20 + $0x288] sm:$0xff]  }
 0x5ba   :  { %v6749_v3 = vadd.f32 %v6748_v56, %v17923_v19  ;;  %v6310_v6 = vpop.f32.mrf.mxu1  ;;  %v6750_v34 = vpop.f32.mrf.mxu0  ;;  %14207 = vmatprep.subr.bf16.mxu1 %v15218_v43  ;;  %13665 = vmatprep.subr.bf16.mxu0 %v15216_v9  ;;  %v15221_v11 = vld [vmem:[#allocation2 + $0x164] ss:$56 sps:$4 sm:$0xff]  }
 0x5bb   :  { %6488 = vst [vmem:[#allocation2 + $0x138] sm:$0xff] %v13056_v52  ;;  %v13068_v47 = vpack.c.bf16 %v6820_v25, %v6819_v55  ;;  %v6368_v29 = vmax.f32 %v6309_v63, 0.0  ;;  %v6311_v53 = vadd.f32 %v6310_v6, %v17882_v33  ;;  %v6751_v23 = vadd.f32 %v6750_v34, %v17927_v54  ;;  %9123 = vmatmul.mubr.bf16.gmra.mxu1 %v15199_v28  ;;  %v15234_v63 = vld [vmem:[#allocation20 + $0x248] sm:$0xff]   ;;  %v15232_v6 = vld [vmem:[#allocation2 + $0x328] ss:$56 sps:$4 sm:$0xff]  }
 0x5bc   :  { %v6312_v5 = vpop.f32.mrf.mxu1  ;;  %v6752_v45 = vpop.f32.mrf.mxu0  ;;  %v6821_v15 = vmax.f32 %v6749_v3, 0.0  ;;  %9130 = vmatprep.mubr.bf16.mxu1 %v15211_v58  ;;  %14208 = vmatpush3.bf16.msra.mxu1 %v15218_v43  ;;  %v15209_v43 = vld [vmem:[#allocation2 + $0xf0] ss:$56 sps:$4 sm:$0xff]  }
 0x5bd   :  { %6946 = vst [vmem:[#allocation2 + $0x60] sm:$0xff] %v13068_v47  ;;  %v13057_v10 = vpack.c.bf16 %v6368_v29, %v6367_v18  ;;  %v6822_v41 = vmax.f32 %v6751_v23, 0.0  ;;  %v6313_v20 = vadd.f32 %v6312_v5, %v17889_v44  ;;  %v6369_v22 = vmax.f32 %v6311_v53, 0.0  ;;  %13666 = vmatpush3.bf16.msra.mxu0 %v15217_v24  ;;  %14209 = vmatprep.subr.bf16.mxu1 %v15228_v31  ;;  %v15254_v24 = vld [vmem:[#allocation20 + $0x2c8] sm:$0xff]   ;;  %v15238_v58 = vld [vmem:[#allocation20 + $0x280] sm:$0xff]  }
 0x5be   :  { %v6753_v27 = vadd.f32 %v6752_v45, %v17923_v19  ;;  %v6316_v62 = vpop.f32.mrf.mxu1  ;;  %v6754_v42 = vpop.f32.mrf.mxu0  ;;  %13667 = vmatprep.subr.bf16.mxu0 %v15223_v38  ;;  %v15237_v23 = vld [vmem:[#allocation2 + $0x1c] ss:$56 sps:$4 sm:$0xff]  }
 0x5bf   :  { %6489 = vst [vmem:[#allocation2 + $0x170] sm:$0xff] %v13057_v10  ;;  %v13069_v39 = vpack.c.bf16 %v6822_v41, %v6821_v15  ;;  %v6370_v37 = vmax.f32 %v6313_v20, 0.0  ;;  %v6317_v49 = vadd.f32 %v6316_v62, %v17882_v33  ;;  %v6755_v14 = vadd.f32 %v6754_v42, %v17927_v54  ;;  %v15239_v20 = vld [vmem:[#allocation20 + $0x240] sm:$0xff]  }
 0x5c0   :  { %v6318_v51 = vpop.f32.mrf.mxu1  ;;  %v6758_v0 = vpop.f32.mrf.mxu0  ;;  %14196 = vmatmul.mubr.bf16.gmra.mxu0 %v15222_v59  ;;  %v6823_v35 = vmax.f32 %v6753_v27, 0.0  ;;  %14210 = vmatpush3.bf16.msra.mxu1 %v15228_v31 }
 0x5c1   :  { %6947 = vst [vmem:[#allocation2 + $0x98] sm:$0xff] %v13069_v39  ;;  %v13058_v46 = vpack.c.bf16 %v6370_v37, %v6369_v22  ;;  %v6824_v48 = vmax.f32 %v6755_v14, 0.0  ;;  %v6319_v50 = vadd.f32 %v6318_v51, %v17889_v44  ;;  %14199 = vmatprep.mubr.bf16.mxu0 %v15224_v12  ;;  %v6371_v9 = vmax.f32 %v6317_v49, 0.0  ;;  %13668 = vmatpush3.bf16.msra.mxu0 %v15225_v36  ;;  %v15261_v36 = vld [vmem:[#allocation20 + $0x2c0] sm:$0xff]   ;;  %v15219_v22 = vld [vmem:[#allocation2 + $0x160] ss:$56 sps:$4 sm:$0xff]  }
 0x5c2   :  { %v6759_v2 = vadd.f32 %v6758_v0, %v17923_v19  ;;  %v6320_v60 = vpop.f32.mrf.mxu1  ;;  %v6760_v61 = vpop.f32.mrf.mxu0  ;;  %14211 = vmatprep.subr.bf16.mxu1 %v15240_v40  ;;  %13669 = vmatprep.subr.bf16.mxu0 %v15226_v7  ;;  %v15231_v14 = vld [vmem:[#allocation2 + $0x1d4] ss:$56 sps:$4 sm:$0xff]  }
 0x5c3   :  { %6490 = vst [vmem:[#allocation2 + $0x1a8] sm:$0xff] %v13058_v46  ;;  %v13070_v1 = vpack.c.bf16 %v6824_v48, %v6823_v35  ;;  %v6372_v57 = vmax.f32 %v6319_v50, 0.0  ;;  %v6321_v4 = vadd.f32 %v6320_v60, %v17882_v33  ;;  %v6761_v8 = vadd.f32 %v6760_v61, %v17927_v54  ;;  %9131 = vmatmul.mubr.bf16.gmra.mxu1 %v15209_v43  ;;  %v15270_v12 = vld [vmem:[#allocation20 + $0x3b8] sm:$0xff]  }
 0x5c4   :  { %v6322_v30 = vpop.f32.mrf.mxu1  ;;  %v6762_v16 = vpop.f32.mrf.mxu0  ;;  %v6825_v52 = vmax.f32 %v6759_v2, 0.0  ;;  %9138 = vmatprep.mubr.bf16.mxu1 %v15221_v11  ;;  %14212 = vmatpush3.bf16.msra.mxu1 %v15240_v40  ;;  %v15267_v43 = vld [vmem:[#allocation20 + $0x378] sm:$0xff]  }
 0x5c5   :  { %6948 = vst [vmem:[#allocation2 + $0xd0] sm:$0xff] %v13070_v1  ;;  %v13059_v56 = vpack.c.bf16 %v6372_v57, %v6371_v9  ;;  %v6826_v55 = vmax.f32 %v6761_v8, 0.0  ;;  %v6323_v25 = vadd.f32 %v6322_v30, %v17889_v44  ;;  %v6373_v31 = vmax.f32 %v6321_v4, 0.0  ;;  %13670 = vmatpush3.bf16.msra.mxu0 %v15227_v17  ;;  %14213 = vmatprep.subr.bf16.mxu1 %v15247_v26  ;;  %v15235_v57 = vld [vmem:[#allocation2 + $0x18] ss:$56 sps:$4 sm:$0xff]   ;;  %v15276_v4 = vld [vmem:[#allocation20 + $0x3b0] sm:$0xff]  }
 0x5c6   :  { %v6763_v18 = vadd.f32 %v6762_v16, %v17923_v19  ;;  %v6326_v28 = vpop.f32.mrf.mxu1  ;;  %v6764_v3 = vpop.f32.mrf.mxu0  ;;  %13671 = vmatprep.subr.bf16.mxu0 %v15233_v13  ;;  %v15246_v13 = vld [vmem:[#allocation2 + $0x8c] ss:$56 sps:$4 sm:$0xff]  }
 0x5c7   :  { %6491 = vst [vmem:[#allocation2 + $0x1e0] sm:$0xff] %v13059_v56  ;;  %v13071_v34 = vpack.c.bf16 %v6826_v55, %v6825_v52  ;;  %v6374_v47 = vmax.f32 %v6323_v25, 0.0  ;;  %v6327_v29 = vadd.f32 %v6326_v28, %v17882_v33  ;;  %v6765_v53 = vadd.f32 %v6764_v3, %v17927_v54  ;;  %v15229_v25 = vld [vmem:[#allocation2 + $0x1d0] ss:$56 sps:$4 sm:$0xff]  }
 0x5c8   :  { %v6328_v38 = vpop.f32.mrf.mxu1  ;;  %v6768_v5 = vpop.f32.mrf.mxu0  ;;  %14200 = vmatmul.mubr.bf16.gmra.mxu0 %v15232_v6  ;;  %v6827_v10 = vmax.f32 %v6763_v18, 0.0  ;;  %14214 = vmatpush3.bf16.msra.mxu1 %v15247_v26 }
 0x5c9   :  { %6949 = vst [vmem:[#allocation2 + $0x108] sm:$0xff] %v13071_v34  ;;  %v13060_v45 = vpack.c.bf16 %v6374_v47, %v6373_v31  ;;  %v6828_v15 = vmax.f32 %v6765_v53, 0.0  ;;  %v6329_v41 = vadd.f32 %v6328_v38, %v17889_v44  ;;  %9764 = vmatprep.mubr.bf16.mxu0 %v15237_v23  ;;  %v6375_v40 = vmax.f32 %v6327_v29, 0.0  ;;  %13672 = vmatpush3.bf16.msra.mxu0 %v15234_v63  ;;  %v15243_v34 = vld [vmem:[#allocation2 + $0x244] ss:$56 sps:$4 sm:$0xff]  }
 0x5ca   :  { %v6769_v27 = vadd.f32 %v6768_v5, %v17923_v19  ;;  %v6330_v62 = vpop.f32.mrf.mxu1  ;;  %v6770_v42 = vpop.f32.mrf.mxu0  ;;  %14215 = vmatprep.subr.bf16.mxu1 %v15254_v24  ;;  %13673 = vmatprep.subr.bf16.mxu0 %v15238_v58  ;;  %v15281_v53 = vld [vmem:[#allocation20 + $0x3a8] sm:$0xff]  }
 0x5cb   :  { %6492 = vst [vmem:[#allocation2 + $0x218] sm:$0xff] %v13060_v45  ;;  %v13072_v59 = vpack.c.bf16 %v6828_v15, %v6827_v10  ;;  %v6376_v39 = vmax.f32 %v6329_v41, 0.0  ;;  %v6331_v37 = vadd.f32 %v6330_v62, %v17882_v33  ;;  %v6771_v49 = vadd.f32 %v6770_v42, %v17927_v54  ;;  %9139 = vmatmul.mubr.bf16.gmra.mxu1 %v15219_v22  ;;  %v15287_v62 = vld [vmem:[#allocation20 + $0x3a0] sm:$0xff]  }
 0x5cc   :  { %v6332_v7 = vpop.f32.mrf.mxu1  ;;  %v6772_v51 = vpop.f32.mrf.mxu0  ;;  %v6829_v46 = vmax.f32 %v6769_v27, 0.0  ;;  %9146 = vmatprep.mubr.bf16.mxu1 %v15231_v14  ;;  %14216 = vmatpush3.bf16.msra.mxu1 %v15254_v24  ;;  %v15244_v27 = vld [vmem:[#allocation2 + $0x88] ss:$56 sps:$4 sm:$0xff]  }
 0x5cd   :  { %6950 = vst [vmem:[#allocation2 + $0x140] sm:$0xff] %v13072_v59  ;;  %v13061_v0 = vpack.c.bf16 %v6376_v39, %v6375_v40  ;;  %v6830_v35 = vmax.f32 %v6771_v49, 0.0  ;;  %v6333_v48 = vadd.f32 %v6332_v7, %v17889_v44  ;;  %v6377_v50 = vmax.f32 %v6331_v37, 0.0  ;;  %13674 = vmatpush3.bf16.msra.mxu0 %v15239_v20  ;;  %14217 = vmatprep.subr.bf16.mxu1 %v15261_v36  ;;  %v15253_v39 = vld [vmem:[#allocation2 + $0xfc] ss:$56 sps:$4 sm:$0xff]  }
 0x5ce   :  { %v6773_v17 = vadd.f32 %v6772_v51, %v17923_v19  ;;  %v6336_v26 = vpop.f32.mrf.mxu1  ;;  %v6774_v9 = vpop.f32.mrf.mxu0  ;;  %14235 = vmatprep.subr.bf16.mxu0 %v15270_v12  ;;  %v6994_v7 = vld [vmem:[%s18474_s10 + $0xc] sm:$0x3] }
 0x5cf   :  { %6493 = vst [vmem:[#allocation2 + $0x250] sm:$0xff] %v13061_v0  ;;  %v13073_v2 = vpack.c.bf16 %v6830_v35, %v6829_v46  ;;  %v6378_v60 = vmax.f32 %v6333_v48, 0.0  ;;  %v6337_v61 = vadd.f32 %v6336_v26, %v17882_v33  ;;  %v6775_v1 = vadd.f32 %v6774_v9, %v17927_v54  ;;  %v15241_v0 = vld [vmem:[#allocation2 + $0x240] ss:$56 sps:$4 sm:$0xff]  }
 0x5d0   :  { %v6338_v8 = vpop.f32.mrf.mxu1  ;;  %v6778_v11 = vpop.f32.mrf.mxu0  ;;  %v6831_v16 = vmax.f32 %v6773_v17, 0.0  ;;  %9765 = vmatmul.mubr.bf16.vlgmr.msra.gmra.mxu0 %v15235_v57  ;;  %14218 = vmatpush3.bf16.msra.mxu1 %v15261_v36 }
 0x5d1   :  { %6951 = vst [vmem:[#allocation2 + $0x178] sm:$0xff] %v13073_v2  ;;  %v13062_v30 = vpack.c.bf16 %v6378_v60, %v6377_v50  ;;  %v6832_v56 = vmax.f32 %v6775_v1, 0.0  ;;  %v6339_v52 = vadd.f32 %v6338_v8, %v17889_v44  ;;  %v6379_v55 = vmax.f32 %v6337_v61, 0.0  ;;  %9772 = vmatprep.mubr.bf16.mxu0 %v15246_v13  ;;  %13739 = vmatprep.subr.bf16.mxu1 %v15267_v43  ;;  %v15250_v43 = vld [vmem:[#allocation2 + $0x2b4] ss:$56 sps:$4 sm:$0xff]  }
 0x5d2   :  { %v6779_v63 = vadd.f32 %v6778_v11, %v17923_v19  ;;  %v6340_v24 = vpop.f32.mrf.mxu1  ;;  %v6780_v31 = vpop.f32.mrf.mxu0  ;;  %14236 = vmatpush3.bf16.msra.mxu0 %v15270_v12  ;;  %v17978_v61 = vrot.slane %v6994_v7, %v18532_v32  ;;  %v15292_v1 = vld [vmem:[#allocation20 + $0x398] sm:$0xff]  }
 0x5d3   :  { %6494 = vst [vmem:[#allocation2 + $0x288] sm:$0xff] %v13062_v30  ;;  %v13074_v18 = vpack.c.bf16 %v6832_v56, %v6831_v16  ;;  %v6380_v28 = vmax.f32 %v6339_v52, 0.0  ;;  %v6341_v3 = vadd.f32 %v6340_v24, %v17882_v33  ;;  %v6781_v6 = vadd.f32 %v6780_v31, %v17927_v54  ;;  %9147 = vmatmul.mubr.bf16.gmra.mxu1 %v15229_v25  ;;  %v15251_v25 = vld [vmem:[#allocation2 + $0xf8] ss:$56 sps:$4 sm:$0xff]  }
 0x5d4   :  { %v6342_v47 = vpop.f32.mrf.mxu1  ;;  %v6782_v29 = vpop.f32.mrf.mxu0  ;;  %14237 = vmatprep.subr.bf16.mxu0 %v15276_v4  ;;  %v6833_v58 = vmax.f32 %v6779_v63, 0.0  ;;  %9154 = vmatprep.mubr.bf16.mxu1 %v15243_v34  ;;  %v17983_v16 = vrot.slane %v6994_v7, %v18533_v21  ;;  %v15298_v63 = vld [vmem:[#allocation20 + $0x390] sm:$0xff]   ;;  %v15248_v34 = vld [vmem:[#allocation2 + $0x2b0] ss:$56 sps:$4 sm:$0xff]  }
 0x5d5   :  { %6952 = vst [vmem:[#allocation2 + $0x1b0] sm:$0xff] %v13074_v18  ;;  %v13063_v23 = vpack.c.bf16 %v6380_v28, %v6379_v55  ;;  %v6834_v38 = vmax.f32 %v6781_v6, 0.0  ;;  %v6343_v5 = vadd.f32 %v6342_v47, %v17889_v44  ;;  %v6381_v45 = vmax.f32 %v6341_v3, 0.0  ;;  %v15260_v18 = vld [vmem:[#allocation2 + $0x16c] ss:$56 sps:$4 sm:$0xff]   ;;  %v15309_v7 = vld [vmem:[#allocation20 + $0x380] sm:$0xff]  }
 0x5d6   :  { %v6783_v10 = vadd.f32 %v6782_v29, %v17923_v19  ;;  %v6346_v15 = vpop.f32.mrf.mxu1  ;;  %v6784_v41 = vpop.f32.mrf.mxu0  ;;  %14238 = vmatpush3.bf16.msra.mxu0 %v15276_v4 }
 0x5d7   :  { %6495 = vst [vmem:[#allocation2 + $0x2c0] sm:$0xff] %v13063_v23  ;;  %v13075_v20 = vpack.c.bf16 %v6834_v38, %v6833_v58  ;;  %v6382_v36 = vmax.f32 %v6343_v5, 0.0  ;;  %v6347_v40 = vadd.f32 %v6346_v15, %v17882_v33  ;;  %v6785_v22 = vadd.f32 %v6784_v41, %v17927_v54  ;;  %14239 = vmatprep.subr.bf16.mxu0 %v15281_v53  ;;  %v15257_v5 = vld [vmem:[#allocation2 + $0x324] ss:$56 sps:$4 sm:$0xff]  }
 0x5d8   :  { %v6348_v42 = vpop.f32.mrf.mxu1  ;;  %v6788_v59 = vpop.f32.mrf.mxu0  ;;  %v6835_v49 = vmax.f32 %v6783_v10, 0.0  ;;  %9773 = vmatmul.mubr.bf16.gmra.mxu0 %v15244_v27 }
 0x5d9   :  { %6953 = vst [vmem:[#allocation2 + $0x1e8] sm:$0xff] %v13075_v20  ;;  %v13064_v37 = vpack.c.bf16 %v6382_v36, %v6381_v45  ;;  %v6836_v14 = vmax.f32 %v6785_v22, 0.0  ;;  %v6349_v12 = vadd.f32 %v6348_v42, %v17889_v44  ;;  %v6383_v51 = vmax.f32 %v6347_v40, 0.0  ;;  %9780 = vmatprep.mubr.bf16.mxu0 %v15253_v39  ;;  %v15305_v20 = vld [vmem:[#allocation20 + $0x388] sm:$0xff]  }
 0x5da   :  { %v6789_v46 = vadd.f32 %v6788_v59, %v17923_v19  ;;  %v6350_v35 = vpop.f32.mrf.mxu1  ;;  %v6790_v48 = vpop.f32.mrf.mxu0  ;;  %14240 = vmatpush3.bf16.msra.mxu0 %v15281_v53 }
 0x5db   :  { %6496 = vst [vmem:[#allocation2 + $0x2f8] sm:$0xff] %v13064_v37  ;;  %v13076_v50 = vpack.c.bf16 %v6836_v14, %v6835_v49  ;;  %v6384_v17 = vmax.f32 %v6349_v12, 0.0  ;;  %v6351_v26 = vadd.f32 %v6350_v35, %v17882_v33  ;;  %v6791_v9 = vadd.f32 %v6790_v48, %v17927_v54  ;;  %9155 = vmatmul.mubr.bf16.gmra.mxu1 %v15241_v0  ;;  %v15258_v12 = vld [vmem:[#allocation2 + $0x168] ss:$56 sps:$4 sm:$0xff]   ;;  %v15265_v48 = vld [vmem:[#allocation2 + $0x1dc] ss:$56 sps:$4 sm:$0xff]  }
 0x5dc   :  { %v6352_v2 = vpop.f32.mrf.mxu1  ;;  %v6792_v60 = vpop.f32.mrf.mxu0  ;;  %14241 = vmatprep.subr.bf16.mxu0 %v15287_v62  ;;  %v6837_v4 = vmax.f32 %v6789_v46, 0.0  ;;  %9162 = vmatprep.mubr.bf16.mxu1 %v15250_v43  ;;  %v15255_v43 = vld [vmem:[#allocation2 + $0x320] ss:$56 sps:$4 sm:$0xff]  }
 0x5dd   :  { %6954 = vst [vmem:[#allocation2 + $0x220] sm:$0xff] %v13076_v50  ;;  %v13065_v57 = vpack.c.bf16 %v6384_v17, %v6383_v51  ;;  %v6838_v8 = vmax.f32 %v6791_v9, 0.0  ;;  %v6353_v11 = vadd.f32 %v6352_v2, %v17889_v44  ;;  %v6793_v33 = vadd.f32 %v6792_v60, %v17923_v19 }
 0x5de   :  { %v6794_v13 = vpop.f32.mrf.mxu0  ;;  %v7200_v30 = vpop.f32.mrf.mxu1  ;;  %v6385_v56 = vmax.f32 %v6351_v26, 0.0  ;;  %14242 = vmatpush3.bf16.msra.mxu0 %v15287_v62 }
 0x5df   :  { %6497 = vst [vmem:[#allocation2 + $0x330] sm:$0xff] %v13065_v57  ;;  %v13077_v32 = vpack.c.bf16 %v6838_v8, %v6837_v4  ;;  %v6386_v52 = vmax.f32 %v6353_v11, 0.0  ;;  %v6795_v55 = vadd.f32 %v6794_v13, %v17927_v54  ;;  %v7201_v24 = vadd.f32 %v7200_v30, %v17978_v61  ;;  %14243 = vmatprep.subr.bf16.mxu0 %v15292_v1  ;;  %v15262_v11 = vld [vmem:[#allocation2 + $0x20] ss:$56 sps:$4 sm:$0xff]  }
 0x5e0   :  { %v6798_v44 = vpop.f32.mrf.mxu0  ;;  %v7202_v31 = vpop.f32.mrf.mxu1  ;;  %v6839_v3 = vmax.f32 %v6793_v33, 0.0  ;;  %9781 = vmatmul.mubr.bf16.gmra.mxu0 %v15251_v25 }
 0x5e1   :  { %6955 = vst [vmem:[#allocation2 + $0x258] sm:$0xff] %v13077_v32  ;;  %v13066_v28 = vpack.c.bf16 %v6386_v52, %v6385_v56  ;;  %v6840_v21 = vmax.f32 %v6795_v55, 0.0  ;;  %v6799_v6 = vadd.f32 %v6798_v44, %v17923_v19  ;;  %v7203_v47 = vadd.f32 %v7202_v31, %v17983_v16  ;;  %9788 = vmatprep.mubr.bf16.mxu0 %v15260_v18  ;;  %v15315_v32 = vld [vmem:[#allocation20 + $0x438] sm:$0xff]   ;;  %v15263_v31 = vld [vmem:[#allocation2 + $0x1d8] ss:$56 sps:$4 sm:$0xff]  }
 0x5e2   :  { %v6800_v29 = vpop.f32.mrf.mxu0  ;;  %v7204_v53 = vpop.f32.mrf.mxu1  ;;  %14244 = vmatpush3.bf16.msra.mxu0 %v15292_v1  ;;  %v7279_v45 = vmax.f32 %v7201_v24, 0.0  ;;  %v15273_v18 = vld [vmem:[#allocation2 + $0x24c] ss:$56 sps:$4 sm:$0xff]  }
 0x5e3   :  { %6498 = vst [vmem:[#allocation2 + $0x368] sm:$0xff] %v13066_v28  ;;  %v13078_v23 = vpack.c.bf16 %v6840_v21, %v6839_v3  ;;  %v6801_v58 = vadd.f32 %v6800_v29, %v17927_v54  ;;  %v7205_v38 = vadd.f32 %v7204_v53, %v17978_v61  ;;  %v7280_v10 = vmax.f32 %v7203_v47, 0.0  ;;  %9163 = vmatmul.mubr.bf16.gmra.mxu1 %v15248_v34 }
 0x5e4   :  { %v6802_v15 = vpop.f32.mrf.mxu0  ;;  %v7206_v41 = vpop.f32.mrf.mxu1  ;;  %14245 = vmatprep.subr.bf16.mxu0 %v15298_v63  ;;  %v6841_v36 = vmax.f32 %v6799_v6, 0.0  ;;  %9170 = vmatprep.mubr.bf16.mxu1 %v15257_v5  ;;  %v15274_v5 = vld [vmem:[#allocation20 + $0x370] sm:$0xff]  }
 0x5e5   :  { %6956 = vst [vmem:[#allocation2 + $0x290] sm:$0xff] %v13078_v23  ;;  %v6842_v40 = vmax.f32 %v6801_v58, 0.0  ;;  %v6803_v22 = vadd.f32 %v6802_v15, %v17923_v19  ;;  %v7207_v27 = vadd.f32 %v7206_v41, %v17983_v16  ;;  %v13083_v62 = vpack.c.bf16 %v7280_v10, %v7279_v45  ;;  %v15266_v10 = vld [vmem:[#allocation2 + $0x90] ss:$56 sps:$4 sm:$0xff]  }
 0x5e6   :  { %v6804_v42 = vpop.f32.mrf.mxu0  ;;  %v7210_v59 = vpop.f32.mrf.mxu1  ;;  %v7281_v37 = vmax.f32 %v7205_v38, 0.0  ;;  %14246 = vmatpush3.bf16.msra.mxu0 %v15298_v63  ;;  %v15269_v38 = vld [vmem:[#allocation20 + $0x338] sm:$0xff]  }
 0x5e7   :  { %v13079_v39 = vpack.c.bf16 %v6842_v40, %v6841_v36  ;;  %v7282_v49 = vmax.f32 %v7207_v27, 0.0  ;;  %v6805_v14 = vadd.f32 %v6804_v42, %v17927_v54  ;;  %7407 = vst [vmem:[#allocation2 + $0x30] sm:$0xff] %v13083_v62  ;;  %v6843_v51 = vmax.f32 %v6803_v22, 0.0  ;;  %14247 = vmatprep.subr.bf16.mxu0 %v15305_v20  ;;  %v15268_v40 = vld [vmem:[#allocation2 + $0x100] ss:$56 sps:$4 sm:$0xff]  }
 0x5e8   :  { %v7211_v0 = vadd.f32 %v7210_v59, %v17978_v61  ;;  %v6808_v46 = vpop.f32.mrf.mxu0  ;;  %v7212_v35 = vpop.f32.mrf.mxu1  ;;  %9789 = vmatmul.mubr.bf16.gmra.mxu0 %v15258_v12  ;;  %v15275_v59 = vld [vmem:[#allocation20 + $0x330] sm:$0xff]  }
 0x5e9   :  { %6957 = vst [vmem:[#allocation2 + $0x2c8] sm:$0xff] %v13079_v39  ;;  %v13084_v50 = vpack.c.bf16 %v7282_v49, %v7281_v37  ;;  %v6844_v17 = vmax.f32 %v6805_v14, 0.0  ;;  %v6809_v26 = vadd.f32 %v6808_v46, %v17923_v19  ;;  %v7213_v9 = vadd.f32 %v7212_v35, %v17983_v16  ;;  %9796 = vmatprep.mubr.bf16.mxu0 %v15265_v48  ;;  %v15278_v39 = vld [vmem:[#allocation20 + $0x368] sm:$0xff]   ;;  %v15271_v49 = vld [vmem:[#allocation2 + $0x248] ss:$56 sps:$4 sm:$0xff]  }
 0x5ea   :  { %v6810_v2 = vpop.f32.mrf.mxu0  ;;  %v7214_v60 = vpop.f32.mrf.mxu1  ;;  %v7283_v57 = vmax.f32 %v7211_v0, 0.0  ;;  %14248 = vmatpush3.bf16.msra.mxu0 %v15305_v20  ;;  %v15284_v35 = vld [vmem:[#allocation2 + $0x2bc] ss:$56 sps:$4 sm:$0xff]  }
 0x5eb   :  { %7408 = vst [vmem:[#allocation2 + $0x68] sm:$0xff] %v13084_v50  ;;  %v13080_v1 = vpack.c.bf16 %v6844_v17, %v6843_v51  ;;  %v7284_v4 = vmax.f32 %v7213_v9, 0.0  ;;  %v6811_v8 = vadd.f32 %v6810_v2, %v17927_v54  ;;  %v6845_v33 = vmax.f32 %v6809_v26, 0.0  ;;  %9171 = vmatmul.mubr.bf16.gmra.mxu1 %v15255_v43  ;;  %14249 = vmatprep.subr.bf16.mxu0 %v15309_v7  ;;  %v15280_v17 = vld [vmem:[#allocation20 + $0x328] sm:$0xff]   ;;  %v15285_v26 = vld [vmem:[#allocation20 + $0x360] sm:$0xff]  }
 0x5ec   :  { %v7215_v13 = vadd.f32 %v7214_v60, %v17978_v61  ;;  %v6812_v30 = vpop.f32.mrf.mxu0  ;;  %v7216_v56 = vpop.f32.mrf.mxu1  ;;  %14219 = vmatprep.mubr.bf16.mxu1 %v15262_v11  ;;  %v15277_v43 = vld [vmem:[#allocation2 + $0x170] ss:$56 sps:$4 sm:$0xff]  }
 0x5ed   :  { %6958 = vst [vmem:[#allocation2 + $0x300] sm:$0xff] %v13080_v1  ;;  %v13085_v52 = vpack.c.bf16 %v7284_v4, %v7283_v57  ;;  %v6846_v55 = vmax.f32 %v6811_v8, 0.0  ;;  %v6813_v25 = vadd.f32 %v6812_v30, %v17923_v19  ;;  %v7217_v63 = vadd.f32 %v7216_v56, %v17983_v16  ;;  %v15279_v4 = vld [vmem:[#allocation2 + $0x1e0] ss:$56 sps:$4 sm:$0xff]   ;;  %v15286_v30 = vld [vmem:[#allocation20 + $0x320] sm:$0xff]   ;;  %v15289_v56 = vld [vmem:[#allocation20 + $0x358] sm:$0xff]  }
 0x5ee   :  { %v6814_v24 = vpop.f32.mrf.mxu0  ;;  %v7220_v44 = vpop.f32.mrf.mxu1  ;;  %v7285_v3 = vmax.f32 %v7215_v13, 0.0  ;;  %14250 = vmatpush3.bf16.msra.mxu0 %v15309_v7 }
 0x5ef   :  { %7409 = vst [vmem:[#allocation2 + $0xa0] sm:$0xff] %v13085_v52  ;;  %v13081_v28 = vpack.c.bf16 %v6846_v55, %v6845_v33  ;;  %v7286_v21 = vmax.f32 %v7217_v63, 0.0  ;;  %v6815_v6 = vadd.f32 %v6814_v24, %v17927_v54  ;;  %v7221_v34 = vadd.f32 %v7220_v44, %v17978_v61  ;;  %13819 = vmatprep.subr.bf16.mxu0 %v15315_v32  ;;  %v15282_v52 = vld [vmem:[#allocation2 + $0x2b8] ss:$56 sps:$4 sm:$0xff]  }
 0x5f0   :  { %v7222_v47 = vpop.f32.mrf.mxu1  ;;  %v18003_v29 = vpop.f32.mrf.mxu0  ;;  %v6847_v19 = vmax.f32 %v6813_v25, 0.0  ;;  %9797 = vmatmul.mubr.bf16.gmra.mxu0 %v15263_v31 }
 0x5f1   :  { %6959 = vst [vmem:[#allocation2 + $0x338] sm:$0xff] %v13081_v28  ;;  %v13086_v53 = vpack.c.bf16 %v7286_v21, %v7285_v3  ;;  %v6848_v23 = vmax.f32 %v6815_v6, 0.0  ;;  %v7223_v58 = vadd.f32 %v7222_v47, %v17983_v16  ;;  %9804 = vmatprep.mubr.bf16.mxu0 %v15273_v18  ;;  %v7287_v41 = vmax.f32 %v7221_v34, 0.0  ;;  %v15295_v18 = vld [vmem:[#allocation2 + $0x32c] ss:$56 sps:$4 sm:$0xff]  }
 0x5f2   :  { %v7224_v45 = vpop.f32.mrf.mxu1  ;;  %v18006_v54 = vpop.f32.mrf.mxu0  ;;  %v15291_v21 = vld [vmem:[#allocation20 + $0x318] sm:$0xff]   ;;  %v15296_v6 = vld [vmem:[#allocation20 + $0x350] sm:$0xff]  }
 0x5f3   :  { %7410 = vst [vmem:[#allocation2 + $0xd8] sm:$0xff] %v13086_v53  ;;  %v13082_v15 = vpack.c.bf16 %v6848_v23, %v6847_v19  ;;  %v7288_v20 = vmax.f32 %v7223_v58, 0.0  ;;  %v7225_v36 = vadd.f32 %v7224_v45, %v17978_v61  ;;  %14220 = vmatmul.mubr.bf16.vlgmr.msra.gmra.mxu1 %v15266_v10  ;;  %v15288_v47 = vld [vmem:[#allocation2 + $0x250] ss:$56 sps:$4 sm:$0xff]  }
 0x5f4   :  { %v7226_v22 = vpop.f32.mrf.mxu1  ;;  %v18009_v27 = vpop.f32.mrf.mxu0  ;;  %14223 = vmatprep.mubr.bf16.mxu1 %v15268_v40  ;;  %13740 = vmatpush3.bf16.msra.mxu1 %v15269_v38  ;;  %v15290_v38 = vld [vmem:[#allocation2 + $0x2c0] ss:$56 sps:$4 sm:$0xff]  }
 0x5f5   :  { %6960 = vst [vmem:[#allocation2 + $0x370] sm:$0xff] %v13082_v15  ;;  %v13087_v62 = vpack.c.bf16 %v7288_v20, %v7287_v41  ;;  %v7227_v42 = vadd.f32 %v7226_v22, %v17983_v16  ;;  %13741 = vmatprep.subr.bf16.mxu1 %v15274_v5  ;;  %v7289_v12 = vmax.f32 %v7225_v36, 0.0  ;;  %v15297_v41 = vld [vmem:[#allocation20 + $0x310] sm:$0xff]   ;;  %v15300_v20 = vld [vmem:[#allocation20 + $0x348] sm:$0xff]  }
 0x5f6   :  { %v7230_v37 = vpop.f32.mrf.mxu1  ;;  %v18012_v14 = vpop.f32.mrf.mxu0 }
 0x5f7   :  { %7411 = vst [vmem:[#allocation2 + $0x110] sm:$0xff] %v13087_v62  ;;  %v7290_v7 = vmax.f32 %v7227_v42, 0.0  ;;  %v7231_v51 = vadd.f32 %v7230_v37, %v17978_v61 }
 0x5f8   :  { %v7232_v0 = vpop.f32.mrf.mxu1  ;;  %v18015_v46 = vpop.f32.mrf.mxu0  ;;  %13742 = vmatpush3.bf16.msra.mxu1 %v15275_v59  ;;  %9805 = vmatmul.mubr.bf16.gmra.mxu0 %v15271_v49  ;;  %v15293_v59 = vld [vmem:[#allocation2 + $0x328] ss:$56 sps:$4 sm:$0xff]  }
 0x5f9   :  { %v13088_v48 = vpack.c.bf16 %v7290_v7, %v7289_v12  ;;  %v7233_v50 = vadd.f32 %v7232_v0, %v17983_v16  ;;  %13743 = vmatprep.subr.bf16.mxu1 %v15278_v39  ;;  %9812 = vmatprep.mubr.bf16.mxu0 %v15284_v35  ;;  %v7291_v60 = vmax.f32 %v7231_v51, 0.0  ;;  %v15306_v49 = vld [vmem:[#allocation2 + $0x28] ss:$56 sps:$4 sm:$0xff]   ;;  %v15301_v51 = vld [vmem:[#allocation20 + $0x308] sm:$0xff]   ;;  %v15307_v0 = vld [vmem:[#allocation20 + $0x340] sm:$0xff]  }
 0x5fa   :  { %v7234_v9 = vpop.f32.mrf.mxu1  ;;  %v18018_v2 = vpop.f32.mrf.mxu0 }
 0x5fb   :  { %7412 = vst [vmem:[#allocation2 + $0x148] sm:$0xff] %v13088_v48  ;;  %v7292_v1 = vmax.f32 %v7233_v50, 0.0  ;;  %v7235_v57 = vadd.f32 %v7234_v9, %v17978_v61  ;;  %14224 = vmatmul.mubr.bf16.gmra.mxu1 %v15277_v43  ;;  %v15299_v48 = vld [vmem:[#allocation2 + $0x330] ss:$56 sps:$4 sm:$0xff]   ;;  %v15304_v43 = vld [vmem:[#allocation2 + $0x24] ss:$56 sps:$4 sm:$0xff]  }
 0x5fc   :  { %v7236_v8 = vpop.f32.mrf.mxu1  ;;  %v18021_v11 = vpop.f32.mrf.mxu0  ;;  %14227 = vmatprep.mubr.bf16.mxu1 %v15279_v4  ;;  %13744 = vmatpush3.bf16.msra.mxu1 %v15280_v17 }
 0x5fd   :  { %v13089_v33 = vpack.c.bf16 %v7292_v1, %v7291_v60  ;;  %v7237_v13 = vadd.f32 %v7236_v8, %v17983_v16  ;;  %13745 = vmatprep.subr.bf16.mxu1 %v15285_v26  ;;  %v7293_v25 = vmax.f32 %v7235_v57, 0.0  ;;  %v15308_v8 = vld [vmem:[#allocation20 + $0x300] sm:$0xff]  }
 0x5fe   :  { %v7240_v32 = vpop.f32.mrf.mxu1  ;;  %v18024_v55 = vpop.f32.mrf.mxu0 }
 0x5ff   :  { %7413 = vst [vmem:[#allocation2 + $0x180] sm:$0xff] %v13089_v33  ;;  %v7294_v63 = vmax.f32 %v7237_v13, 0.0  ;;  %v7241_v24 = vadd.f32 %v7240_v32, %v17978_v61  ;;  %v15310_v33 = vld [vmem:[#allocation20 + $0x478] sm:$0xff]  }
 0x600   :  { %v7242_v44 = vpop.f32.mrf.mxu1  ;;  %v18027_v31 = vpop.f32.mrf.mxu0  ;;  %13746 = vmatpush3.bf16.msra.mxu1 %v15286_v30  ;;  %9813 = vmatmul.mubr.bf16.gmra.mxu0 %v15282_v52 }
 0x601   :  { %v13090_v28 = vpack.c.bf16 %v7294_v63, %v7293_v25  ;;  %v7243_v3 = vadd.f32 %v7242_v44, %v17983_v16  ;;  %13747 = vmatprep.subr.bf16.mxu1 %v15289_v56  ;;  %9820 = vmatprep.mubr.bf16.mxu0 %v15295_v18  ;;  %v7295_v53 = vmax.f32 %v7241_v24, 0.0  ;;  %v15314_v25 = vld [vmem:[#allocation2 + $0x98] ss:$56 sps:$4 sm:$0xff]   ;;  %v15317_v63 = vld [vmem:[#allocation20 + $0x3f8] sm:$0xff]  }
 0x602   :  { %v7244_v34 = vpop.f32.mrf.mxu1  ;;  %v18030_v19 = vpop.f32.mrf.mxu0  ;;  %v15316_v18 = vld [vmem:[#allocation2 + $0x108] ss:$56 sps:$4 sm:$0xff]  }
 0x603   :  { %7414 = vst [vmem:[#allocation2 + $0x1b8] sm:$0xff] %v13090_v28  ;;  %v7296_v23 = vmax.f32 %v7243_v3, 0.0  ;;  %v7245_v58 = vadd.f32 %v7244_v34, %v17978_v61  ;;  %14228 = vmatmul.mubr.bf16.gmra.mxu1 %v15288_v47  ;;  %v15318_v28 = vld [vmem:[#allocation20 + $0x430] sm:$0xff]  }
 0x604   :  { %v7246_v5 = vpop.f32.mrf.mxu1  ;;  %v18033_v45 = vpop.f32.mrf.mxu0  ;;  %14231 = vmatprep.mubr.bf16.mxu1 %v15290_v38  ;;  %13748 = vmatpush3.bf16.msra.mxu1 %v15291_v21  ;;  %v15302_v34 = vld [vmem:[#allocation2 + $0x20] ss:$56 sps:$4 sm:$0xff]  }
 0x605   :  { %v13091_v10 = vpack.c.bf16 %v7296_v23, %v7295_v53  ;;  %v7247_v15 = vadd.f32 %v7246_v5, %v17983_v16  ;;  %13749 = vmatprep.subr.bf16.mxu1 %v15296_v6  ;;  %v7297_v22 = vmax.f32 %v7245_v58, 0.0  ;;  %v15320_v6 = vld [vmem:[#allocation20 + $0x470] sm:$0xff]   ;;  %v15313_v5 = vld [vmem:[#allocation2 + $0x94] ss:$56 sps:$4 sm:$0xff]  }
 0x606   :  { %v7250_v36 = vpop.f32.mrf.mxu1  ;;  %v18036_v40 = vpop.f32.mrf.mxu0 }
 0x607   :  { %7415 = vst [vmem:[#allocation2 + $0x1f0] sm:$0xff] %v13091_v10  ;;  %v7298_v62 = vmax.f32 %v7247_v15, 0.0  ;;  %v7251_v42 = vadd.f32 %v7250_v36, %v17978_v61  ;;  %v15319_v10 = vld [vmem:[#allocation20 + $0x3f0] sm:$0xff]  }
 0x608   :  { %v7252_v39 = vpop.f32.mrf.mxu1  ;;  %v18039_v37 = vpop.f32.mrf.mxu0  ;;  %13750 = vmatpush3.bf16.msra.mxu1 %v15297_v41  ;;  %9821 = vmatmul.mubr.bf16.gmra.mxu0 %v15293_v59 }
 0x609   :  { %v13092_v12 = vpack.c.bf16 %v7298_v62, %v7297_v22  ;;  %v7253_v7 = vadd.f32 %v7252_v39, %v17983_v16  ;;  %13751 = vmatprep.subr.bf16.mxu1 %v15300_v20  ;;  %14251 = vmatprep.mubr.bf16.mxu0 %v15306_v49  ;;  %v7299_v17 = vmax.f32 %v7251_v42, 0.0  ;;  %v15325_v20 = vld [vmem:[#allocation20 + $0x428] sm:$0xff]  }
 0x60a   :  { %v7254_v35 = vpop.f32.mrf.mxu1  ;;  %v18042_v50 = vpop.f32.mrf.mxu0  ;;  %v15330_v62 = vld [vmem:[#allocation20 + $0x468] sm:$0xff]  }
 0x60b   :  { %7416 = vst [vmem:[#allocation2 + $0x228] sm:$0xff] %v13092_v12  ;;  %v7300_v26 = vmax.f32 %v7253_v7, 0.0  ;;  %v7255_v9 = vadd.f32 %v7254_v35, %v17978_v61  ;;  %14232 = vmatmul.mubr.bf16.gmra.mxu1 %v15299_v48  ;;  %v15324_v7 = vld [vmem:[#allocation2 + $0x178] ss:$56 sps:$4 sm:$0xff]  }
 0x60c   :  { %v7256_v60 = vpop.f32.mrf.mxu1  ;;  %v18045_v1 = vpop.f32.mrf.mxu0  ;;  %13752 = vmatpush3.bf16.msra.mxu1 %v15301_v51  ;;  %10414 = vmatprep.mubr.bf16.mxu1 %v15304_v43  ;;  %v15327_v51 = vld [vmem:[#allocation20 + $0x3e8] sm:$0xff]   ;;  %v15311_v43 = vld [vmem:[#allocation2 + $0x90] ss:$56 sps:$4 sm:$0xff]  }
 0x60d   :  { %v13093_v57 = vpack.c.bf16 %v7300_v26, %v7299_v17  ;;  %v7257_v4 = vadd.f32 %v7256_v60, %v17983_v16  ;;  %13753 = vmatprep.subr.bf16.mxu1 %v15307_v0  ;;  %v7301_v56 = vmax.f32 %v7255_v9, 0.0  ;;  %v13443_v0 = vadd.f32 %v18018_v2, %v18015_v46  ;;  %v15326_v17 = vld [vmem:[#allocation2 + $0x1e8] ss:$56 sps:$4 sm:$0xff]   ;;  %v15328_v26 = vld [vmem:[#allocation20 + $0x420] sm:$0xff]  }
 0x60e   :  { %v7260_v13 = vpop.f32.mrf.mxu1  ;;  %v18048_v30 = vpop.f32.mrf.mxu0  ;;  %v13437_v46 = vadd.f32 %v18006_v54, %v18003_v29  ;;  %v15335_v29 = vld [vmem:[#allocation20 + $0x418] sm:$0xff]   ;;  %v13446_v54 = vadd.f32 %v18024_v55, %v18021_v11  ;;  %v15334_v11 = vld [vmem:[#allocation2 + $0x258] ss:$56 sps:$4 sm:$0xff]  }
 0x60f   :  { %7417 = vst [vmem:[#allocation2 + $0x260] sm:$0xff] %v13093_v57  ;;  %v7302_v32 = vmax.f32 %v7257_v4, 0.0  ;;  %v7261_v52 = vadd.f32 %v7260_v13, %v17978_v61  ;;  %v18071_v57 = vld [vmem:[%s18476_s12] ss:$0 sm:$0xff]  ;;  %v15337_v55 = vld [vmem:[#allocation20 + $0x3d8] sm:$0xff]  }
 0x610   :  { %v7262_v24 = vpop.f32.mrf.mxu1  ;;  %v18051_v44 = vpop.f32.mrf.mxu0  ;;  %13754 = vmatpush3.bf16.msra.mxu1 %v15308_v8  ;;  %14252 = vmatmul.mubr.bf16.vlgmr.msra.gmra.mxu0 %v15314_v25  ;;  %v15340_v8 = vld [vmem:[#allocation20 + $0x460] sm:$0xff]  }
 0x611   :  { %v13094_v3 = vpack.c.bf16 %v7302_v32, %v7301_v56  ;;  %v7263_v21 = vadd.f32 %v7262_v24, %v17983_v16  ;;  %14267 = vmatprep.subr.bf16.mxu1 %v15310_v33  ;;  %14255 = vmatprep.mubr.bf16.mxu0 %v15316_v18  ;;  %v7303_v23 = vmax.f32 %v7261_v52, 0.0  ;;  %v15323_v32 = vld [vmem:[#allocation2 + $0x104] ss:$56 sps:$4 sm:$0xff]   ;;  %v15329_v52 = vld [vmem:[#allocation20 + $0x3e0] sm:$0xff]  }
 0x612   :  { %v7264_v47 = vpop.f32.mrf.mxu1  ;;  %v18054_v53 = vpop.f32.mrf.mxu0  ;;  %13820 = vmatpush3.bf16.msra.mxu0 %v15317_v63  ;;  %v7825_v63 = vadd.f32 %v13443_v0, %v18071_v57  ;;  %v15333_v0 = vld [vmem:[#allocation2 + $0x174] ss:$56 sps:$4 sm:$0xff]  }
 0x613   :  { %7418 = vst [vmem:[#allocation2 + $0x298] sm:$0xff] %v13094_v3  ;;  %v7304_v58 = vmax.f32 %v7263_v21, 0.0  ;;  %v7265_v38 = vadd.f32 %v7264_v47, %v17978_v61  ;;  %10415 = vmatmul.mubr.bf16.vlgmr.msra.gmra.mxu1 %v15302_v34  ;;  %13821 = vmatprep.subr.bf16.mxu0 %v15318_v28  ;;  %v7817_v21 = vadd.f32 %v13437_v46, %v18071_v57  ;;  %v15366_v46 = vld [vmem:[#allocation20 + $0x448] sm:$0xff]  }
 0x614   :  { %v7266_v15 = vpop.f32.mrf.mxu1  ;;  %v18057_v41 = vpop.f32.mrf.mxu0  ;;  %10422 = vmatprep.mubr.bf16.mxu1 %v15313_v5  ;;  %14268 = vmatpush3.bf16.msra.mxu1 %v15310_v33  ;;  %v13440_v34 = vadd.f32 %v18012_v14, %v18009_v27  ;;  %v7828_v14 = vadd.f32 %v13446_v54, %v18071_v57  ;;  %v15350_v54 = vld [vmem:[#allocation20 + $0x400] sm:$0xff]  }
 0x615   :  { %v13095_v36 = vpack.c.bf16 %v7304_v58, %v7303_v23  ;;  %v7267_v22 = vadd.f32 %v7266_v15, %v17983_v16  ;;  %14269 = vmatprep.subr.bf16.mxu1 %v15320_v6  ;;  %v7305_v39 = vmax.f32 %v7265_v38, 0.0  ;;  %v15338_v15 = vld [vmem:[#allocation20 + $0x410] sm:$0xff]  }
 0x616   :  { %v7270_v42 = vpop.f32.mrf.mxu1  ;;  %v18060_v59 = vpop.f32.mrf.mxu0  ;;  %13822 = vmatpush3.bf16.msra.mxu0 %v15319_v10  ;;  %v15336_v10 = vld [vmem:[#allocation2 + $0x2c8] ss:$56 sps:$4 sm:$0xff]  }
 0x617   :  { %7419 = vst [vmem:[#allocation2 + $0x2d0] sm:$0xff] %v13095_v36  ;;  %v7306_v49 = vmax.f32 %v7267_v22, 0.0  ;;  %v7271_v12 = vadd.f32 %v7270_v42, %v17978_v61  ;;  %13823 = vmatprep.subr.bf16.mxu0 %v15325_v20  ;;  %v15321_v22 = vld [vmem:[#allocation2 + $0x100] ss:$56 sps:$4 sm:$0xff]   ;;  %v13449_v42 = vadd.f32 %v18030_v19, %v18027_v31 }
 0x618   :  { %v7272_v35 = vpop.f32.mrf.mxu1  ;;  %v18065_v48 = vpop.f32.mrf.mxu0  ;;  %14256 = vmatmul.mubr.bf16.gmra.mxu0 %v15324_v7  ;;  %14270 = vmatpush3.bf16.msra.mxu1 %v15320_v6 }
 0x619   :  { %v13096_v9 = vpack.c.bf16 %v7306_v49, %v7305_v39  ;;  %v7273_v60 = vadd.f32 %v7272_v35, %v17983_v16  ;;  %14259 = vmatprep.mubr.bf16.mxu0 %v15326_v17  ;;  %14271 = vmatprep.subr.bf16.mxu1 %v15330_v62  ;;  %v7307_v33 = vmax.f32 %v7271_v12, 0.0  ;;  %v13458_v35 = vadd.f32 %v18048_v30, %v18045_v1 }
 0x61a   :  { %v7274_v2 = vpop.f32.mrf.mxu1  ;;  %v18075_v4 = vpop.f32.mrf.mxu0  ;;  %13824 = vmatpush3.bf16.msra.mxu0 %v15327_v51  ;;  %v7820_v51 = vadd.f32 %v13440_v34, %v18071_v57  ;;  %v7833_v1 = vadd.f32 %v13449_v42, %v18071_v57  ;;  %v13461_v34 = vadd.f32 %v18054_v53, %v18051_v44  ;;  %v15382_v44 = vld [vmem:[#allocation20 + $0x538] sm:$0xff]  }
 0x61b   :  { %7420 = vst [vmem:[#allocation2 + $0x308] sm:$0xff] %v13096_v9  ;;  %v7308_v13 = vmax.f32 %v7273_v60, 0.0  ;;  %v7275_v56 = vadd.f32 %v7274_v2, %v17978_v61  ;;  %10423 = vmatmul.mubr.bf16.gmra.mxu1 %v15311_v43  ;;  %13825 = vmatprep.subr.bf16.mxu0 %v15328_v26  ;;  %v15352_v61 = vld [vmem:[#allocation20 + $0x458] sm:$0xff]   ;;  %v15345_v26 = vld [vmem:[#allocation20 + $0x408] sm:$0xff]   ;;  %v13452_v2 = vadd.f32 %v18036_v40, %v18033_v45 }
 0x61c   :  { %v7276_v25 = vpop.f32.mrf.mxu1  ;;  %v18079_v24 = vpop.f32.mrf.mxu0  ;;  %10430 = vmatprep.mubr.bf16.mxu1 %v15323_v32  ;;  %14272 = vmatpush3.bf16.msra.mxu1 %v15330_v62  ;;  %v15339_v62 = vld [vmem:[#allocation20 + $0x3d0] sm:$0xff]   ;;  %v15344_v32 = vld [vmem:[#allocation2 + $0x338] ss:$56 sps:$4 sm:$0xff]  }
 0x61d   :  { %v13097_v18 = vpack.c.bf16 %v7308_v13, %v7307_v33  ;;  %v7277_v28 = vadd.f32 %v7276_v25, %v17983_v16  ;;  %14273 = vmatprep.subr.bf16.mxu1 %v15340_v8  ;;  %v7309_v47 = vmax.f32 %v7275_v56, 0.0  ;;  %v13455_v16 = vadd.f32 %v18042_v50, %v18039_v37  ;;  %v15359_v50 = vld [vmem:[#allocation20 + $0x450] sm:$0xff]  }
 0x61e   :  { %v14125_v3 = vpop.f32.mrf.mxu1  ;;  %v18085_v6 = vpop.f32.mrf.mxu0  ;;  %13826 = vmatpush3.bf16.msra.mxu0 %v15329_v52  ;;  %v15346_v52 = vld [vmem:[#allocation20 + $0x3c8] sm:$0xff]   ;;  %v13467_v25 = vadd.f32 %v18075_v4, %v18065_v48  ;;  %v15349_v40 = vld [vmem:[#allocation2 + $0x2c] ss:$56 sps:$4 sm:$0xff]   ;;  %v7836_v4 = vadd.f32 %v13452_v2, %v18071_v57 }
 0x61f   :  { %7421 = vst [vmem:[#allocation2 + $0x340] sm:$0xff] %v13097_v18  ;;  %v7310_v23 = vmax.f32 %v7277_v28, 0.0  ;;  %v7922_v58 = vadd.f32 %v14125_v3, %v7825_v63  ;;  %13827 = vmatprep.subr.bf16.mxu0 %v15335_v29  ;;  %v7841_v31 = vadd.f32 %v13455_v16, %v18071_v57  ;;  %v7844_v29 = vadd.f32 %v13458_v35, %v18071_v57  ;;  %v15343_v16 = vld [vmem:[#allocation2 + $0x1e4] ss:$56 sps:$4 sm:$0xff]  }
 0x620   :  { %v7913_v38 = vpop.f32.mrf.mxu1  ;;  %v18091_v5 = vpop.f32.mrf.mxu0  ;;  %14260 = vmatmul.mubr.bf16.gmra.mxu0 %v15334_v11  ;;  %14274 = vmatpush3.bf16.msra.mxu1 %v15340_v8  ;;  %v15358_v35 = vld [vmem:[#allocation2 + $0x9c] ss:$56 sps:$4 sm:$0xff]  }
 0x621   :  { %v13098_v20 = vpack.c.bf16 %v7310_v23, %v7309_v47  ;;  %v7978_v36 = vsub.f32 0.0, %v7922_v58  ;;  %v7914_v27 = vadd.f32 %v7913_v38, %v7817_v21  ;;  %14263 = vmatprep.mubr.bf16.mxu0 %v15336_v10  ;;  %14275 = vmatprep.subr.bf16.mxu1 %v15352_v61  ;;  %v15351_v21 = vld [vmem:[#allocation20 + $0x3c0] sm:$0xff]   ;;  %v7857_v10 = vadd.f32 %v13467_v25, %v18071_v57  ;;  %v15393_v25 = vld [vmem:[#allocation20 + $0x528] sm:$0xff]  }
 0x622   :  { %v14126_v39 = vpop.f32.mrf.mxu1  ;;  %v18096_v37 = vpop.f32.mrf.mxu0  ;;  %13828 = vmatpush3.bf16.msra.mxu0 %v15337_v55  ;;  %v15373_v23 = vld [vmem:[#allocation20 + $0x440] sm:$0xff]  }
 0x623   :  { %7422 = vst [vmem:[#allocation2 + $0x378] sm:$0xff] %v13098_v20  ;;  %v7996_v49 = vmul.f32 1.442695, %v7978_v36  ;;  %v7976_v12 = vsub.f32 0.0, %v7914_v27  ;;  %v7925_v7 = vadd.f32 %v14126_v39, %v7828_v14  ;;  %10431 = vmatmul.mubr.bf16.gmra.mxu1 %v15321_v22  ;;  %13829 = vmatprep.subr.bf16.mxu0 %v15338_v15  ;;  %v13464_v22 = vadd.f32 %v18060_v59, %v18057_v41  ;;  %v15379_v39 = vld [vmem:[#allocation20 + $0x4f8] sm:$0xff]   ;;  %v15388_v41 = vld [vmem:[#allocation20 + $0x530] sm:$0xff]  }
 0x624   :  { %v7916_v17 = vpop.f32.mrf.mxu1  ;;  %v18102_v19 = vpop.f32.mrf.mxu0  ;;  %10438 = vmatprep.mubr.bf16.mxu1 %v15333_v0  ;;  %14276 = vmatpush3.bf16.msra.mxu1 %v15352_v61  ;;  %v15331_v61 = vld [vmem:[#allocation2 + $0x170] ss:$56 sps:$4 sm:$0xff]   ;;  %v13470_v27 = vadd.f32 %v18085_v6, %v18079_v24 }
 0x625   :  { %15450 = vpow2.f32 %v7996_v49  ;;  %v7992_v9 = vmul.f32 1.442695, %v7976_v12  ;;  %v7979_v43 = vsub.f32 0.0, %v7925_v7  ;;  %v7917_v60 = vadd.f32 %v7916_v17, %v7820_v51  ;;  %14277 = vmatprep.subr.bf16.mxu1 %v15359_v50  ;;  %v15347_v7 = vld [vmem:[#allocation2 + $0x28] ss:$56 sps:$4 sm:$0xff]  }
 0x626   :  { %v14129_v8 = vpop.f32.mrf.mxu1  ;;  %v18107_v30 = vpop.f32.mrf.mxu0  ;;  %13830 = vmatpush3.bf16.msra.mxu0 %v15339_v62  ;;  %v7849_v62 = vadd.f32 %v13461_v34, %v18071_v57 }
 0x627   :  { %15452 = vpow2.f32 %v7992_v9  ;;  %v7998_v33 = vmul.f32 1.442695, %v7979_v43  ;;  %v7977_v13 = vsub.f32 0.0, %v7917_v60  ;;  %v7938_v56 = vadd.f32 %v14129_v8, %v7841_v31  ;;  %13831 = vmatprep.subr.bf16.mxu0 %v15345_v26  ;;  %v15341_v31 = vld [vmem:[#allocation2 + $0x1e0] ss:$56 sps:$4 sm:$0xff]  }
 0x628   :  { %v7929_v63 = vpop.f32.mrf.mxu1  ;;  %v18112_v45 = vpop.f32.mrf.mxu0  ;;  %14264 = vmatmul.mubr.bf16.gmra.mxu0 %v15344_v32  ;;  %14278 = vmatpush3.bf16.msra.mxu1 %v15359_v50  ;;  %v7860_v26 = vadd.f32 %v13470_v27, %v18071_v57  ;;  %v7852_v43 = vadd.f32 %v13464_v22, %v18071_v57  ;;  %v15362_v22 = vld [vmem:[#allocation2 + $0x2c4] ss:$56 sps:$4 sm:$0xff]  }
 0x629   :  { %15454 = vpow2.f32 %v7998_v33  ;;  %v7994_v18 = vmul.f32 1.442695, %v7977_v13  ;;  %v7982_v28 = vsub.f32 0.0, %v7938_v56  ;;  %v7930_v3 = vadd.f32 %v7929_v63, %v7833_v1  ;;  %11064 = vmatprep.mubr.bf16.mxu0 %v15349_v40  ;;  %14279 = vmatprep.subr.bf16.mxu1 %v15366_v46  ;;  %v15355_v1 = vld [vmem:[#allocation2 + $0x254] ss:$56 sps:$4 sm:$0xff]  }
 0x62a   :  { %v14130_v48 = vpop.f32.mrf.mxu1  ;;  %v13478_v47 = vpop.f32.mrf.mxu0  ;;  %13832 = vmatpush3.bf16.msra.mxu0 %v15346_v52 }
 0x62b   :  { %15456 = vpow2.f32 %v7994_v18  ;;  %v8004_v58 = vmul.f32 1.442695, %v7982_v28  ;;  %v7980_v11 = vsub.f32 0.0, %v7930_v3  ;;  %v7941_v55 = vadd.f32 %v14130_v48, %v7844_v29  ;;  %10439 = vmatmul.mubr.bf16.gmra.mxu1 %v15331_v61  ;;  %13833 = vmatprep.subr.bf16.mxu0 %v15350_v54 }
 0x62c   :  { %v7932_v38 = vpop.f32.mrf.mxu1  ;;  %v18118_v15 = vpop.f32.mrf.mxu0  ;;  %10446 = vmatprep.mubr.bf16.mxu1 %v15343_v16  ;;  %14280 = vmatpush3.bf16.msra.mxu1 %v15366_v46  ;;  %v13479_v13 = vadd.f32 %v13478_v47, %v18112_v45  ;;  %v13473_v18 = vadd.f32 %v18096_v37, %v18091_v5  ;;  %v13476_v37 = vadd.f32 %v18107_v30, %v18102_v19  ;;  %v15365_v16 = vld [vmem:[#allocation2 + $0x10c] ss:$56 sps:$4 sm:$0xff]  }
 0x62d   :  { %15458 = vpow2.f32 %v8004_v58  ;;  %v8000_v53 = vmul.f32 1.442695, %v7980_v11  ;;  %v7983_v20 = vsub.f32 0.0, %v7941_v55  ;;  %v7933_v36 = vadd.f32 %v7932_v38, %v7836_v4  ;;  %14281 = vmatprep.subr.bf16.mxu1 %v15373_v23  ;;  %v15356_v4 = vld [vmem:[#allocation2 + $0x98] ss:$56 sps:$4 sm:$0xff]  }
 0x62e   :  { %v14133_v14 = vpop.f32.mrf.mxu1  ;;  %v13481_v42 = vpop.f32.mrf.mxu0  ;;  %13834 = vmatpush3.bf16.msra.mxu0 %v15351_v21  ;;  %v7873_v47 = vadd.f32 %v13479_v13, %v18071_v57  ;;  %v15399_v58 = vld [vmem:[#allocation20 + $0x520] sm:$0xff]  }
 0x62f   :  { %15460 = vpow2.f32 %v8000_v53  ;;  %v8006_v50 = vmul.f32 1.442695, %v7983_v20  ;;  %v7981_v49 = vsub.f32 0.0, %v7933_v36  ;;  %v7954_v12 = vadd.f32 %v14133_v14, %v7857_v10  ;;  %14299 = vmatprep.subr.bf16.mxu0 %v15382_v44  ;;  %v15353_v10 = vld [vmem:[#allocation2 + $0x250] ss:$56 sps:$4 sm:$0xff]  }
 0x630   :  { %v7945_v51 = vpop.f32.mrf.mxu1  ;;  %v18125_v0 = vpop.f32.mrf.mxu0  ;;  %14282 = vmatpush3.bf16.msra.mxu1 %v15373_v23  ;;  %v13482_v48 = vadd.f32 %v13481_v42, %v18118_v15  ;;  %v7865_v15 = vadd.f32 %v13473_v18, %v18071_v57 }
 0x631   :  { %15462 = vpow2.f32 %v8006_v50  ;;  %v8002_v59 = vmul.f32 1.442695, %v7981_v49  ;;  %v7986_v24 = vsub.f32 0.0, %v7954_v12  ;;  %v7946_v6 = vadd.f32 %v7945_v51, %v7849_v62  ;;  %11065 = vmatmul.mubr.bf16.vlgmr.msra.gmra.mxu0 %v15347_v7  ;;  %13899 = vmatprep.subr.bf16.mxu1 %v15379_v39  ;;  %v15404_v39 = vld [vmem:[#allocation20 + $0x518] sm:$0xff]  }
 0x632   :  { %v15451_v17 = vpop.eup %15450  ;;  %v14134_v9 = vpop.f32.mrf.mxu1  ;;  %11072 = vmatprep.mubr.bf16.mxu0 %v15358_v35  ;;  %14300 = vmatpush3.bf16.msra.mxu0 %v15382_v44  ;;  %v7876_v62 = vadd.f32 %v13482_v48, %v18071_v57  ;;  %v7868_v12 = vadd.f32 %v13476_v37, %v18071_v57 }
 0x633   :  { %v18129_v60 = vpop.f32.mrf.mxu0  ;;  %v8026_v46 = vadd.f32 1.0, %v15451_v17  ;;  %15464 = vpow2.f32 %v8002_v59  ;;  %v8012_v2 = vmul.f32 1.442695, %v7986_v24  ;;  %v7984_v8 = vsub.f32 0.0, %v7946_v6  ;;  %10447 = vmatmul.mubr.bf16.gmra.mxu1 %v15341_v31  ;;  %14301 = vmatprep.subr.bf16.mxu0 %v15388_v41  ;;  %v18150_v6 = vld [vmem:[%s18476_s12 + $0x1] ss:$0 sm:$0xff] }
 0x634   :  { %v15453_v33 = vpop.eup %15452  ;;  %v7957_v56 = vadd.f32 %v14134_v9, %v7860_v26  ;;  %v7948_v32 = vpop.f32.mrf.mxu1  ;;  %10454 = vmatprep.mubr.bf16.mxu1 %v15355_v1  ;;  %v13517_v51 = vadd.f32 %v18129_v60, %v18125_v0  ;;  %v15363_v60 = vld [vmem:[#allocation2 + $0x108] ss:$56 sps:$4 sm:$0xff]  }
 0x635   :  { %v18132_v52 = vpop.f32.mrf.mxu0  ;;  %15466 = vrcp.f32 %v8026_v46  ;;  %v8024_v63 = vadd.f32 1.0, %v15453_v33  ;;  %v8008_v29 = vmul.f32 1.442695, %v7984_v8  ;;  %v7949_v40 = vadd.f32 %v7948_v32, %v7852_v43  ;;  %v15410_v8 = vld [vmem:[#allocation20 + $0x510] sm:$0xff]  }
 0x636   :  { %v15455_v54 = vpop.eup %15454  ;;  %15468 = vpow2.f32 %v8012_v2  ;;  %v7987_v28 = vsub.f32 0.0, %v7957_v56  ;;  %14302 = vmatpush3.bf16.msra.mxu0 %v15388_v41  ;;  %v15372_v56 = vld [vmem:[#allocation2 + $0x17c] ss:$56 sps:$4 sm:$0xff]  }
 0x637   :  { %v18136_v61 = vpop.f32.mrf.mxu0  ;;  %15470 = vrcp.f32 %v8024_v63  ;;  %v8027_v45 = vadd.f32 1.0, %v15455_v54  ;;  %v7985_v3 = vsub.f32 0.0, %v7949_v40  ;;  %14303 = vmatprep.subr.bf16.mxu0 %v15393_v25 }
 0x638   :  { %v15457_v21 = vpop.eup %15456  ;;  %15472 = vpow2.f32 %v8008_v29  ;;  %v8014_v34 = vmul.f32 1.442695, %v7987_v28  ;;  %v13520_v33 = vadd.f32 %v18136_v61, %v18132_v52  ;;  %v8467_v28 = vadd.f32 %v13517_v51, %v18150_v6 }
 0x639   :  { %v13521_v23 = vpop.f32.mrf.mxu0  ;;  %15474 = vrcp.f32 %v8027_v45  ;;  %v8025_v5 = vadd.f32 1.0, %v15457_v21  ;;  %v8010_v11 = vmul.f32 1.442695, %v7985_v3  ;;  %v14137_v55 = vpop.f32.mrf.mxu1  ;;  %11073 = vmatmul.mubr.bf16.gmra.mxu0 %v15356_v4  ;;  %v15369_v3 = vld [vmem:[#allocation2 + $0x334] ss:$56 sps:$4 sm:$0xff]  }
 0x63a   :  { %v15459_v38 = vpop.eup %15458  ;;  %15476 = vpow2.f32 %v8014_v34  ;;  %v7970_v44 = vadd.f32 %v14137_v55, %v7873_v47  ;;  %11080 = vmatprep.mubr.bf16.mxu0 %v15365_v16  ;;  %14304 = vmatpush3.bf16.msra.mxu0 %v15393_v25  ;;  %v15360_v25 = vld [vmem:[#allocation2 + $0x2c0] ss:$56 sps:$4 sm:$0xff]   ;;  %v8470_v37 = vadd.f32 %v13520_v33, %v18150_v6 }
 0x63b   :  { %v13522_v53 = vpop.f32.mrf.mxu0  ;;  %15478 = vrcp.f32 %v8025_v5  ;;  %v8030_v20 = vadd.f32 1.0, %v15459_v38  ;;  %v7961_v36 = vpop.f32.mrf.mxu1  ;;  %10455 = vmatmul.mubr.bf16.gmra.mxu1 %v15353_v10  ;;  %14305 = vmatprep.subr.bf16.mxu0 %v15399_v58  ;;  %v15417_v47 = vld [vmem:[#allocation20 + $0x508] sm:$0xff]  }
 0x63c   :  { %v13523_v27 = vadd.f32 %v13522_v53, %v13521_v23  ;;  %v15461_v14 = vpop.eup %15460  ;;  %15480 = vpow2.f32 %v8010_v11  ;;  %v7990_v19 = vsub.f32 0.0, %v7970_v44  ;;  %v7962_v30 = vadd.f32 %v7961_v36, %v7865_v15  ;;  %10462 = vmatprep.mubr.bf16.mxu1 %v15362_v22 }
 0x63d   :  { %v13524_v42 = vpop.f32.mrf.mxu0  ;;  %15482 = vrcp.f32 %v8030_v20  ;;  %v8028_v50 = vadd.f32 1.0, %v15461_v14  ;;  %v14138_v49 = vpop.f32.mrf.mxu1 }
 0x63e   :  { %v15463_v7 = vpop.eup %15462  ;;  %v8020_v41 = vmul.f32 1.442695, %v7990_v19  ;;  %v7988_v59 = vsub.f32 0.0, %v7962_v30  ;;  %v7973_v24 = vadd.f32 %v14138_v49, %v7876_v62  ;;  %v8475_v26 = vadd.f32 %v13523_v27, %v18150_v6  ;;  %14306 = vmatpush3.bf16.msra.mxu0 %v15399_v58  ;;  %v15370_v27 = vld [vmem:[#allocation2 + $0x178] ss:$56 sps:$4 sm:$0xff]  }
 0x63f   :  { %v13525_v35 = vpop.f32.mrf.mxu0  ;;  %15484 = vrcp.f32 %v8028_v50  ;;  %v8031_v17 = vadd.f32 1.0, %v15463_v7  ;;  %v7964_v31 = vpop.f32.mrf.mxu1  ;;  %14307 = vmatprep.subr.bf16.mxu0 %v15404_v39  ;;  %v15421_v30 = vld [vmem:[#allocation20 + $0x500] sm:$0xff]   ;;  %v15377_v50 = vld [vmem:[#allocation2 + $0x1ec] ss:$56 sps:$4 sm:$0xff]  }
 0x640   :  { %v13526_v9 = vadd.f32 %v13525_v35, %v13524_v42  ;;  %v15465_v57 = vpop.eup %15464  ;;  %15486 = vpow2.f32 %v8020_v41  ;;  %v8016_v43 = vmul.f32 1.442695, %v7988_v59  ;;  %v7991_v0 = vsub.f32 0.0, %v7973_v24  ;;  %v15367_v7 = vld [vmem:[#allocation2 + $0x330] ss:$56 sps:$4 sm:$0xff]  }
 0x641   :  { %v7965_v46 = vadd.f32 %v7964_v31, %v7868_v12  ;;  %v18153_v2 = vpop.f32.mrf.mxu0  ;;  %15488 = vrcp.f32 %v8031_v17  ;;  %v8029_v1 = vadd.f32 1.0, %v15465_v57  ;;  %v14157_v13 = vpop.f32.mrf.mxu1  ;;  %11081 = vmatmul.mubr.bf16.gmra.mxu0 %v15363_v60  ;;  %v15374_v24 = vld [vmem:[#allocation2 + $0x30] ss:$56 sps:$4 sm:$0xff]  }
 0x642   :  { %v15467_v32 = vpop.eup %15466  ;;  %15490 = vpow2.f32 %v8016_v43  ;;  %v8022_v63 = vmul.f32 1.442695, %v7991_v0  ;;  %v8572_v40 = vadd.f32 %v14157_v13, %v8475_v26  ;;  %v8478_v21 = vadd.f32 %v13526_v9, %v18150_v6  ;;  %11088 = vmatprep.mubr.bf16.mxu0 %v15372_v56  ;;  %14308 = vmatpush3.bf16.msra.mxu0 %v15404_v39 }
 0x643   :  { %v7989_v29 = vsub.f32 0.0, %v7965_v46  ;;  %v13528_v54 = vpop.f32.mrf.mxu0  ;;  %v15469_v18 = vpop.eup %15468  ;;  %8058 = vst [vmem:[#allocation21 + $0x70] sm:$0xff] %v15467_v32  ;;  %15492 = vrcp.f32 %v8029_v1  ;;  %10463 = vmatmul.mubr.bf16.gmra.mxu1 %v15360_v25  ;;  %14309 = vmatprep.subr.bf16.mxu0 %v15410_v8 }
 0x644   :  { %v8563_v45 = vpop.f32.mrf.mxu1  ;;  %v15471_v52 = vpop.eup %15470  ;;  %v8034_v61 = vadd.f32 1.0, %v15469_v18  ;;  %15494 = vpow2.f32 %v8022_v63  ;;  %v8628_v48 = vsub.f32 0.0, %v8572_v40  ;;  %10470 = vmatprep.mubr.bf16.mxu1 %v15369_v3  ;;  %v13529_v39 = vadd.f32 %v13528_v54, %v18153_v2 }
 0x645   :  { %v8018_v34 = vmul.f32 1.442695, %v7989_v29  ;;  %v13530_v4 = vpop.f32.mrf.mxu0  ;;  %v15473_v23 = vpop.eup %15472  ;;  %8056 = vst [vmem:[#allocation21] sm:$0xff] %v15471_v52  ;;  %v8564_v58 = vadd.f32 %v8563_v45, %v8467_v28  ;;  %v15375_v29 = vld [vmem:[#allocation2 + $0x1e8] ss:$56 sps:$4 sm:$0xff]  }
 0x646   :  { %v14158_v5 = vpop.f32.mrf.mxu1  ;;  %v15475_v11 = vpop.eup %15474  ;;  %15496 = vrcp.f32 %v8034_v61  ;;  %v8032_v55 = vadd.f32 1.0, %v15473_v23  ;;  %v8646_v16 = vmul.f32 1.442695, %v8628_v48  ;;  %14310 = vmatpush3.bf16.msra.mxu0 %v15410_v8  ;;  %v8483_v0 = vadd.f32 %v13529_v39, %v18150_v6  ;;  %v15381_v52 = vld [vmem:[#allocation20 + $0x4b8] sm:$0xff]   ;;  %v15385_v61 = vld [vmem:[#allocation2 + $0x25c] ss:$56 sps:$4 sm:$0xff]  }
 0x647   :  { %v8575_v38 = vadd.f32 %v14158_v5, %v8478_v21  ;;  %v13531_v10 = vpop.f32.mrf.mxu0  ;;  %v15477_v44 = vpop.eup %15476  ;;  %8059 = vst [vmem:[#allocation21 + $0xa8] sm:$0xff] %v15475_v11  ;;  %15498 = vpow2.f32 %v8018_v34  ;;  %v8626_v15 = vsub.f32 0.0, %v8564_v58  ;;  %14311 = vmatprep.subr.bf16.mxu0 %v15417_v47  ;;  %v15386_v23 = vld [vmem:[#allocation20 + $0x4f0] sm:$0xff]  }
 0x648   :  { %v8566_v53 = vpop.f32.mrf.mxu1  ;;  %v15479_v20 = vpop.eup %15478  ;;  %15500 = vrcp.f32 %v8032_v55  ;;  %v8035_v36 = vadd.f32 1.0, %v15477_v44  ;;  %v13532_v43 = vadd.f32 %v13531_v10, %v13530_v4  ;;  %v15378_v4 = vld [vmem:[#allocation2 + $0xa0] ss:$56 sps:$4 sm:$0xff]  }
 0x649   :  { %v8629_v22 = vsub.f32 0.0, %v8575_v38  ;;  %v8567_v14 = vadd.f32 %v8566_v53, %v8470_v37  ;;  %v13533_v19 = vpop.f32.mrf.mxu0  ;;  %v15481_v62 = vpop.eup %15480  ;;  %8057 = vst [vmem:[#allocation21 + $0x38] sm:$0xff] %v15479_v20  ;;  %15502 = vpow2.f32 %v8646_v16  ;;  %v8642_v42 = vmul.f32 1.442695, %v8626_v15  ;;  %11089 = vmatmul.mubr.bf16.gmra.mxu0 %v15370_v27  ;;  %v15380_v16 = vld [vmem:[#allocation2 + $0x110] ss:$56 sps:$4 sm:$0xff]  }
 0x64a   :  { %v15483_v49 = vpop.eup %15482  ;;  %15504 = vrcp.f32 %v8035_v36  ;;  %v8033_v12 = vadd.f32 1.0, %v15481_v62  ;;  %11096 = vmatprep.mubr.bf16.mxu0 %v15377_v50  ;;  %14312 = vmatpush3.bf16.msra.mxu0 %v15417_v47  ;;  %v8486_v3 = vadd.f32 %v13532_v43, %v18150_v6  ;;  %v15387_v36 = vld [vmem:[#allocation20 + $0x4b0] sm:$0xff]   ;;  %v15383_v50 = vld [vmem:[#allocation2 + $0x258] ss:$56 sps:$4 sm:$0xff]  }
 0x64b   :  { %v8648_v51 = vmul.f32 1.442695, %v8629_v22  ;;  %v8627_v41 = vsub.f32 0.0, %v8567_v14  ;;  %v13534_v59 = vpop.f32.mrf.mxu0  ;;  %8062 = vst [vmem:[#allocation21 + $0x150] sm:$0xff] %v15483_v49  ;;  %15506 = vpow2.f32 %v8642_v42  ;;  %10471 = vmatmul.mubr.bf16.gmra.mxu1 %v15367_v7  ;;  %14313 = vmatprep.subr.bf16.mxu0 %v15421_v30  ;;  %v15390_v14 = vld [vmem:[#allocation20 + $0x4e8] sm:$0xff]  }
 0x64c   :  { %v13535_v35 = vadd.f32 %v13534_v59, %v13533_v19  ;;  %v15485_v17 = vpop.eup %15484  ;;  %15508 = vrcp.f32 %v8033_v12  ;;  %v14161_v26 = vpop.f32.mrf.mxu1  ;;  %14283 = vmatprep.mubr.bf16.mxu1 %v15374_v24  ;;  %v15396_v59 = vld [vmem:[#allocation2 + $0x2cc] ss:$56 sps:$4 sm:$0xff]  }
 0x64d   :  { %v8644_v31 = vmul.f32 1.442695, %v8627_v41  ;;  %v13536_v9 = vpop.f32.mrf.mxu0  ;;  %v15487_v57 = vpop.eup %15486  ;;  %8060 = vst [vmem:[#allocation21 + $0xe0] sm:$0xff] %v15485_v17  ;;  %15510 = vpow2.f32 %v8648_v51  ;;  %v15392_v41 = vld [vmem:[#allocation20 + $0x4a8] sm:$0xff]  }
 0x64e   :  { %v8491_v60 = vadd.f32 %v13535_v35, %v18150_v6  ;;  %v15489_v46 = vpop.eup %15488  ;;  %v8038_v2 = vadd.f32 1.0, %v15487_v57  ;;  %v8579_v8 = vpop.f32.mrf.mxu1  ;;  %14314 = vmatpush3.bf16.msra.mxu0 %v15421_v30  ;;  %v15389_v35 = vld [vmem:[#allocation2 + $0x180] ss:$56 sps:$4 sm:$0xff]   ;;  %v15391_v57 = vld [vmem:[#allocation2 + $0x1f0] ss:$56 sps:$4 sm:$0xff]  }
 0x64f   :  { %15512 = vpow2.f32 %v8644_v31  ;;  %v13537_v1 = vpop.f32.mrf.mxu0  ;;  %v15491_v33 = vpop.eup %15490  ;;  %8063 = vst [vmem:[#allocation21 + $0x188] sm:$0xff] %v15489_v46  ;;  %v8580_v13 = vadd.f32 %v8579_v8, %v8483_v0  ;;  %v15397_v31 = vld [vmem:[#allocation20 + $0x4e0] sm:$0xff]  }
 0x650   :  { %v8588_v56 = vadd.f32 %v14161_v26, %v8491_v60  ;;  %v13538_v32 = vadd.f32 %v13537_v1, %v13536_v9  ;;  %v15493_v25 = vpop.eup %15492  ;;  %15514 = vrcp.f32 %v8038_v2  ;;  %v8036_v63 = vadd.f32 1.0, %v15491_v33  ;;  %v14162_v40 = vpop.f32.mrf.mxu1 }
 0x651   :  { %v13539_v54 = vpop.f32.mrf.mxu0  ;;  %v15495_v18 = vpop.eup %15494  ;;  %8061 = vst [vmem:[#allocation21 + $0x118] sm:$0xff] %v15493_v25  ;;  %v8630_v28 = vsub.f32 0.0, %v8580_v13  ;;  %11097 = vmatmul.mubr.bf16.gmra.mxu0 %v15375_v29  ;;  %v15398_v13 = vld [vmem:[#allocation20 + $0x4a0] sm:$0xff]   ;;  %v15401_v25 = vld [vmem:[#allocation20 + $0x4d8] sm:$0xff]  }
 0x652   :  { %v8632_v45 = vsub.f32 0.0, %v8588_v56  ;;  %v8494_v21 = vadd.f32 %v13538_v32, %v18150_v6  ;;  %15516 = vrcp.f32 %v8036_v63  ;;  %v8039_v34 = vadd.f32 1.0, %v15495_v18  ;;  %v8582_v48 = vpop.f32.mrf.mxu1  ;;  %11104 = vmatprep.mubr.bf16.mxu0 %v15385_v61  ;;  %v15394_v18 = vld [vmem:[#allocation2 + $0x2c8] ss:$56 sps:$4 sm:$0xff]  }
 0x653   :  { %v13540_v47 = vpop.f32.mrf.mxu0  ;;  %v15497_v58 = vpop.eup %15496  ;;  %v8650_v5 = vmul.f32 1.442695, %v8630_v28  ;;  %v8583_v11 = vadd.f32 %v8582_v48, %v8486_v3  ;;  %14284 = vmatmul.mubr.bf16.vlgmr.msra.gmra.mxu1 %v15378_v4  ;;  %v15403_v48 = vld [vmem:[#allocation20 + $0x498] sm:$0xff]   ;;  %v15407_v4 = vld [vmem:[#allocation2 + $0x33c] ss:$56 sps:$4 sm:$0xff]  }
 0x654   :  { %v8654_v37 = vmul.f32 1.442695, %v8632_v45  ;;  %v8591_v55 = vadd.f32 %v14162_v40, %v8494_v21  ;;  %v15499_v38 = vpop.eup %15498  ;;  %8066 = vst [vmem:[#allocation21 + $0x230] sm:$0xff] %v15497_v58  ;;  %15518 = vrcp.f32 %v8039_v34  ;;  %14287 = vmatprep.mubr.bf16.mxu1 %v15380_v16  ;;  %13900 = vmatpush3.bf16.msra.mxu1 %v15381_v52  ;;  %v13541_v51 = vadd.f32 %v13540_v47, %v13539_v54  ;;  %v15400_v58 = vld [vmem:[#allocation2 + $0x260] ss:$56 sps:$4 sm:$0xff]  }
 0x655   :  { %v13542_v10 = vpop.f32.mrf.mxu0  ;;  %v15501_v44 = vpop.eup %15500  ;;  %v8037_v15 = vadd.f32 1.0, %v15499_v38  ;;  %15520 = vpow2.f32 %v8650_v5  ;;  %v8631_v53 = vsub.f32 0.0, %v8583_v11  ;;  %13901 = vmatprep.subr.bf16.mxu1 %v15386_v23 }
 0x656   :  { %v8633_v20 = vsub.f32 0.0, %v8591_v55  ;;  %v15503_v22 = vpop.eup %15502  ;;  %8064 = vst [vmem:[#allocation21 + $0x1c0] sm:$0xff] %v15501_v44  ;;  %15522 = vpow2.f32 %v8654_v37  ;;  %v8499_v1 = vadd.f32 %v13541_v51, %v18150_v6  ;;  %v15408_v37 = vld [vmem:[#allocation20 + $0x4d0] sm:$0xff]  }
 0x657   :  { %v13543_v27 = vpop.f32.mrf.mxu0  ;;  %v15505_v19 = vpop.eup %15504  ;;  %15524 = vrcp.f32 %v8037_v15  ;;  %v8676_v30 = vadd.f32 1.0, %v15503_v22  ;;  %v8652_v62 = vmul.f32 1.442695, %v8631_v53 }
 0x658   :  { %v15507_v42 = vpop.eup %15506  ;;  %8067 = vst [vmem:[#allocation21 + $0x268] sm:$0xff] %v15505_v19  ;;  %v8656_v39 = vmul.f32 1.442695, %v8633_v20  ;;  %13902 = vmatpush3.bf16.msra.mxu1 %v15387_v36  ;;  %v13544_v8 = vadd.f32 %v13543_v27, %v13542_v10  ;;  %v15402_v10 = vld [vmem:[#allocation2 + $0x2d0] ss:$56 sps:$4 sm:$0xff]   ;;  %v15409_v27 = vld [vmem:[#allocation20 + $0x490] sm:$0xff]  }
 0x659   :  { %v13545_v49 = vpop.f32.mrf.mxu0  ;;  %v15509_v12 = vpop.eup %15508  ;;  %15526 = vrcp.f32 %v8676_v30  ;;  %v8674_v7 = vadd.f32 1.0, %v15507_v42  ;;  %13903 = vmatprep.subr.bf16.mxu1 %v15390_v14  ;;  %11105 = vmatmul.mubr.bf16.gmra.mxu0 %v15383_v50 }
 0x65a   :  { %v15511_v24 = vpop.eup %15510  ;;  %8065 = vst [vmem:[#allocation21 + $0x1f8] sm:$0xff] %v15509_v12  ;;  %15528 = vpow2.f32 %v8652_v62  ;;  %11112 = vmatprep.mubr.bf16.mxu0 %v15396_v59  ;;  %v8502_v61 = vadd.f32 %v13544_v8, %v18150_v6  ;;  %v15412_v62 = vld [vmem:[#allocation20 + $0x4c8] sm:$0xff]  }
 0x65b   :  { %v13546_v17 = vpop.f32.mrf.mxu0  ;;  %15530 = vrcp.f32 %v8674_v7  ;;  %v8677_v9 = vadd.f32 1.0, %v15511_v24  ;;  %v14165_v60 = vpop.f32.mrf.mxu1  ;;  %14288 = vmatmul.mubr.bf16.gmra.mxu1 %v15389_v35  ;;  %v15405_v7 = vld [vmem:[#allocation2 + $0x338] ss:$56 sps:$4 sm:$0xff]   ;;  %v15418_v35 = vld [vmem:[#allocation2 + $0x34] ss:$56 sps:$4 sm:$0xff]  }
 0x65c   :  { %v15513_v26 = vpop.eup %15512  ;;  %v13547_v43 = vadd.f32 %v13546_v17, %v13545_v49  ;;  %15532 = vpow2.f32 %v8656_v39  ;;  %14291 = vmatprep.mubr.bf16.mxu1 %v15391_v57  ;;  %13904 = vmatpush3.bf16.msra.mxu1 %v15392_v41  ;;  %v15413_v24 = vld [vmem:[#allocation20 + $0x488] sm:$0xff]   ;;  %v15419_v57 = vld [vmem:[#allocation20 + $0x4c0] sm:$0xff]  }
 0x65d   :  { %v8675_v0 = vadd.f32 1.0, %v15513_v26  ;;  %v13548_v46 = vpop.f32.mrf.mxu0  ;;  %v15515_v2 = vpop.eup %15514  ;;  %15534 = vrcp.f32 %v8677_v9  ;;  %13905 = vmatprep.subr.bf16.mxu1 %v15397_v31  ;;  %v15411_v26 = vld [vmem:[#allocation2 + $0x340] ss:$56 sps:$4 sm:$0xff]  }
 0x65e   :  { %v8507_v33 = vadd.f32 %v13547_v43, %v18150_v6  ;;  %8070 = vst [vmem:[#allocation21 + $0x310] sm:$0xff] %v15515_v2  ;;  %v8595_v56 = vpop.f32.mrf.mxu1 }
 0x65f   :  { %15536 = vrcp.f32 %v8675_v0  ;;  %v13549_v32 = vpop.f32.mrf.mxu0  ;;  %v15517_v63 = vpop.eup %15516  ;;  %v8596_v29 = vadd.f32 %v8595_v56, %v8499_v1  ;;  %v15416_v0 = vld [vmem:[#allocation2 + $0x30] ss:$56 sps:$4 sm:$0xff]  }
 0x660   :  { %v8604_v40 = vadd.f32 %v14165_v60, %v8507_v33  ;;  %v13550_v54 = vadd.f32 %v13549_v32, %v13548_v46  ;;  %8068 = vst [vmem:[#allocation21 + $0x2a0] sm:$0xff] %v15517_v63  ;;  %v14166_v28 = vpop.f32.mrf.mxu1  ;;  %13906 = vmatpush3.bf16.msra.mxu1 %v15398_v13  ;;  %v15420_v13 = vld [vmem:[#allocation20 + $0x480] sm:$0xff]  }
 0x661   :  { %v13551_v45 = vpop.f32.mrf.mxu0  ;;  %v15519_v3 = vpop.eup %15518  ;;  %v8634_v21 = vsub.f32 0.0, %v8596_v29  ;;  %13907 = vmatprep.subr.bf16.mxu1 %v15401_v25  ;;  %11113 = vmatmul.mubr.bf16.gmra.mxu0 %v15394_v18  ;;  %v15425_v18 = vld [vmem:[#allocation2 + $0xa4] ss:$56 sps:$4 sm:$0xff]  }
 0x662   :  { %v8636_v52 = vsub.f32 0.0, %v8604_v40  ;;  %v8510_v34 = vadd.f32 %v13550_v54, %v18150_v6  ;;  %v15521_v47 = vpop.eup %15520  ;;  %8071 = vst [vmem:[#allocation21 + $0x348] sm:$0xff] %v15519_v3  ;;  %v8598_v23 = vpop.f32.mrf.mxu1  ;;  %11120 = vmatprep.mubr.bf16.mxu0 %v15407_v4 }
 0x663   :  { %v13552_v5 = vpop.f32.mrf.mxu0  ;;  %v15523_v11 = vpop.eup %15522  ;;  %v8678_v55 = vadd.f32 1.0, %v15521_v47  ;;  %v8658_v16 = vmul.f32 1.442695, %v8634_v21  ;;  %v8599_v38 = vadd.f32 %v8598_v23, %v8502_v61  ;;  %14292 = vmatmul.mubr.bf16.gmra.mxu1 %v15400_v58 }
 0x664   :  { %v15525_v44 = vpop.eup %15524  ;;  %v8680_v15 = vadd.f32 1.0, %v15523_v11  ;;  %v8662_v53 = vmul.f32 1.442695, %v8636_v52  ;;  %v8607_v20 = vadd.f32 %v14166_v28, %v8510_v34  ;;  %14295 = vmatprep.mubr.bf16.mxu1 %v15402_v10  ;;  %13908 = vmatpush3.bf16.msra.mxu1 %v15403_v48  ;;  %v13553_v59 = vadd.f32 %v13552_v5, %v13551_v45  ;;  %v15426_v52 = vld [vmem:[#allocation2 + $0x114] ss:$56 sps:$4 sm:$0xff]  }
 0x665   :  { %v13554_v36 = vpop.f32.mrf.mxu0  ;;  %8069 = vst [vmem:[#allocation21 + $0x2d8] sm:$0xff] %v15525_v44  ;;  %15538 = vrcp.f32 %v8678_v55  ;;  %v8635_v22 = vsub.f32 0.0, %v8599_v38  ;;  %13909 = vmatprep.subr.bf16.mxu1 %v15408_v37  ;;  %v15414_v34 = vld [vmem:[#allocation2 + $0x2c] ss:$56 sps:$4 sm:$0xff]   ;;  %v15424_v11 = vld [vmem:[#allocation2 + $0xa0] ss:$56 sps:$4 sm:$0xff]  }
 0x666   :  { %v15527_v14 = vpop.eup %15526  ;;  %15540 = vrcp.f32 %v8680_v15  ;;  %v8637_v19 = vsub.f32 0.0, %v8607_v20  ;;  %v8515_v1 = vadd.f32 %v13553_v59, %v18150_v6  ;;  %v15422_v59 = vld [vmem:[#allocation2 + $0x9c] ss:$56 sps:$4 sm:$0xff]  }
 0x667   :  { %v13555_v30 = vpop.f32.mrf.mxu0  ;;  %v15529_v42 = vpop.eup %15528  ;;  %8708 = vst [vmem:[#allocation21 + $0x78] sm:$0xff] %v15527_v14  ;;  %15542 = vpow2.f32 %v8658_v16  ;;  %v8660_v39 = vmul.f32 1.442695, %v8635_v22 }
 0x668   :  { %v15531_v50 = vpop.eup %15530  ;;  %v8679_v49 = vadd.f32 1.0, %v15529_v42  ;;  %15544 = vpow2.f32 %v8662_v53  ;;  %v8664_v12 = vmul.f32 1.442695, %v8637_v19  ;;  %13910 = vmatpush3.bf16.msra.mxu1 %v15409_v27  ;;  %v13556_v8 = vadd.f32 %v13555_v30, %v13554_v36  ;;  %v18180_v30 = vld [vmem:[%s18476_s12 + $0x2] ss:$0 sm:$0xff] }
 0x669   :  { %v13557_v51 = vpop.f32.mrf.mxu0  ;;  %v15533_v41 = vpop.eup %15532  ;;  %8706 = vst [vmem:[#allocation21 + $0x8] sm:$0xff] %v15531_v50  ;;  %15546 = vpow2.f32 %v8660_v39  ;;  %13911 = vmatprep.subr.bf16.mxu1 %v15412_v62  ;;  %11121 = vmatmul.mubr.bf16.gmra.mxu0 %v15405_v7 }
 0x66a   :  { %v15535_v17 = vpop.eup %15534  ;;  %15548 = vrcp.f32 %v8679_v49  ;;  %v8681_v31 = vadd.f32 1.0, %v15533_v41  ;;  %14315 = vmatprep.mubr.bf16.mxu0 %v15418_v35  ;;  %v8518_v3 = vadd.f32 %v13556_v8, %v18150_v6  ;;  %v15431_v41 = vld [vmem:[#allocation2 + $0x1f4] ss:$56 sps:$4 sm:$0xff]  }
 0x66b   :  { %v13558_v9 = vpop.f32.mrf.mxu0  ;;  %8709 = vst [vmem:[#allocation21 + $0xb0] sm:$0xff] %v15535_v17  ;;  %15550 = vpow2.f32 %v8664_v12  ;;  %v14169_v46 = vpop.f32.mrf.mxu1  ;;  %14296 = vmatmul.mubr.bf16.gmra.mxu1 %v15411_v26  ;;  %v15430_v12 = vld [vmem:[#allocation2 + $0x184] ss:$56 sps:$4 sm:$0xff]   ;;  %v15429_v26 = vld [vmem:[#allocation2 + $0x110] ss:$56 sps:$4 sm:$0xff]  }
 0x66c   :  { %v15537_v43 = vpop.eup %15536  ;;  %v13559_v60 = vadd.f32 %v13558_v9, %v13557_v51  ;;  %15552 = vrcp.f32 %v8681_v31  ;;  %13912 = vmatpush3.bf16.msra.mxu1 %v15413_v24  ;;  %11714 = vmatprep.mubr.bf16.mxu1 %v15416_v0 }
 0x66d   :  { %8707 = vst [vmem:[#allocation21 + $0x40] sm:$0xff] %v15537_v43  ;;  %v13560_v2 = vpop.f32.mrf.mxu0  ;;  %v8611_v56 = vpop.f32.mrf.mxu1  ;;  %13913 = vmatprep.subr.bf16.mxu1 %v15419_v57 }
 0x66e   :  { %v8523_v33 = vadd.f32 %v13559_v60, %v18150_v6  ;;  %v8612_v25 = vadd.f32 %v8611_v56, %v8515_v1 }
 0x66f   :  { %v13561_v32 = vpop.f32.mrf.mxu0  ;;  %v14170_v40 = vpop.f32.mrf.mxu1 }
 0x670   :  { %v8620_v63 = vadd.f32 %v14169_v46, %v8523_v33  ;;  %v13562_v29 = vadd.f32 %v13561_v32, %v13560_v2  ;;  %v8638_v28 = vsub.f32 0.0, %v8612_v25  ;;  %13914 = vmatpush3.bf16.msra.mxu1 %v15420_v13  ;;  %v15435_v32 = vld [vmem:[#allocation2 + $0x264] ss:$56 sps:$4 sm:$0xff]  }
 0x671   :  { %v18171_v54 = vpop.f32.mrf.mxu0  ;;  %v8614_v48 = vpop.f32.mrf.mxu1  ;;  %14316 = vmatmul.mubr.bf16.vlgmr.msra.gmra.mxu0 %v15425_v18  ;;  %v15427_v18 = vld [vmem:[#allocation2 + $0x10c] ss:$56 sps:$4 sm:$0xff]  }
 0x672   :  { %v8640_v45 = vsub.f32 0.0, %v8620_v63  ;;  %v8526_v21 = vadd.f32 %v13562_v29, %v18150_v6  ;;  %v15539_v61 = vpop.eup %15538  ;;  %v8666_v23 = vmul.f32 1.442695, %v8638_v28  ;;  %v8615_v5 = vadd.f32 %v8614_v48, %v8518_v3  ;;  %14319 = vmatprep.mubr.bf16.mxu0 %v15426_v52  ;;  %v15436_v29 = vld [vmem:[#allocation2 + $0x2d4] ss:$56 sps:$4 sm:$0xff]  }
 0x673   :  { %v9213_v4 = vpop.f32.mrf.mxu0  ;;  %v15541_v47 = vpop.eup %15540  ;;  %8710 = vst [vmem:[#allocation21 + $0xe8] sm:$0xff] %v15539_v61  ;;  %11715 = vmatmul.mubr.bf16.vlgmr.msra.gmra.mxu1 %v15414_v34  ;;  %v15434_v48 = vld [vmem:[#allocation2 + $0x180] ss:$56 sps:$4 sm:$0xff]  }
 0x674   :  { %v8670_v58 = vmul.f32 1.442695, %v8640_v45  ;;  %v8623_v37 = vadd.f32 %v14170_v40, %v8526_v21  ;;  %v15543_v55 = vpop.eup %15542  ;;  %8712 = vst [vmem:[#allocation21 + $0x158] sm:$0xff] %v15541_v47  ;;  %v13595_v16 = vpop.f32.mrf.mxu1  ;;  %15554 = vpow2.f32 %v8666_v23  ;;  %v8639_v44 = vsub.f32 0.0, %v8615_v5  ;;  %11722 = vmatprep.mubr.bf16.mxu1 %v15424_v11 }
 0x675   :  { %v18175_v38 = vpop.f32.mrf.mxu0  ;;  %v15545_v6 = vpop.eup %15544  ;;  %v8682_v10 = vadd.f32 1.0, %v15543_v55 }
 0x676   :  { %v8641_v15 = vsub.f32 0.0, %v8623_v37  ;;  %v15547_v53 = vpop.eup %15546  ;;  %v8684_v20 = vadd.f32 1.0, %v15545_v6  ;;  %15556 = vpow2.f32 %v8670_v58  ;;  %v13596_v36 = vpop.f32.mrf.mxu1  ;;  %v8668_v19 = vmul.f32 1.442695, %v8639_v44 }
 0x677   :  { %v9216_v22 = vpop.f32.mrf.mxu0  ;;  %v15549_v27 = vpop.eup %15548  ;;  %15558 = vrcp.f32 %v8682_v10  ;;  %v8683_v14 = vadd.f32 1.0, %v15547_v53  ;;  %v13597_v39 = vadd.f32 %v13596_v36, %v13595_v16 }
 0x678   :  { %v15551_v62 = vpop.eup %15550  ;;  %8711 = vst [vmem:[#allocation21 + $0x120] sm:$0xff] %v15549_v27  ;;  %15560 = vrcp.f32 %v8684_v20  ;;  %v8672_v42 = vmul.f32 1.442695, %v8641_v15  ;;  %v13598_v50 = vpop.f32.mrf.mxu1  ;;  %v15440_v27 = vld [vmem:[#allocation2 + $0x344] ss:$56 sps:$4 sm:$0xff]  }
 0x679   :  { %v18182_v49 = vpop.f32.mrf.mxu0  ;;  %v15553_v7 = vpop.eup %15552  ;;  %15562 = vrcp.f32 %v8683_v14  ;;  %v8685_v51 = vadd.f32 1.0, %v15551_v62  ;;  %v9117_v24 = vadd.f32 %v13597_v39, %v18180_v30  ;;  %14320 = vmatmul.mubr.bf16.gmra.mxu0 %v15430_v12  ;;  %v15432_v39 = vld [vmem:[#allocation2 + $0x17c] ss:$56 sps:$4 sm:$0xff]  }
 0x67a   :  { %8713 = vst [vmem:[#allocation21 + $0x190] sm:$0xff] %v15553_v7  ;;  %15564 = vpow2.f32 %v8668_v19  ;;  %v13599_v35 = vpop.f32.mrf.mxu1  ;;  %14323 = vmatprep.mubr.bf16.mxu0 %v15431_v41  ;;  %v15439_v41 = vld [vmem:[#allocation2 + $0x1f0] ss:$56 sps:$4 sm:$0xff]  }
 0x67b   :  { %v18185_v17 = vpop.f32.mrf.mxu0  ;;  %15566 = vrcp.f32 %v8685_v51  ;;  %v13600_v31 = vadd.f32 %v13599_v35, %v13598_v50  ;;  %v9214_v9 = vadd.f32 %v9213_v4, %v9117_v24  ;;  %11723 = vmatmul.mubr.bf16.gmra.mxu1 %v15422_v59 }
 0x67c   :  { %15568 = vpow2.f32 %v8672_v42  ;;  %v13601_v57 = vpop.f32.mrf.mxu1  ;;  %11730 = vmatprep.mubr.bf16.mxu1 %v15429_v26 }
 0x67d   :  { %v18187_v43 = vpop.f32.mrf.mxu0  ;;  %v9120_v0 = vadd.f32 %v13600_v31, %v18180_v30  ;;  %v9276_v60 = vsub.f32 0.0, %v9214_v9 }
 0x67e   :  { %v13602_v46 = vpop.f32.mrf.mxu1 }
 0x67f   :  { %v18190_v2 = vpop.f32.mrf.mxu0  ;;  %v9217_v8 = vadd.f32 %v9216_v22, %v9120_v0  ;;  %v13603_v1 = vadd.f32 %v13602_v46, %v13601_v57  ;;  %v9292_v33 = vmul.f32 1.442695, %v9276_v60 }
 0x680   :  { %v13604_v13 = vpop.f32.mrf.mxu1 }
 0x681   :  { %v18192_v56 = vpop.f32.mrf.mxu0  ;;  %v9277_v25 = vsub.f32 0.0, %v9217_v8  ;;  %v9125_v63 = vadd.f32 %v13603_v1, %v18180_v30  ;;  %v15555_v40 = vpop.eup %15554  ;;  %15570 = vpow2.f32 %v9292_v33  ;;  %14324 = vmatmul.mubr.bf16.gmra.mxu0 %v15435_v32 }
 0x682   :  { %v13605_v28 = vpop.f32.mrf.mxu1  ;;  %v8686_v21 = vadd.f32 1.0, %v15555_v40  ;;  %14327 = vmatprep.mubr.bf16.mxu0 %v15436_v29 }
 0x683   :  { %v18195_v45 = vpop.f32.mrf.mxu0  ;;  %v15557_v3 = vpop.eup %15556  ;;  %v9294_v52 = vmul.f32 1.442695, %v9277_v25  ;;  %v9222_v61 = vadd.f32 %v18171_v54, %v9125_v63  ;;  %v13606_v34 = vadd.f32 %v13605_v28, %v13604_v13  ;;  %11731 = vmatmul.mubr.bf16.gmra.mxu1 %v15427_v18  ;;  %v15437_v25 = vld [vmem:[#allocation2 + $0x1ec] ss:$56 sps:$4 sm:$0xff]  }
 0x684   :  { %v15559_v4 = vpop.eup %15558  ;;  %v8688_v47 = vadd.f32 1.0, %v15557_v3  ;;  %v13607_v23 = vpop.f32.mrf.mxu1  ;;  %15572 = vrcp.f32 %v8686_v21  ;;  %11738 = vmatprep.mubr.bf16.mxu1 %v15434_v48 }
 0x685   :  { %v18198_v58 = vpop.f32.mrf.mxu0  ;;  %v15561_v5 = vpop.eup %15560  ;;  %8714 = vst [vmem:[#allocation21 + $0x1c8] sm:$0xff] %v15559_v4  ;;  %v9278_v37 = vsub.f32 0.0, %v9222_v61  ;;  %v9128_v11 = vadd.f32 %v13606_v34, %v18180_v30 }
 0x686   :  { %v15563_v55 = vpop.eup %15562  ;;  %8716 = vst [vmem:[#allocation21 + $0x238] sm:$0xff] %v15561_v5  ;;  %15574 = vrcp.f32 %v8688_v47  ;;  %v13608_v54 = vpop.f32.mrf.mxu1 }
 0x687   :  { %v18201_v16 = vpop.f32.mrf.mxu0  ;;  %v15565_v6 = vpop.eup %15564  ;;  %8715 = vst [vmem:[#allocation21 + $0x200] sm:$0xff] %v15563_v55  ;;  %15576 = vpow2.f32 %v9294_v52  ;;  %v9296_v10 = vmul.f32 1.442695, %v9278_v37  ;;  %v9225_v44 = vadd.f32 %v18175_v38, %v9128_v11  ;;  %v13609_v15 = vadd.f32 %v13608_v54, %v13607_v23 }
 0x688   :  { %v15567_v53 = vpop.eup %15566  ;;  %v8687_v20 = vadd.f32 1.0, %v15565_v6  ;;  %v13610_v36 = vpop.f32.mrf.mxu1 }
 0x689   :  { %v18204_v22 = vpop.f32.mrf.mxu0  ;;  %v15569_v14 = vpop.eup %15568  ;;  %8717 = vst [vmem:[#allocation21 + $0x270] sm:$0xff] %v15567_v53  ;;  %15578 = vpow2.f32 %v9296_v10  ;;  %v9279_v19 = vsub.f32 0.0, %v9225_v44  ;;  %v9133_v62 = vadd.f32 %v13609_v15, %v18180_v30  ;;  %14328 = vmatmul.mubr.bf16.gmra.mxu0 %v15440_v27 }
 0x68a   :  { %15580 = vrcp.f32 %v8687_v20  ;;  %v8689_v42 = vadd.f32 1.0, %v15569_v14  ;;  %v13611_v50 = vpop.f32.mrf.mxu1  ;;  %v15441_v20 = vld [vmem:[#allocation2 + $0x25c] ss:$56 sps:$4 sm:$0xff]  }
 0x68b   :  { %v18207_v12 = vpop.f32.mrf.mxu0  ;;  %v9298_v38 = vmul.f32 1.442695, %v9279_v19  ;;  %v9230_v7 = vadd.f32 %v18185_v17, %v9133_v62  ;;  %v13612_v51 = vadd.f32 %v13611_v50, %v13610_v36  ;;  %11739 = vmatmul.mubr.bf16.gmra.mxu1 %v15432_v39  ;;  %v15446_v62 = vld [vmem:[#allocation2 + $0x2d0] ss:$56 sps:$4 sm:$0xff]  }
 0x68c   :  { %15582 = vrcp.f32 %v8689_v42  ;;  %v13613_v59 = vpop.f32.mrf.mxu1  ;;  %11746 = vmatprep.mubr.bf16.mxu1 %v15439_v41 }
 0x68d   :  { %v18210_v24 = vpop.f32.mrf.mxu0  ;;  %15584 = vpow2.f32 %v9298_v38  ;;  %v9280_v35 = vsub.f32 0.0, %v9230_v7  ;;  %v9136_v31 = vadd.f32 %v13612_v51, %v18180_v30 }
 0x68e   :  { %v13614_v26 = vpop.f32.mrf.mxu1  ;;  %v15571_v57 = vpop.eup %15570 }
 0x68f   :  { %v18213_v9 = vpop.f32.mrf.mxu0  ;;  %v9300_v0 = vmul.f32 1.442695, %v9280_v35  ;;  %v9233_v60 = vadd.f32 %v18190_v2, %v9136_v31  ;;  %v13615_v17 = vadd.f32 %v13614_v26, %v13613_v59  ;;  %v9324_v46 = vadd.f32 1.0, %v15571_v57  ;;  %v15443_v2 = vld [vmem:[#allocation2 + $0x260] ss:$56 sps:$4 sm:$0xff]  }
 0x690   :  { %v13616_v8 = vpop.f32.mrf.mxu1 }
 0x691   :  { %15586 = vpow2.f32 %v9300_v0  ;;  %v9281_v1 = vsub.f32 0.0, %v9233_v60  ;;  %v9141_v33 = vadd.f32 %v13615_v17, %v18180_v30  ;;  %v18217_v13 = vpop.f32.mrf.mxu0  ;;  %v15573_v32 = vpop.eup %15572 }
 0x692   :  { %15588 = vrcp.f32 %v9324_v46  ;;  %v13617_v63 = vpop.f32.mrf.mxu1  ;;  %8718 = vst [vmem:[#allocation21 + $0x2a8] sm:$0xff] %v15573_v32 }
 0x693   :  { %v15575_v29 = vpop.eup %15574  ;;  %v9302_v40 = vmul.f32 1.442695, %v9281_v1  ;;  %v9238_v18 = vadd.f32 %v18182_v49, %v9141_v33  ;;  %v13618_v28 = vadd.f32 %v13617_v63, %v13616_v8  ;;  %v18220_v3 = vpop.f32.mrf.mxu0  ;;  %11747 = vmatmul.mubr.bf16.gmra.mxu1 %v15437_v25  ;;  %v15444_v33 = vld [vmem:[#allocation2 + $0x2cc] ss:$56 sps:$4 sm:$0xff]  }
 0x694   :  { %v15577_v21 = vpop.eup %15576  ;;  %8720 = vst [vmem:[#allocation21 + $0x318] sm:$0xff] %v15575_v29  ;;  %v13619_v52 = vpop.f32.mrf.mxu1  ;;  %11754 = vmatprep.mubr.bf16.mxu1 %v15443_v2 }
 0x695   :  { %v9325_v61 = vadd.f32 1.0, %v15577_v21  ;;  %15590 = vpow2.f32 %v9302_v40  ;;  %v9282_v34 = vsub.f32 0.0, %v9238_v18  ;;  %v9144_v48 = vadd.f32 %v13618_v28, %v18180_v30  ;;  %v18223_v4 = vpop.f32.mrf.mxu0  ;;  %v15449_v40 = vld [vmem:[#allocation2 + $0x340] ss:$56 sps:$4 sm:$0xff]  }
 0x696   :  { %v15579_v47 = vpop.eup %15578  ;;  %v13620_v23 = vpop.f32.mrf.mxu1 }
 0x697   :  { %v15581_v5 = vpop.eup %15580  ;;  %15592 = vrcp.f32 %v9325_v61  ;;  %v9326_v49 = vadd.f32 1.0, %v15579_v47  ;;  %v9304_v37 = vmul.f32 1.442695, %v9282_v34  ;;  %v9241_v11 = vadd.f32 %v18187_v43, %v9144_v48  ;;  %v18226_v55 = vpop.f32.mrf.mxu0 }
 0x698   :  { %8719 = vst [vmem:[#allocation21 + $0x2e0] sm:$0xff] %v15581_v5  ;;  %v13621_v54 = vadd.f32 %v13620_v23, %v13619_v52  ;;  %v13622_v6 = vpop.f32.mrf.mxu1 }
 0x699   :  { %v15583_v10 = vpop.eup %15582  ;;  %15594 = vrcp.f32 %v9326_v49  ;;  %v9283_v44 = vsub.f32 0.0, %v9241_v11  ;;  %v18228_v15 = vpop.f32.mrf.mxu0 }
 0x69a   :  { %v15585_v53 = vpop.eup %15584  ;;  %8721 = vst [vmem:[#allocation21 + $0x350] sm:$0xff] %v15583_v10  ;;  %15596 = vpow2.f32 %v9304_v37  ;;  %v9149_v36 = vadd.f32 %v13621_v54, %v18180_v30  ;;  %v13623_v27 = vpop.f32.mrf.mxu1 }
 0x69b   :  { %v9327_v14 = vadd.f32 1.0, %v15585_v53  ;;  %v9306_v19 = vmul.f32 1.442695, %v9283_v44  ;;  %v13624_v43 = vadd.f32 %v13623_v27, %v13622_v6  ;;  %v18231_v42 = vpop.f32.mrf.mxu0  ;;  %11755 = vmatmul.mubr.bf16.gmra.mxu1 %v15441_v20  ;;  %v15447_v53 = vld [vmem:[#allocation2 + $0x33c] ss:$56 sps:$4 sm:$0xff]  }
 0x69c   :  { %v9246_v39 = vadd.f32 %v18195_v45, %v9149_v36  ;;  %v13625_v50 = vpop.f32.mrf.mxu1  ;;  %11762 = vmatprep.mubr.bf16.mxu1 %v15446_v62 }
 0x69d   :  { %15598 = vrcp.f32 %v9327_v14  ;;  %v9152_v38 = vadd.f32 %v13624_v43, %v18180_v30  ;;  %v18235_v7 = vpop.f32.mrf.mxu0 }
 0x69e   :  { %v15587_v51 = vpop.eup %15586  ;;  %15600 = vpow2.f32 %v9306_v19  ;;  %v9284_v41 = vsub.f32 0.0, %v9246_v39  ;;  %v13626_v59 = vpop.f32.mrf.mxu1 }
 0x69f   :  { %v15589_v35 = vpop.eup %15588  ;;  %v9328_v31 = vadd.f32 1.0, %v15587_v51  ;;  %v9249_v26 = vadd.f32 %v18201_v16, %v9152_v38  ;;  %v13627_v57 = vadd.f32 %v13626_v59, %v13625_v50  ;;  %v18238_v0 = vpop.f32.mrf.mxu0 }
 0x6a0   :  { %9356 = vst [vmem:[#allocation21 + $0x10] sm:$0xff] %v15589_v35  ;;  %v9308_v45 = vmul.f32 1.442695, %v9284_v41  ;;  %v13628_v60 = vpop.f32.mrf.mxu1  ;;  %v13683_v35 = vadd.f32 %v18231_v42, %v18228_v15  ;;  %v13686_v15 = vadd.f32 %v18238_v0, %v18235_v7 }
 0x6a1   :  { %15602 = vrcp.f32 %v9328_v31  ;;  %v9285_v17 = vsub.f32 0.0, %v9249_v26  ;;  %v9157_v46 = vadd.f32 %v13627_v57, %v18180_v30  ;;  %v18241_v8 = vpop.f32.mrf.mxu0 }
 0x6a2   :  { %v15591_v1 = vpop.eup %15590  ;;  %15604 = vpow2.f32 %v9308_v45  ;;  %v13629_v32 = vpop.f32.mrf.mxu1 }
 0x6a3   :  { %v9329_v25 = vadd.f32 1.0, %v15591_v1  ;;  %v9310_v63 = vmul.f32 1.442695, %v9285_v17  ;;  %v9254_v16 = vadd.f32 %v18192_v56, %v9157_v46  ;;  %v13630_v29 = vadd.f32 %v13629_v32, %v13628_v60  ;;  %v18244_v18 = vpop.f32.mrf.mxu0  ;;  %11763 = vmatmul.mubr.bf16.gmra.mxu1 %v15444_v33 }
 0x6a4   :  { %v15593_v28 = vpop.eup %15592  ;;  %v13631_v2 = vpop.f32.mrf.mxu1  ;;  %11770 = vmatprep.mubr.bf16.mxu1 %v15449_v40  ;;  %v13677_v32 = vadd.f32 %v18220_v3, %v18217_v13  ;;  %v13680_v3 = vadd.f32 %v18226_v55, %v18223_v4 }
 0x6a5   :  { %9357 = vst [vmem:[#allocation21 + $0x48] sm:$0xff] %v15593_v28  ;;  %15606 = vrcp.f32 %v9329_v25  ;;  %v9286_v21 = vsub.f32 0.0, %v9254_v16  ;;  %v9160_v52 = vadd.f32 %v13630_v29, %v18180_v30  ;;  %v18247_v61 = vpop.f32.mrf.mxu0 }
 0x6a6   :  { %v15595_v34 = vpop.eup %15594  ;;  %15608 = vpow2.f32 %v9310_v63  ;;  %v13632_v48 = vpop.f32.mrf.mxu1 }
 0x6a7   :  { %v15597_v47 = vpop.eup %15596  ;;  %9358 = vst [vmem:[#allocation21 + $0x80] sm:$0xff] %v15595_v34  ;;  %v9312_v56 = vmul.f32 1.442695, %v9286_v21  ;;  %v9257_v23 = vadd.f32 %v18198_v58, %v9160_v52  ;;  %v13633_v5 = vadd.f32 %v13632_v48, %v13631_v2  ;;  %v18250_v49 = vpop.f32.mrf.mxu0 }
 0x6a8   :  { %v9330_v37 = vadd.f32 1.0, %v15597_v47  ;;  %v13634_v11 = vpop.f32.mrf.mxu1 }
 0x6a9   :  { %15610 = vpow2.f32 %v9312_v56  ;;  %v9287_v54 = vsub.f32 0.0, %v9257_v23  ;;  %v9165_v6 = vadd.f32 %v13633_v5, %v18180_v30  ;;  %v13693_v10 = vpop.f32.mrf.mxu0 }
 0x6aa   :  { %v15599_v44 = vpop.eup %15598  ;;  %15612 = vrcp.f32 %v9330_v37  ;;  %v13635_v20 = vpop.f32.mrf.mxu1 }
 0x6ab   :  { %v15601_v36 = vpop.eup %15600  ;;  %9359 = vst [vmem:[#allocation21 + $0xb8] sm:$0xff] %v15599_v44  ;;  %v9314_v27 = vmul.f32 1.442695, %v9287_v54  ;;  %v9262_v14 = vadd.f32 %v18207_v12, %v9165_v6  ;;  %v13636_v58 = vadd.f32 %v13635_v20, %v13634_v11  ;;  %v13694_v19 = vpop.f32.mrf.mxu0  ;;  %11771 = vmatmul.mubr.bf16.gmra.mxu1 %v15447_v53 }
 0x6ac   :  { %v9331_v43 = vadd.f32 1.0, %v15601_v36  ;;  %v13637_v62 = vpop.f32.mrf.mxu1 }
 0x6ad   :  { %15614 = vpow2.f32 %v9314_v27  ;;  %v9288_v39 = vsub.f32 0.0, %v9262_v14  ;;  %v9168_v50 = vadd.f32 %v13636_v58, %v18180_v30  ;;  %v13696_v38 = vpop.f32.mrf.mxu0 }
 0x6ae   :  { %v15603_v51 = vpop.eup %15602  ;;  %15616 = vrcp.f32 %v9331_v43  ;;  %v13638_v41 = vpop.f32.mrf.mxu1 }
 0x6af   :  { %v15605_v59 = vpop.eup %15604  ;;  %9360 = vst [vmem:[#allocation21 + $0xf0] sm:$0xff] %v15603_v51  ;;  %v9316_v31 = vmul.f32 1.442695, %v9288_v39  ;;  %v9265_v12 = vadd.f32 %v18213_v9, %v9168_v50  ;;  %v13639_v26 = vadd.f32 %v13638_v41, %v13637_v62  ;;  %v13697_v57 = vpop.f32.mrf.mxu0  ;;  %v18268_v9 = vld [vmem:[%s18476_s12 + $0x3] ss:$0 sm:$0xff] }
 0x6b0   :  { %v9332_v45 = vadd.f32 1.0, %v15605_v59  ;;  %v13640_v60 = vpop.f32.mrf.mxu1  ;;  %v9775_v40 = vadd.f32 %v13683_v35, %v18268_v9  ;;  %v9767_v48 = vadd.f32 %v13677_v32, %v18268_v9  ;;  %v9778_v56 = vadd.f32 %v13686_v15, %v18268_v9 }
 0x6b1   :  { %15618 = vpow2.f32 %v9316_v31  ;;  %v9289_v17 = vsub.f32 0.0, %v9265_v12  ;;  %v9173_v46 = vadd.f32 %v13639_v26, %v18180_v30  ;;  %v18259_v1 = vpop.f32.mrf.mxu0  ;;  %v13698_v14 = vadd.f32 %v13697_v57, %v13696_v38 }
 0x6b2   :  { %v15607_v33 = vpop.eup %15606  ;;  %15620 = vrcp.f32 %v9332_v45  ;;  %v13641_v42 = vpop.f32.mrf.mxu1  ;;  %v13692_v38 = vadd.f32 %v18250_v49, %v18247_v61 }
 0x6b3   :  { %v15609_v25 = vpop.eup %15608  ;;  %9361 = vst [vmem:[#allocation21 + $0x128] sm:$0xff] %v15607_v33  ;;  %v9318_v63 = vmul.f32 1.442695, %v9289_v17  ;;  %v9270_v16 = vadd.f32 %v18204_v22, %v9173_v46  ;;  %v13642_v29 = vadd.f32 %v13641_v42, %v13640_v60  ;;  %v18272_v28 = vpop.f32.mrf.mxu0  ;;  %v13695_v22 = vadd.f32 %v13694_v19, %v13693_v10 }
 0x6b4   :  { %v9333_v13 = vadd.f32 1.0, %v15609_v25  ;;  %v14221_v7 = vpop.f32.mrf.mxu1  ;;  %v9770_v10 = vadd.f32 %v13680_v3, %v18268_v9  ;;  %v9794_v17 = vadd.f32 %v13698_v14, %v18268_v9  ;;  %v13701_v61 = vadd.f32 %v18272_v28, %v18259_v1 }
 0x6b5   :  { %15622 = vpow2.f32 %v9318_v63  ;;  %v9290_v0 = vsub.f32 0.0, %v9270_v16  ;;  %v9176_v2 = vadd.f32 %v13642_v29, %v18180_v30  ;;  %v9872_v21 = vadd.f32 %v14221_v7, %v9775_v40  ;;  %v18277_v52 = vpop.f32.mrf.mxu0 }
 0x6b6   :  { %v15611_v34 = vpop.eup %15610  ;;  %15624 = vrcp.f32 %v9333_v13  ;;  %v9863_v47 = vpop.f32.mrf.mxu1  ;;  %v13689_v30 = vadd.f32 %v18244_v18, %v18241_v8  ;;  %v9791_v19 = vadd.f32 %v13695_v22, %v18268_v9  ;;  %v9786_v3 = vadd.f32 %v13692_v38, %v18268_v9 }
 0x6b7   :  { %v15613_v23 = vpop.eup %15612  ;;  %v9334_v5 = vadd.f32 1.0, %v15611_v34  ;;  %v9320_v37 = vmul.f32 1.442695, %v9290_v0  ;;  %v9273_v4 = vadd.f32 %v18210_v24, %v9176_v2  ;;  %v9928_v55 = vsub.f32 0.0, %v9872_v21  ;;  %v18282_v11 = vpop.f32.mrf.mxu0 }
 0x6b8   :  { %9362 = vst [vmem:[#allocation21 + $0x160] sm:$0xff] %v15613_v23  ;;  %v9864_v54 = vadd.f32 %v9863_v47, %v9767_v48  ;;  %v14222_v6 = vpop.f32.mrf.mxu1  ;;  %v9783_v59 = vadd.f32 %v13689_v30, %v18268_v9  ;;  %v13704_v48 = vadd.f32 %v18282_v11, %v18277_v52 }
 0x6b9   :  { %15626 = vrcp.f32 %v9334_v5  ;;  %v9291_v44 = vsub.f32 0.0, %v9273_v4  ;;  %v9946_v53 = vmul.f32 1.442695, %v9928_v55  ;;  %v9875_v20 = vadd.f32 %v14222_v6, %v9778_v56  ;;  %v13705_v36 = vpop.f32.mrf.mxu0 }
 0x6ba   :  { %v15615_v27 = vpop.eup %15614  ;;  %15628 = vpow2.f32 %v9320_v37  ;;  %v9926_v24 = vsub.f32 0.0, %v9864_v54  ;;  %v9866_v58 = vpop.f32.mrf.mxu1  ;;  %v9799_v37 = vadd.f32 %v13701_v61, %v18268_v9 }
 0x6bb   :  { %v15617_v43 = vpop.eup %15616  ;;  %v9335_v62 = vadd.f32 1.0, %v15615_v27  ;;  %v9322_v39 = vmul.f32 1.442695, %v9291_v44  ;;  %15630 = vpow2.f32 %v9946_v53  ;;  %v9929_v8 = vsub.f32 0.0, %v9875_v20  ;;  %v13706_v18 = vpop.f32.mrf.mxu0 }
 0x6bc   :  { %9363 = vst [vmem:[#allocation21 + $0x198] sm:$0xff] %v15617_v43  ;;  %v9942_v50 = vmul.f32 1.442695, %v9926_v24  ;;  %v9867_v51 = vadd.f32 %v9866_v58, %v9770_v10  ;;  %v14225_v41 = vpop.f32.mrf.mxu1  ;;  %v13707_v60 = vadd.f32 %v13706_v18, %v13705_v36  ;;  %v9802_v24 = vadd.f32 %v13704_v48, %v18268_v9 }
 0x6bd   :  { %15632 = vrcp.f32 %v9335_v62  ;;  %v9948_v35 = vmul.f32 1.442695, %v9929_v8  ;;  %v9888_v31 = vadd.f32 %v14225_v41, %v9791_v19  ;;  %v13708_v12 = vpop.f32.mrf.mxu0 }
 0x6be   :  { %v15619_v26 = vpop.eup %15618  ;;  %15634 = vpow2.f32 %v9322_v39  ;;  %v9927_v57 = vsub.f32 0.0, %v9867_v51  ;;  %v9879_v45 = vpop.f32.mrf.mxu1  ;;  %v9807_v2 = vadd.f32 %v13707_v60, %v18268_v9 }
 0x6bf   :  { %v15621_v46 = vpop.eup %15620  ;;  %v9336_v33 = vadd.f32 1.0, %v15619_v26  ;;  %15636 = vpow2.f32 %v9942_v50  ;;  %v9932_v32 = vsub.f32 0.0, %v9888_v31  ;;  %v9880_v15 = vadd.f32 %v9879_v45, %v9783_v59  ;;  %v13709_v42 = vpop.f32.mrf.mxu0 }
 0x6c0   :  { %9364 = vst [vmem:[#allocation21 + $0x1d0] sm:$0xff] %v15621_v46  ;;  %15638 = vpow2.f32 %v9948_v35  ;;  %v9944_v49 = vmul.f32 1.442695, %v9927_v57  ;;  %v14226_v25 = vpop.f32.mrf.mxu1  ;;  %v13710_v0 = vadd.f32 %v13709_v42, %v13708_v12 }
 0x6c1   :  { %15640 = vrcp.f32 %v9336_v33  ;;  %v9954_v63 = vmul.f32 1.442695, %v9932_v32  ;;  %v9930_v16 = vsub.f32 0.0, %v9880_v15  ;;  %v9891_v29 = vadd.f32 %v14226_v25, %v9794_v17  ;;  %v13711_v40 = vpop.f32.mrf.mxu0 }
 0x6c2   :  { %v15623_v13 = vpop.eup %15622  ;;  %15642 = vpow2.f32 %v9944_v49  ;;  %v9882_v7 = vpop.f32.mrf.mxu1  ;;  %v9810_v53 = vadd.f32 %v13710_v0, %v18268_v9 }
 0x6c3   :  { %v15625_v21 = vpop.eup %15624  ;;  %v9337_v34 = vadd.f32 1.0, %v15623_v13  ;;  %15644 = vpow2.f32 %v9954_v63  ;;  %v9950_v1 = vmul.f32 1.442695, %v9930_v16  ;;  %v9933_v28 = vsub.f32 0.0, %v9891_v29  ;;  %v13712_v22 = vpop.f32.mrf.mxu0 }
 0x6c4   :  { %9365 = vst [vmem:[#allocation21 + $0x208] sm:$0xff] %v15625_v21  ;;  %v9883_v47 = vadd.f32 %v9882_v7, %v9786_v3  ;;  %v14229_v56 = vpop.f32.mrf.mxu1  ;;  %v13713_v27 = vadd.f32 %v13712_v22, %v13711_v40 }
 0x6c5   :  { %15646 = vrcp.f32 %v9337_v34  ;;  %v9956_v23 = vmul.f32 1.442695, %v9933_v28  ;;  %v9904_v5 = vadd.f32 %v14229_v56, %v9807_v2  ;;  %v13714_v4 = vpop.f32.mrf.mxu0 }
 0x6c6   :  { %v15627_v55 = vpop.eup %15626  ;;  %15648 = vpow2.f32 %v9950_v1  ;;  %v9931_v30 = vsub.f32 0.0, %v9883_v47  ;;  %v9895_v54 = vpop.f32.mrf.mxu1  ;;  %v9815_v26 = vadd.f32 %v13713_v27, %v18268_v9 }
 0x6c7   :  { %v15629_v6 = vpop.eup %15628  ;;  %9366 = vst [vmem:[#allocation21 + $0x240] sm:$0xff] %v15627_v55  ;;  %15650 = vpow2.f32 %v9956_v23  ;;  %v9936_v10 = vsub.f32 0.0, %v9904_v5  ;;  %v9896_v44 = vadd.f32 %v9895_v54, %v9799_v37  ;;  %v13715_v52 = vpop.f32.mrf.mxu0 }
 0x6c8   :  { %v15631_v11 = vpop.eup %15630  ;;  %v9338_v20 = vadd.f32 1.0, %v15629_v6  ;;  %v9952_v36 = vmul.f32 1.442695, %v9931_v30  ;;  %v14230_v14 = vpop.f32.mrf.mxu1  ;;  %v13716_v59 = vadd.f32 %v13715_v52, %v13714_v4 }
 0x6c9   :  { %v9976_v58 = vadd.f32 1.0, %v15631_v11  ;;  %v9962_v19 = vmul.f32 1.442695, %v9936_v10  ;;  %v9934_v43 = vsub.f32 0.0, %v9896_v44  ;;  %v9907_v62 = vadd.f32 %v14230_v14, %v9810_v53  ;;  %v13717_v39 = vpop.f32.mrf.mxu0  ;;  %v18312_v11 = vld [vmem:[%s18476_s12 + $0x4] ss:$0 sm:$0xff] }
 0x6ca   :  { %v15633_v8 = vpop.eup %15632  ;;  %15652 = vrcp.f32 %v9338_v20  ;;  %v9898_v18 = vpop.f32.mrf.mxu1  ;;  %v9818_v16 = vadd.f32 %v13716_v59, %v18268_v9 }
 0x6cb   :  { %v15635_v50 = vpop.eup %15634  ;;  %9367 = vst [vmem:[#allocation21 + $0x278] sm:$0xff] %v15633_v8  ;;  %15654 = vrcp.f32 %v9976_v58  ;;  %v9937_v51 = vsub.f32 0.0, %v9907_v62  ;;  %v9899_v41 = vadd.f32 %v9898_v18, %v9802_v24  ;;  %v13718_v38 = vpop.f32.mrf.mxu0  ;;  %v9958_v17 = vmul.f32 1.442695, %v9934_v43 }
 0x6cc   :  { %v15637_v35 = vpop.eup %15636  ;;  %v9339_v31 = vadd.f32 1.0, %v15635_v50  ;;  %15656 = vpow2.f32 %v9952_v36  ;;  %v14233_v12 = vpop.f32.mrf.mxu1  ;;  %v13719_v57 = vadd.f32 %v13718_v38, %v13717_v39 }
 0x6cd   :  { %v15639_v45 = vpop.eup %15638  ;;  %v9974_v60 = vadd.f32 1.0, %v15637_v35  ;;  %15658 = vpow2.f32 %v9962_v19  ;;  %v9935_v46 = vsub.f32 0.0, %v9899_v41  ;;  %v13720_v33 = vpop.f32.mrf.mxu0  ;;  %v9964_v25 = vmul.f32 1.442695, %v9937_v51 }
 0x6ce   :  { %v15641_v32 = vpop.eup %15640  ;;  %15660 = vrcp.f32 %v9339_v31  ;;  %v9977_v15 = vadd.f32 1.0, %v15639_v45  ;;  %v9911_v42 = vpop.f32.mrf.mxu1  ;;  %v9823_v61 = vadd.f32 %v13719_v57, %v18268_v9 }
 0x6cf   :  { %v15643_v49 = vpop.eup %15642  ;;  %9368 = vst [vmem:[#allocation21 + $0x2b0] sm:$0xff] %v15641_v32  ;;  %15662 = vrcp.f32 %v9974_v60  ;;  %v9912_v63 = vadd.f32 %v9911_v42, %v9815_v26  ;;  %v13721_v29 = vpop.f32.mrf.mxu0  ;;  %v9960_v21 = vmul.f32 1.442695, %v9935_v46 }
 0x6d0   :  { %v15645_v40 = vpop.eup %15644  ;;  %15664 = vrcp.f32 %v9977_v15  ;;  %v9975_v13 = vadd.f32 1.0, %v15643_v49  ;;  %v9920_v3 = vadd.f32 %v14233_v12, %v9823_v61  ;;  %v14234_v7 = vpop.f32.mrf.mxu1  ;;  %v13722_v0 = vadd.f32 %v13721_v29, %v13720_v33 }
 0x6d1   :  { %v9980_v2 = vadd.f32 1.0, %v15645_v40  ;;  %15666 = vpow2.f32 %v9958_v17  ;;  %v9938_v34 = vsub.f32 0.0, %v9912_v63  ;;  %v18304_v1 = vpop.f32.mrf.mxu0 }
 0x6d2   :  { %v15647_v28 = vpop.eup %15646  ;;  %15668 = vrcp.f32 %v9975_v13  ;;  %v9940_v22 = vsub.f32 0.0, %v9920_v3  ;;  %v9914_v48 = vpop.f32.mrf.mxu1  ;;  %v9826_v47 = vadd.f32 %v13722_v0, %v18268_v9 }
 0x6d3   :  { %v15649_v56 = vpop.eup %15648  ;;  %9369 = vst [vmem:[#allocation21 + $0x2e8] sm:$0xff] %v15647_v28  ;;  %15670 = vrcp.f32 %v9980_v2  ;;  %v9915_v23 = vadd.f32 %v9914_v48, %v9818_v16  ;;  %v10513_v5 = vpop.f32.mrf.mxu0  ;;  %v9966_v55 = vmul.f32 1.442695, %v9938_v34 }
 0x6d4   :  { %v15651_v37 = vpop.eup %15650  ;;  %v9978_v4 = vadd.f32 1.0, %v15649_v56  ;;  %15672 = vpow2.f32 %v9964_v25  ;;  %v9923_v30 = vadd.f32 %v14234_v7, %v9826_v47  ;;  %v13755_v54 = vpop.f32.mrf.mxu1  ;;  %v9970_v10 = vmul.f32 1.442695, %v9940_v22 }
 0x6d5   :  { %v9981_v6 = vadd.f32 1.0, %v15651_v37  ;;  %15674 = vpow2.f32 %v9960_v21  ;;  %v9939_v44 = vsub.f32 0.0, %v9915_v23  ;;  %v18307_v53 = vpop.f32.mrf.mxu0 }
 0x6d6   :  { %15676 = vrcp.f32 %v9978_v4  ;;  %v9941_v52 = vsub.f32 0.0, %v9923_v30  ;;  %v13756_v9 = vpop.f32.mrf.mxu1 }
 0x6d7   :  { %v15653_v20 = vpop.eup %15652  ;;  %15678 = vrcp.f32 %v9981_v6  ;;  %v9968_v36 = vmul.f32 1.442695, %v9939_v44  ;;  %v13757_v27 = vadd.f32 %v13756_v9, %v13755_v54  ;;  %v10516_v14 = vpop.f32.mrf.mxu0 }
 0x6d8   :  { %v15655_v24 = vpop.eup %15654  ;;  %9370 = vst [vmem:[#allocation21 + $0x320] sm:$0xff] %v15653_v20  ;;  %15680 = vpow2.f32 %v9966_v55  ;;  %v9972_v58 = vmul.f32 1.442695, %v9941_v52  ;;  %v13758_v19 = vpop.f32.mrf.mxu1 }
 0x6d9   :  { %v15657_v43 = vpop.eup %15656  ;;  %10008 = vst [vmem:[#allocation21 + $0x88] sm:$0xff] %v15655_v24  ;;  %15682 = vpow2.f32 %v9970_v10  ;;  %v10417_v62 = vadd.f32 %v13757_v27, %v18312_v11  ;;  %v18315_v39 = vpop.f32.mrf.mxu0 }
 0x6da   :  { %v15659_v8 = vpop.eup %15658  ;;  %v9979_v18 = vadd.f32 1.0, %v15657_v43  ;;  %15684 = vpow2.f32 %v9968_v36  ;;  %v13759_v50 = vpop.f32.mrf.mxu1 }
 0x6db   :  { %v15661_v51 = vpop.eup %15660  ;;  %v9984_v41 = vadd.f32 1.0, %v15659_v8  ;;  %15686 = vpow2.f32 %v9972_v58  ;;  %v10514_v59 = vadd.f32 %v10513_v5, %v10417_v62  ;;  %v13760_v38 = vadd.f32 %v13759_v50, %v13758_v19  ;;  %v18317_v35 = vpop.f32.mrf.mxu0 }
 0x6dc   :  { %v15663_v31 = vpop.eup %15662  ;;  %9371 = vst [vmem:[#allocation21 + $0x358] sm:$0xff] %v15661_v51  ;;  %15688 = vrcp.f32 %v9979_v18  ;;  %v13761_v12 = vpop.f32.mrf.mxu1 }
 0x6dd   :  { %v15665_v26 = vpop.eup %15664  ;;  %10006 = vst [vmem:[#allocation21 + $0x18] sm:$0xff] %v15663_v31  ;;  %15690 = vrcp.f32 %v9984_v41  ;;  %v10576_v57 = vsub.f32 0.0, %v10514_v59  ;;  %v10420_v45 = vadd.f32 %v13760_v38, %v18312_v11  ;;  %v18320_v60 = vpop.f32.mrf.mxu0 }
 0x6de   :  { %v15667_v17 = vpop.eup %15666  ;;  %10009 = vst [vmem:[#allocation21 + $0xc0] sm:$0xff] %v15665_v26  ;;  %v13762_v46 = vpop.f32.mrf.mxu1 }
 0x6df   :  { %v15669_v33 = vpop.eup %15668  ;;  %v9982_v32 = vadd.f32 1.0, %v15667_v17  ;;  %v10592_v15 = vmul.f32 1.442695, %v10576_v57  ;;  %v10517_v42 = vadd.f32 %v10516_v14, %v10420_v45  ;;  %v13763_v61 = vadd.f32 %v13762_v46, %v13761_v12  ;;  %v18322_v49 = vpop.f32.mrf.mxu0 }
 0x6e0   :  { %v15671_v25 = vpop.eup %15670  ;;  %10007 = vst [vmem:[#allocation21 + $0x50] sm:$0xff] %v15669_v33  ;;  %v13764_v63 = vpop.f32.mrf.mxu1 }
 0x6e1   :  { %v15673_v16 = vpop.eup %15672  ;;  %10012 = vst [vmem:[#allocation21 + $0x168] sm:$0xff] %v15671_v25  ;;  %15692 = vrcp.f32 %v9982_v32  ;;  %v10577_v29 = vsub.f32 0.0, %v10517_v42  ;;  %v10425_v40 = vadd.f32 %v13763_v61, %v18312_v11  ;;  %v18325_v13 = vpop.f32.mrf.mxu0 }
 0x6e2   :  { %v15675_v3 = vpop.eup %15674  ;;  %v9985_v7 = vadd.f32 1.0, %v15673_v16  ;;  %15694 = vpow2.f32 %v10592_v15  ;;  %v13765_v0 = vpop.f32.mrf.mxu1 }
 0x6e3   :  { %v15677_v2 = vpop.eup %15676  ;;  %v9983_v21 = vadd.f32 1.0, %v15675_v3  ;;  %v10594_v34 = vmul.f32 1.442695, %v10577_v29  ;;  %v10522_v28 = vadd.f32 %v18304_v1, %v10425_v40  ;;  %v13766_v22 = vadd.f32 %v13765_v0, %v13764_v63  ;;  %v18328_v48 = vpop.f32.mrf.mxu0 }
 0x6e4   :  { %v15679_v47 = vpop.eup %15678  ;;  %10010 = vst [vmem:[#allocation21 + $0xf8] sm:$0xff] %v15677_v2  ;;  %15696 = vrcp.f32 %v9985_v7  ;;  %v13767_v56 = vpop.f32.mrf.mxu1 }
 0x6e5   :  { %v15681_v23 = vpop.eup %15680  ;;  %10013 = vst [vmem:[#allocation21 + $0x1a0] sm:$0xff] %v15679_v47  ;;  %15698 = vrcp.f32 %v9983_v21  ;;  %v10578_v5 = vsub.f32 0.0, %v10522_v28  ;;  %v10428_v37 = vadd.f32 %v13766_v22, %v18312_v11  ;;  %v18331_v4 = vpop.f32.mrf.mxu0 }
 0x6e6   :  { %v15683_v55 = vpop.eup %15682  ;;  %v9986_v30 = vadd.f32 1.0, %v15681_v23  ;;  %15700 = vpow2.f32 %v10594_v34  ;;  %v13768_v54 = vpop.f32.mrf.mxu1 }
 0x6e7   :  { %v15685_v1 = vpop.eup %15684  ;;  %v9988_v6 = vadd.f32 1.0, %v15683_v55  ;;  %v10525_v10 = vadd.f32 %v18307_v53, %v10428_v37  ;;  %v13769_v44 = vadd.f32 %v13768_v54, %v13767_v56  ;;  %v18334_v52 = vpop.f32.mrf.mxu0  ;;  %v10596_v36 = vmul.f32 1.442695, %v10578_v5 }
 0x6e8   :  { %v15687_v9 = vpop.eup %15686  ;;  %15702 = vrcp.f32 %v9986_v30  ;;  %v9987_v20 = vadd.f32 1.0, %v15685_v1  ;;  %v13770_v27 = vpop.f32.mrf.mxu1 }
 0x6e9   :  { %v15689_v14 = vpop.eup %15688  ;;  %15704 = vrcp.f32 %v9988_v6  ;;  %v9989_v24 = vadd.f32 1.0, %v15687_v9  ;;  %v10579_v58 = vsub.f32 0.0, %v10525_v10  ;;  %v10433_v19 = vadd.f32 %v13769_v44, %v18312_v11  ;;  %v18337_v43 = vpop.f32.mrf.mxu0 }
 0x6ea   :  { %v15691_v62 = vpop.eup %15690  ;;  %10011 = vst [vmem:[#allocation21 + $0x130] sm:$0xff] %v15689_v14  ;;  %15706 = vrcp.f32 %v9987_v20  ;;  %v13771_v53 = vpop.f32.mrf.mxu1 }
 0x6eb   :  { %10016 = vst [vmem:[#allocation21 + $0x248] sm:$0xff] %v15691_v62  ;;  %15708 = vrcp.f32 %v9989_v24  ;;  %v10598_v8 = vmul.f32 1.442695, %v10579_v58  ;;  %v10530_v18 = vadd.f32 %v18317_v35, %v10433_v19  ;;  %v13772_v50 = vadd.f32 %v13771_v53, %v13770_v27  ;;  %v18340_v51 = vpop.f32.mrf.mxu0 }
 0x6ec   :  { %15710 = vpow2.f32 %v10596_v36  ;;  %v13773_v41 = vpop.f32.mrf.mxu1 }
 0x6ed   :  { %15712 = vpow2.f32 %v10598_v8  ;;  %v10580_v59 = vsub.f32 0.0, %v10530_v18  ;;  %v10436_v38 = vadd.f32 %v13772_v50, %v18312_v11  ;;  %v18343_v31 = vpop.f32.mrf.mxu0 }
 0x6ee   :  { %v15693_v12 = vpop.eup %15692  ;;  %v13774_v26 = vpop.f32.mrf.mxu1 }
 0x6ef   :  { %v15695_v57 = vpop.eup %15694  ;;  %10014 = vst [vmem:[#allocation21 + $0x1d8] sm:$0xff] %v15693_v12  ;;  %v10600_v45 = vmul.f32 1.442695, %v10580_v59  ;;  %v10533_v17 = vadd.f32 %v18322_v49, %v10436_v38  ;;  %v13775_v46 = vadd.f32 %v13774_v26, %v13773_v41  ;;  %v18346_v35 = vpop.f32.mrf.mxu0 }
 0x6f0   :  { %v10624_v33 = vadd.f32 1.0, %v15695_v57  ;;  %v13776_v32 = vpop.f32.mrf.mxu1 }
 0x6f1   :  { %v15697_v15 = vpop.eup %15696  ;;  %15714 = vpow2.f32 %v10600_v45  ;;  %v10581_v42 = vsub.f32 0.0, %v10533_v17  ;;  %v10441_v61 = vadd.f32 %v13775_v46, %v18312_v11  ;;  %v18349_v16 = vpop.f32.mrf.mxu0 }
 0x6f2   :  { %v15699_v25 = vpop.eup %15698  ;;  %10017 = vst [vmem:[#allocation21 + $0x280] sm:$0xff] %v15697_v15  ;;  %15716 = vrcp.f32 %v10624_v33  ;;  %v13777_v63 = vpop.f32.mrf.mxu1 }
 0x6f3   :  { %v15701_v29 = vpop.eup %15700  ;;  %10015 = vst [vmem:[#allocation21 + $0x210] sm:$0xff] %v15699_v25  ;;  %v10602_v40 = vmul.f32 1.442695, %v10581_v42  ;;  %v10538_v49 = vadd.f32 %v18315_v39, %v10441_v61  ;;  %v13778_v3 = vadd.f32 %v13777_v63, %v13776_v32  ;;  %v18352_v2 = vpop.f32.mrf.mxu0 }
 0x6f4   :  { %v10625_v7 = vadd.f32 1.0, %v15701_v29  ;;  %v13779_v0 = vpop.f32.mrf.mxu1 }
 0x6f5   :  { %v15703_v21 = vpop.eup %15702  ;;  %15718 = vpow2.f32 %v10602_v40  ;;  %v10582_v34 = vsub.f32 0.0, %v10538_v49  ;;  %v10444_v28 = vadd.f32 %v13778_v3, %v18312_v11  ;;  %v18355_v56 = vpop.f32.mrf.mxu0 }
 0x6f6   :  { %v15705_v22 = vpop.eup %15704  ;;  %10018 = vst [vmem:[#allocation21 + $0x2b8] sm:$0xff] %v15703_v21  ;;  %15720 = vrcp.f32 %v10625_v7  ;;  %v13780_v47 = vpop.f32.mrf.mxu1 }
 0x6f7   :  { %v15707_v23 = vpop.eup %15706  ;;  %10020 = vst [vmem:[#allocation21 + $0x328] sm:$0xff] %v15705_v22  ;;  %v10604_v5 = vmul.f32 1.442695, %v10582_v34  ;;  %v10541_v39 = vadd.f32 %v18320_v60, %v10444_v28  ;;  %v13781_v37 = vadd.f32 %v13780_v47, %v13779_v0  ;;  %v18358_v54 = vpop.f32.mrf.mxu0 }
 0x6f8   :  { %v15709_v55 = vpop.eup %15708  ;;  %10019 = vst [vmem:[#allocation21 + $0x2f0] sm:$0xff] %v15707_v23  ;;  %v13782_v30 = vpop.f32.mrf.mxu1 }
 0x6f9   :  { %v15711_v1 = vpop.eup %15710  ;;  %10021 = vst [vmem:[#allocation21 + $0x360] sm:$0xff] %v15709_v55  ;;  %15722 = vpow2.f32 %v10604_v5  ;;  %v10583_v6 = vsub.f32 0.0, %v10541_v39  ;;  %v10449_v10 = vadd.f32 %v13781_v37, %v18312_v11  ;;  %v18361_v36 = vpop.f32.mrf.mxu0 }
 0x6fa   :  { %v15713_v44 = vpop.eup %15712  ;;  %v10626_v9 = vadd.f32 1.0, %v15711_v1  ;;  %v13783_v20 = vpop.f32.mrf.mxu1 }
 0x6fb   :  { %v10627_v27 = vadd.f32 1.0, %v15713_v44  ;;  %v10606_v14 = vmul.f32 1.442695, %v10583_v6  ;;  %v10546_v60 = vadd.f32 %v18328_v48, %v10449_v10  ;;  %v13784_v24 = vadd.f32 %v13783_v20, %v13782_v30  ;;  %v18364_v19 = vpop.f32.mrf.mxu0 }
 0x6fc   :  { %15724 = vrcp.f32 %v10626_v9  ;;  %v13785_v58 = vpop.f32.mrf.mxu1 }
 0x6fd   :  { %15726 = vrcp.f32 %v10627_v27  ;;  %v10584_v62 = vsub.f32 0.0, %v10546_v60  ;;  %v10452_v53 = vadd.f32 %v13784_v24, %v18312_v11  ;;  %v18367_v50 = vpop.f32.mrf.mxu0 }
 0x6fe   :  { %v15715_v8 = vpop.eup %15714  ;;  %15728 = vpow2.f32 %v10606_v14  ;;  %v13786_v18 = vpop.f32.mrf.mxu1 }
 0x6ff   :  { %v15717_v41 = vpop.eup %15716  ;;  %v10628_v59 = vadd.f32 1.0, %v15715_v8  ;;  %v10608_v38 = vmul.f32 1.442695, %v10584_v62  ;;  %v10549_v12 = vadd.f32 %v18334_v52, %v10452_v53  ;;  %v13787_v48 = vadd.f32 %v13786_v18, %v13785_v58  ;;  %v18370_v57 = vpop.f32.mrf.mxu0 }
 0x700   :  { %10656 = vst [vmem:[#allocation21 + $0x20] sm:$0xff] %v15717_v41  ;;  %v13788_v26 = vpop.f32.mrf.mxu1  ;;  %v13843_v53 = vadd.f32 %v18364_v19, %v18361_v36 }
 0x701   :  { %15730 = vrcp.f32 %v10628_v59  ;;  %v10585_v45 = vsub.f32 0.0, %v10549_v12  ;;  %v10457_v17 = vadd.f32 %v13787_v48, %v18312_v11  ;;  %v18373_v32 = vpop.f32.mrf.mxu0  ;;  %v13837_v59 = vadd.f32 %v18352_v2, %v18349_v16 }
 0x702   :  { %v15719_v46 = vpop.eup %15718  ;;  %15732 = vpow2.f32 %v10608_v38  ;;  %v13789_v33 = vpop.f32.mrf.mxu1 }
 0x703   :  { %v15721_v15 = vpop.eup %15720  ;;  %v10629_v42 = vadd.f32 1.0, %v15719_v46  ;;  %v10610_v61 = vmul.f32 1.442695, %v10585_v45  ;;  %v10554_v25 = vadd.f32 %v18325_v13, %v10457_v17  ;;  %v13790_v52 = vadd.f32 %v13789_v33, %v13788_v26  ;;  %v18376_v29 = vpop.f32.mrf.mxu0  ;;  %v18396_v45 = vld [vmem:[%s18476_s12 + $0x5] ss:$0 sm:$0xff] }
 0x704   :  { %10657 = vst [vmem:[#allocation21 + $0x58] sm:$0xff] %v15721_v15  ;;  %v13791_v63 = vpop.f32.mrf.mxu1  ;;  %v11075_v33 = vadd.f32 %v13843_v53, %v18396_v45 }
 0x705   :  { %15734 = vrcp.f32 %v10629_v42  ;;  %v10586_v40 = vsub.f32 0.0, %v10554_v25  ;;  %v10460_v49 = vadd.f32 %v13790_v52, %v18312_v11  ;;  %v18379_v0 = vpop.f32.mrf.mxu0  ;;  %v13846_v42 = vadd.f32 %v18370_v57, %v18367_v50 }
 0x706   :  { %v15723_v3 = vpop.eup %15722  ;;  %15736 = vpow2.f32 %v10610_v61  ;;  %v13792_v7 = vpop.f32.mrf.mxu1  ;;  %v11067_v25 = vadd.f32 %v13837_v59, %v18396_v45 }
 0x707   :  { %v10630_v21 = vadd.f32 1.0, %v15723_v3  ;;  %v10612_v34 = vmul.f32 1.442695, %v10586_v40  ;;  %v10557_v28 = vadd.f32 %v18331_v4, %v10460_v49  ;;  %v13793_v22 = vadd.f32 %v13792_v7, %v13791_v63  ;;  %v18382_v47 = vpop.f32.mrf.mxu0 }
 0x708   :  { %v13794_v13 = vpop.f32.mrf.mxu1 }
 0x709   :  { %v15725_v23 = vpop.eup %15724  ;;  %15738 = vrcp.f32 %v10630_v21  ;;  %v10587_v5 = vsub.f32 0.0, %v10557_v28  ;;  %v10465_v39 = vadd.f32 %v13793_v22, %v18312_v11  ;;  %v13853_v30 = vpop.f32.mrf.mxu0 }
 0x70a   :  { %v15727_v37 = vpop.eup %15726  ;;  %10658 = vst [vmem:[#allocation21 + $0x90] sm:$0xff] %v15725_v23  ;;  %15740 = vpow2.f32 %v10612_v34  ;;  %v13795_v55 = vpop.f32.mrf.mxu1 }
 0x70b   :  { %v15729_v1 = vpop.eup %15728  ;;  %10659 = vst [vmem:[#allocation21 + $0xc8] sm:$0xff] %v15727_v37  ;;  %v10614_v6 = vmul.f32 1.442695, %v10587_v5  ;;  %v10562_v10 = vadd.f32 %v18340_v51, %v10465_v39  ;;  %v13796_v4 = vadd.f32 %v13795_v55, %v13794_v13  ;;  %v13854_v20 = vpop.f32.mrf.mxu0  ;;  %v11078_v39 = vadd.f32 %v13846_v42, %v18396_v45 }
 0x70c   :  { %v10631_v44 = vadd.f32 1.0, %v15729_v1  ;;  %v13797_v9 = vpop.f32.mrf.mxu1  ;;  %v13855_v7 = vadd.f32 %v13854_v20, %v13853_v30 }
 0x70d   :  { %15742 = vpow2.f32 %v10614_v6  ;;  %v10588_v27 = vsub.f32 0.0, %v10562_v10  ;;  %v10468_v14 = vadd.f32 %v13796_v4, %v18312_v11  ;;  %v13856_v58 = vpop.f32.mrf.mxu0 }
 0x70e   :  { %v15731_v60 = vpop.eup %15730  ;;  %15744 = vrcp.f32 %v10631_v44  ;;  %v13798_v24 = vpop.f32.mrf.mxu1  ;;  %v11091_v4 = vadd.f32 %v13855_v7, %v18396_v45 }
 0x70f   :  { %v15733_v62 = vpop.eup %15732  ;;  %10660 = vst [vmem:[#allocation21 + $0x100] sm:$0xff] %v15731_v60  ;;  %v10616_v8 = vmul.f32 1.442695, %v10588_v27  ;;  %v10565_v51 = vadd.f32 %v18346_v35, %v10468_v14  ;;  %v13799_v18 = vadd.f32 %v13798_v24, %v13797_v9  ;;  %v13857_v12 = vpop.f32.mrf.mxu0 }
 0x710   :  { %v10632_v41 = vadd.f32 1.0, %v15733_v62  ;;  %v13800_v38 = vpop.f32.mrf.mxu1  ;;  %v13858_v5 = vadd.f32 %v13857_v12, %v13856_v58  ;;  %v13852_v62 = vadd.f32 %v18382_v47, %v18379_v0 }
 0x711   :  { %15746 = vpow2.f32 %v10616_v8  ;;  %v10589_v48 = vsub.f32 0.0, %v10565_v51  ;;  %v10473_v26 = vadd.f32 %v13799_v18, %v18312_v11  ;;  %v18398_v35 = vpop.f32.mrf.mxu0 }
 0x712   :  { %v15735_v36 = vpop.eup %15734  ;;  %15748 = vrcp.f32 %v10632_v41  ;;  %v13801_v19 = vpop.f32.mrf.mxu1  ;;  %v11094_v8 = vadd.f32 %v13858_v5, %v18396_v45  ;;  %v11086_v42 = vadd.f32 %v13852_v62, %v18396_v45 }
 0x713   :  { %v15737_v17 = vpop.eup %15736  ;;  %10661 = vst [vmem:[#allocation21 + $0x138] sm:$0xff] %v15735_v36  ;;  %v10618_v46 = vmul.f32 1.442695, %v10589_v48  ;;  %v10570_v16 = vadd.f32 %v18337_v43, %v10473_v26  ;;  %v13802_v2 = vadd.f32 %v13801_v19, %v13800_v38  ;;  %v13860_v52 = vpop.f32.mrf.mxu0  ;;  %v13840_v43 = vadd.f32 %v18358_v54, %v18355_v56 }
 0x714   :  { %v10633_v15 = vadd.f32 1.0, %v15737_v17  ;;  %v14285_v61 = vpop.f32.mrf.mxu1  ;;  %v13861_v17 = vadd.f32 %v13860_v52, %v18398_v35 }
 0x715   :  { %15750 = vpow2.f32 %v10618_v46  ;;  %v10590_v63 = vsub.f32 0.0, %v10570_v16  ;;  %v10476_v40 = vadd.f32 %v13802_v2, %v18312_v11  ;;  %v11172_v49 = vadd.f32 %v14285_v61, %v11075_v33  ;;  %v18408_v34 = vpop.f32.mrf.mxu0 }
 0x716   :  { %v15739_v3 = vpop.eup %15738  ;;  %15752 = vrcp.f32 %v10633_v15  ;;  %v11163_v21 = vpop.f32.mrf.mxu1  ;;  %v13849_v11 = vadd.f32 %v18376_v29, %v18373_v32 }
 0x717   :  { %v15741_v28 = vpop.eup %15740  ;;  %10662 = vst [vmem:[#allocation21 + $0x170] sm:$0xff] %v15739_v3  ;;  %v10620_v50 = vmul.f32 1.442695, %v10590_v63  ;;  %v10573_v57 = vadd.f32 %v18343_v31, %v10476_v40  ;;  %v11228_v22 = vsub.f32 0.0, %v11172_v49  ;;  %v11164_v13 = vadd.f32 %v11163_v21, %v11067_v25  ;;  %v13863_v56 = vpop.f32.mrf.mxu0 }
 0x718   :  { %v10634_v23 = vadd.f32 1.0, %v15741_v28  ;;  %v14286_v37 = vpop.f32.mrf.mxu1  ;;  %v11070_v31 = vadd.f32 %v13840_v43, %v18396_v45  ;;  %v11083_v24 = vadd.f32 %v13849_v11, %v18396_v45  ;;  %v13864_v3 = vadd.f32 %v13863_v56, %v18408_v34 }
 0x719   :  { %15754 = vpow2.f32 %v10620_v50  ;;  %v10591_v54 = vsub.f32 0.0, %v10573_v57  ;;  %v11246_v55 = vmul.f32 1.442695, %v11228_v22  ;;  %v11226_v30 = vsub.f32 0.0, %v11164_v13  ;;  %v13865_v44 = vpop.f32.mrf.mxu0 }
 0x71a   :  { %v15743_v1 = vpop.eup %15742  ;;  %15756 = vrcp.f32 %v10634_v23  ;;  %v11175_v6 = vadd.f32 %v14286_v37, %v11078_v39  ;;  %v11166_v10 = vpop.f32.mrf.mxu1  ;;  %v11099_v22 = vadd.f32 %v13861_v17, %v18396_v45 }
 0x71b   :  { %v15745_v9 = vpop.eup %15744  ;;  %v10635_v32 = vadd.f32 1.0, %v15743_v1  ;;  %v10622_v29 = vmul.f32 1.442695, %v10591_v54  ;;  %15758 = vpow2.f32 %v11246_v55  ;;  %v11242_v20 = vmul.f32 1.442695, %v11226_v30  ;;  %v13866_v58 = vpop.f32.mrf.mxu0 }
 0x71c   :  { %10663 = vst [vmem:[#allocation21 + $0x1a8] sm:$0xff] %v15745_v9  ;;  %v11229_v27 = vsub.f32 0.0, %v11175_v6  ;;  %v11167_v14 = vadd.f32 %v11166_v10, %v11070_v31  ;;  %v14289_v60 = vpop.f32.mrf.mxu1  ;;  %v13867_v38 = vadd.f32 %v13866_v58, %v13865_v44  ;;  %v11102_v31 = vadd.f32 %v13864_v3, %v18396_v45 }
 0x71d   :  { %15760 = vrcp.f32 %v10635_v32  ;;  %v11188_v53 = vadd.f32 %v14289_v60, %v11091_v4  ;;  %v13868_v12 = vpop.f32.mrf.mxu0 }
 0x71e   :  { %v15747_v51 = vpop.eup %15746  ;;  %15762 = vpow2.f32 %v10622_v29  ;;  %v11248_v18 = vmul.f32 1.442695, %v11229_v27  ;;  %v11227_v41 = vsub.f32 0.0, %v11167_v14  ;;  %v11179_v59 = vpop.f32.mrf.mxu1  ;;  %v11107_v25 = vadd.f32 %v13867_v38, %v18396_v45 }
 0x71f   :  { %v15749_v48 = vpop.eup %15748  ;;  %v10636_v26 = vadd.f32 1.0, %v15747_v51  ;;  %15764 = vpow2.f32 %v11242_v20  ;;  %v11232_v36 = vsub.f32 0.0, %v11188_v53  ;;  %v11180_v19 = vadd.f32 %v11179_v59, %v11083_v24  ;;  %v13869_v46 = vpop.f32.mrf.mxu0 }
 0x720   :  { %10664 = vst [vmem:[#allocation21 + $0x1e0] sm:$0xff] %v15749_v48  ;;  %15766 = vpow2.f32 %v11248_v18  ;;  %v11244_v0 = vmul.f32 1.442695, %v11227_v41  ;;  %v14290_v47 = vpop.f32.mrf.mxu1  ;;  %v13870_v7 = vadd.f32 %v13869_v46, %v13868_v12 }
 0x721   :  { %15768 = vrcp.f32 %v10636_v26  ;;  %v11254_v16 = vmul.f32 1.442695, %v11232_v36  ;;  %v11230_v2 = vsub.f32 0.0, %v11180_v19  ;;  %v11191_v33 = vadd.f32 %v14290_v47, %v11094_v8  ;;  %v13871_v63 = vpop.f32.mrf.mxu0 }
 0x722   :  { %v15751_v15 = vpop.eup %15750  ;;  %15770 = vpow2.f32 %v11244_v0  ;;  %v11182_v61 = vpop.f32.mrf.mxu1  ;;  %v11110_v1 = vadd.f32 %v13870_v7, %v18396_v45 }
 0x723   :  { %v15753_v40 = vpop.eup %15752  ;;  %v10637_v49 = vadd.f32 1.0, %v15751_v15  ;;  %15772 = vpow2.f32 %v11254_v16  ;;  %v11250_v35 = vmul.f32 1.442695, %v11230_v2  ;;  %v11233_v52 = vsub.f32 0.0, %v11191_v33  ;;  %v13872_v28 = vpop.f32.mrf.mxu0 }
 0x724   :  { %10665 = vst [vmem:[#allocation21 + $0x218] sm:$0xff] %v15753_v40  ;;  %v11183_v43 = vadd.f32 %v11182_v61, %v11086_v42  ;;  %v14293_v21 = vpop.f32.mrf.mxu1  ;;  %v13873_v5 = vadd.f32 %v13872_v28, %v13871_v63 }
 0x725   :  { %15774 = vrcp.f32 %v10637_v49  ;;  %v11256_v50 = vmul.f32 1.442695, %v11233_v52  ;;  %v11204_v57 = vadd.f32 %v14293_v21, %v11107_v25  ;;  %v13874_v39 = vpop.f32.mrf.mxu0 }
 0x726   :  { %v15755_v13 = vpop.eup %15754  ;;  %15776 = vpow2.f32 %v11250_v35  ;;  %v11231_v23 = vsub.f32 0.0, %v11183_v43  ;;  %v11195_v11 = vpop.f32.mrf.mxu1  ;;  %v11115_v58 = vadd.f32 %v13873_v5, %v18396_v45 }
 0x727   :  { %v15757_v37 = vpop.eup %15756  ;;  %v10638_v54 = vadd.f32 1.0, %v15755_v13  ;;  %15778 = vpow2.f32 %v11256_v50  ;;  %v11236_v55 = vsub.f32 0.0, %v11204_v57  ;;  %v11196_v34 = vadd.f32 %v11195_v11, %v11099_v22  ;;  %v13875_v10 = vpop.f32.mrf.mxu0 }
 0x728   :  { %v15759_v56 = vpop.eup %15758  ;;  %10666 = vst [vmem:[#allocation21 + $0x250] sm:$0xff] %v15757_v37  ;;  %v11252_v30 = vmul.f32 1.442695, %v11231_v23  ;;  %v14294_v6 = vpop.f32.mrf.mxu1  ;;  %v13876_v51 = vadd.f32 %v13875_v10, %v13874_v39 }
 0x729   :  { %15780 = vrcp.f32 %v10638_v54  ;;  %v11276_v4 = vadd.f32 1.0, %v15759_v56  ;;  %v11262_v44 = vmul.f32 1.442695, %v11236_v55  ;;  %v11234_v9 = vsub.f32 0.0, %v11196_v34  ;;  %v13877_v27 = vpop.f32.mrf.mxu0  ;;  %v18436_v34 = vld [vmem:[%s18476_s12 + $0x6] ss:$0 sm:$0xff] }
 0x72a   :  { %v15761_v32 = vpop.eup %15760  ;;  %15782 = vpow2.f32 %v11252_v30  ;;  %v11207_v29 = vadd.f32 %v14294_v6, %v11110_v1  ;;  %v11198_v20 = vpop.f32.mrf.mxu1  ;;  %v11118_v61 = vadd.f32 %v13876_v51, %v18396_v45  ;;  %s16206_s12 = smov [#allocation21]  }
 0x72b   :  { %v15763_v14 = vpop.eup %15762  ;;  %10667 = vst [vmem:[#allocation21 + $0x288] sm:$0xff] %v15761_v32  ;;  %15784 = vrcp.f32 %v11276_v4  ;;  %v11258_v60 = vmul.f32 1.442695, %v11234_v9  ;;  %v11199_v24 = vadd.f32 %v11198_v20, %v11102_v31  ;;  %v13878_v41 = vpop.f32.mrf.mxu0  ;;  %s11977_s14 = sshll.u32 %s16206_s12, 4  ;;  %s11978_s14 = int_to_ptr.vmem [resolvable:$true] %s11977_s14 }
 0x72c   :  { %v15765_v62 = vpop.eup %15764  ;;  %v10639_v53 = vadd.f32 1.0, %v15763_v14  ;;  %15786 = vpow2.f32 %v11262_v44  ;;  %v11237_v8 = vsub.f32 0.0, %v11207_v29  ;;  %v14297_v18 = vpop.f32.mrf.mxu1  ;;  %v13879_v48 = vadd.f32 %v13878_v41, %v13877_v27  ;;  %s16152_s8 = scalar_lea.vmem %s11978_s14, 14336  ;;  %p16157_p0 = scmp.lt.s32.totalorder %s11978_s14, %s11978_s14 }
 0x72d   :  { %v15767_v59 = vpop.eup %15766  ;;  %v11274_v38 = vadd.f32 1.0, %v15765_v62  ;;  %15788 = vpow2.f32 %v11258_v60  ;;  %v11235_v12 = vsub.f32 0.0, %v11199_v24  ;;  %v13880_v0 = vpop.f32.mrf.mxu0  ;;  %p16153_p13 = scmp.ne.s32.totalorder %s11978_s14, %s16152_s8  ;;  %p16158_p1 = scmp.lt.s32.totalorder %s16152_s8, %s16152_s8 }
 0x72e   :  { %v15769_v26 = vpop.eup %15768  ;;  %15790 = vrcp.f32 %v10639_v53  ;;  %v11277_v36 = vadd.f32 1.0, %v15767_v59  ;;  %v11264_v19 = vmul.f32 1.442695, %v11237_v8  ;;  %v11211_v17 = vpop.f32.mrf.mxu1  ;;  %v11123_v16 = vadd.f32 %v13879_v48, %v18396_v45 }
 0x72f   :  { %v15771_v47 = vpop.eup %15770  ;;  %10668 = vst [vmem:[#allocation21 + $0x2c0] sm:$0xff] %v15769_v26  ;;  %15792 = vrcp.f32 %v11274_v38  ;;  %v11212_v46 = vadd.f32 %v11211_v17, %v11115_v58  ;;  %v11260_v15 = vmul.f32 1.442695, %v11235_v12  ;;  %v13881_v25 = vpop.f32.mrf.mxu0  ;;  %p16159_p2 = por %p16158_p1, %p16157_p0 }
 0x730   :  { %v15773_v2 = vpop.eup %15772  ;;  %15794 = vrcp.f32 %v11277_v36  ;;  %v11275_v33 = vadd.f32 1.0, %v15771_v47  ;;  %v14298_v42 = vpop.f32.mrf.mxu1  ;;  %v11220_v49 = vadd.f32 %v14297_v18, %v11123_v16  ;;  %v13882_v3 = vadd.f32 %v13881_v25, %v13880_v0 }
 0x731   :  { %v11280_v63 = vadd.f32 1.0, %v15773_v2  ;;  %15796 = vpow2.f32 %v11264_v19  ;;  %v11238_v40 = vsub.f32 0.0, %v11212_v46  ;;  %v18430_v43 = vpop.f32.mrf.mxu0  ;;  %p16160_p3 = pnand %p16159_p2, %p16153_p13 }
 0x732   :  { %v15775_v35 = vpop.eup %15774  ;;  %15798 = vrcp.f32 %v11275_v33  ;;  %v11214_v52 = vpop.f32.mrf.mxu1  ;;  %v11240_v28 = vsub.f32 0.0, %v11220_v49  ;;  %v11126_v13 = vadd.f32 %v13882_v3, %v18396_v45 }
 0x733   :  { %v15777_v7 = vpop.eup %15776  ;;  %10669 = vst [vmem:[#allocation21 + $0x2f8] sm:$0xff] %v15775_v35  ;;  %15800 = vrcp.f32 %v11280_v63  ;;  %v11266_v21 = vmul.f32 1.442695, %v11238_v40  ;;  %v11215_v50 = vadd.f32 %v11214_v52, %v11118_v61  ;;  %v11813_v56 = vpop.f32.mrf.mxu0 }
 0x734   :  { %v15779_v57 = vpop.eup %15778  ;;  %v11278_v22 = vadd.f32 1.0, %v15777_v7  ;;  %15802 = vpow2.f32 %v11260_v15  ;;  %v13915_v23 = vpop.f32.mrf.mxu1  ;;  %v11270_v5 = vmul.f32 1.442695, %v11240_v28  ;;  %v11223_v54 = vadd.f32 %v14298_v42, %v11126_v13 }
 0x735   :  { %v11281_v11 = vadd.f32 1.0, %v15779_v57  ;;  %15804 = vpow2.f32 %v11266_v21  ;;  %v11239_v39 = vsub.f32 0.0, %v11215_v50  ;;  %v14318_v27 = vpop.f32.mrf.mxu0 }
 0x736   :  { %v15781_v37 = vpop.eup %15780  ;;  %15806 = vrcp.f32 %v11278_v22  ;;  %v13916_v55 = vpop.f32.mrf.mxu1  ;;  %v11241_v10 = vsub.f32 0.0, %v11223_v54 }
 0x737   :  { %v15783_v30 = vpop.eup %15782  ;;  %10670 = vst [vmem:[#allocation21 + $0x330] sm:$0xff] %v15781_v37  ;;  %15808 = vrcp.f32 %v11281_v11  ;;  %v11268_v1 = vmul.f32 1.442695, %v11239_v39  ;;  %v13917_v45 = vadd.f32 %v13916_v55, %v13915_v23  ;;  %v11816_v38 = vpop.f32.mrf.mxu0 }
 0x738   :  { %v15785_v6 = vpop.eup %15784  ;;  %v11279_v31 = vadd.f32 1.0, %v15783_v30  ;;  %15810 = vpow2.f32 %v11270_v5  ;;  %v13918_v4 = vpop.f32.mrf.mxu1  ;;  %v11272_v20 = vmul.f32 1.442695, %v11241_v10 }
 0x739   :  { %v15787_v44 = vpop.eup %15786  ;;  %11308 = vst [vmem:[#allocation21 + $0x98] sm:$0xff] %v15785_v6  ;;  %15812 = vpow2.f32 %v11268_v1  ;;  %v11717_v9 = vadd.f32 %v13917_v45, %v18436_v34  ;;  %v18441_v42 = vpop.f32.mrf.mxu0 }
 0x73a   :  { %v15789_v32 = vpop.eup %15788  ;;  %15814 = vrcp.f32 %v11279_v31  ;;  %v11284_v29 = vadd.f32 1.0, %v15787_v44  ;;  %v13919_v14 = vpop.f32.mrf.mxu1 }
 0x73b   :  { %v15791_v60 = vpop.eup %15790  ;;  %v11282_v24 = vadd.f32 1.0, %v15789_v32  ;;  %v11814_v58 = vadd.f32 %v11813_v56, %v11717_v9  ;;  %v13920_v62 = vadd.f32 %v13919_v14, %v13918_v4  ;;  %v11829_v22 = vpop.f32.mrf.mxu0 }
 0x73c   :  { %v15793_v53 = vpop.eup %15792  ;;  %10671 = vst [vmem:[#allocation21 + $0x368] sm:$0xff] %v15791_v60  ;;  %15816 = vrcp.f32 %v11284_v29  ;;  %v13921_v8 = vpop.f32.mrf.mxu1 }
 0x73d   :  { %v15795_v51 = vpop.eup %15794  ;;  %11306 = vst [vmem:[#allocation21 + $0x28] sm:$0xff] %v15793_v53  ;;  %15818 = vrcp.f32 %v11282_v24  ;;  %v11876_v18 = vsub.f32 0.0, %v11814_v58  ;;  %v11720_v41 = vadd.f32 %v13920_v62, %v18436_v34  ;;  %v14322_v1 = vpop.f32.mrf.mxu0 }
 0x73e   :  { %v15797_v59 = vpop.eup %15796  ;;  %11309 = vst [vmem:[#allocation21 + $0xd0] sm:$0xff] %v15795_v51  ;;  %15820 = vpow2.f32 %v11272_v20  ;;  %v13922_v12 = vpop.f32.mrf.mxu1 }
 0x73f   :  { %v15799_v48 = vpop.eup %15798  ;;  %v11285_v26 = vadd.f32 1.0, %v15797_v59  ;;  %v11892_v36 = vmul.f32 1.442695, %v11876_v18  ;;  %v11817_v19 = vadd.f32 %v11816_v38, %v11720_v41  ;;  %v13923_v17 = vadd.f32 %v13922_v12, %v13921_v8 }
 0x740   :  { %v15801_v0 = vpop.eup %15800  ;;  %11307 = vst [vmem:[#allocation21 + $0x60] sm:$0xff] %v15799_v48  ;;  %v13924_v47 = vpop.f32.mrf.mxu1 }
 0x741   :  { %v15803_v46 = vpop.eup %15802  ;;  %11312 = vst [vmem:[#allocation21 + $0x178] sm:$0xff] %v15801_v0  ;;  %15822 = vrcp.f32 %v11285_v26  ;;  %v11877_v16 = vsub.f32 0.0, %v11817_v19  ;;  %v11725_v2 = vadd.f32 %v13923_v17, %v18436_v34 }
 0x742   :  { %v15805_v33 = vpop.eup %15804  ;;  %v11283_v15 = vadd.f32 1.0, %v15803_v46  ;;  %15824 = vpow2.f32 %v11892_v36  ;;  %v13925_v61 = vpop.f32.mrf.mxu1 }
 0x743   :  { %v15807_v25 = vpop.eup %15806  ;;  %v11286_v63 = vadd.f32 1.0, %v15805_v33  ;;  %v11894_v40 = vmul.f32 1.442695, %v11877_v16  ;;  %v11822_v49 = vadd.f32 %v18430_v43, %v11725_v2  ;;  %v13926_v35 = vadd.f32 %v13925_v61, %v13924_v47 }
 0x744   :  { %v15809_v52 = vpop.eup %15808  ;;  %11310 = vst [vmem:[#allocation21 + $0x108] sm:$0xff] %v15807_v25  ;;  %15826 = vrcp.f32 %v11283_v15  ;;  %v13927_v3 = vpop.f32.mrf.mxu1 }
 0x745   :  { %v15811_v7 = vpop.eup %15810  ;;  %11313 = vst [vmem:[#allocation21 + $0x1b0] sm:$0xff] %v15809_v52  ;;  %15828 = vrcp.f32 %v11286_v63  ;;  %v11878_v21 = vsub.f32 0.0, %v11822_v49  ;;  %v11728_v28 = vadd.f32 %v13926_v35, %v18436_v34 }
 0x746   :  { %v15813_v50 = vpop.eup %15812  ;;  %v11288_v57 = vadd.f32 1.0, %v15811_v7  ;;  %15830 = vpow2.f32 %v11894_v40  ;;  %v13928_v13 = vpop.f32.mrf.mxu1 }
 0x747   :  { %v15815_v23 = vpop.eup %15814  ;;  %v11287_v11 = vadd.f32 1.0, %v15813_v50  ;;  %v11896_v5 = vmul.f32 1.442695, %v11878_v21  ;;  %v11825_v43 = vadd.f32 %v14318_v27, %v11728_v28  ;;  %v13929_v39 = vadd.f32 %v13928_v13, %v13927_v3  ;;  %v11832_v27 = vpop.f32.mrf.mxu0 }
 0x748   :  { %11311 = vst [vmem:[#allocation21 + $0x140] sm:$0xff] %v15815_v23  ;;  %15832 = vrcp.f32 %v11288_v57  ;;  %v13930_v37 = vpop.f32.mrf.mxu1 }
 0x749   :  { %v15817_v54 = vpop.eup %15816  ;;  %15834 = vrcp.f32 %v11287_v11  ;;  %v11879_v55 = vsub.f32 0.0, %v11825_v43  ;;  %v11733_v56 = vadd.f32 %v13929_v39, %v18436_v34  ;;  %v18448_v38 = vpop.f32.mrf.mxu0 }
 0x74a   :  { %v15819_v30 = vpop.eup %15818  ;;  %11316 = vst [vmem:[#allocation21 + $0x258] sm:$0xff] %v15817_v54  ;;  %15836 = vpow2.f32 %v11896_v5  ;;  %v13931_v45 = vpop.f32.mrf.mxu1 }
 0x74b   :  { %v15821_v6 = vpop.eup %15820  ;;  %11314 = vst [vmem:[#allocation21 + $0x1e8] sm:$0xff] %v15819_v30  ;;  %v11898_v31 = vmul.f32 1.442695, %v11879_v55  ;;  %v11830_v10 = vadd.f32 %v11829_v22, %v11733_v56  ;;  %v13932_v4 = vadd.f32 %v13931_v45, %v13930_v37  ;;  %v11845_v33 = vpop.f32.mrf.mxu0 }
 0x74c   :  { %v11289_v44 = vadd.f32 1.0, %v15821_v6  ;;  %v13933_v9 = vpop.f32.mrf.mxu1 }
 0x74d   :  { %15838 = vpow2.f32 %v11898_v31  ;;  %v11880_v32 = vsub.f32 0.0, %v11830_v10  ;;  %v11736_v29 = vadd.f32 %v13932_v4, %v18436_v34  ;;  %v14326_v7 = vpop.f32.mrf.mxu0 }
 0x74e   :  { %v15823_v20 = vpop.eup %15822  ;;  %15840 = vrcp.f32 %v11289_v44  ;;  %v13934_v14 = vpop.f32.mrf.mxu1 }
 0x74f   :  { %v15825_v60 = vpop.eup %15824  ;;  %11317 = vst [vmem:[#allocation21 + $0x290] sm:$0xff] %v15823_v20  ;;  %v11900_v24 = vmul.f32 1.442695, %v11880_v32  ;;  %v11833_v58 = vadd.f32 %v11832_v27, %v11736_v29  ;;  %v13935_v62 = vadd.f32 %v13934_v14, %v13933_v9  ;;  %v11848_v39 = vpop.f32.mrf.mxu0 }
 0x750   :  { %v11924_v53 = vadd.f32 1.0, %v15825_v60  ;;  %v13936_v8 = vpop.f32.mrf.mxu1 }
 0x751   :  { %v15827_v51 = vpop.eup %15826  ;;  %15842 = vpow2.f32 %v11900_v24  ;;  %v11881_v18 = vsub.f32 0.0, %v11833_v58  ;;  %v11741_v41 = vadd.f32 %v13935_v62, %v18436_v34  ;;  %v14329_v4 = vpop.f32.mrf.mxu0 }
 0x752   :  { %v15829_v59 = vpop.eup %15828  ;;  %11315 = vst [vmem:[#allocation21 + $0x220] sm:$0xff] %v15827_v51  ;;  %15844 = vrcp.f32 %v11924_v53  ;;  %v13937_v12 = vpop.f32.mrf.mxu1 }
 0x753   :  { %v15831_v48 = vpop.eup %15830  ;;  %11318 = vst [vmem:[#allocation21 + $0x2c8] sm:$0xff] %v15829_v59  ;;  %v11902_v26 = vmul.f32 1.442695, %v11881_v18  ;;  %v11838_v36 = vadd.f32 %v18441_v42, %v11741_v41  ;;  %v13938_v19 = vadd.f32 %v13937_v12, %v13936_v8  ;;  %v11861_v62 = vpop.f32.mrf.mxu0 }
 0x754   :  { %v11925_v17 = vadd.f32 1.0, %v15831_v48  ;;  %v13939_v0 = vpop.f32.mrf.mxu1 }
 0x755   :  { %v15833_v47 = vpop.eup %15832  ;;  %15846 = vpow2.f32 %v11902_v26  ;;  %v11882_v46 = vsub.f32 0.0, %v11838_v36  ;;  %v11744_v16 = vadd.f32 %v13938_v19, %v18436_v34  ;;  %v14330_v36 = vpop.f32.mrf.mxu0 }
 0x756   :  { %v15835_v2 = vpop.eup %15834  ;;  %11320 = vst [vmem:[#allocation21 + $0x338] sm:$0xff] %v15833_v47  ;;  %15848 = vrcp.f32 %v11925_v17  ;;  %v13940_v15 = vpop.f32.mrf.mxu1 }
 0x757   :  { %v15837_v61 = vpop.eup %15836  ;;  %11319 = vst [vmem:[#allocation21 + $0x300] sm:$0xff] %v15835_v2  ;;  %v11904_v25 = vmul.f32 1.442695, %v11882_v46  ;;  %v11841_v63 = vadd.f32 %v14322_v1, %v11744_v16  ;;  %v13941_v40 = vadd.f32 %v13940_v15, %v13939_v0 }
 0x758   :  { %v11926_v49 = vadd.f32 1.0, %v15837_v61  ;;  %v13942_v42 = vpop.f32.mrf.mxu1 }
 0x759   :  { %15850 = vpow2.f32 %v11904_v25  ;;  %v11883_v35 = vsub.f32 0.0, %v11841_v63  ;;  %v11749_v52 = vadd.f32 %v13941_v40, %v18436_v34  ;;  %v11864_v25 = vpop.f32.mrf.mxu0 }
 0x75a   :  { %v15839_v3 = vpop.eup %15838  ;;  %15852 = vrcp.f32 %v11926_v49  ;;  %v13943_v21 = vpop.f32.mrf.mxu1 }
 0x75b   :  { %v15841_v28 = vpop.eup %15840  ;;  %v11927_v50 = vadd.f32 1.0, %v15839_v3  ;;  %v11906_v57 = vmul.f32 1.442695, %v11883_v35  ;;  %v11846_v22 = vadd.f32 %v11845_v33, %v11749_v52  ;;  %v13944_v13 = vadd.f32 %v13943_v21, %v13942_v42 }
 0x75c   :  { %11321 = vst [vmem:[#allocation21 + $0x370] sm:$0xff] %v15841_v28  ;;  %v13945_v23 = vpop.f32.mrf.mxu1 }
 0x75d   :  { %15854 = vrcp.f32 %v11927_v50  ;;  %v11884_v11 = vsub.f32 0.0, %v11846_v22  ;;  %v11752_v5 = vadd.f32 %v13944_v13, %v18436_v34 }
 0x75e   :  { %v15843_v43 = vpop.eup %15842  ;;  %15856 = vpow2.f32 %v11906_v57  ;;  %v13946_v37 = vpop.f32.mrf.mxu1 }
 0x75f   :  { %v15845_v54 = vpop.eup %15844  ;;  %v11928_v55 = vadd.f32 1.0, %v15843_v43  ;;  %v11908_v56 = vmul.f32 1.442695, %v11884_v11  ;;  %v11849_v30 = vadd.f32 %v11848_v39, %v11752_v5  ;;  %v13947_v1 = vadd.f32 %v13946_v37, %v13945_v23 }
 0x760   :  { %11956 = vst [vmem:[#allocation21 + $0x30] sm:$0xff] %v15845_v54  ;;  %v13948_v45 = vpop.f32.mrf.mxu1 }
 0x761   :  { %15858 = vrcp.f32 %v11928_v55  ;;  %v11885_v6 = vsub.f32 0.0, %v11849_v30  ;;  %v11757_v31 = vadd.f32 %v13947_v1, %v18436_v34 }
 0x762   :  { %v15847_v10 = vpop.eup %15846  ;;  %15860 = vpow2.f32 %v11908_v56  ;;  %v13949_v44 = vpop.f32.mrf.mxu1 }
 0x763   :  { %v15849_v9 = vpop.eup %15848  ;;  %v11929_v32 = vadd.f32 1.0, %v15847_v10  ;;  %v11910_v29 = vmul.f32 1.442695, %v11885_v6  ;;  %v11854_v20 = vadd.f32 %v18448_v38, %v11757_v31  ;;  %v13950_v27 = vadd.f32 %v13949_v44, %v13948_v45 }
 0x764   :  { %11957 = vst [vmem:[#allocation21 + $0x68] sm:$0xff] %v15849_v9  ;;  %v13951_v14 = vpop.f32.mrf.mxu1 }
 0x765   :  { %15862 = vrcp.f32 %v11929_v32  ;;  %v11886_v60 = vsub.f32 0.0, %v11854_v20  ;;  %v11760_v24 = vadd.f32 %v13950_v27, %v18436_v34 }
 0x766   :  { %v15851_v58 = vpop.eup %15850  ;;  %15864 = vpow2.f32 %v11910_v29  ;;  %v13952_v53 = vpop.f32.mrf.mxu1 }
 0x767   :  { %v15853_v8 = vpop.eup %15852  ;;  %v11930_v51 = vadd.f32 1.0, %v15851_v58  ;;  %v11912_v18 = vmul.f32 1.442695, %v11886_v60  ;;  %v11857_v41 = vadd.f32 %v14326_v7, %v11760_v24  ;;  %v13953_v59 = vadd.f32 %v13952_v53, %v13951_v14 }
 0x768   :  { %11958 = vst [vmem:[#allocation21 + $0xa0] sm:$0xff] %v15853_v8  ;;  %v13954_v12 = vpop.f32.mrf.mxu1 }
 0x769   :  { %15866 = vrcp.f32 %v11930_v51  ;;  %v11887_v38 = vsub.f32 0.0, %v11857_v41  ;;  %v11765_v48 = vadd.f32 %v13953_v59, %v18436_v34 }
 0x76a   :  { %v15855_v26 = vpop.eup %15854  ;;  %15868 = vpow2.f32 %v11912_v18  ;;  %v13955_v19 = vpop.f32.mrf.mxu1 }
 0x76b   :  { %v15857_v17 = vpop.eup %15856  ;;  %11959 = vst [vmem:[#allocation21 + $0xd8] sm:$0xff] %v15855_v26  ;;  %v11914_v0 = vmul.f32 1.442695, %v11887_v38  ;;  %v11862_v47 = vadd.f32 %v11861_v62, %v11765_v48  ;;  %v13956_v46 = vadd.f32 %v13955_v19, %v13954_v12 }
 0x76c   :  { %v11931_v16 = vadd.f32 1.0, %v15857_v17  ;;  %v13957_v2 = vpop.f32.mrf.mxu1 }
 0x76d   :  { %15870 = vpow2.f32 %v11914_v0  ;;  %v11888_v33 = vsub.f32 0.0, %v11862_v47  ;;  %v11768_v15 = vadd.f32 %v13956_v46, %v18436_v34 }
 0x76e   :  { %v15859_v61 = vpop.eup %15858  ;;  %15872 = vrcp.f32 %v11931_v16  ;;  %v13958_v63 = vpop.f32.mrf.mxu1 }
 0x76f   :  { %v15861_v40 = vpop.eup %15860  ;;  %11960 = vst [vmem:[#allocation21 + $0x110] sm:$0xff] %v15859_v61  ;;  %v11916_v49 = vmul.f32 1.442695, %v11888_v33  ;;  %v11865_v42 = vadd.f32 %v11864_v25, %v11768_v15  ;;  %v13959_v35 = vadd.f32 %v13958_v63, %v13957_v2 }
 0x770   :  { %v11932_v52 = vadd.f32 1.0, %v15861_v40  ;;  %v13960_v3 = vpop.f32.mrf.mxu1 }
 0x771   :  { %15874 = vpow2.f32 %v11916_v49  ;;  %v11889_v7 = vsub.f32 0.0, %v11865_v42  ;;  %v11773_v21 = vadd.f32 %v13959_v35, %v18436_v34 }
 0x772   :  { %v15863_v28 = vpop.eup %15862  ;;  %15876 = vrcp.f32 %v11932_v52  ;;  %v13961_v50 = vpop.f32.mrf.mxu1 }
 0x773   :  { %v15865_v57 = vpop.eup %15864  ;;  %11961 = vst [vmem:[#allocation21 + $0x148] sm:$0xff] %v15863_v28  ;;  %v11918_v22 = vmul.f32 1.442695, %v11889_v7  ;;  %v11870_v13 = vadd.f32 %v14329_v4, %v11773_v21  ;;  %v13962_v23 = vadd.f32 %v13961_v50, %v13960_v3 }
 0x774   :  { %v11933_v11 = vadd.f32 1.0, %v15865_v57 }
 0x775   :  { %15878 = vpow2.f32 %v11918_v22  ;;  %v11890_v5 = vsub.f32 0.0, %v11870_v13  ;;  %v11776_v43 = vadd.f32 %v13962_v23, %v18436_v34 }
 0x776   :  { %v15867_v39 = vpop.eup %15866  ;;  %15880 = vrcp.f32 %v11933_v11 }
 0x777   :  { %v15869_v37 = vpop.eup %15868  ;;  %11962 = vst [vmem:[#allocation21 + $0x180] sm:$0xff] %v15867_v39  ;;  %v11920_v54 = vmul.f32 1.442695, %v11890_v5  ;;  %v11873_v55 = vadd.f32 %v14330_v36, %v11776_v43 }
 0x778   :  { %v11934_v56 = vadd.f32 1.0, %v15869_v37 }
 0x779   :  { %15882 = vpow2.f32 %v11920_v54  ;;  %v11891_v30 = vsub.f32 0.0, %v11873_v55 }
 0x77a   :  { %v15871_v1 = vpop.eup %15870  ;;  %15884 = vrcp.f32 %v11934_v56 }
 0x77b   :  { %v15873_v45 = vpop.eup %15872  ;;  %v11935_v6 = vadd.f32 1.0, %v15871_v1  ;;  %v11922_v31 = vmul.f32 1.442695, %v11891_v30 }
 0x77c   :  { %11963 = vst [vmem:[#allocation21 + $0x1b8] sm:$0xff] %v15873_v45 }
 0x77d   :  { %15886 = vrcp.f32 %v11935_v6 }
 0x77e   :  { %v15875_v10 = vpop.eup %15874  ;;  %15888 = vpow2.f32 %v11922_v31 }
 0x77f   :  { %v15877_v4 = vpop.eup %15876  ;;  %v11936_v34 = vadd.f32 1.0, %v15875_v10 }
 0x780   :  { %11964 = vst [vmem:[#allocation21 + $0x1f0] sm:$0xff] %v15877_v4 }
 0x781   :  { %15890 = vrcp.f32 %v11936_v34 }
 0x782   :  { %v15879_v44 = vpop.eup %15878 }
 0x783   :  { %v15881_v9 = vpop.eup %15880  ;;  %v11937_v32 = vadd.f32 1.0, %v15879_v44 }
 0x784   :  { %11965 = vst [vmem:[#allocation21 + $0x228] sm:$0xff] %v15881_v9 }
 0x785   :  { %15892 = vrcp.f32 %v11937_v32 }
 0x786   :  { %v15883_v29 = vpop.eup %15882 }
 0x787   :  { %v15885_v20 = vpop.eup %15884  ;;  %v11938_v27 = vadd.f32 1.0, %v15883_v29 }
 0x788   :  { %11966 = vst [vmem:[#allocation21 + $0x260] sm:$0xff] %v15885_v20 }
 0x789   :  { %15894 = vrcp.f32 %v11938_v27 }
 0x78a   :  { %v15887_v14 = vpop.eup %15886 }
 0x78b   :  { %v15889_v60 = vpop.eup %15888  ;;  %11967 = vst [vmem:[#allocation21 + $0x298] sm:$0xff] %v15887_v14 }
 0x78c   :  { %v11939_v24 = vadd.f32 1.0, %v15889_v60 }
 0x78e   :  { %v15891_v58 = vpop.eup %15890  ;;  %15896 = vrcp.f32 %v11939_v24 }
 0x78f   :  { %11968 = vst [vmem:[#allocation21 + $0x2d0] sm:$0xff] %v15891_v58 }
 0x792   :  { %v15893_v62 = vpop.eup %15892 }
 0x793   :  { %11969 = vst [vmem:[#allocation21 + $0x308] sm:$0xff] %v15893_v62 }
 0x796   :  { %v15895_v53 = vpop.eup %15894 }
 0x797   :  { %11970 = vst [vmem:[#allocation21 + $0x340] sm:$0xff] %v15895_v53 }
 0x79b   :  { %v15897_v8 = vpop.eup %15896 }
 0x79c   :  { %11971 = vst [vmem:[#allocation21 + $0x378] sm:$0xff] %v15897_v8 }
 0x79d   :  { %16163 = shalt.err (!%p16160_p3)
}
 0x79e   :  { %s16207_s11 = smov 896   ;;  %s16208_s28 = smov 56  }
 0x79f   :  { %11983 = dma.vmem_to_hbm [thread:$0]  %s11978_s14, 14336, %s18477_s13, [#allocation5], %s16207_s11, %s16207_s11, %s16208_s28  }
 0x7a0   :  { %16184 = dma.done.wait [#allocation5], 14336  }
 0x7a1   :  { %16185 = vsyncadd [#allocation5], 4294952960 }
 0x7a2   :  { %11987 = vsyncpa [#allocation4], 1 }
 0x7a3   :  { %11988 = vsyncpa [#allocation7], 1 }
 0x7a4   :  { %11989 = vsyncpa [#allocation10], 1 }
 0x7a5   :  { %11990 = vsyncpa [#allocation13], 1 }
 0x7a6   :  { %11991 = vsyncpa [#allocation16], 1 }
 0x7a7   :  { %11992 = vsyncpa [#allocation19], 1 }
 0x7a8   :  { %11993 = vsyncpa [#allocation5], 1 }

</bundles_post_ra>
